<compile_context>
chip_gen: v7x
topology: tpu7x:2x2x1
jax: 0.10.0
libtpu: 0.0.40
codegen_flags: <defaults>
</compile_context>

<pallas_src>
import functools

import jax
import jax.numpy as jnp
from jax.experimental import pallas as pl
from jax.experimental.pallas import tpu as pltpu

LEAKY_SLOPE = 0.2
BN_EPS = 1e-5
MAX_TILE_M = 512
VMEM_LIMIT = 32 * 1024 * 1024  # <= default scoped limit on v6e/v7x, raises v5e


def _leaky(x, slope):
    return jnp.where(x >= 0, x, slope * x)


def _tile_rows(m, max_tile=MAX_TILE_M):
    """Pick a large row tile. Prefer an exact divisor (no padding needed)."""
    for t in (max_tile, 256, 128, 64, 32, 16, 8):
        if m % t == 0:
            return t, m
    t = max_tile if m > max_tile else 8 * ((m + 7) // 8)
    return t, t * ((m + t - 1) // t)


# ----------------------------------------------------------------------------
# Pallas kernels
# ----------------------------------------------------------------------------
def _mm_bias_act_kernel(x_ref, w_ref, b_ref, o_ref, *, slope):
    """y = leaky(x @ w + b); bf16 in, f32 MXU accumulation, bf16 out."""
    acc = jnp.dot(x_ref[...], w_ref[...], preferred_element_type=jnp.float32)
    acc = acc + b_ref[...]
    o_ref[...] = _leaky(acc, slope).astype(o_ref.dtype)


def _mm_bias_stats_kernel(x_ref, w_ref, b_ref, y_ref, sum_ref, sq_ref, *,
                          tile_m, m_valid, need_mask):
    """y = x @ w + b plus fused per-tile per-channel sum / sumsq (for BN)."""
    acc = jnp.dot(x_ref[...], w_ref[...], preferred_element_type=jnp.float32)
    acc = acc + b_ref[...]
    y_ref[...] = acc.astype(y_ref.dtype)
    if need_mask:  # exclude padded rows from the batch statistics
        row = pl.program_id(0) * tile_m + jax.lax.broadcasted_iota(
            jnp.int32, acc.shape, 0)
        acc = acc * (row < m_valid).astype(jnp.float32)
    sum_ref[0] = jnp.sum(acc, axis=0, keepdims=True)
    sq_ref[0] = jnp.sum(acc * acc, axis=0, keepdims=True)


def _scale_shift_act_kernel(x_ref, scale_ref, shift_ref, o_ref, *, slope):
    """Affine BN normalize (precomputed scale/shift) + LeakyReLU."""
    y = x_ref[...].astype(jnp.float32) * scale_ref[...] + shift_ref[...]
    o_ref[...] = _leaky(y, slope).astype(o_ref.dtype)


def _head_kernel(x_ref, w1_ref, b1_ref, w2_ref, b2_ref, o_ref, *, slope):
    """AdaptiveAvgPool2d(1) + 1x1 conv + LeakyReLU + 1x1 conv, fused."""
    x = x_ref[...].astype(jnp.float32)                 # (N, HW, C)
    pooled = jnp.mean(x, axis=1)                       # (N, C)
    h = jnp.dot(pooled.astype(jnp.bfloat16), w1_ref[...],
                preferred_element_type=jnp.float32) + b1_ref[...]
    h = _leaky(h, slope)
    out = jnp.dot(h.astype(jnp.bfloat16), w2_ref[...],
                  preferred_element_type=jnp.float32) + b2_ref[...]
    o_ref[...] = out.astype(o_ref.dtype)


# ----------------------------------------------------------------------------
# Glue: bf16 im2col for 3x3 / pad=1 convolutions
# ----------------------------------------------------------------------------
def extract_patches_nhwc(x, stride):
    n, h, w, c = x.shape
    ho = (h - 1) // stride + 1
    wo = (w - 1) // stride + 1
    xp = jnp.pad(x, ((0, 0), (1, 1), (1, 1), (0, 0)))
    pieces = []
    for dy in range(3):
        for dx in range(3):
            pieces.append(
                xp[:, dy: dy + (ho - 1) * stride + 1: stride,
                      dx: dx + (wo - 1) * stride + 1: stride, :])
    patches = jnp.concatenate(pieces, axis=-1)          # (N, Ho, Wo, 9*C) bf16
    return patches.reshape(n * ho * wo, 9 * c), (n, ho, wo)


# ----------------------------------------------------------------------------
# Layer wrappers
# ----------------------------------------------------------------------------
def conv3x3(x_nhwc, w, b, stride, bn=None):
    patches, (n, ho, wo) = extract_patches_nhwc(x_nhwc, stride)
    m, k = patches.shape
    cout = w.shape[1]
    tile_m, m_pad = _tile_rows(m)
    if m_pad != m:
        patches = jnp.pad(patches, ((0, m_pad - m), (0, 0)))
    grid = (m_pad // tile_m,)

    x_spec = pl.BlockSpec((tile_m, k), lambda i: (i, 0))
    w_spec = pl.BlockSpec((k, cout), lambda i: (0, 0))
    v_spec = pl.BlockSpec((1, cout), lambda i: (0, 0))      # bias / scale / shift
    y_spec = pl.BlockSpec((tile_m, cout), lambda i: (i, 0))
    cparams = pltpu.CompilerParams(dimension_semantics=("parallel",),
                                   vmem_limit_bytes=VMEM_LIMIT)

    if bn is None:
        y = pl.pallas_call(
            functools.partial(_mm_bias_act_kernel, slope=LEAKY_SLOPE),
            out_shape=jax.ShapeDtypeStruct((m_pad, cout), jnp.bfloat16),
            grid=grid,
            in_specs=[x_spec, w_spec, v_spec],
            out_specs=y_spec,
            compiler_params=cparams,
        )(patches, w, b.reshape(1, cout))
    else:
        gamma, beta = bn
        n_tiles = grid[0]
        y, psum, psq = pl.pallas_call(
            functools.partial(_mm_bias_stats_kernel, tile_m=tile_m,
                              m_valid=m, need_mask=(m_pad != m)),
            out_shape=(
                jax.ShapeDtypeStruct((m_pad, cout), jnp.bfloat16),
                jax.ShapeDtypeStruct((n_tiles, 1, cout), jnp.float32),
                jax.ShapeDtypeStruct((n_tiles, 1, cout), jnp.float32),
            ),
            grid=grid,
            in_specs=[x_spec, w_spec, v_spec],
            out_specs=(
                y_spec,
                pl.BlockSpec((1, 1, cout), lambda i: (i, 0, 0)),
                pl.BlockSpec((1, 1, cout), lambda i: (i, 0, 0)),
            ),
            compiler_params=cparams,
        )(patches, w, b.reshape(1, cout))

        # Tiny O(C) per-channel math (biased variance, like PyTorch forward).
        mean = jnp.sum(psum, axis=(0, 1)) / m
        var = jnp.maximum(jnp.sum(psq, axis=(0, 1)) / m - mean * mean, 0.0)
        scale = gamma * jax.lax.rsqrt(var + BN_EPS)
        shift = beta - mean * scale

        y = pl.pallas_call(
            functools.partial(_scale_shift_act_kernel, slope=LEAKY_SLOPE),
            out_shape=jax.ShapeDtypeStruct((m_pad, cout), jnp.bfloat16),
            grid=grid,
            in_specs=[y_spec, v_spec, v_spec],
            out_specs=y_spec,
            compiler_params=cparams,
        )(y, scale.reshape(1, cout), shift.reshape(1, cout))

    if m_pad != m:
        y = y[:m]
    return y.reshape(n, ho, wo, cout)


def head(x_nhwc, w1, b1, w2, b2):
    n, h, w_, c = x_nhwc.shape
    x = x_nhwc.reshape(n, h * w_, c)
    vmem = pl.BlockSpec(memory_space=pltpu.MemorySpace.VMEM)
    return pl.pallas_call(
        functools.partial(_head_kernel, slope=LEAKY_SLOPE),
        out_shape=jax.ShapeDtypeStruct((n, 1), jnp.float32),
        in_specs=[vmem] * 5,
        out_specs=vmem,
        compiler_params=pltpu.CompilerParams(vmem_limit_bytes=VMEM_LIMIT),
    )(x, w1, b1.reshape(1, -1), w2, b2.reshape(1, 1))


# ----------------------------------------------------------------------------
# Parameters (deterministic in-script init; conv weights as (kh*kw*Cin, Cout))
# ----------------------------------------------------------------------------
def init_params(key, base_channels=16, n_blocks=2):
    def conv_init(k, cin, cout, ksize):
        fan_in = cin * ksize * ksize
        bound = 1.0 / float(fan_in) ** 0.5
        kw, kb = jax.random.split(k)
        w = jax.random.uniform(kw, (ksize * ksize * cin, cout), jnp.float32,
                               -bound, bound)
        b = jax.random.uniform(kb, (cout,), jnp.float32, -bound, bound)
        return w.astype(jnp.bfloat16), b        # weights bf16, bias f32

    specs = [
        dict(cin=3, cout=base_channels, stride=1, bn=False),
        dict(cin=base_channels, cout=base_channels, stride=2, bn=True),
    ]
    cur = base_channels
    for _ in range(n_blocks):
        specs.append(dict(cin=cur, cout=2 * cur, stride=1, bn=True))
        specs.append(dict(cin=2 * cur, cout=2 * cur, stride=2, bn=True))
        cur *= 2

    keys = jax.random.split(key, len(specs) + 2)
    params = []
    for s, k in zip(specs, keys[: len(specs)]):
        w, b = conv_init(k, s["cin"], s["cout"], 3)
        p = dict(type="conv3", stride=s["stride"], bn=s["bn"], w=w, b=b)
        if s["bn"]:
            p["gamma"] = jnp.ones((s["cout"],), jnp.float32)   # BatchNorm2d init
            p["beta"] = jnp.zeros((s["cout"],), jnp.float32)
        params.append(p)

    w1, b1 = conv_init(keys[-2], cur, 2 * cur, 1)
    w2, b2 = conv_init(keys[-1], 2 * cur, 1, 1)
    params.append(dict(type="head", w1=w1, b1=b1, w2=w2, b2=b2))
    return params


# ----------------------------------------------------------------------------
# Forward
# ----------------------------------------------------------------------------
def discriminator_forward(x_nchw, params):
    x = jnp.transpose(x_nchw, (0, 2, 3, 1)).astype(jnp.bfloat16)   # NCHW->NHWC
    for p in params:
        if p["type"] == "conv3":
            bn = (p["gamma"], p["beta"]) if p["bn"] else None
            x = conv3x3(x, p["w"], p["b"], p["stride"], bn=bn)
        else:  # fused pool + 1x1 conv + LeakyReLU + 1x1 conv + flatten
            x = head(x, p["w1"], p["b1"], p["w2"], p["b2"])
    return x                                                       # (N, 1)


if __name__ == "__main__":
    key = jax.random.PRNGKey(0)
    kx, kp = jax.random.split(key)

    base_channels, n_blocks = 16, 2
    x = jax.random.normal(kx, (4, 3, 32, 32), jnp.float32)  # NCHW like PyTorch
    params = init_params(kp, base_channels, n_blocks)

    fwd = jax.jit(lambda inp: discriminator_forward(inp, params))
    out = jax.block_until_ready(fwd(x))

    assert out.shape == (4, 1), out.shape
    assert bool(jnp.all(jnp.isfinite(out)))
    print("KERNEL_OK")
</pallas_src>

<mosaic_0001>
module attributes {stable_mosaic.version = 11 : i64} {
  func.func @_mm_bias_act_kernel(%arg0: i32, %arg1: memref<512x27xbf16, #tpu.memory_space<vmem>>, %arg2: memref<27x16xbf16, #tpu.memory_space<vmem>>, %arg3: memref<1x16xf32, #tpu.memory_space<vmem>>, %arg4: memref<512x16xbf16, #tpu.memory_space<vmem>>) attributes {dimension_semantics = [#tpu.dimension_semantics<parallel>], iteration_bounds = array<i64: 8>, scalar_prefetch = 0 : i64, scratch_operands = 0 : i64, tpu.core_type = #tpu.core_type<tc>, window_params = [{transform_indices = @transform_0, window_bounds = array<i64: 512, 27>}, {pipeline_mode = #tpu.pipeline_mode<synchronous>, transform_indices = @transform_1, window_bounds = array<i64: 27, 16>}, {pipeline_mode = #tpu.pipeline_mode<synchronous>, transform_indices = @transform_2, window_bounds = array<i64: 1, 16>}, {transform_indices = @transform_3, window_bounds = array<i64: 512, 16>}]} {
    %c0 = arith.constant 0 : index
    %c0_0 = arith.constant 0 : index
    %0 = vector.load %arg1[%c0, %c0_0] : memref<512x27xbf16, #tpu.memory_space<vmem>>, vector<512x27xbf16>
    %c0_1 = arith.constant 0 : index
    %c0_2 = arith.constant 0 : index
    %1 = vector.load %arg2[%c0_1, %c0_2] : memref<27x16xbf16, #tpu.memory_space<vmem>>, vector<27x16xbf16>
    %cst = arith.constant dense<0.000000e+00> : vector<512x16xf32>
    %2 = tpu.matmul %0, %1, %cst {dimension_numbers = #tpu.dot_dimension_numbers<[1], [0], [0], [1], [0, 0, 1, 1], [], []>} : vector<512x27xbf16>, vector<27x16xbf16>, vector<512x16xf32> -> vector<512x16xf32>
    %c0_3 = arith.constant 0 : index
    %c0_4 = arith.constant 0 : index
    %3 = vector.load %arg3[%c0_3, %c0_4] : memref<1x16xf32, #tpu.memory_space<vmem>>, vector<1x16xf32>
    %4 = vector.broadcast %3 : vector<1x16xf32> to vector<512x16xf32>
    %5 = arith.addf %2, %4 : vector<512x16xf32>
    %cst_5 = arith.constant 0.000000e+00 : f32
    %6 = vector.broadcast %cst_5 : f32 to vector<512x16xf32>
    %7 = arith.cmpf oge, %5, %6 : vector<512x16xf32>
    %cst_6 = arith.constant 2.000000e-01 : f32
    %8 = vector.broadcast %cst_6 : f32 to vector<512x16xf32>
    %9 = arith.mulf %8, %5 : vector<512x16xf32>
    %10 = arith.select %7, %5, %9 : vector<512x16xi1>, vector<512x16xf32>
    %11 = arith.truncf %10 : vector<512x16xf32> to vector<512x16xbf16>
    %c0_7 = arith.constant 0 : index
    %c0_8 = arith.constant 0 : index
    %12 = vector.load %arg4[%c0_7, %c0_8] : memref<512x16xbf16, #tpu.memory_space<vmem>>, vector<512x16xbf16>
    tpu.vector_store %arg4[%c0_7, %c0_8], %11 {strides = array<i32>} : memref<512x16xbf16, #tpu.memory_space<vmem>>, vector<512x16xbf16>,
    return
  }
  func.func @transform_0(%arg0: i32) -> (i32, i32) {
    %c0_i32 = arith.constant 0 : i32
    %c0_i32_0 = arith.constant 0 : i32
    return %arg0, %c0_i32 : i32, i32
  }
  func.func @transform_1(%arg0: i32) -> (i32, i32) {
    %c0_i32 = arith.constant 0 : i32
    %c0_i32_0 = arith.constant 0 : i32
    %c0_i32_1 = arith.constant 0 : i32
    return %c0_i32, %c0_i32_0 : i32, i32
  }
  func.func @transform_2(%arg0: i32) -> (i32, i32) {
    %c0_i32 = arith.constant 0 : i32
    %c0_i32_0 = arith.constant 0 : i32
    %c0_i32_1 = arith.constant 0 : i32
    return %c0_i32, %c0_i32_0 : i32, i32
  }
  func.func @transform_3(%arg0: i32) -> (i32, i32) {
    %c0_i32 = arith.constant 0 : i32
    %c0_i32_0 = arith.constant 0 : i32
    return %arg0, %c0_i32 : i32, i32
  }
}

module attributes {stable_mosaic.version = 11 : i64} {
  func.func @_mm_bias_stats_kernel(%arg0: i32, %arg1: memref<512x144xbf16, #tpu.memory_space<vmem>>, %arg2: memref<144x16xbf16, #tpu.memory_space<vmem>>, %arg3: memref<1x16xf32, #tpu.memory_space<vmem>>, %arg4: memref<512x16xbf16, #tpu.memory_space<vmem>>, %arg5: memref<1x1x16xf32, #tpu.memory_space<vmem>>, %arg6: memref<1x1x16xf32, #tpu.memory_space<vmem>>) attributes {dimension_semantics = [#tpu.dimension_semantics<parallel>], iteration_bounds = array<i64: 2>, scalar_prefetch = 0 : i64, scratch_operands = 0 : i64, tpu.core_type = #tpu.core_type<tc>, window_params = [{transform_indices = @transform_0, window_bounds = array<i64: 512, 144>}, {pipeline_mode = #tpu.pipeline_mode<synchronous>, transform_indices = @transform_1, window_bounds = array<i64: 144, 16>}, {pipeline_mode = #tpu.pipeline_mode<synchronous>, transform_indices = @transform_2, window_bounds = array<i64: 1, 16>}, {transform_indices = @transform_3, window_bounds = array<i64: 512, 16>}, {transform_indices = @transform_4, window_bounds = array<i64: 1, 1, 16>}, {transform_indices = @transform_5, window_bounds = array<i64: 1, 1, 16>}]} {
    %c0 = arith.constant 0 : index
    %c0_0 = arith.constant 0 : index
    %0 = vector.load %arg1[%c0, %c0_0] : memref<512x144xbf16, #tpu.memory_space<vmem>>, vector<512x144xbf16>
    %c0_1 = arith.constant 0 : index
    %c0_2 = arith.constant 0 : index
    %1 = vector.load %arg2[%c0_1, %c0_2] : memref<144x16xbf16, #tpu.memory_space<vmem>>, vector<144x16xbf16>
    %cst = arith.constant dense<0.000000e+00> : vector<512x16xf32>
    %2 = tpu.matmul %0, %1, %cst {dimension_numbers = #tpu.dot_dimension_numbers<[1], [0], [0], [1], [0, 0, 1, 1], [], []>} : vector<512x144xbf16>, vector<144x16xbf16>, vector<512x16xf32> -> vector<512x16xf32>
    %c0_3 = arith.constant 0 : index
    %c0_4 = arith.constant 0 : index
    %3 = vector.load %arg3[%c0_3, %c0_4] : memref<1x16xf32, #tpu.memory_space<vmem>>, vector<1x16xf32>
    %4 = vector.broadcast %3 : vector<1x16xf32> to vector<512x16xf32>
    %5 = arith.addf %2, %4 : vector<512x16xf32>
    %6 = arith.truncf %5 : vector<512x16xf32> to vector<512x16xbf16>
    %c0_5 = arith.constant 0 : index
    %c0_6 = arith.constant 0 : index
    %7 = vector.load %arg4[%c0_5, %c0_6] : memref<512x16xbf16, #tpu.memory_space<vmem>>, vector<512x16xbf16>
    tpu.vector_store %arg4[%c0_5, %c0_6], %6 {strides = array<i32>} : memref<512x16xbf16, #tpu.memory_space<vmem>>, vector<512x16xbf16>,
    %cst_7 = arith.constant dense<0.000000e+00> : vector<16xf32>
    %8 = vector.multi_reduction <add>, %5, %cst_7 [0] : vector<512x16xf32> to vector<16xf32>
    %9 = vector.shape_cast %8 : vector<16xf32> to vector<1x16xf32>
    %c0_8 = arith.constant 0 : index
    %c0_9 = arith.constant 0 : index
    %c0_10 = arith.constant 0 : index
    %10 = vector.load %arg5[%c0_8, %c0_9, %c0_10] : memref<1x1x16xf32, #tpu.memory_space<vmem>>, vector<1x1x16xf32>
    %11 = vector.shape_cast %10 : vector<1x1x16xf32> to vector<1x16xf32>
    %12 = vector.shape_cast %9 : vector<1x16xf32> to vector<1x1x16xf32>
    tpu.vector_store %arg5[%c0_8, %c0_9, %c0_10], %12 {strides = array<i32>} : memref<1x1x16xf32, #tpu.memory_space<vmem>>, vector<1x1x16xf32>,
    %13 = arith.mulf %5, %5 : vector<512x16xf32>
    %cst_11 = arith.constant dense<0.000000e+00> : vector<16xf32>
    %14 = vector.multi_reduction <add>, %13, %cst_11 [0] : vector<512x16xf32> to vector<16xf32>
    %15 = vector.shape_cast %14 : vector<16xf32> to vector<1x16xf32>
    %c0_12 = arith.constant 0 : index
    %c0_13 = arith.constant 0 : index
    %c0_14 = arith.constant 0 : index
    %16 = vector.load %arg6[%c0_12, %c0_13, %c0_14] : memref<1x1x16xf32, #tpu.memory_space<vmem>>, vector<1x1x16xf32>
    %17 = vector.shape_cast %16 : vector<1x1x16xf32> to vector<1x16xf32>
    %18 = vector.shape_cast %15 : vector<1x16xf32> to vector<1x1x16xf32>
    tpu.vector_store %arg6[%c0_12, %c0_13, %c0_14], %18 {strides = array<i32>} : memref<1x1x16xf32, #tpu.memory_space<vmem>>, vector<1x1x16xf32>,
    return
  }
  func.func @transform_0(%arg0: i32) -> (i32, i32) {
    %c0_i32 = arith.constant 0 : i32
    %c0_i32_0 = arith.constant 0 : i32
    return %arg0, %c0_i32 : i32, i32
  }
  func.func @transform_1(%arg0: i32) -> (i32, i32) {
    %c0_i32 = arith.constant 0 : i32
    %c0_i32_0 = arith.constant 0 : i32
    %c0_i32_1 = arith.constant 0 : i32
    return %c0_i32, %c0_i32_0 : i32, i32
  }
  func.func @transform_2(%arg0: i32) -> (i32, i32) {
    %c0_i32 = arith.constant 0 : i32
    %c0_i32_0 = arith.constant 0 : i32
    %c0_i32_1 = arith.constant 0 : i32
    return %c0_i32, %c0_i32_0 : i32, i32
  }
  func.func @transform_3(%arg0: i32) -> (i32, i32) {
    %c0_i32 = arith.constant 0 : i32
    %c0_i32_0 = arith.constant 0 : i32
    return %arg0, %c0_i32 : i32, i32
  }
  func.func @transform_4(%arg0: i32) -> (i32, i32, i32) {
    %c0_i32 = arith.constant 0 : i32
    %c0_i32_0 = arith.constant 0 : i32
    %c0_i32_1 = arith.constant 0 : i32
    return %arg0, %c0_i32, %c0_i32_0 : i32, i32, i32
  }
  func.func @transform_5(%arg0: i32) -> (i32, i32, i32) {
    %c0_i32 = arith.constant 0 : i32
    %c0_i32_0 = arith.constant 0 : i32
    %c0_i32_1 = arith.constant 0 : i32
    return %arg0, %c0_i32, %c0_i32_0 : i32, i32, i32
  }
}

module attributes {stable_mosaic.version = 11 : i64} {
  func.func @_scale_shift_act_kernel(%arg0: i32, %arg1: memref<512x16xbf16, #tpu.memory_space<vmem>>, %arg2: memref<1x16xf32, #tpu.memory_space<vmem>>, %arg3: memref<1x16xf32, #tpu.memory_space<vmem>>, %arg4: memref<512x16xbf16, #tpu.memory_space<vmem>>) attributes {dimension_semantics = [#tpu.dimension_semantics<parallel>], iteration_bounds = array<i64: 2>, scalar_prefetch = 0 : i64, scratch_operands = 0 : i64, tpu.core_type = #tpu.core_type<tc>, window_params = [{transform_indices = @transform_0, window_bounds = array<i64: 512, 16>}, {pipeline_mode = #tpu.pipeline_mode<synchronous>, transform_indices = @transform_1, window_bounds = array<i64: 1, 16>}, {pipeline_mode = #tpu.pipeline_mode<synchronous>, transform_indices = @transform_2, window_bounds = array<i64: 1, 16>}, {transform_indices = @transform_3, window_bounds = array<i64: 512, 16>}]} {
    %c0 = arith.constant 0 : index
    %c0_0 = arith.constant 0 : index
    %0 = vector.load %arg1[%c0, %c0_0] : memref<512x16xbf16, #tpu.memory_space<vmem>>, vector<512x16xbf16>
    %1 = arith.extf %0 : vector<512x16xbf16> to vector<512x16xf32>
    %c0_1 = arith.constant 0 : index
    %c0_2 = arith.constant 0 : index
    %2 = vector.load %arg2[%c0_1, %c0_2] : memref<1x16xf32, #tpu.memory_space<vmem>>, vector<1x16xf32>
    %3 = vector.broadcast %2 : vector<1x16xf32> to vector<512x16xf32>
    %4 = arith.mulf %1, %3 : vector<512x16xf32>
    %c0_3 = arith.constant 0 : index
    %c0_4 = arith.constant 0 : index
    %5 = vector.load %arg3[%c0_3, %c0_4] : memref<1x16xf32, #tpu.memory_space<vmem>>, vector<1x16xf32>
    %6 = vector.broadcast %5 : vector<1x16xf32> to vector<512x16xf32>
    %7 = arith.addf %4, %6 : vector<512x16xf32>
    %cst = arith.constant 0.000000e+00 : f32
    %8 = vector.broadcast %cst : f32 to vector<512x16xf32>
    %9 = arith.cmpf oge, %7, %8 : vector<512x16xf32>
    %cst_5 = arith.constant 2.000000e-01 : f32
    %10 = vector.broadcast %cst_5 : f32 to vector<512x16xf32>
    %11 = arith.mulf %10, %7 : vector<512x16xf32>
    %12 = arith.select %9, %7, %11 : vector<512x16xi1>, vector<512x16xf32>
    %13 = arith.truncf %12 : vector<512x16xf32> to vector<512x16xbf16>
    %c0_6 = arith.constant 0 : index
    %c0_7 = arith.constant 0 : index
    %14 = vector.load %arg4[%c0_6, %c0_7] : memref<512x16xbf16, #tpu.memory_space<vmem>>, vector<512x16xbf16>
    tpu.vector_store %arg4[%c0_6, %c0_7], %13 {strides = array<i32>} : memref<512x16xbf16, #tpu.memory_space<vmem>>, vector<512x16xbf16>,
    return
  }
  func.func @transform_0(%arg0: i32) -> (i32, i32) {
    %c0_i32 = arith.constant 0 : i32
    %c0_i32_0 = arith.constant 0 : i32
    return %arg0, %c0_i32 : i32, i32
  }
  func.func @transform_1(%arg0: i32) -> (i32, i32) {
    %c0_i32 = arith.constant 0 : i32
    %c0_i32_0 = arith.constant 0 : i32
    %c0_i32_1 = arith.constant 0 : i32
    return %c0_i32, %c0_i32_0 : i32, i32
  }
  func.func @transform_2(%arg0: i32) -> (i32, i32) {
    %c0_i32 = arith.constant 0 : i32
    %c0_i32_0 = arith.constant 0 : i32
    %c0_i32_1 = arith.constant 0 : i32
    return %c0_i32, %c0_i32_0 : i32, i32
  }
  func.func @transform_3(%arg0: i32) -> (i32, i32) {
    %c0_i32 = arith.constant 0 : i32
    %c0_i32_0 = arith.constant 0 : i32
    return %arg0, %c0_i32 : i32, i32
  }
}

module attributes {stable_mosaic.version = 11 : i64} {
  func.func @_mm_bias_stats_kernel(%arg0: i32, %arg1: memref<512x144xbf16, #tpu.memory_space<vmem>>, %arg2: memref<144x32xbf16, #tpu.memory_space<vmem>>, %arg3: memref<1x32xf32, #tpu.memory_space<vmem>>, %arg4: memref<512x32xbf16, #tpu.memory_space<vmem>>, %arg5: memref<1x1x32xf32, #tpu.memory_space<vmem>>, %arg6: memref<1x1x32xf32, #tpu.memory_space<vmem>>) attributes {dimension_semantics = [#tpu.dimension_semantics<parallel>], iteration_bounds = array<i64: 2>, scalar_prefetch = 0 : i64, scratch_operands = 0 : i64, tpu.core_type = #tpu.core_type<tc>, window_params = [{transform_indices = @transform_0, window_bounds = array<i64: 512, 144>}, {pipeline_mode = #tpu.pipeline_mode<synchronous>, transform_indices = @transform_1, window_bounds = array<i64: 144, 32>}, {pipeline_mode = #tpu.pipeline_mode<synchronous>, transform_indices = @transform_2, window_bounds = array<i64: 1, 32>}, {transform_indices = @transform_3, window_bounds = array<i64: 512, 32>}, {transform_indices = @transform_4, window_bounds = array<i64: 1, 1, 32>}, {transform_indices = @transform_5, window_bounds = array<i64: 1, 1, 32>}]} {
    %c0 = arith.constant 0 : index
    %c0_0 = arith.constant 0 : index
    %0 = vector.load %arg1[%c0, %c0_0] : memref<512x144xbf16, #tpu.memory_space<vmem>>, vector<512x144xbf16>
    %c0_1 = arith.constant 0 : index
    %c0_2 = arith.constant 0 : index
    %1 = vector.load %arg2[%c0_1, %c0_2] : memref<144x32xbf16, #tpu.memory_space<vmem>>, vector<144x32xbf16>
    %cst = arith.constant dense<0.000000e+00> : vector<512x32xf32>
    %2 = tpu.matmul %0, %1, %cst {dimension_numbers = #tpu.dot_dimension_numbers<[1], [0], [0], [1], [0, 0, 1, 1], [], []>} : vector<512x144xbf16>, vector<144x32xbf16>, vector<512x32xf32> -> vector<512x32xf32>
    %c0_3 = arith.constant 0 : index
    %c0_4 = arith.constant 0 : index
    %3 = vector.load %arg3[%c0_3, %c0_4] : memref<1x32xf32, #tpu.memory_space<vmem>>, vector<1x32xf32>
    %4 = vector.broadcast %3 : vector<1x32xf32> to vector<512x32xf32>
    %5 = arith.addf %2, %4 : vector<512x32xf32>
    %6 = arith.truncf %5 : vector<512x32xf32> to vector<512x32xbf16>
    %c0_5 = arith.constant 0 : index
    %c0_6 = arith.constant 0 : index
    %7 = vector.load %arg4[%c0_5, %c0_6] : memref<512x32xbf16, #tpu.memory_space<vmem>>, vector<512x32xbf16>
    tpu.vector_store %arg4[%c0_5, %c0_6], %6 {strides = array<i32>} : memref<512x32xbf16, #tpu.memory_space<vmem>>, vector<512x32xbf16>,
    %cst_7 = arith.constant dense<0.000000e+00> : vector<32xf32>
    %8 = vector.multi_reduction <add>, %5, %cst_7 [0] : vector<512x32xf32> to vector<32xf32>
    %9 = vector.shape_cast %8 : vector<32xf32> to vector<1x32xf32>
    %c0_8 = arith.constant 0 : index
    %c0_9 = arith.constant 0 : index
    %c0_10 = arith.constant 0 : index
    %10 = vector.load %arg5[%c0_8, %c0_9, %c0_10] : memref<1x1x32xf32, #tpu.memory_space<vmem>>, vector<1x1x32xf32>
    %11 = vector.shape_cast %10 : vector<1x1x32xf32> to vector<1x32xf32>
    %12 = vector.shape_cast %9 : vector<1x32xf32> to vector<1x1x32xf32>
    tpu.vector_store %arg5[%c0_8, %c0_9, %c0_10], %12 {strides = array<i32>} : memref<1x1x32xf32, #tpu.memory_space<vmem>>, vector<1x1x32xf32>,
    %13 = arith.mulf %5, %5 : vector<512x32xf32>
    %cst_11 = arith.constant dense<0.000000e+00> : vector<32xf32>
    %14 = vector.multi_reduction <add>, %13, %cst_11 [0] : vector<512x32xf32> to vector<32xf32>
    %15 = vector.shape_cast %14 : vector<32xf32> to vector<1x32xf32>
    %c0_12 = arith.constant 0 : index
    %c0_13 = arith.constant 0 : index
    %c0_14 = arith.constant 0 : index
    %16 = vector.load %arg6[%c0_12, %c0_13, %c0_14] : memref<1x1x32xf32, #tpu.memory_space<vmem>>, vector<1x1x32xf32>
    %17 = vector.shape_cast %16 : vector<1x1x32xf32> to vector<1x32xf32>
    %18 = vector.shape_cast %15 : vector<1x32xf32> to vector<1x1x32xf32>
    tpu.vector_store %arg6[%c0_12, %c0_13, %c0_14], %18 {strides = array<i32>} : memref<1x1x32xf32, #tpu.memory_space<vmem>>, vector<1x1x32xf32>,
    return
  }
  func.func @transform_0(%arg0: i32) -> (i32, i32) {
    %c0_i32 = arith.constant 0 : i32
    %c0_i32_0 = arith.constant 0 : i32
    return %arg0, %c0_i32 : i32, i32
  }
  func.func @transform_1(%arg0: i32) -> (i32, i32) {
    %c0_i32 = arith.constant 0 : i32
    %c0_i32_0 = arith.constant 0 : i32
    %c0_i32_1 = arith.constant 0 : i32
    return %c0_i32, %c0_i32_0 : i32, i32
  }
  func.func @transform_2(%arg0: i32) -> (i32, i32) {
    %c0_i32 = arith.constant 0 : i32
    %c0_i32_0 = arith.constant 0 : i32
    %c0_i32_1 = arith.constant 0 : i32
    return %c0_i32, %c0_i32_0 : i32, i32
  }
  func.func @transform_3(%arg0: i32) -> (i32, i32) {
    %c0_i32 = arith.constant 0 : i32
    %c0_i32_0 = arith.constant 0 : i32
    return %arg0, %c0_i32 : i32, i32
  }
  func.func @transform_4(%arg0: i32) -> (i32, i32, i32) {
    %c0_i32 = arith.constant 0 : i32
    %c0_i32_0 = arith.constant 0 : i32
    %c0_i32_1 = arith.constant 0 : i32
    return %arg0, %c0_i32, %c0_i32_0 : i32, i32, i32
  }
  func.func @transform_5(%arg0: i32) -> (i32, i32, i32) {
    %c0_i32 = arith.constant 0 : i32
    %c0_i32_0 = arith.constant 0 : i32
    %c0_i32_1 = arith.constant 0 : i32
    return %arg0, %c0_i32, %c0_i32_0 : i32, i32, i32
  }
}

module attributes {stable_mosaic.version = 11 : i64} {
  func.func @_scale_shift_act_kernel(%arg0: i32, %arg1: memref<512x32xbf16, #tpu.memory_space<vmem>>, %arg2: memref<1x32xf32, #tpu.memory_space<vmem>>, %arg3: memref<1x32xf32, #tpu.memory_space<vmem>>, %arg4: memref<512x32xbf16, #tpu.memory_space<vmem>>) attributes {dimension_semantics = [#tpu.dimension_semantics<parallel>], iteration_bounds = array<i64: 2>, scalar_prefetch = 0 : i64, scratch_operands = 0 : i64, tpu.core_type = #tpu.core_type<tc>, window_params = [{transform_indices = @transform_0, window_bounds = array<i64: 512, 32>}, {pipeline_mode = #tpu.pipeline_mode<synchronous>, transform_indices = @transform_1, window_bounds = array<i64: 1, 32>}, {pipeline_mode = #tpu.pipeline_mode<synchronous>, transform_indices = @transform_2, window_bounds = array<i64: 1, 32>}, {transform_indices = @transform_3, window_bounds = array<i64: 512, 32>}]} {
    %c0 = arith.constant 0 : index
    %c0_0 = arith.constant 0 : index
    %0 = vector.load %arg1[%c0, %c0_0] : memref<512x32xbf16, #tpu.memory_space<vmem>>, vector<512x32xbf16>
    %1 = arith.extf %0 : vector<512x32xbf16> to vector<512x32xf32>
    %c0_1 = arith.constant 0 : index
    %c0_2 = arith.constant 0 : index
    %2 = vector.load %arg2[%c0_1, %c0_2] : memref<1x32xf32, #tpu.memory_space<vmem>>, vector<1x32xf32>
    %3 = vector.broadcast %2 : vector<1x32xf32> to vector<512x32xf32>
    %4 = arith.mulf %1, %3 : vector<512x32xf32>
    %c0_3 = arith.constant 0 : index
    %c0_4 = arith.constant 0 : index
    %5 = vector.load %arg3[%c0_3, %c0_4] : memref<1x32xf32, #tpu.memory_space<vmem>>, vector<1x32xf32>
    %6 = vector.broadcast %5 : vector<1x32xf32> to vector<512x32xf32>
    %7 = arith.addf %4, %6 : vector<512x32xf32>
    %cst = arith.constant 0.000000e+00 : f32
    %8 = vector.broadcast %cst : f32 to vector<512x32xf32>
    %9 = arith.cmpf oge, %7, %8 : vector<512x32xf32>
    %cst_5 = arith.constant 2.000000e-01 : f32
    %10 = vector.broadcast %cst_5 : f32 to vector<512x32xf32>
    %11 = arith.mulf %10, %7 : vector<512x32xf32>
    %12 = arith.select %9, %7, %11 : vector<512x32xi1>, vector<512x32xf32>
    %13 = arith.truncf %12 : vector<512x32xf32> to vector<512x32xbf16>
    %c0_6 = arith.constant 0 : index
    %c0_7 = arith.constant 0 : index
    %14 = vector.load %arg4[%c0_6, %c0_7] : memref<512x32xbf16, #tpu.memory_space<vmem>>, vector<512x32xbf16>
    tpu.vector_store %arg4[%c0_6, %c0_7], %13 {strides = array<i32>} : memref<512x32xbf16, #tpu.memory_space<vmem>>, vector<512x32xbf16>,
    return
  }
  func.func @transform_0(%arg0: i32) -> (i32, i32) {
    %c0_i32 = arith.constant 0 : i32
    %c0_i32_0 = arith.constant 0 : i32
    return %arg0, %c0_i32 : i32, i32
  }
  func.func @transform_1(%arg0: i32) -> (i32, i32) {
    %c0_i32 = arith.constant 0 : i32
    %c0_i32_0 = arith.constant 0 : i32
    %c0_i32_1 = arith.constant 0 : i32
    return %c0_i32, %c0_i32_0 : i32, i32
  }
  func.func @transform_2(%arg0: i32) -> (i32, i32) {
    %c0_i32 = arith.constant 0 : i32
    %c0_i32_0 = arith.constant 0 : i32
    %c0_i32_1 = arith.constant 0 : i32
    return %c0_i32, %c0_i32_0 : i32, i32
  }
  func.func @transform_3(%arg0: i32) -> (i32, i32) {
    %c0_i32 = arith.constant 0 : i32
    %c0_i32_0 = arith.constant 0 : i32
    return %arg0, %c0_i32 : i32, i32
  }
}

module attributes {stable_mosaic.version = 11 : i64} {
  func.func @_scale_shift_act_kernel(%arg0: i32, %arg1: memref<256x32xbf16, #tpu.memory_space<vmem>>, %arg2: memref<1x32xf32, #tpu.memory_space<vmem>>, %arg3: memref<1x32xf32, #tpu.memory_space<vmem>>, %arg4: memref<256x32xbf16, #tpu.memory_space<vmem>>) attributes {dimension_semantics = [#tpu.dimension_semantics<parallel>], iteration_bounds = array<i64: 1>, scalar_prefetch = 0 : i64, scratch_operands = 0 : i64, tpu.core_type = #tpu.core_type<tc>, window_params = [{transform_indices = @transform_0, window_bounds = array<i64: 256, 32>}, {pipeline_mode = #tpu.pipeline_mode<synchronous>, transform_indices = @transform_1, window_bounds = array<i64: 1, 32>}, {pipeline_mode = #tpu.pipeline_mode<synchronous>, transform_indices = @transform_2, window_bounds = array<i64: 1, 32>}, {transform_indices = @transform_3, window_bounds = array<i64: 256, 32>}]} {
    %c0 = arith.constant 0 : index
    %c0_0 = arith.constant 0 : index
    %0 = vector.load %arg1[%c0, %c0_0] : memref<256x32xbf16, #tpu.memory_space<vmem>>, vector<256x32xbf16>
    %1 = arith.extf %0 : vector<256x32xbf16> to vector<256x32xf32>
    %c0_1 = arith.constant 0 : index
    %c0_2 = arith.constant 0 : index
    %2 = vector.load %arg2[%c0_1, %c0_2] : memref<1x32xf32, #tpu.memory_space<vmem>>, vector<1x32xf32>
    %3 = vector.broadcast %2 : vector<1x32xf32> to vector<256x32xf32>
    %4 = arith.mulf %1, %3 : vector<256x32xf32>
    %c0_3 = arith.constant 0 : index
    %c0_4 = arith.constant 0 : index
    %5 = vector.load %arg3[%c0_3, %c0_4] : memref<1x32xf32, #tpu.memory_space<vmem>>, vector<1x32xf32>
    %6 = vector.broadcast %5 : vector<1x32xf32> to vector<256x32xf32>
    %7 = arith.addf %4, %6 : vector<256x32xf32>
    %cst = arith.constant 0.000000e+00 : f32
    %8 = vector.broadcast %cst : f32 to vector<256x32xf32>
    %9 = arith.cmpf oge, %7, %8 : vector<256x32xf32>
    %cst_5 = arith.constant 2.000000e-01 : f32
    %10 = vector.broadcast %cst_5 : f32 to vector<256x32xf32>
    %11 = arith.mulf %10, %7 : vector<256x32xf32>
    %12 = arith.select %9, %7, %11 : vector<256x32xi1>, vector<256x32xf32>
    %13 = arith.truncf %12 : vector<256x32xf32> to vector<256x32xbf16>
    %c0_6 = arith.constant 0 : index
    %c0_7 = arith.constant 0 : index
    %14 = vector.load %arg4[%c0_6, %c0_7] : memref<256x32xbf16, #tpu.memory_space<vmem>>, vector<256x32xbf16>
    tpu.vector_store %arg4[%c0_6, %c0_7], %13 {strides = array<i32>} : memref<256x32xbf16, #tpu.memory_space<vmem>>, vector<256x32xbf16>,
    return
  }
  func.func @transform_0(%arg0: i32) -> (i32, i32) {
    %c0_i32 = arith.constant 0 : i32
    %c0_i32_0 = arith.constant 0 : i32
    return %arg0, %c0_i32 : i32, i32
  }
  func.func @transform_1(%arg0: i32) -> (i32, i32) {
    %c0_i32 = arith.constant 0 : i32
    %c0_i32_0 = arith.constant 0 : i32
    %c0_i32_1 = arith.constant 0 : i32
    return %c0_i32, %c0_i32_0 : i32, i32
  }
  func.func @transform_2(%arg0: i32) -> (i32, i32) {
    %c0_i32 = arith.constant 0 : i32
    %c0_i32_0 = arith.constant 0 : i32
    %c0_i32_1 = arith.constant 0 : i32
    return %c0_i32, %c0_i32_0 : i32, i32
  }
  func.func @transform_3(%arg0: i32) -> (i32, i32) {
    %c0_i32 = arith.constant 0 : i32
    %c0_i32_0 = arith.constant 0 : i32
    return %arg0, %c0_i32 : i32, i32
  }
}

module attributes {stable_mosaic.version = 11 : i64} {
  func.func @_mm_bias_stats_kernel(%arg0: i32, %arg1: memref<256x288xbf16, #tpu.memory_space<vmem>>, %arg2: memref<288x32xbf16, #tpu.memory_space<vmem>>, %arg3: memref<1x32xf32, #tpu.memory_space<vmem>>, %arg4: memref<256x32xbf16, #tpu.memory_space<vmem>>, %arg5: memref<1x1x32xf32, #tpu.memory_space<vmem>>, %arg6: memref<1x1x32xf32, #tpu.memory_space<vmem>>) attributes {dimension_semantics = [#tpu.dimension_semantics<parallel>], iteration_bounds = array<i64: 1>, scalar_prefetch = 0 : i64, scratch_operands = 0 : i64, tpu.core_type = #tpu.core_type<tc>, window_params = [{transform_indices = @transform_0, window_bounds = array<i64: 256, 288>}, {pipeline_mode = #tpu.pipeline_mode<synchronous>, transform_indices = @transform_1, window_bounds = array<i64: 288, 32>}, {pipeline_mode = #tpu.pipeline_mode<synchronous>, transform_indices = @transform_2, window_bounds = array<i64: 1, 32>}, {transform_indices = @transform_3, window_bounds = array<i64: 256, 32>}, {transform_indices = @transform_4, window_bounds = array<i64: 1, 1, 32>}, {transform_indices = @transform_5, window_bounds = array<i64: 1, 1, 32>}]} {
    %c0 = arith.constant 0 : index
    %c0_0 = arith.constant 0 : index
    %0 = vector.load %arg1[%c0, %c0_0] : memref<256x288xbf16, #tpu.memory_space<vmem>>, vector<256x288xbf16>
    %c0_1 = arith.constant 0 : index
    %c0_2 = arith.constant 0 : index
    %1 = vector.load %arg2[%c0_1, %c0_2] : memref<288x32xbf16, #tpu.memory_space<vmem>>, vector<288x32xbf16>
    %cst = arith.constant dense<0.000000e+00> : vector<256x32xf32>
    %2 = tpu.matmul %0, %1, %cst {dimension_numbers = #tpu.dot_dimension_numbers<[1], [0], [0], [1], [0, 0, 1, 1], [], []>} : vector<256x288xbf16>, vector<288x32xbf16>, vector<256x32xf32> -> vector<256x32xf32>
    %c0_3 = arith.constant 0 : index
    %c0_4 = arith.constant 0 : index
    %3 = vector.load %arg3[%c0_3, %c0_4] : memref<1x32xf32, #tpu.memory_space<vmem>>, vector<1x32xf32>
    %4 = vector.broadcast %3 : vector<1x32xf32> to vector<256x32xf32>
    %5 = arith.addf %2, %4 : vector<256x32xf32>
    %6 = arith.truncf %5 : vector<256x32xf32> to vector<256x32xbf16>
    %c0_5 = arith.constant 0 : index
    %c0_6 = arith.constant 0 : index
    %7 = vector.load %arg4[%c0_5, %c0_6] : memref<256x32xbf16, #tpu.memory_space<vmem>>, vector<256x32xbf16>
    tpu.vector_store %arg4[%c0_5, %c0_6], %6 {strides = array<i32>} : memref<256x32xbf16, #tpu.memory_space<vmem>>, vector<256x32xbf16>,
    %cst_7 = arith.constant dense<0.000000e+00> : vector<32xf32>
    %8 = vector.multi_reduction <add>, %5, %cst_7 [0] : vector<256x32xf32> to vector<32xf32>
    %9 = vector.shape_cast %8 : vector<32xf32> to vector<1x32xf32>
    %c0_8 = arith.constant 0 : index
    %c0_9 = arith.constant 0 : index
    %c0_10 = arith.constant 0 : index
    %10 = vector.load %arg5[%c0_8, %c0_9, %c0_10] : memref<1x1x32xf32, #tpu.memory_space<vmem>>, vector<1x1x32xf32>
    %11 = vector.shape_cast %10 : vector<1x1x32xf32> to vector<1x32xf32>
    %12 = vector.shape_cast %9 : vector<1x32xf32> to vector<1x1x32xf32>
    tpu.vector_store %arg5[%c0_8, %c0_9, %c0_10], %12 {strides = array<i32>} : memref<1x1x32xf32, #tpu.memory_space<vmem>>, vector<1x1x32xf32>,
    %13 = arith.mulf %5, %5 : vector<256x32xf32>
    %cst_11 = arith.constant dense<0.000000e+00> : vector<32xf32>
    %14 = vector.multi_reduction <add>, %13, %cst_11 [0] : vector<256x32xf32> to vector<32xf32>
    %15 = vector.shape_cast %14 : vector<32xf32> to vector<1x32xf32>
    %c0_12 = arith.constant 0 : index
    %c0_13 = arith.constant 0 : index
    %c0_14 = arith.constant 0 : index
    %16 = vector.load %arg6[%c0_12, %c0_13, %c0_14] : memref<1x1x32xf32, #tpu.memory_space<vmem>>, vector<1x1x32xf32>
    %17 = vector.shape_cast %16 : vector<1x1x32xf32> to vector<1x32xf32>
    %18 = vector.shape_cast %15 : vector<1x32xf32> to vector<1x1x32xf32>
    tpu.vector_store %arg6[%c0_12, %c0_13, %c0_14], %18 {strides = array<i32>} : memref<1x1x32xf32, #tpu.memory_space<vmem>>, vector<1x1x32xf32>,
    return
  }
  func.func @transform_0(%arg0: i32) -> (i32, i32) {
    %c0_i32 = arith.constant 0 : i32
    %c0_i32_0 = arith.constant 0 : i32
    return %arg0, %c0_i32 : i32, i32
  }
  func.func @transform_1(%arg0: i32) -> (i32, i32) {
    %c0_i32 = arith.constant 0 : i32
    %c0_i32_0 = arith.constant 0 : i32
    %c0_i32_1 = arith.constant 0 : i32
    return %c0_i32, %c0_i32_0 : i32, i32
  }
  func.func @transform_2(%arg0: i32) -> (i32, i32) {
    %c0_i32 = arith.constant 0 : i32
    %c0_i32_0 = arith.constant 0 : i32
    %c0_i32_1 = arith.constant 0 : i32
    return %c0_i32, %c0_i32_0 : i32, i32
  }
  func.func @transform_3(%arg0: i32) -> (i32, i32) {
    %c0_i32 = arith.constant 0 : i32
    %c0_i32_0 = arith.constant 0 : i32
    return %arg0, %c0_i32 : i32, i32
  }
  func.func @transform_4(%arg0: i32) -> (i32, i32, i32) {
    %c0_i32 = arith.constant 0 : i32
    %c0_i32_0 = arith.constant 0 : i32
    %c0_i32_1 = arith.constant 0 : i32
    return %arg0, %c0_i32, %c0_i32_0 : i32, i32, i32
  }
  func.func @transform_5(%arg0: i32) -> (i32, i32, i32) {
    %c0_i32 = arith.constant 0 : i32
    %c0_i32_0 = arith.constant 0 : i32
    %c0_i32_1 = arith.constant 0 : i32
    return %arg0, %c0_i32, %c0_i32_0 : i32, i32, i32
  }
}

module attributes {stable_mosaic.version = 11 : i64} {
  func.func @_mm_bias_stats_kernel(%arg0: i32, %arg1: memref<256x288xbf16, #tpu.memory_space<vmem>>, %arg2: memref<288x64xbf16, #tpu.memory_space<vmem>>, %arg3: memref<1x64xf32, #tpu.memory_space<vmem>>, %arg4: memref<256x64xbf16, #tpu.memory_space<vmem>>, %arg5: memref<1x1x64xf32, #tpu.memory_space<vmem>>, %arg6: memref<1x1x64xf32, #tpu.memory_space<vmem>>) attributes {dimension_semantics = [#tpu.dimension_semantics<parallel>], iteration_bounds = array<i64: 1>, scalar_prefetch = 0 : i64, scratch_operands = 0 : i64, tpu.core_type = #tpu.core_type<tc>, window_params = [{transform_indices = @transform_0, window_bounds = array<i64: 256, 288>}, {pipeline_mode = #tpu.pipeline_mode<synchronous>, transform_indices = @transform_1, window_bounds = array<i64: 288, 64>}, {pipeline_mode = #tpu.pipeline_mode<synchronous>, transform_indices = @transform_2, window_bounds = array<i64: 1, 64>}, {transform_indices = @transform_3, window_bounds = array<i64: 256, 64>}, {transform_indices = @transform_4, window_bounds = array<i64: 1, 1, 64>}, {transform_indices = @transform_5, window_bounds = array<i64: 1, 1, 64>}]} {
    %c0 = arith.constant 0 : index
    %c0_0 = arith.constant 0 : index
    %0 = vector.load %arg1[%c0, %c0_0] : memref<256x288xbf16, #tpu.memory_space<vmem>>, vector<256x288xbf16>
    %c0_1 = arith.constant 0 : index
    %c0_2 = arith.constant 0 : index
    %1 = vector.load %arg2[%c0_1, %c0_2] : memref<288x64xbf16, #tpu.memory_space<vmem>>, vector<288x64xbf16>
    %cst = arith.constant dense<0.000000e+00> : vector<256x64xf32>
    %2 = tpu.matmul %0, %1, %cst {dimension_numbers = #tpu.dot_dimension_numbers<[1], [0], [0], [1], [0, 0, 1, 1], [], []>} : vector<256x288xbf16>, vector<288x64xbf16>, vector<256x64xf32> -> vector<256x64xf32>
    %c0_3 = arith.constant 0 : index
    %c0_4 = arith.constant 0 : index
    %3 = vector.load %arg3[%c0_3, %c0_4] : memref<1x64xf32, #tpu.memory_space<vmem>>, vector<1x64xf32>
    %4 = vector.broadcast %3 : vector<1x64xf32> to vector<256x64xf32>
    %5 = arith.addf %2, %4 : vector<256x64xf32>
    %6 = arith.truncf %5 : vector<256x64xf32> to vector<256x64xbf16>
    %c0_5 = arith.constant 0 : index
    %c0_6 = arith.constant 0 : index
    %7 = vector.load %arg4[%c0_5, %c0_6] : memref<256x64xbf16, #tpu.memory_space<vmem>>, vector<256x64xbf16>
    tpu.vector_store %arg4[%c0_5, %c0_6], %6 {strides = array<i32>} : memref<256x64xbf16, #tpu.memory_space<vmem>>, vector<256x64xbf16>,
    %cst_7 = arith.constant dense<0.000000e+00> : vector<64xf32>
    %8 = vector.multi_reduction <add>, %5, %cst_7 [0] : vector<256x64xf32> to vector<64xf32>
    %9 = vector.shape_cast %8 : vector<64xf32> to vector<1x64xf32>
    %c0_8 = arith.constant 0 : index
    %c0_9 = arith.constant 0 : index
    %c0_10 = arith.constant 0 : index
    %10 = vector.load %arg5[%c0_8, %c0_9, %c0_10] : memref<1x1x64xf32, #tpu.memory_space<vmem>>, vector<1x1x64xf32>
    %11 = vector.shape_cast %10 : vector<1x1x64xf32> to vector<1x64xf32>
    %12 = vector.shape_cast %9 : vector<1x64xf32> to vector<1x1x64xf32>
    tpu.vector_store %arg5[%c0_8, %c0_9, %c0_10], %12 {strides = array<i32>} : memref<1x1x64xf32, #tpu.memory_space<vmem>>, vector<1x1x64xf32>,
    %13 = arith.mulf %5, %5 : vector<256x64xf32>
    %cst_11 = arith.constant dense<0.000000e+00> : vector<64xf32>
    %14 = vector.multi_reduction <add>, %13, %cst_11 [0] : vector<256x64xf32> to vector<64xf32>
    %15 = vector.shape_cast %14 : vector<64xf32> to vector<1x64xf32>
    %c0_12 = arith.constant 0 : index
    %c0_13 = arith.constant 0 : index
    %c0_14 = arith.constant 0 : index
    %16 = vector.load %arg6[%c0_12, %c0_13, %c0_14] : memref<1x1x64xf32, #tpu.memory_space<vmem>>, vector<1x1x64xf32>
    %17 = vector.shape_cast %16 : vector<1x1x64xf32> to vector<1x64xf32>
    %18 = vector.shape_cast %15 : vector<1x64xf32> to vector<1x1x64xf32>
    tpu.vector_store %arg6[%c0_12, %c0_13, %c0_14], %18 {strides = array<i32>} : memref<1x1x64xf32, #tpu.memory_space<vmem>>, vector<1x1x64xf32>,
    return
  }
  func.func @transform_0(%arg0: i32) -> (i32, i32) {
    %c0_i32 = arith.constant 0 : i32
    %c0_i32_0 = arith.constant 0 : i32
    return %arg0, %c0_i32 : i32, i32
  }
  func.func @transform_1(%arg0: i32) -> (i32, i32) {
    %c0_i32 = arith.constant 0 : i32
    %c0_i32_0 = arith.constant 0 : i32
    %c0_i32_1 = arith.constant 0 : i32
    return %c0_i32, %c0_i32_0 : i32, i32
  }
  func.func @transform_2(%arg0: i32) -> (i32, i32) {
    %c0_i32 = arith.constant 0 : i32
    %c0_i32_0 = arith.constant 0 : i32
    %c0_i32_1 = arith.constant 0 : i32
    return %c0_i32, %c0_i32_0 : i32, i32
  }
  func.func @transform_3(%arg0: i32) -> (i32, i32) {
    %c0_i32 = arith.constant 0 : i32
    %c0_i32_0 = arith.constant 0 : i32
    return %arg0, %c0_i32 : i32, i32
  }
  func.func @transform_4(%arg0: i32) -> (i32, i32, i32) {
    %c0_i32 = arith.constant 0 : i32
    %c0_i32_0 = arith.constant 0 : i32
    %c0_i32_1 = arith.constant 0 : i32
    return %arg0, %c0_i32, %c0_i32_0 : i32, i32, i32
  }
  func.func @transform_5(%arg0: i32) -> (i32, i32, i32) {
    %c0_i32 = arith.constant 0 : i32
    %c0_i32_0 = arith.constant 0 : i32
    %c0_i32_1 = arith.constant 0 : i32
    return %arg0, %c0_i32, %c0_i32_0 : i32, i32, i32
  }
}

module attributes {stable_mosaic.version = 11 : i64} {
  func.func @_scale_shift_act_kernel(%arg0: i32, %arg1: memref<256x64xbf16, #tpu.memory_space<vmem>>, %arg2: memref<1x64xf32, #tpu.memory_space<vmem>>, %arg3: memref<1x64xf32, #tpu.memory_space<vmem>>, %arg4: memref<256x64xbf16, #tpu.memory_space<vmem>>) attributes {dimension_semantics = [#tpu.dimension_semantics<parallel>], iteration_bounds = array<i64: 1>, scalar_prefetch = 0 : i64, scratch_operands = 0 : i64, tpu.core_type = #tpu.core_type<tc>, window_params = [{transform_indices = @transform_0, window_bounds = array<i64: 256, 64>}, {pipeline_mode = #tpu.pipeline_mode<synchronous>, transform_indices = @transform_1, window_bounds = array<i64: 1, 64>}, {pipeline_mode = #tpu.pipeline_mode<synchronous>, transform_indices = @transform_2, window_bounds = array<i64: 1, 64>}, {transform_indices = @transform_3, window_bounds = array<i64: 256, 64>}]} {
    %c0 = arith.constant 0 : index
    %c0_0 = arith.constant 0 : index
    %0 = vector.load %arg1[%c0, %c0_0] : memref<256x64xbf16, #tpu.memory_space<vmem>>, vector<256x64xbf16>
    %1 = arith.extf %0 : vector<256x64xbf16> to vector<256x64xf32>
    %c0_1 = arith.constant 0 : index
    %c0_2 = arith.constant 0 : index
    %2 = vector.load %arg2[%c0_1, %c0_2] : memref<1x64xf32, #tpu.memory_space<vmem>>, vector<1x64xf32>
    %3 = vector.broadcast %2 : vector<1x64xf32> to vector<256x64xf32>
    %4 = arith.mulf %1, %3 : vector<256x64xf32>
    %c0_3 = arith.constant 0 : index
    %c0_4 = arith.constant 0 : index
    %5 = vector.load %arg3[%c0_3, %c0_4] : memref<1x64xf32, #tpu.memory_space<vmem>>, vector<1x64xf32>
    %6 = vector.broadcast %5 : vector<1x64xf32> to vector<256x64xf32>
    %7 = arith.addf %4, %6 : vector<256x64xf32>
    %cst = arith.constant 0.000000e+00 : f32
    %8 = vector.broadcast %cst : f32 to vector<256x64xf32>
    %9 = arith.cmpf oge, %7, %8 : vector<256x64xf32>
    %cst_5 = arith.constant 2.000000e-01 : f32
    %10 = vector.broadcast %cst_5 : f32 to vector<256x64xf32>
    %11 = arith.mulf %10, %7 : vector<256x64xf32>
    %12 = arith.select %9, %7, %11 : vector<256x64xi1>, vector<256x64xf32>
    %13 = arith.truncf %12 : vector<256x64xf32> to vector<256x64xbf16>
    %c0_6 = arith.constant 0 : index
    %c0_7 = arith.constant 0 : index
    %14 = vector.load %arg4[%c0_6, %c0_7] : memref<256x64xbf16, #tpu.memory_space<vmem>>, vector<256x64xbf16>
    tpu.vector_store %arg4[%c0_6, %c0_7], %13 {strides = array<i32>} : memref<256x64xbf16, #tpu.memory_space<vmem>>, vector<256x64xbf16>,
    return
  }
  func.func @transform_0(%arg0: i32) -> (i32, i32) {
    %c0_i32 = arith.constant 0 : i32
    %c0_i32_0 = arith.constant 0 : i32
    return %arg0, %c0_i32 : i32, i32
  }
  func.func @transform_1(%arg0: i32) -> (i32, i32) {
    %c0_i32 = arith.constant 0 : i32
    %c0_i32_0 = arith.constant 0 : i32
    %c0_i32_1 = arith.constant 0 : i32
    return %c0_i32, %c0_i32_0 : i32, i32
  }
  func.func @transform_2(%arg0: i32) -> (i32, i32) {
    %c0_i32 = arith.constant 0 : i32
    %c0_i32_0 = arith.constant 0 : i32
    %c0_i32_1 = arith.constant 0 : i32
    return %c0_i32, %c0_i32_0 : i32, i32
  }
  func.func @transform_3(%arg0: i32) -> (i32, i32) {
    %c0_i32 = arith.constant 0 : i32
    %c0_i32_0 = arith.constant 0 : i32
    return %arg0, %c0_i32 : i32, i32
  }
}

module attributes {stable_mosaic.version = 11 : i64} {
  func.func @_mm_bias_stats_kernel(%arg0: i32, %arg1: memref<64x576xbf16, #tpu.memory_space<vmem>>, %arg2: memref<576x64xbf16, #tpu.memory_space<vmem>>, %arg3: memref<1x64xf32, #tpu.memory_space<vmem>>, %arg4: memref<64x64xbf16, #tpu.memory_space<vmem>>, %arg5: memref<1x1x64xf32, #tpu.memory_space<vmem>>, %arg6: memref<1x1x64xf32, #tpu.memory_space<vmem>>) attributes {dimension_semantics = [#tpu.dimension_semantics<parallel>], iteration_bounds = array<i64: 1>, scalar_prefetch = 0 : i64, scratch_operands = 0 : i64, tpu.core_type = #tpu.core_type<tc>, window_params = [{transform_indices = @transform_0, window_bounds = array<i64: 64, 576>}, {pipeline_mode = #tpu.pipeline_mode<synchronous>, transform_indices = @transform_1, window_bounds = array<i64: 576, 64>}, {pipeline_mode = #tpu.pipeline_mode<synchronous>, transform_indices = @transform_2, window_bounds = array<i64: 1, 64>}, {transform_indices = @transform_3, window_bounds = array<i64: 64, 64>}, {transform_indices = @transform_4, window_bounds = array<i64: 1, 1, 64>}, {transform_indices = @transform_5, window_bounds = array<i64: 1, 1, 64>}]} {
    %c0 = arith.constant 0 : index
    %c0_0 = arith.constant 0 : index
    %0 = vector.load %arg1[%c0, %c0_0] : memref<64x576xbf16, #tpu.memory_space<vmem>>, vector<64x576xbf16>
    %c0_1 = arith.constant 0 : index
    %c0_2 = arith.constant 0 : index
    %1 = vector.load %arg2[%c0_1, %c0_2] : memref<576x64xbf16, #tpu.memory_space<vmem>>, vector<576x64xbf16>
    %cst = arith.constant dense<0.000000e+00> : vector<64x64xf32>
    %2 = tpu.matmul %0, %1, %cst {dimension_numbers = #tpu.dot_dimension_numbers<[1], [0], [0], [1], [0, 0, 1, 1], [], []>} : vector<64x576xbf16>, vector<576x64xbf16>, vector<64x64xf32> -> vector<64x64xf32>
    %c0_3 = arith.constant 0 : index
    %c0_4 = arith.constant 0 : index
    %3 = vector.load %arg3[%c0_3, %c0_4] : memref<1x64xf32, #tpu.memory_space<vmem>>, vector<1x64xf32>
    %4 = vector.broadcast %3 : vector<1x64xf32> to vector<64x64xf32>
    %5 = arith.addf %2, %4 : vector<64x64xf32>
    %6 = arith.truncf %5 : vector<64x64xf32> to vector<64x64xbf16>
    %c0_5 = arith.constant 0 : index
    %c0_6 = arith.constant 0 : index
    %7 = vector.load %arg4[%c0_5, %c0_6] : memref<64x64xbf16, #tpu.memory_space<vmem>>, vector<64x64xbf16>
    tpu.vector_store %arg4[%c0_5, %c0_6], %6 {strides = array<i32>} : memref<64x64xbf16, #tpu.memory_space<vmem>>, vector<64x64xbf16>,
    %cst_7 = arith.constant dense<0.000000e+00> : vector<64xf32>
    %8 = vector.multi_reduction <add>, %5, %cst_7 [0] : vector<64x64xf32> to vector<64xf32>
    %9 = vector.shape_cast %8 : vector<64xf32> to vector<1x64xf32>
    %c0_8 = arith.constant 0 : index
    %c0_9 = arith.constant 0 : index
    %c0_10 = arith.constant 0 : index
    %10 = vector.load %arg5[%c0_8, %c0_9, %c0_10] : memref<1x1x64xf32, #tpu.memory_space<vmem>>, vector<1x1x64xf32>
    %11 = vector.shape_cast %10 : vector<1x1x64xf32> to vector<1x64xf32>
    %12 = vector.shape_cast %9 : vector<1x64xf32> to vector<1x1x64xf32>
    tpu.vector_store %arg5[%c0_8, %c0_9, %c0_10], %12 {strides = array<i32>} : memref<1x1x64xf32, #tpu.memory_space<vmem>>, vector<1x1x64xf32>,
    %13 = arith.mulf %5, %5 : vector<64x64xf32>
    %cst_11 = arith.constant dense<0.000000e+00> : vector<64xf32>
    %14 = vector.multi_reduction <add>, %13, %cst_11 [0] : vector<64x64xf32> to vector<64xf32>
    %15 = vector.shape_cast %14 : vector<64xf32> to vector<1x64xf32>
    %c0_12 = arith.constant 0 : index
    %c0_13 = arith.constant 0 : index
    %c0_14 = arith.constant 0 : index
    %16 = vector.load %arg6[%c0_12, %c0_13, %c0_14] : memref<1x1x64xf32, #tpu.memory_space<vmem>>, vector<1x1x64xf32>
    %17 = vector.shape_cast %16 : vector<1x1x64xf32> to vector<1x64xf32>
    %18 = vector.shape_cast %15 : vector<1x64xf32> to vector<1x1x64xf32>
    tpu.vector_store %arg6[%c0_12, %c0_13, %c0_14], %18 {strides = array<i32>} : memref<1x1x64xf32, #tpu.memory_space<vmem>>, vector<1x1x64xf32>,
    return
  }
  func.func @transform_0(%arg0: i32) -> (i32, i32) {
    %c0_i32 = arith.constant 0 : i32
    %c0_i32_0 = arith.constant 0 : i32
    return %arg0, %c0_i32 : i32, i32
  }
  func.func @transform_1(%arg0: i32) -> (i32, i32) {
    %c0_i32 = arith.constant 0 : i32
    %c0_i32_0 = arith.constant 0 : i32
    %c0_i32_1 = arith.constant 0 : i32
    return %c0_i32, %c0_i32_0 : i32, i32
  }
  func.func @transform_2(%arg0: i32) -> (i32, i32) {
    %c0_i32 = arith.constant 0 : i32
    %c0_i32_0 = arith.constant 0 : i32
    %c0_i32_1 = arith.constant 0 : i32
    return %c0_i32, %c0_i32_0 : i32, i32
  }
  func.func @transform_3(%arg0: i32) -> (i32, i32) {
    %c0_i32 = arith.constant 0 : i32
    %c0_i32_0 = arith.constant 0 : i32
    return %arg0, %c0_i32 : i32, i32
  }
  func.func @transform_4(%arg0: i32) -> (i32, i32, i32) {
    %c0_i32 = arith.constant 0 : i32
    %c0_i32_0 = arith.constant 0 : i32
    %c0_i32_1 = arith.constant 0 : i32
    return %arg0, %c0_i32, %c0_i32_0 : i32, i32, i32
  }
  func.func @transform_5(%arg0: i32) -> (i32, i32, i32) {
    %c0_i32 = arith.constant 0 : i32
    %c0_i32_0 = arith.constant 0 : i32
    %c0_i32_1 = arith.constant 0 : i32
    return %arg0, %c0_i32, %c0_i32_0 : i32, i32, i32
  }
}

module attributes {stable_mosaic.version = 11 : i64} {
  func.func @_scale_shift_act_kernel(%arg0: i32, %arg1: memref<64x64xbf16, #tpu.memory_space<vmem>>, %arg2: memref<1x64xf32, #tpu.memory_space<vmem>>, %arg3: memref<1x64xf32, #tpu.memory_space<vmem>>, %arg4: memref<64x64xbf16, #tpu.memory_space<vmem>>) attributes {dimension_semantics = [#tpu.dimension_semantics<parallel>], iteration_bounds = array<i64: 1>, scalar_prefetch = 0 : i64, scratch_operands = 0 : i64, tpu.core_type = #tpu.core_type<tc>, window_params = [{transform_indices = @transform_0, window_bounds = array<i64: 64, 64>}, {pipeline_mode = #tpu.pipeline_mode<synchronous>, transform_indices = @transform_1, window_bounds = array<i64: 1, 64>}, {pipeline_mode = #tpu.pipeline_mode<synchronous>, transform_indices = @transform_2, window_bounds = array<i64: 1, 64>}, {transform_indices = @transform_3, window_bounds = array<i64: 64, 64>}]} {
    %c0 = arith.constant 0 : index
    %c0_0 = arith.constant 0 : index
    %0 = vector.load %arg1[%c0, %c0_0] : memref<64x64xbf16, #tpu.memory_space<vmem>>, vector<64x64xbf16>
    %1 = arith.extf %0 : vector<64x64xbf16> to vector<64x64xf32>
    %c0_1 = arith.constant 0 : index
    %c0_2 = arith.constant 0 : index
    %2 = vector.load %arg2[%c0_1, %c0_2] : memref<1x64xf32, #tpu.memory_space<vmem>>, vector<1x64xf32>
    %3 = vector.broadcast %2 : vector<1x64xf32> to vector<64x64xf32>
    %4 = arith.mulf %1, %3 : vector<64x64xf32>
    %c0_3 = arith.constant 0 : index
    %c0_4 = arith.constant 0 : index
    %5 = vector.load %arg3[%c0_3, %c0_4] : memref<1x64xf32, #tpu.memory_space<vmem>>, vector<1x64xf32>
    %6 = vector.broadcast %5 : vector<1x64xf32> to vector<64x64xf32>
    %7 = arith.addf %4, %6 : vector<64x64xf32>
    %cst = arith.constant 0.000000e+00 : f32
    %8 = vector.broadcast %cst : f32 to vector<64x64xf32>
    %9 = arith.cmpf oge, %7, %8 : vector<64x64xf32>
    %cst_5 = arith.constant 2.000000e-01 : f32
    %10 = vector.broadcast %cst_5 : f32 to vector<64x64xf32>
    %11 = arith.mulf %10, %7 : vector<64x64xf32>
    %12 = arith.select %9, %7, %11 : vector<64x64xi1>, vector<64x64xf32>
    %13 = arith.truncf %12 : vector<64x64xf32> to vector<64x64xbf16>
    %c0_6 = arith.constant 0 : index
    %c0_7 = arith.constant 0 : index
    %14 = vector.load %arg4[%c0_6, %c0_7] : memref<64x64xbf16, #tpu.memory_space<vmem>>, vector<64x64xbf16>
    tpu.vector_store %arg4[%c0_6, %c0_7], %13 {strides = array<i32>} : memref<64x64xbf16, #tpu.memory_space<vmem>>, vector<64x64xbf16>,
    return
  }
  func.func @transform_0(%arg0: i32) -> (i32, i32) {
    %c0_i32 = arith.constant 0 : i32
    %c0_i32_0 = arith.constant 0 : i32
    return %arg0, %c0_i32 : i32, i32
  }
  func.func @transform_1(%arg0: i32) -> (i32, i32) {
    %c0_i32 = arith.constant 0 : i32
    %c0_i32_0 = arith.constant 0 : i32
    %c0_i32_1 = arith.constant 0 : i32
    return %c0_i32, %c0_i32_0 : i32, i32
  }
  func.func @transform_2(%arg0: i32) -> (i32, i32) {
    %c0_i32 = arith.constant 0 : i32
    %c0_i32_0 = arith.constant 0 : i32
    %c0_i32_1 = arith.constant 0 : i32
    return %c0_i32, %c0_i32_0 : i32, i32
  }
  func.func @transform_3(%arg0: i32) -> (i32, i32) {
    %c0_i32 = arith.constant 0 : i32
    %c0_i32_0 = arith.constant 0 : i32
    return %arg0, %c0_i32 : i32, i32
  }
}

module attributes {stable_mosaic.version = 11 : i64} {
  func.func @_head_kernel(%arg0: memref<4x16x64xbf16, #tpu.memory_space<vmem>>, %arg1: memref<64x128xbf16, #tpu.memory_space<vmem>>, %arg2: memref<1x128xf32, #tpu.memory_space<vmem>>, %arg3: memref<128x1xbf16, #tpu.memory_space<vmem>>, %arg4: memref<1x1xf32, #tpu.memory_space<vmem>>, %arg5: memref<4x1xf32, #tpu.memory_space<vmem>>) attributes {dimension_semantics = [], scalar_prefetch = 0 : i64, scratch_operands = 0 : i64, tpu.core_type = #tpu.core_type<tc>} {
    %c0 = arith.constant 0 : index
    %c0_0 = arith.constant 0 : index
    %c0_1 = arith.constant 0 : index
    %0 = vector.load %arg0[%c0, %c0_0, %c0_1] : memref<4x16x64xbf16, #tpu.memory_space<vmem>>, vector<4x16x64xbf16>
    %1 = arith.extf %0 : vector<4x16x64xbf16> to vector<4x16x64xf32>
    %cst = arith.constant dense<0.000000e+00> : vector<4x64xf32>
    %2 = vector.multi_reduction <add>, %1, %cst [1] : vector<4x16x64xf32> to vector<4x64xf32>
    %cst_2 = arith.constant 1.600000e+01 : f32
    %3 = vector.broadcast %cst_2 : f32 to vector<4x64xf32>
    %4 = arith.divf %2, %3 : vector<4x64xf32>
    %5 = arith.truncf %4 : vector<4x64xf32> to vector<4x64xbf16>
    %c0_3 = arith.constant 0 : index
    %c0_4 = arith.constant 0 : index
    %6 = vector.load %arg1[%c0_3, %c0_4] : memref<64x128xbf16, #tpu.memory_space<vmem>>, vector<64x128xbf16>
    %cst_5 = arith.constant dense<0.000000e+00> : vector<4x128xf32>
    %7 = tpu.matmul %5, %6, %cst_5 {dimension_numbers = #tpu.dot_dimension_numbers<[1], [0], [0], [1], [0, 0, 1, 1], [], []>} : vector<4x64xbf16>, vector<64x128xbf16>, vector<4x128xf32> -> vector<4x128xf32>
    %c0_6 = arith.constant 0 : index
    %c0_7 = arith.constant 0 : index
    %8 = vector.load %arg2[%c0_6, %c0_7] : memref<1x128xf32, #tpu.memory_space<vmem>>, vector<1x128xf32>
    %9 = vector.broadcast %8 : vector<1x128xf32> to vector<4x128xf32>
    %10 = arith.addf %7, %9 : vector<4x128xf32>
    %cst_8 = arith.constant 0.000000e+00 : f32
    %11 = vector.broadcast %cst_8 : f32 to vector<4x128xf32>
    %12 = arith.cmpf oge, %10, %11 : vector<4x128xf32>
    %cst_9 = arith.constant 2.000000e-01 : f32
    %13 = vector.broadcast %cst_9 : f32 to vector<4x128xf32>
    %14 = arith.mulf %13, %10 : vector<4x128xf32>
    %15 = arith.select %12, %10, %14 : vector<4x128xi1>, vector<4x128xf32>
    %16 = arith.truncf %15 : vector<4x128xf32> to vector<4x128xbf16>
    %c0_10 = arith.constant 0 : index
    %c0_11 = arith.constant 0 : index
    %17 = vector.load %arg3[%c0_10, %c0_11] : memref<128x1xbf16, #tpu.memory_space<vmem>>, vector<128x1xbf16>
    %cst_12 = arith.constant dense<0.000000e+00> : vector<4x1xf32>
    %18 = tpu.matmul %16, %17, %cst_12 {dimension_numbers = #tpu.dot_dimension_numbers<[1], [0], [0], [1], [0, 0, 1, 1], [], []>} : vector<4x128xbf16>, vector<128x1xbf16>, vector<4x1xf32> -> vector<4x1xf32>
    %c0_13 = arith.constant 0 : index
    %c0_14 = arith.constant 0 : index
    %19 = vector.load %arg4[%c0_13, %c0_14] : memref<1x1xf32, #tpu.memory_space<vmem>>, vector<1x1xf32>
    %20 = vector.broadcast %19 : vector<1x1xf32> to vector<4x1xf32>
    %21 = arith.addf %18, %20 : vector<4x1xf32>
    %c0_15 = arith.constant 0 : index
    %c0_16 = arith.constant 0 : index
    %22 = vector.load %arg5[%c0_15, %c0_16] : memref<4x1xf32, #tpu.memory_space<vmem>>, vector<4x1xf32>
    tpu.vector_store %arg5[%c0_15, %c0_16], %21 {strides = array<i32>} : memref<4x1xf32, #tpu.memory_space<vmem>>, vector<4x1xf32>,
    return
  }
}

</mosaic_0001>

<bundles_post_ra>
// kernel: _lambda_.12
= control target key start
LH: loop header
LB: loop body
LE: loop exit
PB: predicated region body
PF: predicated region fallthrough
CT: control target
= control target key end

     0   :  { %s1767_s12 = smov 0   ;;  %s2127_s0 = inlined_call_operand.vmem [shape: bf16[4096,27], index: 0, kind: input, shape index: {}]   ;;  %s2128_s1 = inlined_call_operand.vmem [shape: bf16[27,16], index: 1, kind: input, shape index: {}]   ;;  %s2129_s2 = inlined_call_operand.vmem [shape: f32[1,16], index: 2, kind: input, shape index: {}]   ;;  %s2130_s3 = inlined_call_operand.vmem [shape: bf16[4096,16], index: 3, kind: output, shape index: {}]  }
   0x1 LB: > { %s1383_s13 = sadd.s32 4294967295, %s1744_s12   ;;  %p1387_p0 = scmp.ge.s32.totalorder %s1744_s12, 1  ;;  %s1744_s12 = sphi %s1767_s12, %s13_s12  }
   0x2   : > { %p138_p1 = scmp.lt.s32.totalorder %s1744_s12, 9 }
   0x4   : > { %p139_p2 = pnand %p1387_p0, %p138_p1 }
   0x5   : > { %v1704_v0 = vld [vmem:[%s2128_s1] sm:$0xff] (!%p139_p2)   ;;  %vm518_vm0 = vcmask (!%p139_p2), 1044480   ;;  %v1705_v1 = vld [vmem:[%s2128_s1 + $0x8] sm:$0x3f] (!%p139_p2)   ;;  %vm519_vm1 = vcmask (!%p139_p2), 1045504   ;;  %s1388_s18 = sshll.u32 (!%p139_p2), %s1383_s13, 6 }
   0x6   : > { %142 = sbr.rel (%p139_p2) target bundleno = 317 (0x13d), region = 32  ;;  %1623 = vmatprep.subr.bf16.mxu0 (!%p139_p2), %v1704_v0  ;;  %1691 = vmatprep.subr.bf16.mxu1 (!%p139_p2), %v1704_v0  ;;  %v1746_v2 = vmov (!%p139_p2), 65535   ;;  %p163_p3 = scmp.lt.s32.totalorder (!%p139_p2), %s1388_s18, 511  ;;  %vm421_vm2 = vcmask (!%p139_p2), 220160   ;;  %v1858_v38 = vld [vmem:[%s2129_s2] ss:$0 sm:$0xff] (!%p139_p2) }
   0x7   : > { %1624 = vmatpush3.bf16.msra.mxu0 (!%p139_p2), %v1704_v0  ;;  %1693 = vmatpush3.bf16.msra.mxu1 (!%p139_p2), %v1704_v0  ;;  %v520_v3 = vsel (!%p139_p2), %vm518_vm0, 4294967295, %v1746_v2  ;;  %vm1262_vm3 = vcmask (!%p139_p2), 125952  }
   0x8   : > { %v521_v4 = vsel (!%p139_p2), %vm519_vm1, %v520_v3, 0 }
   0x9   : > { %v523_v5 = vand.u32 (!%p139_p2), %v1705_v1, %v521_v4 }
   0xb   : > { %1625 = vmatprep.subr.bf16.mxu0 (!%p139_p2), %v523_v5  ;;  %1692 = vmatprep.subr.bf16.mxu1 (!%p139_p2), %v523_v5 }
   0xc   : > { %1626 = vmatpush3.bf16.msra.mxu0 (!%p139_p2), %v523_v5  ;;  %1694 = vmatpush3.bf16.msra.mxu1 (!%p139_p2), %v523_v5 }
   0xd   : > { %s2132_s18 = smov (!%p163_p3, %s1388_s18), 511 }
   0xe   : > { %s1389_s19 = sshll.u32 %s2132_s18, 2 }
   0xf   : > { %s1789_s22 = scalar_lea.vmem %s2127_s0, %s1389_s19  ;;  %s1870_s27 = scalar_lea.vmem %s2130_s3, %s1389_s19 }
  0x10   : > { %v1706_v6 = vld [vmem:[%s1789_s22] sm:$0xff]   ;;  %v1708_v8 = vld [vmem:[%s1789_s22 + $0x8] sm:$0xff]   ;;  %v1710_v10 = vld [vmem:[%s1789_s22 + $0x10] sm:$0xff]  }
  0x11   : > { %v1707_v7 = vld [vmem:[%s1789_s22 + $0x80] sm:$0xff]   ;;  %1627 = vmatprep.mubr.msk.bf16.mxu0 %vm421_vm2, %v1706_v6  ;;  %v1709_v9 = vld [vmem:[%s1789_s22 + $0x88] sm:$0xff]   ;;  %v1711_v11 = vld [vmem:[%s1789_s22 + $0x90] sm:$0xff]  }
  0x12   : > { %1659 = vmatprep.mubr.msk.bf16.mxu1 %vm421_vm2, %v1707_v7  ;;  %1628 = vmatmul.mubr.msk.bf16.vlgmr.msra.gmra.mrb[0].mxu0 %vm421_vm2, %v1708_v8  ;;  %v1712_v12 = vld [vmem:[%s1789_s22 + $0x18] sm:$0xff]   ;;  %v1714_v14 = vld [vmem:[%s1789_s22 + $0x20] sm:$0xff]   ;;  %v1716_v16 = vld [vmem:[%s1789_s22 + $0x28] sm:$0xff]  }
  0x13   : > { %1660 = vmatmul.mubr.msk.bf16.vlgmr.msra.gmra.mrb[0].mxu1 %vm421_vm2, %v1709_v9  ;;  %1631 = vmatprep.mubr.msk.bf16.mxu0 %vm421_vm2, %v1710_v10  ;;  %v1713_v13 = vld [vmem:[%s1789_s22 + $0x98] sm:$0xff]   ;;  %v1715_v15 = vld [vmem:[%s1789_s22 + $0xa0] sm:$0xff]   ;;  %v1717_v17 = vld [vmem:[%s1789_s22 + $0xa8] sm:$0xff]  }
  0x14   : > { %1663 = vmatprep.mubr.msk.bf16.mxu1 %vm421_vm2, %v1711_v11  ;;  %v1718_v18 = vld [vmem:[%s1789_s22 + $0x30] sm:$0xff]   ;;  %v1720_v20 = vld [vmem:[%s1789_s22 + $0x38] sm:$0xff]   ;;  %v1722_v22 = vld [vmem:[%s1789_s22 + $0x40] sm:$0xff]  }
  0x15   : > { %v1719_v19 = vld [vmem:[%s1789_s22 + $0xb0] sm:$0xff]   ;;  %v1721_v21 = vld [vmem:[%s1789_s22 + $0xb8] sm:$0xff]   ;;  %v1723_v23 = vld [vmem:[%s1789_s22 + $0xc0] sm:$0xff]  }
  0x16   : > { %v1724_v24 = vld [vmem:[%s1789_s22 + $0x48] sm:$0xff]   ;;  %v1726_v26 = vld [vmem:[%s1789_s22 + $0x50] sm:$0xff]   ;;  %v1728_v28 = vld [vmem:[%s1789_s22 + $0x58] sm:$0xff]  }
  0x17   : > { %v1725_v25 = vld [vmem:[%s1789_s22 + $0xc8] sm:$0xff]   ;;  %v1727_v27 = vld [vmem:[%s1789_s22 + $0xd0] sm:$0xff]   ;;  %v1729_v29 = vld [vmem:[%s1789_s22 + $0xd8] sm:$0xff]  }
  0x18   : > { %v1730_v30 = vld [vmem:[%s1789_s22 + $0x60] sm:$0xff]   ;;  %v1732_v32 = vld [vmem:[%s1789_s22 + $0x68] sm:$0xff]   ;;  %v1734_v34 = vld [vmem:[%s1789_s22 + $0x70] sm:$0xff]  }
  0x19   : > { %v1731_v31 = vld [vmem:[%s1789_s22 + $0xe0] sm:$0xff]   ;;  %v1733_v33 = vld [vmem:[%s1789_s22 + $0xe8] sm:$0xff]   ;;  %v1735_v35 = vld [vmem:[%s1789_s22 + $0xf0] sm:$0xff]  }
  0x1a   : > { %1632 = vmatmul.mubr.msk.bf16.gmra.mrb[4].mxu0 %vm421_vm2, %v1712_v12  ;;  %v1736_v36 = vld [vmem:[%s1789_s22 + $0x78] sm:$0xff]  }
  0x1b   : > { %1664 = vmatmul.mubr.msk.bf16.gmra.mrb[4].mxu1 %vm421_vm2, %v1713_v13  ;;  %1635 = vmatprep.mubr.msk.bf16.mxu0 %vm421_vm2, %v1714_v14  ;;  %v1737_v37 = vld [vmem:[%s1789_s22 + $0xf8] sm:$0xff]  }
  0x1c   : > { %1667 = vmatprep.mubr.msk.bf16.mxu1 %vm421_vm2, %v1715_v15 }
  0x22   : > { %1636 = vmatmul.mubr.msk.bf16.gmra.mrb[8].mxu0 %vm421_vm2, %v1716_v16 }
  0x23   : > { %1668 = vmatmul.mubr.msk.bf16.gmra.mrb[8].mxu1 %vm421_vm2, %v1717_v17  ;;  %1639 = vmatprep.mubr.msk.bf16.mxu0 %vm421_vm2, %v1718_v18 }
  0x24   : > { %1671 = vmatprep.mubr.msk.bf16.mxu1 %vm421_vm2, %v1719_v19 }
  0x2a   : > { %1640 = vmatmul.mubr.msk.bf16.gmra.mrb[12].mxu0 %vm421_vm2, %v1720_v20 }
  0x2b   : > { %1672 = vmatmul.mubr.msk.bf16.gmra.mrb[12].mxu1 %vm421_vm2, %v1721_v21  ;;  %1643 = vmatprep.mubr.msk.bf16.mxu0 %vm421_vm2, %v1722_v22 }
  0x2c   : > { %1675 = vmatprep.mubr.msk.bf16.mxu1 %vm421_vm2, %v1723_v23 }
  0x32   : > { %1644 = vmatmul.mubr.msk.bf16.gmra.mrb[16].mxu0 %vm421_vm2, %v1724_v24 }
  0x33   : > { %1676 = vmatmul.mubr.msk.bf16.gmra.mrb[16].mxu1 %vm421_vm2, %v1725_v25  ;;  %1647 = vmatprep.mubr.msk.bf16.mxu0 %vm421_vm2, %v1726_v26 }
  0x34   : > { %1679 = vmatprep.mubr.msk.bf16.mxu1 %vm421_vm2, %v1727_v27 }
  0x3a   : > { %1648 = vmatmul.mubr.msk.bf16.gmra.mrb[20].mxu0 %vm421_vm2, %v1728_v28 }
  0x3b   : > { %1680 = vmatmul.mubr.msk.bf16.gmra.mrb[20].mxu1 %vm421_vm2, %v1729_v29  ;;  %1651 = vmatprep.mubr.msk.bf16.mxu0 %vm421_vm2, %v1730_v30 }
  0x3c   : > { %1683 = vmatprep.mubr.msk.bf16.mxu1 %vm421_vm2, %v1731_v31 }
  0x42   : > { %1652 = vmatmul.mubr.msk.bf16.gmra.mrb[24].mxu0 %vm421_vm2, %v1732_v32 }
  0x43   : > { %1684 = vmatmul.mubr.msk.bf16.gmra.mrb[24].mxu1 %vm421_vm2, %v1733_v33  ;;  %1655 = vmatprep.mubr.msk.bf16.mxu0 %vm421_vm2, %v1734_v34 }
  0x44   : > { %1687 = vmatprep.mubr.msk.bf16.mxu1 %vm421_vm2, %v1735_v35 }
  0x4a   : > { %1656 = vmatmul.mubr.msk.bf16.gmra.mrb[28].mxu0 %vm421_vm2, %v1736_v36 }
  0x4b   : > { %1688 = vmatmul.mubr.msk.bf16.gmra.mrb[28].mxu1 %vm421_vm2, %v1737_v37 }
  0xe5   : > { %v1629_v39 = vpop.f32.mrb[0].mxu0 }
  0xe6   : > { %v568_v40 = vadd.f32 %v1629_v39, %v1858_v38  ;;  %v1661_v41 = vpop.f32.mrb[0].mxu1  ;;  %v559_v42 = vpop.f32.mrb[1].mxu0 }
  0xe7   : > { %v696_v43 = vadd.f32 %v1661_v41, %v1858_v38  ;;  %v560_v44 = vadd.f32 %v1858_v38, %v559_v42  ;;  %v687_v45 = vpop.f32.mrb[1].mxu1  ;;  %v1630_v46 = vpop.f32.mrb[2].mxu0 }
  0xe8   : > { %vm816_vm4 = vcmp.ge.f32.partialorder %v568_v40, 0.0  ;;  %v880_v47 = vmul.f32 0.2, %v568_v40  ;;  %v688_v48 = vadd.f32 %v1858_v38, %v687_v45  ;;  %v571_v49 = vadd.f32 %v1630_v46, %v1858_v38  ;;  %v1662_v50 = vpop.f32.mrb[2].mxu1  ;;  %v562_v51 = vpop.f32.mrb[3].mxu0 }
  0xe9   : > { %vm848_vm5 = vcmp.ge.f32.partialorder %v696_v43, 0.0  ;;  %v912_v52 = vmul.f32 0.2, %v696_v43  ;;  %vm814_vm6 = vcmp.ge.f32.partialorder %v560_v44, 0.0  ;;  %v878_v53 = vmul.f32 0.2, %v560_v44 }
  0xea   : > { %v944_v54 = vsel %vm816_vm4, %v568_v40, %v880_v47  ;;  %vm846_vm7 = vcmp.ge.f32.partialorder %v688_v48, 0.0  ;;  %v910_v55 = vmul.f32 0.2, %v688_v48  ;;  %vm817_vm8 = vcmp.ge.f32.partialorder %v571_v49, 0.0  ;;  %v690_v56 = vpop.f32.mrb[3].mxu1 }
  0xeb   : > { %v1527_v57 = vpack.c.bf16 %v944_v54, %v944_v54  ;;  %v976_v58 = vsel %vm848_vm5, %v696_v43, %v912_v52  ;;  %v942_v59 = vsel %vm814_vm6, %v560_v44, %v878_v53  ;;  %v881_v60 = vmul.f32 0.2, %v571_v49 }
  0xec   : > { %v1559_v61 = vpack.c.bf16 %v976_v58, %v976_v58  ;;  %v1525_v62 = vpack.c.bf16 %v942_v59, %v942_v59  ;;  %v974_v63 = vsel %vm846_vm7, %v688_v48, %v910_v55  ;;  %v699_v0 = vadd.f32 %v1662_v50, %v1858_v38 }
  0xed   : > { %1265 = vst.msk [vmem:[%s1870_s27 + $0x8] sm:$0xf] %vm1262_vm3, %v1527_v57  ;;  %v1557_v1 = vpack.c.bf16 %v974_v63, %v974_v63  ;;  %v945_v2 = vsel %vm817_vm8, %v571_v49, %v881_v60  ;;  %v563_v3 = vadd.f32 %v1858_v38, %v562_v51  ;;  %v691_v4 = vadd.f32 %v1858_v38, %v690_v56  ;;  %v1633_v5 = vpop.f32.mrb[4].mxu0 }
  0xee   : > { %1297 = vst.msk [vmem:[%s1870_s27 + $0x88] sm:$0xf] %vm1262_vm3, %v1559_v61  ;;  %1263 = vst.msk [vmem:[%s1870_s27] sm:$0xf] %vm1262_vm3, %v1525_v62  ;;  %v1528_v6 = vpack.c.bf16 %v945_v2, %v945_v2  ;;  %vm849_vm9 = vcmp.ge.f32.partialorder %v699_v0, 0.0  ;;  %v584_v8 = vadd.f32 %v1633_v5, %v1858_v38  ;;  %v1665_v9 = vpop.f32.mrb[4].mxu1 }
  0xef   : > { %v913_v7 = vmul.f32 0.2, %v699_v0  ;;  %v575_v10 = vpop.f32.mrb[5].mxu0  ;;  %1295 = vst.msk [vmem:[%s1870_s27 + $0x80] sm:$0xf] %vm1262_vm3, %v1557_v1  ;;  %vm815_vm10 = vcmp.ge.f32.partialorder %v563_v3, 0.0  ;;  %v712_v15 = vadd.f32 %v1665_v9, %v1858_v38 }
  0xf0   : > { %v879_v11 = vmul.f32 0.2, %v563_v3  ;;  %vm847_vm11 = vcmp.ge.f32.partialorder %v691_v4, 0.0  ;;  %v911_v12 = vmul.f32 0.2, %v691_v4  ;;  %vm820_vm12 = vcmp.ge.f32.partialorder %v584_v8, 0.0 }
  0xf1   : > { %1266 = vst.msk [vmem:[%s1870_s27 + $0xc] sm:$0xf] %vm1262_vm3, %v1528_v6  ;;  %v977_v13 = vsel %vm849_vm9, %v699_v0, %v913_v7  ;;  %v884_v14 = vmul.f32 0.2, %v584_v8  ;;  %v703_v16 = vpop.f32.mrb[5].mxu1  ;;  %v1634_v17 = vpop.f32.mrb[6].mxu0  ;;  %v576_v21 = vadd.f32 %v1858_v38, %v575_v10 }
  0xf2   : > { %v1560_v18 = vpack.c.bf16 %v977_v13, %v977_v13  ;;  %v943_v19 = vsel %vm815_vm10, %v563_v3, %v879_v11  ;;  %v975_v20 = vsel %vm847_vm11, %v691_v4, %v911_v12  ;;  %v1666_v22 = vpop.f32.mrb[6].mxu1  ;;  %v578_v23 = vpop.f32.mrb[7].mxu0  ;;  %vm852_vm13 = vcmp.ge.f32.partialorder %v712_v15, 0.0 }
  0xf3   : > { %v1526_v24 = vpack.c.bf16 %v943_v19, %v943_v19  ;;  %v1558_v25 = vpack.c.bf16 %v975_v20, %v975_v20  ;;  %v948_v26 = vsel %vm820_vm12, %v584_v8, %v884_v14  ;;  %v706_v27 = vpop.f32.mrb[7].mxu1  ;;  %v916_v29 = vmul.f32 0.2, %v712_v15 }
  0xf4   : > { %1298 = vst.msk [vmem:[%s1870_s27 + $0x8c] sm:$0xf] %vm1262_vm3, %v1560_v18  ;;  %v1531_v28 = vpack.c.bf16 %v948_v26, %v948_v26  ;;  %vm818_vm14 = vcmp.ge.f32.partialorder %v576_v21, 0.0  ;;  %v882_v30 = vmul.f32 0.2, %v576_v21  ;;  %v704_v31 = vadd.f32 %v1858_v38, %v703_v16 }
  0xf5   : > { %1264 = vst.msk [vmem:[%s1870_s27 + $0x4] sm:$0xf] %vm1262_vm3, %v1526_v24  ;;  %1296 = vst.msk [vmem:[%s1870_s27 + $0x84] sm:$0xf] %vm1262_vm3, %v1558_v25  ;;  %v587_v32 = vadd.f32 %v1634_v17, %v1858_v38  ;;  %v715_v33 = vadd.f32 %v1666_v22, %v1858_v38  ;;  %v579_v34 = vadd.f32 %v1858_v38, %v578_v23  ;;  %v1637_v39 = vpop.f32.mrb[8].mxu0 }
  0xf6   : > { %1269 = vst.msk [vmem:[%s1870_s27 + $0x18] sm:$0xf] %vm1262_vm3, %v1531_v28  ;;  %v980_v35 = vsel %vm852_vm13, %v712_v15, %v916_v29  ;;  %v946_v36 = vsel %vm818_vm14, %v576_v21, %v882_v30  ;;  %v707_v37 = vadd.f32 %v1858_v38, %v706_v27  ;;  %vm850_vm15 = vcmp.ge.f32.partialorder %v704_v31, 0.0  ;;  %v1669_v43 = vpop.f32.mrb[8].mxu1  ;;  %v591_v44 = vpop.f32.mrb[9].mxu0 }
  0xf7   : > { %v1563_v40 = vpack.c.bf16 %v980_v35, %v980_v35  ;;  %v1529_v41 = vpack.c.bf16 %v946_v36, %v946_v36  ;;  %v914_v42 = vmul.f32 0.2, %v704_v31  ;;  %vm821_vm0 = vcmp.ge.f32.partialorder %v587_v32, 0.0  ;;  %v719_v49 = vpop.f32.mrb[9].mxu1  ;;  %v1638_v50 = vpop.f32.mrb[10].mxu0 }
  0xf8   : > { %v885_v45 = vmul.f32 0.2, %v587_v32  ;;  %vm853_vm1 = vcmp.ge.f32.partialorder %v715_v33, 0.0  ;;  %v917_v46 = vmul.f32 0.2, %v715_v33  ;;  %vm819_vm2 = vcmp.ge.f32.partialorder %v579_v34, 0.0 }
  0xf9   : > { %1301 = vst.msk [vmem:[%s1870_s27 + $0x98] sm:$0xf] %vm1262_vm3, %v1563_v40  ;;  %1267 = vst.msk [vmem:[%s1870_s27 + $0x10] sm:$0xf] %vm1262_vm3, %v1529_v41  ;;  %v978_v47 = vsel %vm850_vm15, %v704_v31, %v914_v42  ;;  %v883_v48 = vmul.f32 0.2, %v579_v34  ;;  %v600_v60 = vadd.f32 %v1637_v39, %v1858_v38  ;;  %v728_v0 = vadd.f32 %v1669_v43, %v1858_v38 }
  0xfa   : > { %vm851_vm4 = vcmp.ge.f32.partialorder %v707_v37, 0.0  ;;  %v1561_v51 = vpack.c.bf16 %v978_v47, %v978_v47  ;;  %v949_v52 = vsel %vm821_vm0, %v587_v32, %v885_v45  ;;  %v981_v53 = vsel %vm853_vm1, %v715_v33, %v917_v46  ;;  %v1670_v55 = vpop.f32.mrb[10].mxu1  ;;  %v594_v56 = vpop.f32.mrb[11].mxu0 }
  0xfb   : > { %v915_v54 = vmul.f32 0.2, %v707_v37  ;;  %v1532_v57 = vpack.c.bf16 %v949_v52, %v949_v52  ;;  %v1564_v58 = vpack.c.bf16 %v981_v53, %v981_v53  ;;  %v947_v59 = vsel %vm819_vm2, %v579_v34, %v883_v48  ;;  %v722_v61 = vpop.f32.mrb[11].mxu1 }
  0xfc   : > { %1299 = vst.msk [vmem:[%s1870_s27 + $0x90] sm:$0xf] %vm1262_vm3, %v1561_v51  ;;  %v1530_v62 = vpack.c.bf16 %v947_v59, %v947_v59  ;;  %v592_v1 = vadd.f32 %v1858_v38, %v591_v44  ;;  %vm824_vm5 = vcmp.ge.f32.partialorder %v600_v60, 0.0  ;;  %v888_v3 = vmul.f32 0.2, %v600_v60 }
  0xfd   : > { %v979_v63 = vsel %vm851_vm4, %v707_v37, %v915_v54  ;;  %1270 = vst.msk [vmem:[%s1870_s27 + $0x1c] sm:$0xf] %vm1262_vm3, %v1532_v57  ;;  %1302 = vst.msk [vmem:[%s1870_s27 + $0x9c] sm:$0xf] %vm1262_vm3, %v1564_v58  ;;  %v720_v4 = vadd.f32 %v1858_v38, %v719_v49  ;;  %vm856_vm6 = vcmp.ge.f32.partialorder %v728_v0, 0.0  ;;  %v603_v9 = vadd.f32 %v1638_v50, %v1858_v38  ;;  %v1641_v10 = vpop.f32.mrb[12].mxu0 }
  0xfe   : > { %v1562_v2 = vpack.c.bf16 %v979_v63, %v979_v63  ;;  %1268 = vst.msk [vmem:[%s1870_s27 + $0x14] sm:$0xf] %vm1262_vm3, %v1530_v62  ;;  %v920_v5 = vmul.f32 0.2, %v728_v0  ;;  %vm822_vm7 = vcmp.ge.f32.partialorder %v592_v1, 0.0  ;;  %v952_v7 = vsel %vm824_vm5, %v600_v60, %v888_v3  ;;  %v1673_v11 = vpop.f32.mrb[12].mxu1 }
  0xff   : > { %v886_v6 = vmul.f32 0.2, %v592_v1  ;;  %vm854_vm8 = vcmp.ge.f32.partialorder %v720_v4, 0.0  ;;  %v918_v8 = vmul.f32 0.2, %v720_v4  ;;  %v1535_v12 = vpack.c.bf16 %v952_v7, %v952_v7  ;;  %v607_v16 = vpop.f32.mrb[13].mxu0 }
 0x100   : > { %1300 = vst.msk [vmem:[%s1870_s27 + $0x94] sm:$0xf] %vm1262_vm3, %v1562_v2  ;;  %v984_v13 = vsel %vm856_vm6, %v728_v0, %v920_v5  ;;  %v731_v15 = vadd.f32 %v1670_v55, %v1858_v38  ;;  %v735_v17 = vpop.f32.mrb[13].mxu1  ;;  %vm825_vm9 = vcmp.ge.f32.partialorder %v603_v9, 0.0  ;;  %v1642_v21 = vpop.f32.mrb[14].mxu0  ;;  %v595_v27 = vadd.f32 %v1858_v38, %v594_v56 }
 0x101   : > { %v950_v14 = vsel %vm822_vm7, %v592_v1, %v886_v6  ;;  %v1567_v18 = vpack.c.bf16 %v984_v13, %v984_v13  ;;  %v982_v20 = vsel %vm854_vm8, %v720_v4, %v918_v8  ;;  %v1674_v22 = vpop.f32.mrb[14].mxu1  ;;  %1273 = vst.msk [vmem:[%s1870_s27 + $0x28] sm:$0xf] %vm1262_vm3, %v1535_v12  ;;  %v889_v24 = vmul.f32 0.2, %v603_v9  ;;  %v610_v26 = vpop.f32.mrb[15].mxu0 }
 0x102   : > { %v1533_v19 = vpack.c.bf16 %v950_v14, %v950_v14  ;;  %v1565_v23 = vpack.c.bf16 %v982_v20, %v982_v20  ;;  %vm857_vm10 = vcmp.ge.f32.partialorder %v731_v15, 0.0  ;;  %v921_v25 = vmul.f32 0.2, %v731_v15  ;;  %v738_v31 = vpop.f32.mrb[15].mxu1 }
 0x103   : > { %1305 = vst.msk [vmem:[%s1870_s27 + $0xa8] sm:$0xf] %vm1262_vm3, %v1567_v18  ;;  %v723_v28 = vadd.f32 %v1858_v38, %v722_v61  ;;  %v616_v29 = vadd.f32 %v1641_v10, %v1858_v38  ;;  %v744_v30 = vadd.f32 %v1673_v11, %v1858_v38  ;;  %v953_v32 = vsel %vm825_vm9, %v603_v9, %v889_v24 }
 0x104   : > { %1271 = vst.msk [vmem:[%s1870_s27 + $0x20] sm:$0xf] %vm1262_vm3, %v1533_v19  ;;  %1303 = vst.msk [vmem:[%s1870_s27 + $0xa0] sm:$0xf] %vm1262_vm3, %v1565_v23  ;;  %v985_v33 = vsel %vm857_vm10, %v731_v15, %v921_v25  ;;  %v608_v34 = vadd.f32 %v1858_v38, %v607_v16  ;;  %v736_v35 = vadd.f32 %v1858_v38, %v735_v17  ;;  %vm823_vm11 = vcmp.ge.f32.partialorder %v595_v27, 0.0 }
 0x105   : > { %v1536_v36 = vpack.c.bf16 %v953_v32, %v953_v32  ;;  %v1568_v37 = vpack.c.bf16 %v985_v33, %v985_v33  ;;  %v887_v39 = vmul.f32 0.2, %v595_v27  ;;  %vm855_vm12 = vcmp.ge.f32.partialorder %v723_v28, 0.0  ;;  %v1645_v44 = vpop.f32.mrb[16].mxu0 }
 0x106   : > { %v919_v40 = vmul.f32 0.2, %v723_v28  ;;  %vm828_vm13 = vcmp.ge.f32.partialorder %v616_v29, 0.0  ;;  %v892_v41 = vmul.f32 0.2, %v616_v29  ;;  %vm860_vm14 = vcmp.ge.f32.partialorder %v744_v30, 0.0 }
 0x107   : > { %1274 = vst.msk [vmem:[%s1870_s27 + $0x2c] sm:$0xf] %vm1262_vm3, %v1536_v36  ;;  %1306 = vst.msk [vmem:[%s1870_s27 + $0xac] sm:$0xf] %vm1262_vm3, %v1568_v37  ;;  %v951_v42 = vsel %vm823_vm11, %v595_v27, %v887_v39  ;;  %v924_v43 = vmul.f32 0.2, %v744_v30  ;;  %v619_v60 = vadd.f32 %v1642_v21, %v1858_v38  ;;  %v747_v0 = vadd.f32 %v1674_v22, %v1858_v38 }
 0x108   : > { %vm826_vm15 = vcmp.ge.f32.partialorder %v608_v34, 0.0  ;;  %v1677_v45 = vpop.f32.mrb[16].mxu1  ;;  %v1534_v46 = vpack.c.bf16 %v951_v42, %v951_v42  ;;  %v983_v47 = vsel %vm855_vm12, %v723_v28, %v919_v40  ;;  %v956_v48 = vsel %vm828_vm13, %v616_v29, %v892_v41  ;;  %v623_v50 = vpop.f32.mrb[17].mxu0 }
 0x109   : > { %v890_v49 = vmul.f32 0.2, %v608_v34  ;;  %v751_v51 = vpop.f32.mrb[17].mxu1  ;;  %v1566_v52 = vpack.c.bf16 %v983_v47, %v983_v47  ;;  %v1539_v53 = vpack.c.bf16 %v956_v48, %v956_v48  ;;  %v988_v54 = vsel %vm860_vm14, %v744_v30, %v924_v43  ;;  %v1646_v55 = vpop.f32.mrb[18].mxu0 }
 0x10a   : > { %vm858_vm0 = vcmp.ge.f32.partialorder %v736_v35, 0.0  ;;  %v1678_v56 = vpop.f32.mrb[18].mxu1  ;;  %1272 = vst.msk [vmem:[%s1870_s27 + $0x24] sm:$0xf] %vm1262_vm3, %v1534_v46  ;;  %v1571_v57 = vpack.c.bf16 %v988_v54, %v988_v54  ;;  %v922_v59 = vmul.f32 0.2, %v736_v35  ;;  %v611_v1 = vadd.f32 %v1858_v38, %v610_v26 }
 0x10b   : > { %v954_v58 = vsel %vm826_vm15, %v608_v34, %v890_v49  ;;  %v626_v61 = vpop.f32.mrb[19].mxu0  ;;  %v1945_v62 = vpop.f32.mrb[19].mxu1  ;;  %1304 = vst.msk [vmem:[%s1870_s27 + $0xa4] sm:$0xf] %vm1262_vm3, %v1566_v52  ;;  %1277 = vst.msk [vmem:[%s1870_s27 + $0x38] sm:$0xf] %vm1262_vm3, %v1539_v53  ;;  %v739_v2 = vadd.f32 %v1858_v38, %v738_v31  ;;  %v632_v5 = vadd.f32 %v1645_v44, %v1858_v38 }
 0x10c   : > { %v1537_v63 = vpack.c.bf16 %v954_v58, %v954_v58  ;;  %1309 = vst.msk [vmem:[%s1870_s27 + $0xb8] sm:$0xf] %vm1262_vm3, %v1571_v57  ;;  %v986_v3 = vsel %vm858_vm0, %v736_v35, %v922_v59  ;;  %vm829_vm1 = vcmp.ge.f32.partialorder %v619_v60, 0.0  ;;  %v893_v4 = vmul.f32 0.2, %v619_v60 }
 0x10d   : > { %v1569_v6 = vpack.c.bf16 %v986_v3, %v986_v3  ;;  %vm861_vm2 = vcmp.ge.f32.partialorder %v747_v0, 0.0  ;;  %v925_v7 = vmul.f32 0.2, %v747_v0  ;;  %vm827_vm4 = vcmp.ge.f32.partialorder %v611_v1, 0.0  ;;  %v1649_v11 = vpop.f32.mrb[20].mxu0 }
 0x10e   : > { %1275 = vst.msk [vmem:[%s1870_s27 + $0x30] sm:$0xf] %vm1262_vm3, %v1537_v63  ;;  %v957_v8 = vsel %vm829_vm1, %v619_v60, %v893_v4  ;;  %v891_v9 = vmul.f32 0.2, %v611_v1  ;;  %vm859_vm5 = vcmp.ge.f32.partialorder %v739_v2, 0.0  ;;  %vm832_vm6 = vcmp.ge.f32.partialorder %v632_v5, 0.0 }
 0x10f   : > { %v923_v10 = vmul.f32 0.2, %v739_v2  ;;  %1307 = vst.msk [vmem:[%s1870_s27 + $0xb0] sm:$0xf] %vm1262_vm3, %v1569_v6  ;;  %v1540_v12 = vpack.c.bf16 %v957_v8, %v957_v8  ;;  %v989_v13 = vsel %vm861_vm2, %v747_v0, %v925_v7  ;;  %v896_v14 = vmul.f32 0.2, %v632_v5 }
 0x110   : > { %v1681_v15 = vpop.f32.mrb[20].mxu1  ;;  %v639_v16 = vpop.f32.mrb[21].mxu0  ;;  %v1572_v17 = vpack.c.bf16 %v989_v13, %v989_v13  ;;  %v955_v18 = vsel %vm827_vm4, %v611_v1, %v891_v9  ;;  %v760_v20 = vadd.f32 %v1677_v45, %v1858_v38  ;;  %v624_v26 = vadd.f32 %v1858_v38, %v623_v50 }
 0x111   : > { %v987_v19 = vsel %vm859_vm5, %v739_v2, %v923_v10  ;;  %v1963_v21 = vpop.f32.mrb[21].mxu1  ;;  %v1965_v22 = vpop.f32.mrb[22].mxu0  ;;  %1278 = vst.msk [vmem:[%s1870_s27 + $0x3c] sm:$0xf] %vm1262_vm3, %v1540_v12  ;;  %v1538_v23 = vpack.c.bf16 %v955_v18, %v955_v18  ;;  %v960_v25 = vsel %vm832_vm6, %v632_v5, %v896_v14  ;;  %v752_v31 = vadd.f32 %v1858_v38, %v751_v51 }
 0x112   : > { %v1570_v24 = vpack.c.bf16 %v987_v19, %v987_v19  ;;  %v1970_v27 = vpop.f32.mrb[22].mxu1  ;;  %v1972_v28 = vpop.f32.mrb[23].mxu0  ;;  %1310 = vst.msk [vmem:[%s1870_s27 + $0xbc] sm:$0xf] %vm1262_vm3, %v1572_v17  ;;  %v1543_v29 = vpack.c.bf16 %v960_v25, %v960_v25  ;;  %vm864_vm7 = vcmp.ge.f32.partialorder %v760_v20, 0.0  ;;  %vm830_vm8 = vcmp.ge.f32.partialorder %v624_v26, 0.0 }
 0x113   : > { %v928_v30 = vmul.f32 0.2, %v760_v20  ;;  %v1977_v32 = vpop.f32.mrb[23].mxu1  ;;  %1276 = vst.msk [vmem:[%s1870_s27 + $0x34] sm:$0xf] %vm1262_vm3, %v1538_v23  ;;  %v635_v34 = vadd.f32 %v1646_v55, %v1858_v38  ;;  %v763_v35 = vadd.f32 %v1678_v56, %v1858_v38  ;;  %vm862_vm9 = vcmp.ge.f32.partialorder %v752_v31, 0.0 }
 0x114   : > { %1308 = vst.msk [vmem:[%s1870_s27 + $0xb4] sm:$0xf] %vm1262_vm3, %v1570_v24  ;;  %v894_v33 = vmul.f32 0.2, %v624_v26  ;;  %1281 = vst.msk [vmem:[%s1870_s27 + $0x48] sm:$0xf] %vm1262_vm3, %v1543_v29  ;;  %v627_v39 = vadd.f32 %v1858_v38, %v626_v61  ;;  %v755_v54 = vadd.f32 %v1858_v38, %v1945_v62  ;;  %v648_v55 = vadd.f32 %v1649_v11, %v1858_v38 }
 0x115   : > { %v992_v36 = vsel %vm864_vm7, %v760_v20, %v928_v30  ;;  %v926_v37 = vmul.f32 0.2, %v752_v31  ;;  %vm833_vm10 = vcmp.ge.f32.partialorder %v635_v34, 0.0  ;;  %v897_v42 = vmul.f32 0.2, %v635_v34  ;;  %v1988_v46 = vpop.f32.mrb[24].mxu0 }
 0x116   : > { %v1575_v40 = vpack.c.bf16 %v992_v36, %v992_v36  ;;  %v958_v41 = vsel %vm830_vm8, %v624_v26, %v894_v33  ;;  %vm865_vm11 = vcmp.ge.f32.partialorder %v763_v35, 0.0  ;;  %v929_v45 = vmul.f32 0.2, %v763_v35  ;;  %v1685_v50 = vpop.f32.mrb[24].mxu1  ;;  %v1992_v51 = vpop.f32.mrb[25].mxu0 }
 0x117   : > { %v1541_v43 = vpack.c.bf16 %v958_v41, %v958_v41  ;;  %v990_v44 = vsel %vm862_vm9, %v752_v31, %v926_v37  ;;  %v961_v48 = vsel %vm833_vm10, %v635_v34, %v897_v42  ;;  %vm831_vm12 = vcmp.ge.f32.partialorder %v627_v39, 0.0  ;;  %v1999_v56 = vpop.f32.mrb[25].mxu1  ;;  %v2001_v57 = vpop.f32.mrb[26].mxu0 }
 0x118   : > { %1313 = vst.msk [vmem:[%s1870_s27 + $0xc8] sm:$0xf] %vm1262_vm3, %v1575_v40  ;;  %v1573_v47 = vpack.c.bf16 %v990_v44, %v990_v44  ;;  %v895_v49 = vmul.f32 0.2, %v627_v39  ;;  %v1544_v52 = vpack.c.bf16 %v961_v48, %v961_v48  ;;  %v993_v53 = vsel %vm865_vm11, %v763_v35, %v929_v45  ;;  %v2007_v63 = vpop.f32.mrb[26].mxu1  ;;  %v2009_v0 = vpop.f32.mrb[27].mxu0 }
 0x119   : > { %1279 = vst.msk [vmem:[%s1870_s27 + $0x40] sm:$0xf] %vm1262_vm3, %v1541_v43  ;;  %v1576_v58 = vpack.c.bf16 %v993_v53, %v993_v53  ;;  %v776_v60 = vadd.f32 %v1681_v15, %v1858_v38  ;;  %v640_v61 = vadd.f32 %v1858_v38, %v639_v16  ;;  %vm863_vm13 = vcmp.ge.f32.partialorder %v755_v54, 0.0  ;;  %v2013_v2 = vpop.f32.mrb[27].mxu1 }
 0x11a   : > { %1311 = vst.msk [vmem:[%s1870_s27 + $0xc0] sm:$0xf] %vm1262_vm3, %v1573_v47  ;;  %v959_v59 = vsel %vm831_vm12, %v627_v39, %v895_v49  ;;  %1282 = vst.msk [vmem:[%s1870_s27 + $0x4c] sm:$0xf] %vm1262_vm3, %v1544_v52  ;;  %v927_v1 = vmul.f32 0.2, %v755_v54  ;;  %v768_v7 = vadd.f32 %v1858_v38, %v1963_v21  ;;  %v651_v8 = vadd.f32 %v1965_v22, %v1858_v38 }
 0x11b   : > { %v1542_v62 = vpack.c.bf16 %v959_v59, %v959_v59  ;;  %vm836_vm14 = vcmp.ge.f32.partialorder %v648_v55, 0.0  ;;  %1314 = vst.msk [vmem:[%s1870_s27 + $0xcc] sm:$0xf] %vm1262_vm3, %v1576_v58  ;;  %v900_v3 = vmul.f32 0.2, %v648_v55  ;;  %vm868_vm15 = vcmp.ge.f32.partialorder %v776_v60, 0.0 }
 0x11c   : > { %v932_v4 = vmul.f32 0.2, %v776_v60  ;;  %vm834_vm0 = vcmp.ge.f32.partialorder %v640_v61, 0.0  ;;  %v991_v5 = vsel %vm863_vm13, %v755_v54, %v927_v1  ;;  %v898_v6 = vmul.f32 0.2, %v640_v61 }
 0x11d   : > { %1280 = vst.msk [vmem:[%s1870_s27 + $0x44] sm:$0xf] %vm1262_vm3, %v1542_v62  ;;  %v1574_v9 = vpack.c.bf16 %v991_v5, %v991_v5  ;;  %v964_v10 = vsel %vm836_vm14, %v648_v55, %v900_v3  ;;  %v779_v12 = vadd.f32 %v1970_v27, %v1858_v38  ;;  %vm866_vm1 = vcmp.ge.f32.partialorder %v768_v7, 0.0  ;;  %v1657_v16 = vpop.f32.mrb[28].mxu0 }
 0x11e   : > { %v996_v11 = vsel %vm868_vm15, %v776_v60, %v932_v4  ;;  %v1547_v13 = vpack.c.bf16 %v964_v10, %v964_v10  ;;  %v962_v15 = vsel %vm834_vm0, %v640_v61, %v898_v6  ;;  %v930_v18 = vmul.f32 0.2, %v768_v7  ;;  %v2027_v20 = vpop.f32.mrb[28].mxu1  ;;  %v2037_v24 = vpop.f32.mrb[29].mxu0 }
 0x11f   : > { %v1579_v14 = vpack.c.bf16 %v996_v11, %v996_v11  ;;  %1312 = vst.msk [vmem:[%s1870_s27 + $0xc4] sm:$0xf] %vm1262_vm3, %v1574_v9  ;;  %v1545_v17 = vpack.c.bf16 %v962_v15, %v962_v15  ;;  %vm837_vm2 = vcmp.ge.f32.partialorder %v651_v8, 0.0  ;;  %v901_v19 = vmul.f32 0.2, %v651_v8  ;;  %v2039_v25 = vpop.f32.mrb[29].mxu1 }
 0x120   : > { %1285 = vst.msk [vmem:[%s1870_s27 + $0x58] sm:$0xf] %vm1262_vm3, %v1547_v13  ;;  %vm869_vm4 = vcmp.ge.f32.partialorder %v779_v12, 0.0  ;;  %v933_v21 = vmul.f32 0.2, %v779_v12  ;;  %v643_v22 = vadd.f32 %v1858_v38, %v1972_v28  ;;  %v771_v23 = vadd.f32 %v1858_v38, %v1977_v32  ;;  %v2047_v28 = vpop.f32.mrb[30].mxu0 }
 0x121   : > { %1317 = vst.msk [vmem:[%s1870_s27 + $0xd8] sm:$0xf] %vm1262_vm3, %v1579_v14  ;;  %1283 = vst.msk [vmem:[%s1870_s27 + $0x50] sm:$0xf] %vm1262_vm3, %v1545_v17  ;;  %v994_v26 = vsel %vm866_vm1, %v768_v7, %v930_v18  ;;  %v965_v27 = vsel %vm837_vm2, %v651_v8, %v901_v19  ;;  %v664_v29 = vadd.f32 %v1988_v46, %v1858_v38  ;;  %v2049_v31 = vpop.f32.mrb[30].mxu1  ;;  %v2051_v35 = vpop.f32.mrb[31].mxu0 }
 0x122   : > { %v792_v30 = vadd.f32 %v1685_v50, %v1858_v38  ;;  %v1577_v32 = vpack.c.bf16 %v994_v26, %v994_v26  ;;  %v1548_v33 = vpack.c.bf16 %v965_v27, %v965_v27  ;;  %v997_v34 = vsel %vm869_vm4, %v779_v12, %v933_v21  ;;  %v2053_v36 = vpop.f32.mrb[31].mxu1 }
 0x123   : > { %vm835_vm5 = vcmp.ge.f32.partialorder %v643_v22, 0.0  ;;  %v1580_v37 = vpack.c.bf16 %v997_v34, %v997_v34  ;;  %v899_v39 = vmul.f32 0.2, %v643_v22  ;;  %vm867_vm6 = vcmp.ge.f32.partialorder %v771_v23, 0.0 }
 0x124   : > { %v931_v40 = vmul.f32 0.2, %v771_v23  ;;  %1315 = vst.msk [vmem:[%s1870_s27 + $0xd0] sm:$0xf] %vm1262_vm3, %v1577_v32  ;;  %1286 = vst.msk [vmem:[%s1870_s27 + $0x5c] sm:$0xf] %vm1262_vm3, %v1548_v33  ;;  %v656_v45 = vadd.f32 %v1858_v38, %v1992_v51  ;;  %v784_v46 = vadd.f32 %v1858_v38, %v1999_v56  ;;  %v667_v51 = vadd.f32 %v2001_v57, %v1858_v38 }
 0x125   : > { %vm840_vm7 = vcmp.ge.f32.partialorder %v664_v29, 0.0  ;;  %v904_v41 = vmul.f32 0.2, %v664_v29  ;;  %vm872_vm8 = vcmp.ge.f32.partialorder %v792_v30, 0.0  ;;  %v936_v42 = vmul.f32 0.2, %v792_v30 }
 0x126   : > { %1318 = vst.msk [vmem:[%s1870_s27 + $0xdc] sm:$0xf] %vm1262_vm3, %v1580_v37  ;;  %v963_v43 = vsel %vm835_vm5, %v643_v22, %v899_v39  ;;  %v995_v44 = vsel %vm867_vm6, %v771_v23, %v931_v40  ;;  %vm838_vm9 = vcmp.ge.f32.partialorder %v656_v45, 0.0  ;;  %v902_v54 = vmul.f32 0.2, %v656_v45 }
 0x127   : > { %v1546_v47 = vpack.c.bf16 %v963_v43, %v963_v43  ;;  %v1578_v48 = vpack.c.bf16 %v995_v44, %v995_v44  ;;  %v968_v49 = vsel %vm840_vm7, %v664_v29, %v904_v41  ;;  %v1000_v50 = vsel %vm872_vm8, %v792_v30, %v936_v42 }
 0x128   : > { %v1551_v52 = vpack.c.bf16 %v968_v49, %v968_v49  ;;  %v1583_v53 = vpack.c.bf16 %v1000_v50, %v1000_v50  ;;  %vm870_vm10 = vcmp.ge.f32.partialorder %v784_v46, 0.0  ;;  %v934_v55 = vmul.f32 0.2, %v784_v46 }
 0x129   : > { %1284 = vst.msk [vmem:[%s1870_s27 + $0x54] sm:$0xf] %vm1262_vm3, %v1546_v47  ;;  %1316 = vst.msk [vmem:[%s1870_s27 + $0xd4] sm:$0xf] %vm1262_vm3, %v1578_v48  ;;  %v795_v56 = vadd.f32 %v2007_v63, %v1858_v38  ;;  %v966_v58 = vsel %vm838_vm9, %v656_v45, %v902_v54  ;;  %v659_v59 = vadd.f32 %v1858_v38, %v2009_v0  ;;  %vm841_vm11 = vcmp.ge.f32.partialorder %v667_v51, 0.0 }
 0x12a   : > { %1289 = vst.msk [vmem:[%s1870_s27 + $0x68] sm:$0xf] %vm1262_vm3, %v1551_v52  ;;  %1321 = vst.msk [vmem:[%s1870_s27 + $0xe8] sm:$0xf] %vm1262_vm3, %v1583_v53  ;;  %v787_v60 = vadd.f32 %v1858_v38, %v2013_v2  ;;  %v680_v61 = vadd.f32 %v1657_v16, %v1858_v38  ;;  %v1549_v62 = vpack.c.bf16 %v966_v58, %v966_v58  ;;  %v905_v1 = vmul.f32 0.2, %v667_v51 }
 0x12b   : > { %v998_v57 = vsel %vm870_vm10, %v784_v46, %v934_v55  ;;  %vm873_vm12 = vcmp.ge.f32.partialorder %v795_v56, 0.0  ;;  %v937_v63 = vmul.f32 0.2, %v795_v56  ;;  %vm839_vm13 = vcmp.ge.f32.partialorder %v659_v59, 0.0 }
 0x12c   : > { %v1581_v3 = vpack.c.bf16 %v998_v57, %v998_v57  ;;  %1287 = vst.msk [vmem:[%s1870_s27 + $0x60] sm:$0xf] %vm1262_vm3, %v1549_v62  ;;  %v969_v4 = vsel %vm841_vm11, %v667_v51, %v905_v1  ;;  %v903_v5 = vmul.f32 0.2, %v659_v59  ;;  %vm871_vm14 = vcmp.ge.f32.partialorder %v787_v60, 0.0 }
 0x12d   : > { %v935_v0 = vmul.f32 0.2, %v787_v60  ;;  %v1552_v2 = vpack.c.bf16 %v969_v4, %v969_v4  ;;  %v1001_v6 = vsel %vm873_vm12, %v795_v56, %v937_v63  ;;  %vm844_vm15 = vcmp.ge.f32.partialorder %v680_v61, 0.0 }
 0x12e   : > { %1319 = vst.msk [vmem:[%s1870_s27 + $0xe0] sm:$0xf] %vm1262_vm3, %v1581_v3  ;;  %v908_v7 = vmul.f32 0.2, %v680_v61  ;;  %v1584_v8 = vpack.c.bf16 %v1001_v6, %v1001_v6  ;;  %v967_v9 = vsel %vm839_vm13, %v659_v59, %v903_v5  ;;  %v808_v11 = vadd.f32 %v2027_v20, %v1858_v38 }
 0x12f   : > { %v999_v10 = vsel %vm871_vm14, %v787_v60, %v935_v0  ;;  %1290 = vst.msk [vmem:[%s1870_s27 + $0x6c] sm:$0xf] %vm1262_vm3, %v1552_v2  ;;  %v1550_v12 = vpack.c.bf16 %v967_v9, %v967_v9  ;;  %v672_v15 = vadd.f32 %v1858_v38, %v2037_v24  ;;  %v800_v18 = vadd.f32 %v1858_v38, %v2039_v25 }
 0x130   : > { %v1582_v13 = vpack.c.bf16 %v999_v10, %v999_v10  ;;  %v972_v14 = vsel %vm844_vm15, %v680_v61, %v908_v7  ;;  %1322 = vst.msk [vmem:[%s1870_s27 + $0xec] sm:$0xf] %vm1262_vm3, %v1584_v8  ;;  %vm876_vm0 = vcmp.ge.f32.partialorder %v808_v11, 0.0  ;;  %v940_v17 = vmul.f32 0.2, %v808_v11 }
 0x131   : > { %v1555_v16 = vpack.c.bf16 %v972_v14, %v972_v14  ;;  %1288 = vst.msk [vmem:[%s1870_s27 + $0x64] sm:$0xf] %vm1262_vm3, %v1550_v12  ;;  %vm842_vm1 = vcmp.ge.f32.partialorder %v672_v15, 0.0  ;;  %v906_v19 = vmul.f32 0.2, %v672_v15  ;;  %v683_v20 = vadd.f32 %v2047_v28, %v1858_v38 }
 0x132   : > { %1320 = vst.msk [vmem:[%s1870_s27 + $0xe4] sm:$0xf] %vm1262_vm3, %v1582_v13  ;;  %v811_v21 = vadd.f32 %v2049_v31, %v1858_v38  ;;  %v1004_v22 = vsel %vm876_vm0, %v808_v11, %v940_v17  ;;  %vm874_vm2 = vcmp.ge.f32.partialorder %v800_v18, 0.0  ;;  %v938_v23 = vmul.f32 0.2, %v800_v18 }
 0x133   : > { %1293 = vst.msk [vmem:[%s1870_s27 + $0x78] sm:$0xf] %vm1262_vm3, %v1555_v16  ;;  %v675_v24 = vadd.f32 %v1858_v38, %v2051_v35  ;;  %v1587_v25 = vpack.c.bf16 %v1004_v22, %v1004_v22  ;;  %v970_v26 = vsel %vm842_vm1, %v672_v15, %v906_v19  ;;  %vm845_vm4 = vcmp.ge.f32.partialorder %v683_v20, 0.0 }
 0x134   : > { %v909_v27 = vmul.f32 0.2, %v683_v20  ;;  %v1553_v29 = vpack.c.bf16 %v970_v26, %v970_v26  ;;  %v1002_v30 = vsel %vm874_vm2, %v800_v18, %v938_v23  ;;  %vm877_vm5 = vcmp.ge.f32.partialorder %v811_v21, 0.0 }
 0x135   : > { %v941_v28 = vmul.f32 0.2, %v811_v21  ;;  %1325 = vst.msk [vmem:[%s1870_s27 + $0xf8] sm:$0xf] %vm1262_vm3, %v1587_v25  ;;  %v1585_v31 = vpack.c.bf16 %v1002_v30, %v1002_v30  ;;  %vm843_vm6 = vcmp.ge.f32.partialorder %v675_v24, 0.0  ;;  %v803_v37 = vadd.f32 %v1858_v38, %v2053_v36 }
 0x136   : > { %v973_v32 = vsel %vm845_vm4, %v683_v20, %v909_v27  ;;  %v907_v33 = vmul.f32 0.2, %v675_v24  ;;  %1291 = vst.msk [vmem:[%s1870_s27 + $0x70] sm:$0xf] %vm1262_vm3, %v1553_v29 }
 0x137   : > { %v1556_v34 = vpack.c.bf16 %v973_v32, %v973_v32  ;;  %v1005_v35 = vsel %vm877_vm5, %v811_v21, %v941_v28  ;;  %1323 = vst.msk [vmem:[%s1870_s27 + $0xf0] sm:$0xf] %vm1262_vm3, %v1585_v31  ;;  %vm875_vm7 = vcmp.ge.f32.partialorder %v803_v37, 0.0  ;;  %v939_v42 = vmul.f32 0.2, %v803_v37 }
 0x138   : > { %v1588_v39 = vpack.c.bf16 %v1005_v35, %v1005_v35  ;;  %v971_v40 = vsel %vm843_vm6, %v675_v24, %v907_v33 }
 0x139   : > { %1294 = vst.msk [vmem:[%s1870_s27 + $0x7c] sm:$0xf] %vm1262_vm3, %v1556_v34  ;;  %v1554_v41 = vpack.c.bf16 %v971_v40, %v971_v40  ;;  %v1003_v43 = vsel %vm875_vm7, %v803_v37, %v939_v42 }
 0x13a   : > { %1326 = vst.msk [vmem:[%s1870_s27 + $0xfc] sm:$0xf] %vm1262_vm3, %v1588_v39  ;;  %v1586_v44 = vpack.c.bf16 %v1003_v43, %v1003_v43 }
 0x13b   : > { %1292 = vst.msk [vmem:[%s1870_s27 + $0x74] sm:$0xf] %vm1262_vm3, %v1554_v41 }
 0x13c   : > { %1324 = vst.msk [vmem:[%s1870_s27 + $0xf4] sm:$0xf] %vm1262_vm3, %v1586_v44 }
 0x13d PF: > { %s13_s12 = sadd.s32 1, %s1744_s12  }
 0x13e   : > { %p10_p4 = scmp.ge.s32.totalorder %s13_s12, 10  }
 0x140   :  { %12 = sbr.rel (!%p10_p4) target bundleno = 1 (0x1), region = 62 }

// kernel: _lambda_.13
= control target key start
LH: loop header
LB: loop body
LE: loop exit
PB: predicated region body
PF: predicated region fallthrough
CT: control target
= control target key end

     0   :  { %s2244_s18 = smov 0   ;;  %s2952_s0 = inlined_call_operand.vmem [shape: bf16[1024,144], index: 0, kind: input, shape index: {}]   ;;  %s2953_s1 = inlined_call_operand.vmem [shape: bf16[144,16], index: 1, kind: input, shape index: {}]   ;;  %s2954_s2 = inlined_call_operand.vmem [shape: f32[1,16], index: 2, kind: input, shape index: {}]   ;;  %s2955_s3 = inlined_call_operand.vmem [shape: bf16[1024,16], index: 3, kind: output, shape index: {0}]   ;;  %s2956_s4 = inlined_call_operand.vmem [shape: f32[2,1,16], index: 4, kind: output, shape index: {1}]   ;;  %s2957_s5 = inlined_call_operand.vmem [shape: f32[2,1,16], index: 5, kind: output, shape index: {2}]  }
   0x1 LB: > { %s2250_s19 = sadd.s32 4294967295, %s2211_s18   ;;  %p1830_p0 = scmp.ge.s32.totalorder %s2211_s18, 1  ;;  %s2211_s18 = sphi %s2244_s18, %s16_s18  }
   0x2   : > { %p194_p1 = scmp.lt.s32.totalorder %s2211_s18, 3 }
   0x4   : > { %p195_p2 = pnand %p1830_p0, %p194_p1 }
   0x5   : > { %v2100_v0 = vld [vmem:[%s2953_s1] sm:$0xff] (!%p195_p2)   ;;  %v2213_v1 = vmov (!%p195_p2), 0   ;;  %s1831_s22 = sshll.u32 (!%p195_p2), %s2250_s19, 6  ;;  %v2101_v2 = vld [vmem:[%s2953_s1 + $0x8] sm:$0xff] (!%p195_p2)   ;;  %v2102_v3 = vld [vmem:[%s2953_s1 + $0x10] sm:$0xff] (!%p195_p2)   ;;  %vm680_vm0 = vcmask (!%p195_p2), 130048  }
   0x6   : > { %198 = sbr.rel (%p195_p2) target bundleno = 460 (0x1cc), region = 32  ;;  %777 = vmatprep.subr.bf16.mxu0 (!%p195_p2), %v2213_v1  ;;  %2073 = vmatprep.subr.bf16.mxu1 (!%p195_p2), %v2213_v1  ;;  %p230_p3 = scmp.lt.s32.totalorder (!%p195_p2), %s1831_s22, 127  ;;  %v2103_v4 = vld [vmem:[%s2953_s1 + $0x18] sm:$0xff] (!%p195_p2)   ;;  %v2104_v6 = vld [vmem:[%s2953_s1 + $0x20] sm:$0xff] (!%p195_p2)   ;;  %v2105_v7 = vld [vmem:[%s2953_s1 + $0x28] sm:$0xff] (!%p195_p2)   ;;  %vm1322_vm1 = vcmask (!%p195_p2), 125952  }
   0x7   : > { %778 = vmatpush1.bf16.msra.mxu0 (!%p195_p2), %v2100_v0  ;;  %2082 = vmatpush1.bf16.msra.mxu1 (!%p195_p2), %v2100_v0  ;;  %v2106_v9 = vld [vmem:[%s2953_s1 + $0x30] sm:$0xff] (!%p195_p2)   ;;  %v2107_v10 = vld [vmem:[%s2953_s1 + $0x38] sm:$0xff] (!%p195_p2)   ;;  %v2108_v11 = vld [vmem:[%s2953_s1 + $0x40] sm:$0xff] (!%p195_p2)   ;;  %p242_p4 = scmp.lt.s32.totalorder (!%p195_p2), %s2250_s19, 1  ;;  %vm1520_vm2 = vcmask (!%p195_p2), 122880  }
   0x8   : > { %779 = vmatprep.subr.bf16.mxu0 (!%p195_p2), %v2213_v1  ;;  %2074 = vmatprep.subr.bf16.mxu1 (!%p195_p2), %v2213_v1 }
   0xb   : > { %780 = vmatpush1.bf16.msra.mxu0 (!%p195_p2), %v2101_v2  ;;  %2083 = vmatpush1.bf16.msra.mxu1 (!%p195_p2), %v2101_v2 }
   0xc   : > { %781 = vmatprep.subr.bf16.mxu0 (!%p195_p2), %v2213_v1  ;;  %2075 = vmatprep.subr.bf16.mxu1 (!%p195_p2), %v2213_v1 }
   0xd   : > { %s2959_s22 = smov (!%p230_p3, %s1831_s22), 127  ;;  %s2961_s19 = smov (!%p242_p4, %s2250_s19), 1 }
   0xe   : > { %s2008_s27 = sshll.u32 %s2959_s22, 3  ;;  %s1835_s23 = sshll.u32 %s2959_s22, 2 }
   0xf   : > { %s2270_s30 = scalar_lea.vmem %s2952_s0, %s2008_s27  ;;  %782 = vmatpush1.bf16.msra.mxu0 %v2102_v3  ;;  %2084 = vmatpush1.bf16.msra.mxu1 %v2102_v3  ;;  %s2399_s26 = scalar_lea.vmem %s2955_s3, %s1835_s23 }
  0x10   : > { %v2111_v5 = vld [vmem:[%s2270_s30 + $0x4] ss:$8 sps:$4 sm:$0xff]   ;;  %783 = vmatprep.subr.bf16.mxu0 %v2213_v1  ;;  %2076 = vmatprep.subr.bf16.mxu1 %v2213_v1  ;;  %v2109_v12 = vld [vmem:[%s2270_s30] ss:$8 sps:$4 sm:$0xff]   ;;  %v2112_v13 = vld [vmem:[%s2270_s30 + $0x14] ss:$8 sps:$4 sm:$0xff]   ;;  %s244_s28 = scalar_lea.vmem %s2956_s4, %s2961_s19  ;;  %s247_s6 = scalar_lea.vmem %s2957_s5, %s2961_s19 }
  0x11   : > { %1910 = vmatprep.mubr.msk.bf16.mxu0 %vm680_vm0, %v2111_v5  ;;  %v2135_v8 = vld [vmem:[%s2270_s30 + $0x104] ss:$8 sps:$4 sm:$0xff]   ;;  %v2133_v14 = vld [vmem:[%s2270_s30 + $0x100] ss:$8 sps:$4 sm:$0xff]   ;;  %v2139_v15 = vld [vmem:[%s2270_s30 + $0x114] ss:$8 sps:$4 sm:$0xff]  }
  0x12   : > { %1926 = vmatprep.mubr.msk.bf16.mxu1 %vm680_vm0, %v2135_v8  ;;  %v2114_v16 = vld [vmem:[%s2270_s30 + $0x10] ss:$8 sps:$4 sm:$0xff]   ;;  %v2115_v17 = vld [vmem:[%s2270_s30 + $0x24] ss:$8 sps:$4 sm:$0xff]   ;;  %v2117_v20 = vld [vmem:[%s2270_s30 + $0x20] ss:$8 sps:$4 sm:$0xff]  }
  0x13   : > { %784 = vmatpush1.bf16.msra.mxu0 %v2103_v4  ;;  %2085 = vmatpush1.bf16.msra.mxu1 %v2103_v4  ;;  %v2141_v18 = vld [vmem:[%s2270_s30 + $0x110] ss:$8 sps:$4 sm:$0xff]   ;;  %v2145_v19 = vld [vmem:[%s2270_s30 + $0x124] ss:$8 sps:$4 sm:$0xff]   ;;  %v2118_v21 = vld [vmem:[%s2270_s30 + $0x34] ss:$8 sps:$4 sm:$0xff]  }
  0x14   : > { %785 = vmatprep.subr.bf16.mxu0 %v2213_v1  ;;  %2077 = vmatprep.subr.bf16.mxu1 %v2213_v1  ;;  %v2147_v22 = vld [vmem:[%s2270_s30 + $0x120] ss:$8 sps:$4 sm:$0xff]   ;;  %v2151_v23 = vld [vmem:[%s2270_s30 + $0x134] ss:$8 sps:$4 sm:$0xff]   ;;  %v2120_v24 = vld [vmem:[%s2270_s30 + $0x30] ss:$8 sps:$4 sm:$0xff]  }
  0x15   : > { %v2153_v25 = vld [vmem:[%s2270_s30 + $0x130] ss:$8 sps:$4 sm:$0xff]   ;;  %v2121_v26 = vld [vmem:[%s2270_s30 + $0x44] ss:$8 sps:$4 sm:$0xff]   ;;  %v2123_v28 = vld [vmem:[%s2270_s30 + $0x40] ss:$8 sps:$4 sm:$0xff]  }
  0x16   : > { %v2157_v27 = vld [vmem:[%s2270_s30 + $0x144] ss:$8 sps:$4 sm:$0xff]   ;;  %v2159_v29 = vld [vmem:[%s2270_s30 + $0x140] ss:$8 sps:$4 sm:$0xff]   ;;  %v2124_v30 = vld [vmem:[%s2270_s30 + $0x54] ss:$8 sps:$4 sm:$0xff]  }
  0x17   : > { %786 = vmatpush1.bf16.msra.mxu0 %v2104_v6  ;;  %2086 = vmatpush1.bf16.msra.mxu1 %v2104_v6  ;;  %v2163_v31 = vld [vmem:[%s2270_s30 + $0x154] ss:$8 sps:$4 sm:$0xff]   ;;  %v2126_v32 = vld [vmem:[%s2270_s30 + $0x50] ss:$8 sps:$4 sm:$0xff]   ;;  %v2127_v34 = vld [vmem:[%s2270_s30 + $0x64] ss:$8 sps:$4 sm:$0xff]  }
  0x18   : > { %787 = vmatprep.subr.bf16.mxu0 %v2213_v1  ;;  %2078 = vmatprep.subr.bf16.mxu1 %v2213_v1  ;;  %v2165_v33 = vld [vmem:[%s2270_s30 + $0x150] ss:$8 sps:$4 sm:$0xff]   ;;  %v2169_v35 = vld [vmem:[%s2270_s30 + $0x164] ss:$8 sps:$4 sm:$0xff]   ;;  %v2129_v36 = vld [vmem:[%s2270_s30 + $0x60] ss:$8 sps:$4 sm:$0xff]  }
  0x19   : > { %v2171_v37 = vld [vmem:[%s2270_s30 + $0x160] ss:$8 sps:$4 sm:$0xff]   ;;  %v2130_v38 = vld [vmem:[%s2270_s30 + $0x74] ss:$8 sps:$4 sm:$0xff]   ;;  %v2132_v40 = vld [vmem:[%s2270_s30 + $0x70] ss:$8 sps:$4 sm:$0xff]  }
  0x1a   : > { %v2175_v39 = vld [vmem:[%s2270_s30 + $0x174] ss:$8 sps:$4 sm:$0xff]   ;;  %v2177_v41 = vld [vmem:[%s2270_s30 + $0x170] ss:$8 sps:$4 sm:$0xff]   ;;  %v2136_v42 = vld [vmem:[%s2270_s30 + $0x84] ss:$8 sps:$4 sm:$0xff]  }
  0x1b   : > { %788 = vmatpush1.bf16.msra.mxu0 %v2105_v7  ;;  %2087 = vmatpush1.bf16.msra.mxu1 %v2105_v7  ;;  %v2181_v43 = vld [vmem:[%s2270_s30 + $0x184] ss:$8 sps:$4 sm:$0xff]   ;;  %v2138_v44 = vld [vmem:[%s2270_s30 + $0x80] ss:$8 sps:$4 sm:$0xff]   ;;  %v2142_v46 = vld [vmem:[%s2270_s30 + $0x94] ss:$8 sps:$4 sm:$0xff]  }
  0x1c   : > { %789 = vmatprep.subr.bf16.mxu0 %v2213_v1  ;;  %2079 = vmatprep.subr.bf16.mxu1 %v2213_v1  ;;  %v2183_v45 = vld [vmem:[%s2270_s30 + $0x180] ss:$8 sps:$4 sm:$0xff]   ;;  %v2184_v47 = vld [vmem:[%s2270_s30 + $0x194] ss:$8 sps:$4 sm:$0xff]   ;;  %v2144_v48 = vld [vmem:[%s2270_s30 + $0x90] ss:$8 sps:$4 sm:$0xff]  }
  0x1d   : > { %v2186_v49 = vld [vmem:[%s2270_s30 + $0x190] ss:$8 sps:$4 sm:$0xff]   ;;  %v2148_v50 = vld [vmem:[%s2270_s30 + $0xa4] ss:$8 sps:$4 sm:$0xff]   ;;  %v2150_v52 = vld [vmem:[%s2270_s30 + $0xa0] ss:$8 sps:$4 sm:$0xff]  }
  0x1e   : > { %v2187_v51 = vld [vmem:[%s2270_s30 + $0x1a4] ss:$8 sps:$4 sm:$0xff]   ;;  %v2189_v53 = vld [vmem:[%s2270_s30 + $0x1a0] ss:$8 sps:$4 sm:$0xff]   ;;  %v2154_v54 = vld [vmem:[%s2270_s30 + $0xb4] ss:$8 sps:$4 sm:$0xff]  }
  0x1f   : > { %790 = vmatpush1.bf16.msra.mxu0 %v2106_v9  ;;  %2088 = vmatpush1.bf16.msra.mxu1 %v2106_v9  ;;  %v2190_v55 = vld [vmem:[%s2270_s30 + $0x1b4] ss:$8 sps:$4 sm:$0xff]   ;;  %v2156_v56 = vld [vmem:[%s2270_s30 + $0xb0] ss:$8 sps:$4 sm:$0xff]   ;;  %v2160_v58 = vld [vmem:[%s2270_s30 + $0xc4] ss:$8 sps:$4 sm:$0xff]  }
  0x20   : > { %791 = vmatprep.subr.bf16.mxu0 %v2213_v1  ;;  %2080 = vmatprep.subr.bf16.mxu1 %v2213_v1  ;;  %v2192_v57 = vld [vmem:[%s2270_s30 + $0x1b0] ss:$8 sps:$4 sm:$0xff]   ;;  %v2193_v59 = vld [vmem:[%s2270_s30 + $0x1c4] ss:$8 sps:$4 sm:$0xff]   ;;  %v2162_v60 = vld [vmem:[%s2270_s30 + $0xc0] ss:$8 sps:$4 sm:$0xff]  }
  0x21   : > { %v2195_v61 = vld [vmem:[%s2270_s30 + $0x1c0] ss:$8 sps:$4 sm:$0xff]   ;;  %v2166_v62 = vld [vmem:[%s2270_s30 + $0xd4] ss:$8 sps:$4 sm:$0xff]   ;;  %v2168_v0 = vld [vmem:[%s2270_s30 + $0xd0] ss:$8 sps:$4 sm:$0xff]  }
  0x22   : > { %v2196_v63 = vld [vmem:[%s2270_s30 + $0x1d4] ss:$8 sps:$4 sm:$0xff]   ;;  %v2172_v2 = vld [vmem:[%s2270_s30 + $0xe4] ss:$8 sps:$4 sm:$0xff]   ;;  %v2174_v4 = vld [vmem:[%s2270_s30 + $0xe0] ss:$8 sps:$4 sm:$0xff]  }
  0x23   : > { %792 = vmatpush1.bf16.msra.mxu0 %v2107_v10  ;;  %2089 = vmatpush1.bf16.msra.mxu1 %v2107_v10  ;;  %v2199_v3 = vld [vmem:[%s2270_s30 + $0x1e4] ss:$8 sps:$4 sm:$0xff]   ;;  %v2201_v5 = vld [vmem:[%s2270_s30 + $0x1e0] ss:$8 sps:$4 sm:$0xff]   ;;  %v2178_v6 = vld [vmem:[%s2270_s30 + $0xf4] ss:$8 sps:$4 sm:$0xff]  }
  0x24   : > { %793 = vmatprep.subr.bf16.mxu0 %v2213_v1  ;;  %2081 = vmatprep.subr.bf16.mxu1 %v2213_v1  ;;  %v2198_v1 = vld [vmem:[%s2270_s30 + $0x1d0] ss:$8 sps:$4 sm:$0xff]   ;;  %v2202_v7 = vld [vmem:[%s2270_s30 + $0x1f4] ss:$8 sps:$4 sm:$0xff]   ;;  %v2389_v10 = vld [vmem:[%s2954_s2] ss:$0 sm:$0xff] }
  0x25   : > { %v2180_v8 = vld [vmem:[%s2270_s30 + $0xf0] ss:$8 sps:$4 sm:$0xff]  }
  0x26   : > { %v2204_v9 = vld [vmem:[%s2270_s30 + $0x1f0] ss:$8 sps:$4 sm:$0xff]  }
  0x27   : > { %794 = vmatpush1.bf16.msra.mxu0 %v2108_v11  ;;  %2090 = vmatpush1.bf16.msra.mxu1 %v2108_v11 }
  0x2a   : > { %810 = vmatmul.mubr.bf16.vlgmr.msra.gmra.mrb[0].mxu0 %v2109_v12  ;;  %938 = vmatmul.mubr.bf16.vlgmr.msra.gmra.mrb[0].mxu1 %v2133_v14 }
  0x2b   : > { %1911 = vmatprep.mubr.msk.bf16.mxu0 %vm680_vm0, %v2112_v13  ;;  %1927 = vmatprep.mubr.msk.bf16.mxu1 %vm680_vm0, %v2139_v15 }
  0x32   : > { %818 = vmatmul.mubr.bf16.gmra.mrb[4].mxu0 %v2114_v16  ;;  %946 = vmatmul.mubr.bf16.gmra.mrb[4].mxu1 %v2141_v18 }
  0x33   : > { %1912 = vmatprep.mubr.msk.bf16.mxu0 %vm680_vm0, %v2115_v17  ;;  %1928 = vmatprep.mubr.msk.bf16.mxu1 %vm680_vm0, %v2145_v19 }
  0x3a   : > { %826 = vmatmul.mubr.bf16.gmra.mrb[8].mxu0 %v2117_v20  ;;  %954 = vmatmul.mubr.bf16.gmra.mrb[8].mxu1 %v2147_v22 }
  0x3b   : > { %1913 = vmatprep.mubr.msk.bf16.mxu0 %vm680_vm0, %v2118_v21  ;;  %1929 = vmatprep.mubr.msk.bf16.mxu1 %vm680_vm0, %v2151_v23 }
  0x42   : > { %834 = vmatmul.mubr.bf16.gmra.mrb[12].mxu0 %v2120_v24  ;;  %962 = vmatmul.mubr.bf16.gmra.mrb[12].mxu1 %v2153_v25 }
  0x43   : > { %1914 = vmatprep.mubr.msk.bf16.mxu0 %vm680_vm0, %v2121_v26  ;;  %1930 = vmatprep.mubr.msk.bf16.mxu1 %vm680_vm0, %v2157_v27 }
  0x4a   : > { %842 = vmatmul.mubr.bf16.gmra.mrb[16].mxu0 %v2123_v28  ;;  %970 = vmatmul.mubr.bf16.gmra.mrb[16].mxu1 %v2159_v29 }
  0x4b   : > { %1915 = vmatprep.mubr.msk.bf16.mxu0 %vm680_vm0, %v2124_v30  ;;  %1931 = vmatprep.mubr.msk.bf16.mxu1 %vm680_vm0, %v2163_v31 }
  0x52   : > { %850 = vmatmul.mubr.bf16.gmra.mrb[20].mxu0 %v2126_v32  ;;  %978 = vmatmul.mubr.bf16.gmra.mrb[20].mxu1 %v2165_v33 }
  0x53   : > { %1916 = vmatprep.mubr.msk.bf16.mxu0 %vm680_vm0, %v2127_v34  ;;  %1932 = vmatprep.mubr.msk.bf16.mxu1 %vm680_vm0, %v2169_v35 }
  0x5a   : > { %858 = vmatmul.mubr.bf16.gmra.mrb[24].mxu0 %v2129_v36  ;;  %986 = vmatmul.mubr.bf16.gmra.mrb[24].mxu1 %v2171_v37 }
  0x5b   : > { %1917 = vmatprep.mubr.msk.bf16.mxu0 %vm680_vm0, %v2130_v38  ;;  %1933 = vmatprep.mubr.msk.bf16.mxu1 %vm680_vm0, %v2175_v39 }
  0x62   : > { %866 = vmatmul.mubr.bf16.gmra.mrb[28].mxu0 %v2132_v40  ;;  %994 = vmatmul.mubr.bf16.gmra.mrb[28].mxu1 %v2177_v41 }
  0x63   : > { %1918 = vmatprep.mubr.msk.bf16.mxu0 %vm680_vm0, %v2136_v42  ;;  %1934 = vmatprep.mubr.msk.bf16.mxu1 %vm680_vm0, %v2181_v43 }
  0x6a   : > { %874 = vmatmul.mubr.bf16.gmra.mrb[32].mxu0 %v2138_v44  ;;  %1002 = vmatmul.mubr.bf16.gmra.mrb[32].mxu1 %v2183_v45 }
  0x6b   : > { %1919 = vmatprep.mubr.msk.bf16.mxu0 %vm680_vm0, %v2142_v46  ;;  %1935 = vmatprep.mubr.msk.bf16.mxu1 %vm680_vm0, %v2184_v47 }
  0x72   : > { %882 = vmatmul.mubr.bf16.gmra.mrb[36].mxu0 %v2144_v48  ;;  %1010 = vmatmul.mubr.bf16.gmra.mrb[36].mxu1 %v2186_v49 }
  0x73   : > { %1920 = vmatprep.mubr.msk.bf16.mxu0 %vm680_vm0, %v2148_v50  ;;  %1936 = vmatprep.mubr.msk.bf16.mxu1 %vm680_vm0, %v2187_v51 }
  0x7a   : > { %890 = vmatmul.mubr.bf16.gmra.mrb[40].mxu0 %v2150_v52  ;;  %1018 = vmatmul.mubr.bf16.gmra.mrb[40].mxu1 %v2189_v53 }
  0x7b   : > { %1921 = vmatprep.mubr.msk.bf16.mxu0 %vm680_vm0, %v2154_v54  ;;  %1937 = vmatprep.mubr.msk.bf16.mxu1 %vm680_vm0, %v2190_v55 }
  0x82   : > { %898 = vmatmul.mubr.bf16.gmra.mrb[44].mxu0 %v2156_v56  ;;  %1026 = vmatmul.mubr.bf16.gmra.mrb[44].mxu1 %v2192_v57 }
  0x83   : > { %1922 = vmatprep.mubr.msk.bf16.mxu0 %vm680_vm0, %v2160_v58  ;;  %1938 = vmatprep.mubr.msk.bf16.mxu1 %vm680_vm0, %v2193_v59 }
  0x8a   : > { %906 = vmatmul.mubr.bf16.gmra.mrb[48].mxu0 %v2162_v60  ;;  %1034 = vmatmul.mubr.bf16.gmra.mrb[48].mxu1 %v2195_v61 }
  0x8b   : > { %1923 = vmatprep.mubr.msk.bf16.mxu0 %vm680_vm0, %v2166_v62  ;;  %1939 = vmatprep.mubr.msk.bf16.mxu1 %vm680_vm0, %v2196_v63 }
  0x92   : > { %914 = vmatmul.mubr.bf16.gmra.mrb[52].mxu0 %v2168_v0  ;;  %1042 = vmatmul.mubr.bf16.gmra.mrb[52].mxu1 %v2198_v1 }
  0x93   : > { %1924 = vmatprep.mubr.msk.bf16.mxu0 %vm680_vm0, %v2172_v2  ;;  %1940 = vmatprep.mubr.msk.bf16.mxu1 %vm680_vm0, %v2199_v3 }
  0x9a   : > { %922 = vmatmul.mubr.bf16.gmra.mrb[56].mxu0 %v2174_v4  ;;  %1050 = vmatmul.mubr.bf16.gmra.mrb[56].mxu1 %v2201_v5 }
  0x9b   : > { %1925 = vmatprep.mubr.msk.bf16.mxu0 %vm680_vm0, %v2178_v6  ;;  %1941 = vmatprep.mubr.msk.bf16.mxu1 %vm680_vm0, %v2202_v7 }
  0xa2   : > { %930 = vmatmul.mubr.bf16.gmra.mrb[60].mxu0 %v2180_v8  ;;  %1058 = vmatmul.mubr.bf16.gmra.mrb[60].mxu1 %v2204_v9 }
  0xfd   : > { %v811_v11 = vpop.f32.mrb[0].mxu0  ;;  %v939_v12 = vpop.f32.mrb[0].mxu1 }
  0xfe   : > { %v812_v13 = vadd.f32 %v2389_v10, %v811_v11  ;;  %v813_v14 = vpop.f32.mrb[1].mxu0  ;;  %v2394_v15 = vadd.f32 %v2389_v10, %v939_v12  ;;  %v941_v16 = vpop.f32.mrb[1].mxu1 }
  0xff   : > { %v814_v17 = vpop.f32.mrb[2].mxu0  ;;  %v942_v18 = vpop.f32.mrb[2].mxu1 }
 0x100   : > { %v2009_v19 = vpack.c.bf16 %v812_v13, %v812_v13  ;;  %v1522_v20 = vmul.f32 %v812_v13, %v812_v13  ;;  %v815_v21 = vadd.f32 %v2389_v10, %v814_v17  ;;  %v816_v22 = vpop.f32.mrb[3].mxu0  ;;  %v944_v23 = vpop.f32.mrb[3].mxu1  ;;  %v2041_v24 = vpack.c.bf16 %v2394_v15, %v2394_v15 }
 0x101   : > { %v2405_v25 = vadd.f32 %v2389_v10, %v942_v18  ;;  %v1387_v26 = vsel %vm680_vm0, %v812_v13, 0.0 }
 0x102   : > { %1323 = vst.msk [vmem:[%s2399_s26] sm:$0xf] %vm1322_vm1, %v2009_v19  ;;  %v2010_v27 = vpack.c.bf16 %v815_v21, %v815_v21  ;;  %v1388_v28 = vsel %vm680_vm0, %v815_v21, 0.0  ;;  %v1523_v29 = vmul.f32 %v815_v21, %v815_v21  ;;  %1355 = vst.msk [vmem:[%s2399_s26 + $0x80] sm:$0xf] %vm1322_vm1, %v2041_v24  ;;  %v1586_v32 = vsel %vm680_vm0, %v1522_v20, 0.0 }
 0x103   : > { %v1389_v30 = vadd.f32 %v1388_v28, %v1387_v26  ;;  %v2042_v31 = vpack.c.bf16 %v2405_v25, %v2405_v25 }
 0x104   : > { %1324 = vst.msk [vmem:[%s2399_s26 + $0x4] sm:$0xf] %vm1322_vm1, %v2010_v27  ;;  %v1587_v33 = vsel %vm680_vm0, %v1523_v29, 0.0 }
 0x105   : > { %v1588_v34 = vadd.f32 %v1587_v33, %v1586_v32  ;;  %v819_v35 = vpop.f32.mrb[4].mxu0  ;;  %1356 = vst.msk [vmem:[%s2399_s26 + $0x84] sm:$0xf] %vm1322_vm1, %v2042_v31  ;;  %v947_v36 = vpop.f32.mrb[4].mxu1 }
 0x106   : > { %v820_v37 = vadd.f32 %v2389_v10, %v819_v35  ;;  %v821_v38 = vpop.f32.mrb[5].mxu0  ;;  %v2423_v39 = vadd.f32 %v2389_v10, %v947_v36  ;;  %v949_v40 = vpop.f32.mrb[5].mxu1 }
 0x107   : > { %v822_v41 = vpop.f32.mrb[6].mxu0  ;;  %v950_v42 = vpop.f32.mrb[6].mxu1 }
 0x108   : > { %v2011_v43 = vpack.c.bf16 %v820_v37, %v820_v37  ;;  %v1390_v44 = vsel %vm680_vm0, %v820_v37, 0.0  ;;  %v1524_v45 = vmul.f32 %v820_v37, %v820_v37  ;;  %v823_v46 = vadd.f32 %v2389_v10, %v822_v41  ;;  %v824_v47 = vpop.f32.mrb[7].mxu0  ;;  %v952_v48 = vpop.f32.mrb[7].mxu1 }
 0x109   : > { %v1391_v49 = vadd.f32 %v1390_v44, %v1389_v30  ;;  %v2043_v50 = vpack.c.bf16 %v2423_v39, %v2423_v39  ;;  %v2436_v57 = vadd.f32 %v2389_v10, %v950_v42 }
 0x10a   : > { %1325 = vst.msk [vmem:[%s2399_s26 + $0x8] sm:$0xf] %vm1322_vm1, %v2011_v43  ;;  %v1589_v51 = vsel %vm680_vm0, %v1524_v45, 0.0  ;;  %v2012_v52 = vpack.c.bf16 %v823_v46, %v823_v46  ;;  %v1392_v53 = vsel %vm680_vm0, %v823_v46, 0.0  ;;  %v1525_v54 = vmul.f32 %v823_v46, %v823_v46 }
 0x10b   : > { %v1590_v55 = vadd.f32 %v1589_v51, %v1588_v34  ;;  %v1393_v56 = vadd.f32 %v1392_v53, %v1391_v49  ;;  %1357 = vst.msk [vmem:[%s2399_s26 + $0x88] sm:$0xf] %vm1322_vm1, %v2043_v50  ;;  %v2044_v61 = vpack.c.bf16 %v2436_v57, %v2436_v57 }
 0x10c   : > { %1326 = vst.msk [vmem:[%s2399_s26 + $0xc] sm:$0xf] %vm1322_vm1, %v2012_v52  ;;  %v1591_v58 = vsel %vm680_vm0, %v1525_v54, 0.0 }
 0x10d   : > { %v1592_v59 = vadd.f32 %v1591_v58, %v1590_v55  ;;  %v827_v60 = vpop.f32.mrb[8].mxu0  ;;  %v955_v62 = vpop.f32.mrb[8].mxu1  ;;  %1358 = vst.msk [vmem:[%s2399_s26 + $0x8c] sm:$0xf] %vm1322_vm1, %v2044_v61 }
 0x10e   : > { %v828_v63 = vadd.f32 %v2389_v10, %v827_v60  ;;  %v829_v0 = vpop.f32.mrb[9].mxu0  ;;  %v2445_v1 = vadd.f32 %v2389_v10, %v955_v62  ;;  %v957_v2 = vpop.f32.mrb[9].mxu1 }
 0x10f   : > { %v830_v3 = vpop.f32.mrb[10].mxu0  ;;  %v958_v4 = vpop.f32.mrb[10].mxu1 }
 0x110   : > { %v2013_v5 = vpack.c.bf16 %v828_v63, %v828_v63  ;;  %v1394_v6 = vsel %vm680_vm0, %v828_v63, 0.0  ;;  %v1526_v7 = vmul.f32 %v828_v63, %v828_v63  ;;  %v831_v8 = vadd.f32 %v2389_v10, %v830_v3  ;;  %v832_v9 = vpop.f32.mrb[11].mxu0  ;;  %v960_v11 = vpop.f32.mrb[11].mxu1 }
 0x111   : > { %v1395_v12 = vadd.f32 %v1394_v6, %v1393_v56  ;;  %v2045_v13 = vpack.c.bf16 %v2445_v1, %v2445_v1  ;;  %v2460_v21 = vadd.f32 %v2389_v10, %v958_v4 }
 0x112   : > { %1327 = vst.msk [vmem:[%s2399_s26 + $0x10] sm:$0xf] %vm1322_vm1, %v2013_v5  ;;  %v1593_v14 = vsel %vm680_vm0, %v1526_v7, 0.0  ;;  %v2014_v16 = vpack.c.bf16 %v831_v8, %v831_v8  ;;  %v1396_v17 = vsel %vm680_vm0, %v831_v8, 0.0  ;;  %v1527_v18 = vmul.f32 %v831_v8, %v831_v8 }
 0x113   : > { %v1594_v19 = vadd.f32 %v1593_v14, %v1592_v59  ;;  %v1397_v20 = vadd.f32 %v1396_v17, %v1395_v12  ;;  %1359 = vst.msk [vmem:[%s2399_s26 + $0x90] sm:$0xf] %vm1322_vm1, %v2045_v13  ;;  %v2046_v26 = vpack.c.bf16 %v2460_v21, %v2460_v21 }
 0x114   : > { %1328 = vst.msk [vmem:[%s2399_s26 + $0x14] sm:$0xf] %vm1322_vm1, %v2014_v16  ;;  %v1595_v22 = vsel %vm680_vm0, %v1527_v18, 0.0 }
 0x115   : > { %v1596_v23 = vadd.f32 %v1595_v22, %v1594_v19  ;;  %v835_v24 = vpop.f32.mrb[12].mxu0  ;;  %v963_v27 = vpop.f32.mrb[12].mxu1  ;;  %1360 = vst.msk [vmem:[%s2399_s26 + $0x94] sm:$0xf] %vm1322_vm1, %v2046_v26 }
 0x116   : > { %v836_v28 = vadd.f32 %v2389_v10, %v835_v24  ;;  %v837_v29 = vpop.f32.mrb[13].mxu0  ;;  %v2469_v30 = vadd.f32 %v2389_v10, %v963_v27  ;;  %v965_v31 = vpop.f32.mrb[13].mxu1 }
 0x117   : > { %v838_v32 = vpop.f32.mrb[14].mxu0  ;;  %v966_v33 = vpop.f32.mrb[14].mxu1 }
 0x118   : > { %v2015_v34 = vpack.c.bf16 %v836_v28, %v836_v28  ;;  %v1398_v35 = vsel %vm680_vm0, %v836_v28, 0.0  ;;  %v1528_v36 = vmul.f32 %v836_v28, %v836_v28  ;;  %v839_v37 = vadd.f32 %v2389_v10, %v838_v32  ;;  %v840_v38 = vpop.f32.mrb[15].mxu0  ;;  %v968_v40 = vpop.f32.mrb[15].mxu1 }
 0x119   : > { %v1399_v41 = vadd.f32 %v1398_v35, %v1397_v20  ;;  %v2047_v42 = vpack.c.bf16 %v2469_v30, %v2469_v30  ;;  %v2484_v49 = vadd.f32 %v2389_v10, %v966_v33 }
 0x11a   : > { %1329 = vst.msk [vmem:[%s2399_s26 + $0x18] sm:$0xf] %vm1322_vm1, %v2015_v34  ;;  %v1597_v43 = vsel %vm680_vm0, %v1528_v36, 0.0  ;;  %v2016_v44 = vpack.c.bf16 %v839_v37, %v839_v37  ;;  %v1400_v45 = vsel %vm680_vm0, %v839_v37, 0.0  ;;  %v1529_v46 = vmul.f32 %v839_v37, %v839_v37 }
 0x11b   : > { %v1598_v47 = vadd.f32 %v1597_v43, %v1596_v23  ;;  %v1401_v48 = vadd.f32 %v1400_v45, %v1399_v41  ;;  %1361 = vst.msk [vmem:[%s2399_s26 + $0x98] sm:$0xf] %vm1322_vm1, %v2047_v42  ;;  %v2048_v53 = vpack.c.bf16 %v2484_v49, %v2484_v49 }
 0x11c   : > { %1330 = vst.msk [vmem:[%s2399_s26 + $0x1c] sm:$0xf] %vm1322_vm1, %v2016_v44  ;;  %v1599_v50 = vsel %vm680_vm0, %v1529_v46, 0.0 }
 0x11d   : > { %v1600_v51 = vadd.f32 %v1599_v50, %v1598_v47  ;;  %v843_v52 = vpop.f32.mrb[16].mxu0  ;;  %v971_v54 = vpop.f32.mrb[16].mxu1  ;;  %1362 = vst.msk [vmem:[%s2399_s26 + $0x9c] sm:$0xf] %vm1322_vm1, %v2048_v53 }
 0x11e   : > { %v844_v55 = vadd.f32 %v2389_v10, %v843_v52  ;;  %v845_v56 = vpop.f32.mrb[17].mxu0  ;;  %v2493_v58 = vadd.f32 %v2389_v10, %v971_v54  ;;  %v973_v59 = vpop.f32.mrb[17].mxu1 }
 0x11f   : > { %v846_v60 = vpop.f32.mrb[18].mxu0  ;;  %v974_v61 = vpop.f32.mrb[18].mxu1 }
 0x120   : > { %v2017_v62 = vpack.c.bf16 %v844_v55, %v844_v55  ;;  %v1402_v63 = vsel %vm680_vm0, %v844_v55, 0.0  ;;  %v1530_v0 = vmul.f32 %v844_v55, %v844_v55  ;;  %v847_v2 = vadd.f32 %v2389_v10, %v846_v60  ;;  %v848_v3 = vpop.f32.mrb[19].mxu0  ;;  %v976_v4 = vpop.f32.mrb[19].mxu1 }
 0x121   : > { %v1403_v5 = vadd.f32 %v1402_v63, %v1401_v48  ;;  %v2049_v6 = vpack.c.bf16 %v2493_v58, %v2493_v58  ;;  %v2508_v14 = vadd.f32 %v2389_v10, %v974_v61 }
 0x122   : > { %1331 = vst.msk [vmem:[%s2399_s26 + $0x20] sm:$0xf] %vm1322_vm1, %v2017_v62  ;;  %v1601_v7 = vsel %vm680_vm0, %v1530_v0, 0.0  ;;  %v2018_v8 = vpack.c.bf16 %v847_v2, %v847_v2  ;;  %v1404_v9 = vsel %vm680_vm0, %v847_v2, 0.0  ;;  %v1531_v11 = vmul.f32 %v847_v2, %v847_v2 }
 0x123   : > { %v1602_v12 = vadd.f32 %v1601_v7, %v1600_v51  ;;  %v1405_v13 = vadd.f32 %v1404_v9, %v1403_v5  ;;  %1363 = vst.msk [vmem:[%s2399_s26 + $0xa0] sm:$0xf] %vm1322_vm1, %v2049_v6  ;;  %v2050_v19 = vpack.c.bf16 %v2508_v14, %v2508_v14 }
 0x124   : > { %1332 = vst.msk [vmem:[%s2399_s26 + $0x24] sm:$0xf] %vm1322_vm1, %v2018_v8  ;;  %v1603_v16 = vsel %vm680_vm0, %v1531_v11, 0.0 }
 0x125   : > { %v1604_v17 = vadd.f32 %v1603_v16, %v1602_v12  ;;  %v851_v18 = vpop.f32.mrb[20].mxu0  ;;  %v979_v20 = vpop.f32.mrb[20].mxu1  ;;  %1364 = vst.msk [vmem:[%s2399_s26 + $0xa4] sm:$0xf] %vm1322_vm1, %v2050_v19 }
 0x126   : > { %v852_v22 = vadd.f32 %v2389_v10, %v851_v18  ;;  %v853_v23 = vpop.f32.mrb[21].mxu0  ;;  %v2517_v24 = vadd.f32 %v2389_v10, %v979_v20  ;;  %v981_v26 = vpop.f32.mrb[21].mxu1 }
 0x127   : > { %v854_v27 = vpop.f32.mrb[22].mxu0  ;;  %v982_v28 = vpop.f32.mrb[22].mxu1 }
 0x128   : > { %v2019_v29 = vpack.c.bf16 %v852_v22, %v852_v22  ;;  %v1406_v31 = vsel %vm680_vm0, %v852_v22, 0.0  ;;  %v1532_v32 = vmul.f32 %v852_v22, %v852_v22  ;;  %v855_v33 = vadd.f32 %v2389_v10, %v854_v27  ;;  %v856_v34 = vpop.f32.mrb[23].mxu0  ;;  %v984_v35 = vpop.f32.mrb[23].mxu1 }
 0x129   : > { %v1407_v36 = vadd.f32 %v1406_v31, %v1405_v13  ;;  %v2051_v37 = vpack.c.bf16 %v2517_v24, %v2517_v24  ;;  %v2532_v45 = vadd.f32 %v2389_v10, %v982_v28 }
 0x12a   : > { %1333 = vst.msk [vmem:[%s2399_s26 + $0x28] sm:$0xf] %vm1322_vm1, %v2019_v29  ;;  %v1605_v38 = vsel %vm680_vm0, %v1532_v32, 0.0  ;;  %v2020_v40 = vpack.c.bf16 %v855_v33, %v855_v33  ;;  %v1408_v41 = vsel %vm680_vm0, %v855_v33, 0.0  ;;  %v1533_v42 = vmul.f32 %v855_v33, %v855_v33 }
 0x12b   : > { %v1606_v43 = vadd.f32 %v1605_v38, %v1604_v17  ;;  %v1409_v44 = vadd.f32 %v1408_v41, %v1407_v36  ;;  %1365 = vst.msk [vmem:[%s2399_s26 + $0xa8] sm:$0xf] %vm1322_vm1, %v2051_v37  ;;  %v2052_v50 = vpack.c.bf16 %v2532_v45, %v2532_v45 }
 0x12c   : > { %1334 = vst.msk [vmem:[%s2399_s26 + $0x2c] sm:$0xf] %vm1322_vm1, %v2020_v40  ;;  %v1607_v46 = vsel %vm680_vm0, %v1533_v42, 0.0 }
 0x12d   : > { %v1608_v47 = vadd.f32 %v1607_v46, %v1606_v43  ;;  %v859_v48 = vpop.f32.mrb[24].mxu0  ;;  %v987_v51 = vpop.f32.mrb[24].mxu1  ;;  %1366 = vst.msk [vmem:[%s2399_s26 + $0xac] sm:$0xf] %vm1322_vm1, %v2052_v50 }
 0x12e   : > { %v860_v52 = vadd.f32 %v2389_v10, %v859_v48  ;;  %v861_v53 = vpop.f32.mrb[25].mxu0  ;;  %v2541_v54 = vadd.f32 %v2389_v10, %v987_v51  ;;  %v989_v55 = vpop.f32.mrb[25].mxu1 }
 0x12f   : > { %v862_v56 = vpop.f32.mrb[26].mxu0  ;;  %v990_v59 = vpop.f32.mrb[26].mxu1 }
 0x130   : > { %v2021_v60 = vpack.c.bf16 %v860_v52, %v860_v52  ;;  %v1410_v61 = vsel %vm680_vm0, %v860_v52, 0.0  ;;  %v1534_v62 = vmul.f32 %v860_v52, %v860_v52  ;;  %v863_v63 = vadd.f32 %v2389_v10, %v862_v56  ;;  %v864_v0 = vpop.f32.mrb[27].mxu0  ;;  %v992_v2 = vpop.f32.mrb[27].mxu1 }
 0x131   : > { %v1411_v3 = vadd.f32 %v1410_v61, %v1409_v44  ;;  %v2053_v4 = vpack.c.bf16 %v2541_v54, %v2541_v54  ;;  %v2556_v12 = vadd.f32 %v2389_v10, %v990_v59 }
 0x132   : > { %1335 = vst.msk [vmem:[%s2399_s26 + $0x30] sm:$0xf] %vm1322_vm1, %v2021_v60  ;;  %v1609_v5 = vsel %vm680_vm0, %v1534_v62, 0.0  ;;  %v2022_v6 = vpack.c.bf16 %v863_v63, %v863_v63  ;;  %v1412_v7 = vsel %vm680_vm0, %v863_v63, 0.0  ;;  %v1535_v8 = vmul.f32 %v863_v63, %v863_v63 }
 0x133   : > { %v1610_v9 = vadd.f32 %v1609_v5, %v1608_v47  ;;  %v1413_v11 = vadd.f32 %v1412_v7, %v1411_v3  ;;  %1367 = vst.msk [vmem:[%s2399_s26 + $0xb0] sm:$0xf] %vm1322_vm1, %v2053_v4  ;;  %v2054_v18 = vpack.c.bf16 %v2556_v12, %v2556_v12 }
 0x134   : > { %1336 = vst.msk [vmem:[%s2399_s26 + $0x34] sm:$0xf] %vm1322_vm1, %v2022_v6  ;;  %v1611_v13 = vsel %vm680_vm0, %v1535_v8, 0.0 }
 0x135   : > { %v1612_v16 = vadd.f32 %v1611_v13, %v1610_v9  ;;  %v867_v17 = vpop.f32.mrb[28].mxu0  ;;  %v995_v19 = vpop.f32.mrb[28].mxu1  ;;  %1368 = vst.msk [vmem:[%s2399_s26 + $0xb4] sm:$0xf] %vm1322_vm1, %v2054_v18 }
 0x136   : > { %v868_v20 = vadd.f32 %v2389_v10, %v867_v17  ;;  %v869_v22 = vpop.f32.mrb[29].mxu0  ;;  %v2565_v23 = vadd.f32 %v2389_v10, %v995_v19  ;;  %v997_v26 = vpop.f32.mrb[29].mxu1 }
 0x137   : > { %v870_v27 = vpop.f32.mrb[30].mxu0  ;;  %v998_v28 = vpop.f32.mrb[30].mxu1 }
 0x138   : > { %v2023_v29 = vpack.c.bf16 %v868_v20, %v868_v20  ;;  %v1414_v31 = vsel %vm680_vm0, %v868_v20, 0.0  ;;  %v1536_v32 = vmul.f32 %v868_v20, %v868_v20  ;;  %v871_v33 = vadd.f32 %v2389_v10, %v870_v27  ;;  %v872_v34 = vpop.f32.mrb[31].mxu0  ;;  %v1000_v35 = vpop.f32.mrb[31].mxu1 }
 0x139   : > { %v1415_v36 = vadd.f32 %v1414_v31, %v1413_v11  ;;  %v2055_v37 = vpack.c.bf16 %v2565_v23, %v2565_v23  ;;  %v2580_v46 = vadd.f32 %v2389_v10, %v998_v28 }
 0x13a   : > { %1337 = vst.msk [vmem:[%s2399_s26 + $0x38] sm:$0xf] %vm1322_vm1, %v2023_v29  ;;  %v1613_v38 = vsel %vm680_vm0, %v1536_v32, 0.0  ;;  %v2024_v40 = vpack.c.bf16 %v871_v33, %v871_v33  ;;  %v1416_v41 = vsel %vm680_vm0, %v871_v33, 0.0  ;;  %v1537_v42 = vmul.f32 %v871_v33, %v871_v33 }
 0x13b   : > { %v1614_v43 = vadd.f32 %v1613_v38, %v1612_v16  ;;  %v1417_v44 = vadd.f32 %v1416_v41, %v1415_v36  ;;  %1369 = vst.msk [vmem:[%s2399_s26 + $0xb8] sm:$0xf] %vm1322_vm1, %v2055_v37  ;;  %v2056_v51 = vpack.c.bf16 %v2580_v46, %v2580_v46 }
 0x13c   : > { %1338 = vst.msk [vmem:[%s2399_s26 + $0x3c] sm:$0xf] %vm1322_vm1, %v2024_v40  ;;  %v1615_v47 = vsel %vm680_vm0, %v1537_v42, 0.0 }
 0x13d   : > { %v1616_v48 = vadd.f32 %v1615_v47, %v1614_v43  ;;  %v875_v50 = vpop.f32.mrb[32].mxu0  ;;  %v1003_v52 = vpop.f32.mrb[32].mxu1  ;;  %1370 = vst.msk [vmem:[%s2399_s26 + $0xbc] sm:$0xf] %vm1322_vm1, %v2056_v51 }
 0x13e   : > { %v876_v53 = vadd.f32 %v2389_v10, %v875_v50  ;;  %v877_v55 = vpop.f32.mrb[33].mxu0  ;;  %v2589_v56 = vadd.f32 %v2389_v10, %v1003_v52  ;;  %v1005_v59 = vpop.f32.mrb[33].mxu1 }
 0x13f   : > { %v878_v60 = vpop.f32.mrb[34].mxu0  ;;  %v1006_v61 = vpop.f32.mrb[34].mxu1 }
 0x140   : > { %v2025_v62 = vpack.c.bf16 %v876_v53, %v876_v53  ;;  %v1418_v63 = vsel %vm680_vm0, %v876_v53, 0.0  ;;  %v1538_v0 = vmul.f32 %v876_v53, %v876_v53  ;;  %v879_v2 = vadd.f32 %v2389_v10, %v878_v60  ;;  %v880_v3 = vpop.f32.mrb[35].mxu0  ;;  %v1008_v4 = vpop.f32.mrb[35].mxu1 }
 0x141   : > { %v1419_v5 = vadd.f32 %v1418_v63, %v1417_v44  ;;  %v2057_v6 = vpack.c.bf16 %v2589_v56, %v2589_v56  ;;  %v2604_v17 = vadd.f32 %v2389_v10, %v1006_v61 }
 0x142   : > { %1339 = vst.msk [vmem:[%s2399_s26 + $0x40] sm:$0xf] %vm1322_vm1, %v2025_v62  ;;  %v1617_v7 = vsel %vm680_vm0, %v1538_v0, 0.0  ;;  %v2026_v8 = vpack.c.bf16 %v879_v2, %v879_v2  ;;  %v1420_v9 = vsel %vm680_vm0, %v879_v2, 0.0  ;;  %v1539_v11 = vmul.f32 %v879_v2, %v879_v2 }
 0x143   : > { %v1618_v13 = vadd.f32 %v1617_v7, %v1616_v48  ;;  %v1421_v16 = vadd.f32 %v1420_v9, %v1419_v5  ;;  %1371 = vst.msk [vmem:[%s2399_s26 + $0xc0] sm:$0xf] %vm1322_vm1, %v2057_v6  ;;  %v2058_v22 = vpack.c.bf16 %v2604_v17, %v2604_v17 }
 0x144   : > { %1340 = vst.msk [vmem:[%s2399_s26 + $0x44] sm:$0xf] %vm1322_vm1, %v2026_v8  ;;  %v1619_v18 = vsel %vm680_vm0, %v1539_v11, 0.0 }
 0x145   : > { %v1620_v19 = vadd.f32 %v1619_v18, %v1618_v13  ;;  %v883_v20 = vpop.f32.mrb[36].mxu0  ;;  %v1011_v26 = vpop.f32.mrb[36].mxu1  ;;  %1372 = vst.msk [vmem:[%s2399_s26 + $0xc4] sm:$0xf] %vm1322_vm1, %v2058_v22 }
 0x146   : > { %v884_v27 = vadd.f32 %v2389_v10, %v883_v20  ;;  %v885_v28 = vpop.f32.mrb[37].mxu0  ;;  %v2613_v29 = vadd.f32 %v2389_v10, %v1011_v26  ;;  %v1013_v31 = vpop.f32.mrb[37].mxu1 }
 0x147   : > { %v886_v32 = vpop.f32.mrb[38].mxu0  ;;  %v1014_v33 = vpop.f32.mrb[38].mxu1 }
 0x148   : > { %v2027_v34 = vpack.c.bf16 %v884_v27, %v884_v27  ;;  %v1422_v35 = vsel %vm680_vm0, %v884_v27, 0.0  ;;  %v1540_v36 = vmul.f32 %v884_v27, %v884_v27  ;;  %v887_v37 = vadd.f32 %v2389_v10, %v886_v32  ;;  %v888_v38 = vpop.f32.mrb[39].mxu0  ;;  %v1016_v40 = vpop.f32.mrb[39].mxu1 }
 0x149   : > { %v1423_v41 = vadd.f32 %v1422_v35, %v1421_v16  ;;  %v2059_v42 = vpack.c.bf16 %v2613_v29, %v2613_v29  ;;  %v2628_v52 = vadd.f32 %v2389_v10, %v1014_v33 }
 0x14a   : > { %1341 = vst.msk [vmem:[%s2399_s26 + $0x48] sm:$0xf] %vm1322_vm1, %v2027_v34  ;;  %v1621_v43 = vsel %vm680_vm0, %v1540_v36, 0.0  ;;  %v2028_v44 = vpack.c.bf16 %v887_v37, %v887_v37  ;;  %v1424_v47 = vsel %vm680_vm0, %v887_v37, 0.0  ;;  %v1541_v48 = vmul.f32 %v887_v37, %v887_v37 }
 0x14b   : > { %v1622_v50 = vadd.f32 %v1621_v43, %v1620_v19  ;;  %v1425_v51 = vadd.f32 %v1424_v47, %v1423_v41  ;;  %1373 = vst.msk [vmem:[%s2399_s26 + $0xc8] sm:$0xf] %vm1322_vm1, %v2059_v42  ;;  %v2060_v60 = vpack.c.bf16 %v2628_v52, %v2628_v52 }
 0x14c   : > { %1342 = vst.msk [vmem:[%s2399_s26 + $0x4c] sm:$0xf] %vm1322_vm1, %v2028_v44  ;;  %v1623_v53 = vsel %vm680_vm0, %v1541_v48, 0.0 }
 0x14d   : > { %v1624_v55 = vadd.f32 %v1623_v53, %v1622_v50  ;;  %v891_v59 = vpop.f32.mrb[40].mxu0  ;;  %v1019_v61 = vpop.f32.mrb[40].mxu1  ;;  %1374 = vst.msk [vmem:[%s2399_s26 + $0xcc] sm:$0xf] %vm1322_vm1, %v2060_v60 }
 0x14e   : > { %v892_v62 = vadd.f32 %v2389_v10, %v891_v59  ;;  %v893_v63 = vpop.f32.mrb[41].mxu0  ;;  %v2637_v0 = vadd.f32 %v2389_v10, %v1019_v61  ;;  %v1021_v2 = vpop.f32.mrb[41].mxu1 }
 0x14f   : > { %v894_v3 = vpop.f32.mrb[42].mxu0  ;;  %v1022_v4 = vpop.f32.mrb[42].mxu1 }
 0x150   : > { %v2029_v5 = vpack.c.bf16 %v892_v62, %v892_v62  ;;  %v1426_v6 = vsel %vm680_vm0, %v892_v62, 0.0  ;;  %v1542_v7 = vmul.f32 %v892_v62, %v892_v62  ;;  %v895_v8 = vadd.f32 %v2389_v10, %v894_v3  ;;  %v896_v9 = vpop.f32.mrb[43].mxu0  ;;  %v1024_v11 = vpop.f32.mrb[43].mxu1 }
 0x151   : > { %v1427_v13 = vadd.f32 %v1426_v6, %v1425_v51  ;;  %v2061_v16 = vpack.c.bf16 %v2637_v0, %v2637_v0  ;;  %v2652_v28 = vadd.f32 %v2389_v10, %v1022_v4 }
 0x152   : > { %1343 = vst.msk [vmem:[%s2399_s26 + $0x50] sm:$0xf] %vm1322_vm1, %v2029_v5  ;;  %v1625_v18 = vsel %vm680_vm0, %v1542_v7, 0.0  ;;  %v2030_v19 = vpack.c.bf16 %v895_v8, %v895_v8  ;;  %v1428_v20 = vsel %vm680_vm0, %v895_v8, 0.0  ;;  %v1543_v22 = vmul.f32 %v895_v8, %v895_v8 }
 0x153   : > { %v1626_v26 = vadd.f32 %v1625_v18, %v1624_v55  ;;  %v1429_v27 = vadd.f32 %v1428_v20, %v1427_v13  ;;  %1375 = vst.msk [vmem:[%s2399_s26 + $0xd0] sm:$0xf] %vm1322_vm1, %v2061_v16  ;;  %v2062_v34 = vpack.c.bf16 %v2652_v28, %v2652_v28 }
 0x154   : > { %1344 = vst.msk [vmem:[%s2399_s26 + $0x54] sm:$0xf] %vm1322_vm1, %v2030_v19  ;;  %v1627_v31 = vsel %vm680_vm0, %v1543_v22, 0.0 }
 0x155   : > { %v1628_v32 = vadd.f32 %v1627_v31, %v1626_v26  ;;  %v899_v33 = vpop.f32.mrb[44].mxu0  ;;  %v1027_v35 = vpop.f32.mrb[44].mxu1  ;;  %1376 = vst.msk [vmem:[%s2399_s26 + $0xd4] sm:$0xf] %vm1322_vm1, %v2062_v34 }
 0x156   : > { %v900_v36 = vadd.f32 %v2389_v10, %v899_v33  ;;  %v901_v37 = vpop.f32.mrb[45].mxu0  ;;  %v2661_v38 = vadd.f32 %v2389_v10, %v1027_v35  ;;  %v1029_v40 = vpop.f32.mrb[45].mxu1 }
 0x157   : > { %v902_v41 = vpop.f32.mrb[46].mxu0  ;;  %v1030_v42 = vpop.f32.mrb[46].mxu1 }
 0x158   : > { %v2031_v43 = vpack.c.bf16 %v900_v36, %v900_v36  ;;  %v1430_v44 = vsel %vm680_vm0, %v900_v36, 0.0  ;;  %v1544_v47 = vmul.f32 %v900_v36, %v900_v36  ;;  %v903_v48 = vadd.f32 %v2389_v10, %v902_v41  ;;  %v904_v50 = vpop.f32.mrb[47].mxu0  ;;  %v1032_v51 = vpop.f32.mrb[47].mxu1 }
 0x159   : > { %v1431_v53 = vadd.f32 %v1430_v44, %v1429_v27  ;;  %v2063_v55 = vpack.c.bf16 %v2661_v38, %v2661_v38  ;;  %v2676_v3 = vadd.f32 %v2389_v10, %v1030_v42 }
 0x15a   : > { %1345 = vst.msk [vmem:[%s2399_s26 + $0x58] sm:$0xf] %vm1322_vm1, %v2031_v43  ;;  %v1629_v59 = vsel %vm680_vm0, %v1544_v47, 0.0  ;;  %v2032_v60 = vpack.c.bf16 %v903_v48, %v903_v48  ;;  %v1432_v61 = vsel %vm680_vm0, %v903_v48, 0.0  ;;  %v1545_v62 = vmul.f32 %v903_v48, %v903_v48 }
 0x15b   : > { %v1630_v63 = vadd.f32 %v1629_v59, %v1628_v32  ;;  %v1433_v2 = vadd.f32 %v1432_v61, %v1431_v53  ;;  %1377 = vst.msk [vmem:[%s2399_s26 + $0xd8] sm:$0xf] %vm1322_vm1, %v2063_v55  ;;  %v2064_v7 = vpack.c.bf16 %v2676_v3, %v2676_v3 }
 0x15c   : > { %1346 = vst.msk [vmem:[%s2399_s26 + $0x5c] sm:$0xf] %vm1322_vm1, %v2032_v60  ;;  %v1631_v4 = vsel %vm680_vm0, %v1545_v62, 0.0 }
 0x15d   : > { %v1632_v5 = vadd.f32 %v1631_v4, %v1630_v63  ;;  %v907_v6 = vpop.f32.mrb[48].mxu0  ;;  %v1035_v8 = vpop.f32.mrb[48].mxu1  ;;  %1378 = vst.msk [vmem:[%s2399_s26 + $0xdc] sm:$0xf] %vm1322_vm1, %v2064_v7 }
 0x15e   : > { %v908_v9 = vadd.f32 %v2389_v10, %v907_v6  ;;  %v909_v11 = vpop.f32.mrb[49].mxu0  ;;  %v2685_v13 = vadd.f32 %v2389_v10, %v1035_v8  ;;  %v1037_v16 = vpop.f32.mrb[49].mxu1 }
 0x15f   : > { %v910_v18 = vpop.f32.mrb[50].mxu0  ;;  %v1038_v19 = vpop.f32.mrb[50].mxu1 }
 0x160   : > { %v2033_v20 = vpack.c.bf16 %v908_v9, %v908_v9  ;;  %v1434_v22 = vsel %vm680_vm0, %v908_v9, 0.0  ;;  %v1546_v26 = vmul.f32 %v908_v9, %v908_v9  ;;  %v911_v27 = vadd.f32 %v2389_v10, %v910_v18  ;;  %v912_v31 = vpop.f32.mrb[51].mxu0  ;;  %v1040_v32 = vpop.f32.mrb[51].mxu1 }
 0x161   : > { %v1435_v33 = vadd.f32 %v1434_v22, %v1433_v2  ;;  %v2065_v34 = vpack.c.bf16 %v2685_v13, %v2685_v13  ;;  %v2700_v43 = vadd.f32 %v2389_v10, %v1038_v19 }
 0x162   : > { %1347 = vst.msk [vmem:[%s2399_s26 + $0x60] sm:$0xf] %vm1322_vm1, %v2033_v20  ;;  %v1633_v35 = vsel %vm680_vm0, %v1546_v26, 0.0  ;;  %v2034_v36 = vpack.c.bf16 %v911_v27, %v911_v27  ;;  %v1436_v37 = vsel %vm680_vm0, %v911_v27, 0.0  ;;  %v1547_v40 = vmul.f32 %v911_v27, %v911_v27 }
 0x163   : > { %v1634_v41 = vadd.f32 %v1633_v35, %v1632_v5  ;;  %v1437_v42 = vadd.f32 %v1436_v37, %v1435_v33  ;;  %1379 = vst.msk [vmem:[%s2399_s26 + $0xe0] sm:$0xf] %vm1322_vm1, %v2065_v34  ;;  %v2066_v50 = vpack.c.bf16 %v2700_v43, %v2700_v43 }
 0x164   : > { %1348 = vst.msk [vmem:[%s2399_s26 + $0x64] sm:$0xf] %vm1322_vm1, %v2034_v36  ;;  %v1635_v44 = vsel %vm680_vm0, %v1547_v40, 0.0 }
 0x165   : > { %v1636_v47 = vadd.f32 %v1635_v44, %v1634_v41  ;;  %v915_v48 = vpop.f32.mrb[52].mxu0  ;;  %v1043_v51 = vpop.f32.mrb[52].mxu1  ;;  %1380 = vst.msk [vmem:[%s2399_s26 + $0xe4] sm:$0xf] %vm1322_vm1, %v2066_v50 }
 0x166   : > { %v916_v53 = vadd.f32 %v2389_v10, %v915_v48  ;;  %v917_v55 = vpop.f32.mrb[53].mxu0  ;;  %v2709_v59 = vadd.f32 %v2389_v10, %v1043_v51  ;;  %v1045_v60 = vpop.f32.mrb[53].mxu1 }
 0x167   : > { %v918_v61 = vpop.f32.mrb[54].mxu0  ;;  %v1046_v62 = vpop.f32.mrb[54].mxu1 }
 0x168   : > { %v2035_v63 = vpack.c.bf16 %v916_v53, %v916_v53  ;;  %v1438_v2 = vsel %vm680_vm0, %v916_v53, 0.0  ;;  %v1548_v4 = vmul.f32 %v916_v53, %v916_v53  ;;  %v919_v5 = vadd.f32 %v2389_v10, %v918_v61  ;;  %v920_v6 = vpop.f32.mrb[55].mxu0  ;;  %v1048_v7 = vpop.f32.mrb[55].mxu1 }
 0x169   : > { %v1439_v8 = vadd.f32 %v1438_v2, %v1437_v42  ;;  %v2067_v9 = vpack.c.bf16 %v2709_v59, %v2709_v59  ;;  %v2724_v26 = vadd.f32 %v2389_v10, %v1046_v62 }
 0x16a   : > { %1349 = vst.msk [vmem:[%s2399_s26 + $0x68] sm:$0xf] %vm1322_vm1, %v2035_v63  ;;  %v1637_v11 = vsel %vm680_vm0, %v1548_v4, 0.0  ;;  %v2036_v16 = vpack.c.bf16 %v919_v5, %v919_v5  ;;  %v1440_v18 = vsel %vm680_vm0, %v919_v5, 0.0  ;;  %v1549_v19 = vmul.f32 %v919_v5, %v919_v5 }
 0x16b   : > { %v1638_v20 = vadd.f32 %v1637_v11, %v1636_v47  ;;  %v1441_v22 = vadd.f32 %v1440_v18, %v1439_v8  ;;  %1381 = vst.msk [vmem:[%s2399_s26 + $0xe8] sm:$0xf] %vm1322_vm1, %v2067_v9  ;;  %v2068_v33 = vpack.c.bf16 %v2724_v26, %v2724_v26 }
 0x16c   : > { %1350 = vst.msk [vmem:[%s2399_s26 + $0x6c] sm:$0xf] %vm1322_vm1, %v2036_v16  ;;  %v1639_v27 = vsel %vm680_vm0, %v1549_v19, 0.0 }
 0x16d   : > { %v1640_v31 = vadd.f32 %v1639_v27, %v1638_v20  ;;  %v923_v32 = vpop.f32.mrb[56].mxu0  ;;  %v1051_v34 = vpop.f32.mrb[56].mxu1  ;;  %1382 = vst.msk [vmem:[%s2399_s26 + $0xec] sm:$0xf] %vm1322_vm1, %v2068_v33 }
 0x16e   : > { %v924_v35 = vadd.f32 %v2389_v10, %v923_v32  ;;  %v925_v36 = vpop.f32.mrb[57].mxu0  ;;  %v2733_v37 = vadd.f32 %v2389_v10, %v1051_v34  ;;  %v1053_v40 = vpop.f32.mrb[57].mxu1 }
 0x16f   : > { %v926_v41 = vpop.f32.mrb[58].mxu0  ;;  %v1054_v42 = vpop.f32.mrb[58].mxu1 }
 0x170   : > { %v2037_v44 = vpack.c.bf16 %v924_v35, %v924_v35  ;;  %v1442_v47 = vsel %vm680_vm0, %v924_v35, 0.0  ;;  %v1550_v48 = vmul.f32 %v924_v35, %v924_v35  ;;  %v927_v50 = vadd.f32 %v2389_v10, %v926_v41  ;;  %v928_v51 = vpop.f32.mrb[59].mxu0  ;;  %v1056_v53 = vpop.f32.mrb[59].mxu1 }
 0x171   : > { %v1443_v55 = vadd.f32 %v1442_v47, %v1441_v22  ;;  %v2069_v60 = vpack.c.bf16 %v2733_v37, %v2733_v37  ;;  %v2748_v6 = vadd.f32 %v2389_v10, %v1054_v42  ;;  %v1554_v41 = vmul.f32 %v2394_v15, %v2394_v15 }
 0x172   : > { %1351 = vst.msk [vmem:[%s2399_s26 + $0x70] sm:$0xf] %vm1322_vm1, %v2037_v44  ;;  %v1641_v61 = vsel %vm680_vm0, %v1550_v48, 0.0  ;;  %v2038_v62 = vpack.c.bf16 %v927_v50, %v927_v50  ;;  %v1444_v63 = vsel %vm680_vm0, %v927_v50, 0.0  ;;  %v1551_v2 = vmul.f32 %v927_v50, %v927_v50 }
 0x173   : > { %v1642_v4 = vadd.f32 %v1641_v61, %v1640_v31  ;;  %v1445_v5 = vadd.f32 %v1444_v63, %v1443_v55  ;;  %1383 = vst.msk [vmem:[%s2399_s26 + $0xf0] sm:$0xf] %vm1322_vm1, %v2069_v60  ;;  %v2070_v11 = vpack.c.bf16 %v2748_v6, %v2748_v6  ;;  %v1450_v61 = vsel %vm680_vm0, %v2394_v15, 0.0 }
 0x174   : > { %1352 = vst.msk [vmem:[%s2399_s26 + $0x74] sm:$0xf] %vm1322_vm1, %v2038_v62  ;;  %v1643_v7 = vsel %vm680_vm0, %v1551_v2, 0.0  ;;  %v1555_v62 = vmul.f32 %v2405_v25, %v2405_v25  ;;  %v1556_v15 = vmul.f32 %v2423_v39, %v2423_v39 }
 0x175   : > { %v1644_v8 = vadd.f32 %v1643_v7, %v1642_v4  ;;  %v931_v9 = vpop.f32.mrb[60].mxu0  ;;  %v1059_v16 = vpop.f32.mrb[60].mxu1  ;;  %1384 = vst.msk [vmem:[%s2399_s26 + $0xf4] sm:$0xf] %vm1322_vm1, %v2070_v11  ;;  %v1649_v7 = vsel %vm680_vm0, %v1554_v41, 0.0 }
 0x176   : > { %v932_v18 = vadd.f32 %v2389_v10, %v931_v9  ;;  %v933_v19 = vpop.f32.mrb[61].mxu0  ;;  %v2757_v20 = vadd.f32 %v2389_v10, %v1059_v16  ;;  %v1061_v22 = vpop.f32.mrb[61].mxu1  ;;  %v1651_v11 = vsel %vm680_vm0, %v1555_v62, 0.0  ;;  %v1454_v16 = vsel %vm680_vm0, %v2423_v39, 0.0 }
 0x177   : > { %v934_v27 = vpop.f32.mrb[62].mxu0  ;;  %v1062_v31 = vpop.f32.mrb[62].mxu1  ;;  %v1458_v39 = vsel %vm680_vm0, %v2445_v1, 0.0 }
 0x178   : > { %v2039_v32 = vpack.c.bf16 %v932_v18, %v932_v18  ;;  %v1446_v33 = vsel %vm680_vm0, %v932_v18, 0.0  ;;  %v1552_v34 = vmul.f32 %v932_v18, %v932_v18  ;;  %v935_v35 = vadd.f32 %v2389_v10, %v934_v27  ;;  %v936_v36 = vpop.f32.mrb[63].mxu0  ;;  %v1064_v40 = vpop.f32.mrb[63].mxu1 }
 0x179   : > { %v1447_v42 = vadd.f32 %v1446_v33, %v1445_v5  ;;  %v2071_v44 = vpack.c.bf16 %v2757_v20, %v2757_v20  ;;  %v2774_v60 = vadd.f32 %v2389_v10, %v1062_v31  ;;  %v1452_v10 = vsel %vm680_vm0, %v2405_v25, 0.0 }
 0x17a   : > { %1353 = vst.msk [vmem:[%s2399_s26 + $0x78] sm:$0xf] %vm1322_vm1, %v2039_v32  ;;  %v1645_v47 = vsel %vm680_vm0, %v1552_v34, 0.0  ;;  %v2040_v48 = vpack.c.bf16 %v935_v35, %v935_v35  ;;  %v1448_v50 = vsel %vm680_vm0, %v935_v35, 0.0  ;;  %v1553_v51 = vmul.f32 %v935_v35, %v935_v35 }
 0x17b   : > { %v1646_v53 = vadd.f32 %v1645_v47, %v1644_v8  ;;  %v1449_v55 = vadd.f32 %v1448_v50, %v1447_v42  ;;  %1385 = vst.msk [vmem:[%s2399_s26 + $0xf8] sm:$0xf] %vm1322_vm1, %v2071_v44  ;;  %v2072_v5 = vpack.c.bf16 %v2774_v60, %v2774_v60  ;;  %v1557_v18 = vmul.f32 %v2436_v57, %v2436_v57 }
 0x17c   : > { %1354 = vst.msk [vmem:[%s2399_s26 + $0x7c] sm:$0xf] %vm1322_vm1, %v2040_v48  ;;  %v1647_v63 = vsel %vm680_vm0, %v1553_v51, 0.0  ;;  %v1653_v27 = vsel %vm680_vm0, %v1556_v15, 0.0  ;;  %v1456_v25 = vsel %vm680_vm0, %v2436_v57, 0.0  ;;  %v1558_v31 = vmul.f32 %v2445_v1, %v2445_v1 }
 0x17d   : > { %v1451_v2 = vadd.f32 %v1450_v61, %v1449_v55  ;;  %v1648_v4 = vadd.f32 %v1647_v63, %v1646_v53  ;;  %1386 = vst.msk [vmem:[%s2399_s26 + $0xfc] sm:$0xf] %vm1322_vm1, %v2072_v5  ;;  %v1655_v34 = vsel %vm680_vm0, %v1557_v18, 0.0  ;;  %v1559_v35 = vmul.f32 %v2460_v21, %v2460_v21 }
 0x17e   : > { %v1657_v41 = vsel %vm680_vm0, %v1558_v31, 0.0  ;;  %v1460_v57 = vsel %vm680_vm0, %v2460_v21, 0.0  ;;  %v1560_v42 = vmul.f32 %v2469_v30, %v2469_v30  ;;  %v1462_v1 = vsel %vm680_vm0, %v2469_v30, 0.0 }
 0x17f   : > { %v1453_v8 = vadd.f32 %v1452_v10, %v1451_v2  ;;  %v1650_v9 = vadd.f32 %v1649_v7, %v1648_v4  ;;  %v1659_v48 = vsel %vm680_vm0, %v1559_v35, 0.0  ;;  %v1561_v50 = vmul.f32 %v2484_v49, %v2484_v49 }
 0x180   : > { %v1661_v55 = vsel %vm680_vm0, %v1560_v42, 0.0  ;;  %v1464_v21 = vsel %vm680_vm0, %v2484_v49, 0.0  ;;  %v1562_v61 = vmul.f32 %v2493_v58, %v2493_v58  ;;  %v1466_v30 = vsel %vm680_vm0, %v2493_v58, 0.0 }
 0x181   : > { %v1455_v19 = vadd.f32 %v1454_v16, %v1453_v8  ;;  %v1652_v22 = vadd.f32 %v1651_v11, %v1650_v9  ;;  %v1663_v2 = vsel %vm680_vm0, %v1561_v50, 0.0  ;;  %v1563_v4 = vmul.f32 %v2508_v14, %v2508_v14 }
 0x182   : > { %v1665_v10 = vsel %vm680_vm0, %v1562_v61, 0.0  ;;  %v1468_v49 = vsel %vm680_vm0, %v2508_v14, 0.0  ;;  %v1564_v15 = vmul.f32 %v2517_v24, %v2517_v24  ;;  %v1470_v58 = vsel %vm680_vm0, %v2517_v24, 0.0 }
 0x183   : > { %v1457_v32 = vadd.f32 %v1456_v25, %v1455_v19  ;;  %v1654_v33 = vadd.f32 %v1653_v27, %v1652_v22  ;;  %v1667_v11 = vsel %vm680_vm0, %v1563_v4, 0.0  ;;  %v1565_v16 = vmul.f32 %v2532_v45, %v2532_v45 }
 0x184   : > { %v1669_v22 = vsel %vm680_vm0, %v1564_v15, 0.0  ;;  %v1472_v14 = vsel %vm680_vm0, %v2532_v45, 0.0  ;;  %v1566_v27 = vmul.f32 %v2541_v54, %v2541_v54  ;;  %v1474_v24 = vsel %vm680_vm0, %v2541_v54, 0.0 }
 0x185   : > { %v1459_v36 = vadd.f32 %v1458_v39, %v1457_v32  ;;  %v1656_v40 = vadd.f32 %v1655_v34, %v1654_v33  ;;  %v1671_v32 = vsel %vm680_vm0, %v1565_v16, 0.0  ;;  %v1567_v33 = vmul.f32 %v2556_v12, %v2556_v12 }
 0x186   : > { %v1673_v35 = vsel %vm680_vm0, %v1566_v27, 0.0  ;;  %v1476_v45 = vsel %vm680_vm0, %v2556_v12, 0.0  ;;  %v1478_v54 = vsel %vm680_vm0, %v2565_v23, 0.0  ;;  %v1569_v42 = vmul.f32 %v2580_v46, %v2580_v46 }
 0x187   : > { %v1461_v44 = vadd.f32 %v1460_v57, %v1459_v36  ;;  %v1658_v47 = vadd.f32 %v1657_v41, %v1656_v40  ;;  %v1568_v36 = vmul.f32 %v2565_v23, %v2565_v23  ;;  %v1675_v57 = vsel %vm680_vm0, %v1567_v33, 0.0 }
 0x188   : > { %v1480_v12 = vsel %vm680_vm0, %v2580_v46, 0.0  ;;  %v1482_v23 = vsel %vm680_vm0, %v2589_v56, 0.0  ;;  %v1484_v46 = vsel %vm680_vm0, %v2604_v17, 0.0  ;;  %v1574_v15 = vmul.f32 %v2637_v0, %v2637_v0 }
 0x189   : > { %v1463_v51 = vadd.f32 %v1462_v1, %v1461_v44  ;;  %v1660_v53 = vadd.f32 %v1659_v48, %v1658_v47  ;;  %v1677_v48 = vsel %vm680_vm0, %v1568_v36, 0.0  ;;  %v1570_v1 = vmul.f32 %v2589_v56, %v2589_v56 }
 0x18a   : > { %v1486_v56 = vsel %vm680_vm0, %v2613_v29, 0.0  ;;  %v1579_v36 = vmul.f32 %v2700_v43, %v2700_v43 }
 0x18b   : > { %v1465_v62 = vadd.f32 %v1464_v21, %v1463_v51  ;;  %v1662_v63 = vadd.f32 %v1661_v55, %v1660_v53  ;;  %v1679_v53 = vsel %vm680_vm0, %v1569_v42, 0.0  ;;  %v1571_v55 = vmul.f32 %v2604_v17, %v2604_v17 }
 0x18c   : > { %v1488_v17 = vsel %vm680_vm0, %v2628_v52, 0.0 }
 0x18d   : > { %v1664_v5 = vadd.f32 %v1663_v2, %v1662_v63  ;;  %v1467_v7 = vadd.f32 %v1466_v30, %v1465_v62  ;;  %v1681_v62 = vsel %vm680_vm0, %v1570_v1, 0.0  ;;  %v1572_v63 = vmul.f32 %v2613_v29, %v2613_v29 }
 0x18e   : > { %v1683_v4 = vsel %vm680_vm0, %v1571_v55, 0.0  ;;  %v1490_v29 = vsel %vm680_vm0, %v2637_v0, 0.0  ;;  %v1494_v0 = vsel %vm680_vm0, %v2661_v38, 0.0 }
 0x18f   : > { %v1469_v8 = vadd.f32 %v1468_v49, %v1467_v7  ;;  %v1666_v9 = vadd.f32 %v1665_v10, %v1664_v5  ;;  %v1573_v5 = vmul.f32 %v2628_v52, %v2628_v52  ;;  %v1685_v49 = vsel %vm680_vm0, %v1572_v63, 0.0 }
 0x190   : > { %v1492_v52 = vsel %vm680_vm0, %v2652_v28, 0.0  ;;  %v1508_v63 = vsel %vm680_vm0, %v2748_v6, 0.0 }
 0x191   : > { %v1471_v18 = vadd.f32 %v1470_v58, %v1469_v8  ;;  %v1668_v19 = vadd.f32 %v1667_v11, %v1666_v9  ;;  %v1687_v11 = vsel %vm680_vm0, %v1573_v5, 0.0  ;;  %v1575_v58 = vmul.f32 %v2652_v28, %v2652_v28 }
 0x192   : > { %v1496_v28 = vsel %vm680_vm0, %v2676_v3, 0.0  ;;  %v1585_v5 = vmul.f32 %v2774_v60, %v2774_v60 }
 0x193   : > { %v1473_v25 = vadd.f32 %v1472_v14, %v1471_v18  ;;  %v1670_v31 = vadd.f32 %v1669_v22, %v1668_v19  ;;  %v1689_v19 = vsel %vm680_vm0, %v1574_v15, 0.0  ;;  %v1576_v22 = vmul.f32 %v2661_v38, %v2661_v38 }
 0x194   : > { %v1498_v38 = vsel %vm680_vm0, %v2685_v13, 0.0  ;;  %v1711_v15 = vsel %vm680_vm0, %v1585_v5, 0.0 }
 0x195   : > { %v1475_v34 = vadd.f32 %v1474_v24, %v1473_v25  ;;  %v1672_v39 = vadd.f32 %v1671_v32, %v1670_v31  ;;  %v1691_v25 = vsel %vm680_vm0, %v1575_v58, 0.0  ;;  %v1577_v31 = vmul.f32 %v2676_v3, %v2676_v3 }
 0x196   : > { %v1693_v33 = vsel %vm680_vm0, %v1576_v22, 0.0  ;;  %v1500_v3 = vsel %vm680_vm0, %v2700_v43, 0.0  ;;  %v1504_v43 = vsel %vm680_vm0, %v2724_v26, 0.0 }
 0x197   : > { %v1477_v40 = vadd.f32 %v1476_v45, %v1475_v34  ;;  %v1674_v41 = vadd.f32 %v1673_v35, %v1672_v39  ;;  %v1578_v34 = vmul.f32 %v2685_v13, %v2685_v13  ;;  %v1695_v45 = vsel %vm680_vm0, %v1577_v31, 0.0 }
 0x198   : > { %v1502_v13 = vsel %vm680_vm0, %v2709_v59, 0.0 }
 0x199   : > { %v1479_v44 = vadd.f32 %v1478_v54, %v1477_v40  ;;  %v1676_v47 = vadd.f32 %v1675_v57, %v1674_v41  ;;  %v1697_v57 = vsel %vm680_vm0, %v1578_v34, 0.0  ;;  %v1580_v54 = vmul.f32 %v2709_v59, %v2709_v59 }
 0x19a   : > { %v1506_v59 = vsel %vm680_vm0, %v2733_v37, 0.0 }
 0x19b   : > { %v1481_v50 = vadd.f32 %v1480_v12, %v1479_v44  ;;  %v1678_v51 = vadd.f32 %v1677_v48, %v1676_v47  ;;  %v1699_v47 = vsel %vm680_vm0, %v1579_v36, 0.0  ;;  %v1581_v48 = vmul.f32 %v2724_v26, %v2724_v26 }
 0x19d   : > { %v1483_v21 = vadd.f32 %v1482_v23, %v1481_v50  ;;  %v1680_v61 = vadd.f32 %v1679_v53, %v1678_v51  ;;  %v1701_v50 = vsel %vm680_vm0, %v1580_v54, 0.0  ;;  %v1582_v51 = vmul.f32 %v2733_v37, %v2733_v37 }
 0x19e   : > { %v1703_v55 = vsel %vm680_vm0, %v1581_v48, 0.0 }
 0x19f   : > { %v1682_v2 = vadd.f32 %v1681_v62, %v1680_v61  ;;  %v1485_v30 = vadd.f32 %v1484_v46, %v1483_v21  ;;  %v1583_v21 = vmul.f32 %v2748_v6, %v2748_v6  ;;  %v1584_v61 = vmul.f32 %v2757_v20, %v2757_v20 }
 0x1a0   : > { %v1705_v26 = vsel %vm680_vm0, %v1582_v51, 0.0 }
 0x1a1   : > { %v1684_v7 = vadd.f32 %v1683_v4, %v1682_v2  ;;  %v1487_v10 = vadd.f32 %v1486_v56, %v1485_v30  ;;  %v1510_v2 = vsel %vm680_vm0, %v2757_v20, 0.0  ;;  %v1707_v37 = vsel %vm680_vm0, %v1583_v21, 0.0 }
 0x1a2   : > { %v1709_v56 = vsel %vm680_vm0, %v1584_v61, 0.0 }
 0x1a3   : > { %v1686_v8 = vadd.f32 %v1685_v49, %v1684_v7  ;;  %v1489_v9 = vadd.f32 %v1488_v17, %v1487_v10  ;;  %v1512_v49 = vsel %vm680_vm0, %v2774_v60, 0.0 }
 0x1a5   : > { %v1688_v16 = vadd.f32 %v1687_v11, %v1686_v8  ;;  %v1491_v18 = vadd.f32 %v1490_v29, %v1489_v9 }
 0x1a7   : > { %v1690_v14 = vadd.f32 %v1689_v19, %v1688_v16  ;;  %v1493_v27 = vadd.f32 %v1492_v52, %v1491_v18 }
 0x1a9   : > { %v1692_v32 = vadd.f32 %v1691_v25, %v1690_v14  ;;  %v1495_v24 = vadd.f32 %v1494_v0, %v1493_v27 }
 0x1ab   : > { %v1694_v39 = vadd.f32 %v1693_v33, %v1692_v32  ;;  %v1497_v35 = vadd.f32 %v1496_v28, %v1495_v24 }
 0x1ad   : > { %v1696_v40 = vadd.f32 %v1695_v45, %v1694_v39  ;;  %v1499_v41 = vadd.f32 %v1498_v38, %v1497_v35 }
 0x1af   : > { %v1698_v42 = vadd.f32 %v1697_v57, %v1696_v40  ;;  %v1501_v44 = vadd.f32 %v1500_v3, %v1499_v41 }
 0x1b1   : > { %v1700_v12 = vadd.f32 %v1699_v47, %v1698_v42  ;;  %v1503_v1 = vadd.f32 %v1502_v13, %v1501_v44 }
 0x1b3   : > { %v1702_v53 = vadd.f32 %v1701_v50, %v1700_v12  ;;  %v1505_v23 = vadd.f32 %v1504_v43, %v1503_v1 }
 0x1b5   : > { %v1704_v62 = vadd.f32 %v1703_v55, %v1702_v53  ;;  %v1507_v46 = vadd.f32 %v1506_v59, %v1505_v23 }
 0x1b7   : > { %v1706_v30 = vadd.f32 %v1705_v26, %v1704_v62  ;;  %v1509_v4 = vadd.f32 %v1508_v63, %v1507_v46 }
 0x1b9   : > { %v1708_v7 = vadd.f32 %v1707_v37, %v1706_v30  ;;  %v1511_v10 = vadd.f32 %v1510_v2, %v1509_v4 }
 0x1bb   : > { %v1710_v17 = vadd.f32 %v1709_v56, %v1708_v7  ;;  %v1513_v6 = vadd.f32 %v1512_v49, %v1511_v10 }
 0x1bd   : > { %v1514_v20 = vrot.slane %v1513_v6, 4  ;;  %v1712_v8 = vadd.f32 %v1711_v15, %v1710_v17 }
 0x1bf   : > { %v1515_v9 = vadd.f32 %v1514_v20, %v1513_v6  ;;  %v1713_v11 = vrot.slane %v1712_v8, 4 }
 0x1c1   : > { %v1516_v29 = vrot.slane %v1515_v9, 2  ;;  %v1714_v58 = vadd.f32 %v1713_v11, %v1712_v8 }
 0x1c3   : > { %v1517_v16 = vadd.f32 %v1516_v29, %v1515_v9  ;;  %v1715_v18 = vrot.slane %v1714_v58, 2 }
 0x1c5   : > { %v1518_v19 = vrot.slane %v1517_v16, 1  ;;  %v1716_v52 = vadd.f32 %v1715_v18, %v1714_v58 }
 0x1c7   : > { %v1519_v60 = vadd.f32 %v1518_v19, %v1517_v16  ;;  %v1717_v22 = vrot.slane %v1716_v52, 1 }
 0x1c9   : > { %1521 = vst.msk [vmem:[%s244_s28] sm:$0x1] %vm1520_vm2, %v1519_v60  ;;  %v1718_v14 = vadd.f32 %v1717_v22, %v1716_v52 }
 0x1cb   : > { %1719 = vst.msk [vmem:[%s247_s6] sm:$0x1] %vm1520_vm2, %v1718_v14 }
 0x1cc PF: > { %s16_s18 = sadd.s32 1, %s2211_s18  }
 0x1cd   : > { %p13_p5 = scmp.ge.s32.totalorder %s16_s18, 4  }
 0x1cf   :  { %15 = sbr.rel (!%p13_p5) target bundleno = 1 (0x1), region = 86 }

// kernel: _lambda_.14
= control target key start
LH: loop header
LB: loop body
LE: loop exit
PB: predicated region body
PF: predicated region fallthrough
CT: control target
= control target key end

     0   :  { %s1351_s12 = smov 0   ;;  %s1681_s0 = inlined_call_operand.vmem [shape: bf16[1024,16], index: 0, kind: input, shape index: {}]   ;;  %s1682_s1 = inlined_call_operand.vmem [shape: f32[1,16], index: 1, kind: input, shape index: {}]   ;;  %s1683_s2 = inlined_call_operand.vmem [shape: f32[1,16], index: 2, kind: input, shape index: {}]   ;;  %s1684_s3 = inlined_call_operand.vmem [shape: bf16[1024,16], index: 3, kind: output, shape index: {}]  }
   0x1 LB: > { %s1013_s13 = sadd.s32 4294967295, %s1329_s12   ;;  %p1017_p0 = scmp.ge.s32.totalorder %s1329_s12, 1  ;;  %s1329_s12 = sphi %s1351_s12, %s13_s12  }
   0x2   : > { %p138_p1 = scmp.lt.s32.totalorder %s1329_s12, 3 }
   0x4   : > { %p139_p2 = pnand %p1017_p0, %p138_p1 }
   0x5   : > { %s1018_s14 = sshll.u32 (!%p139_p2), %s1013_s13, 6  ;;  %v1372_v0 = vld [vmem:[%s1682_s1] ss:$0 sm:$0xff] (!%p139_p2)  ;;  %vm892_vm0 = vcmask (!%p139_p2), 125952  }
   0x6   : > { %142 = sbr.rel (%p139_p2) target bundleno = 135 (0x87), region = 32  ;;  %p163_p3 = scmp.lt.s32.totalorder (!%p139_p2), %s1018_s14, 127  ;;  %v1381_v9 = vld [vmem:[%s1683_s2] ss:$0 sm:$0xff] (!%p139_p2) }
   0xd   : > { %s1686_s14 = smov (!%p163_p3, %s1018_s14), 127 }
   0xe   : > { %s1019_s15 = sshll.u32 %s1686_s14, 2 }
   0xf   : > { %s1367_s18 = scalar_lea.vmem %s1681_s0, %s1019_s15  ;;  %s1404_s25 = scalar_lea.vmem %s1684_s3, %s1019_s15 }
  0x10   : > { %v1155_v1 = vld [vmem:[%s1367_s18] sm:$0xff]   ;;  %v1282_v2 = vld [vmem:[%s1367_s18 + $0x8] sm:$0xff]   ;;  %v1283_v3 = vld [vmem:[%s1367_s18 + $0x10] sm:$0xff]  }
  0x11   : > { %v1156_v4 = vunpack.c.l.bf16 %v1155_v1  ;;  %v1157_v5 = vunpack.c.h.bf16 %v1155_v1  ;;  %v1160_v6 = vunpack.c.l.bf16 %v1282_v2  ;;  %v1161_v7 = vunpack.c.h.bf16 %v1282_v2  ;;  %v1284_v8 = vld [vmem:[%s1367_s18 + $0x18] sm:$0xff]   ;;  %v1285_v41 = vld [vmem:[%s1367_s18 + $0x20] sm:$0xff]   ;;  %v1286_v45 = vld [vmem:[%s1367_s18 + $0x28] sm:$0xff]  }
  0x12   : > { %v1164_v10 = vunpack.c.l.bf16 %v1283_v3  ;;  %v1165_v11 = vunpack.c.h.bf16 %v1283_v3  ;;  %v1168_v12 = vunpack.c.l.bf16 %v1284_v8  ;;  %v1169_v13 = vunpack.c.h.bf16 %v1284_v8  ;;  %v1287_v56 = vld [vmem:[%s1367_s18 + $0x30] sm:$0xff]   ;;  %v1288_v57 = vld [vmem:[%s1367_s18 + $0x38] sm:$0xff]  }
  0x13   : > { %v309_v14 = vmul.f32 %v1156_v4, %v1372_v0  ;;  %v310_v15 = vmul.f32 %v1157_v5, %v1372_v0  ;;  %v311_v16 = vmul.f32 %v1160_v6, %v1372_v0  ;;  %v312_v17 = vmul.f32 %v1161_v7, %v1372_v0 }
  0x14   : > { %v313_v18 = vmul.f32 %v1164_v10, %v1372_v0  ;;  %v314_v19 = vmul.f32 %v1165_v11, %v1372_v0  ;;  %v315_v20 = vmul.f32 %v1168_v12, %v1372_v0  ;;  %v316_v21 = vmul.f32 %v1169_v13, %v1372_v0 }
  0x15   : > { %v380_v22 = vadd.f32 %v1381_v9, %v309_v14  ;;  %v381_v23 = vadd.f32 %v1381_v9, %v310_v15  ;;  %v382_v24 = vadd.f32 %v1381_v9, %v311_v16  ;;  %v383_v25 = vadd.f32 %v1381_v9, %v312_v17 }
  0x16   : > { %v384_v26 = vadd.f32 %v1381_v9, %v313_v18  ;;  %v385_v27 = vadd.f32 %v1381_v9, %v314_v19  ;;  %v386_v28 = vadd.f32 %v1381_v9, %v315_v20  ;;  %v387_v29 = vadd.f32 %v1381_v9, %v316_v21 }
  0x17   : > { %vm444_vm1 = vcmp.ge.f32.partialorder %v380_v22, 0.0  ;;  %v508_v30 = vmul.f32 0.2, %v380_v22  ;;  %vm445_vm2 = vcmp.ge.f32.partialorder %v381_v23, 0.0  ;;  %v509_v31 = vmul.f32 0.2, %v381_v23 }
  0x18   : > { %vm446_vm3 = vcmp.ge.f32.partialorder %v382_v24, 0.0  ;;  %v510_v32 = vmul.f32 0.2, %v382_v24  ;;  %vm447_vm4 = vcmp.ge.f32.partialorder %v383_v25, 0.0  ;;  %v511_v33 = vmul.f32 0.2, %v383_v25 }
  0x19   : > { %v572_v34 = vsel %vm444_vm1, %v380_v22, %v508_v30  ;;  %v573_v35 = vsel %vm445_vm2, %v381_v23, %v509_v31  ;;  %vm448_vm5 = vcmp.ge.f32.partialorder %v384_v26, 0.0  ;;  %v512_v36 = vmul.f32 0.2, %v384_v26 }
  0x1a   : > { %v1090_v37 = vpack.c.bf16 %v572_v34, %v572_v34  ;;  %v1091_v38 = vpack.c.bf16 %v573_v35, %v573_v35  ;;  %v574_v39 = vsel %vm446_vm3, %v382_v24, %v510_v32  ;;  %v575_v40 = vsel %vm447_vm4, %v383_v25, %v511_v33  ;;  %v1289_v24 = vld [vmem:[%s1367_s18 + $0x40] sm:$0xff]  }
  0x1b   : > { %v1092_v42 = vpack.c.bf16 %v574_v39, %v574_v39  ;;  %v1093_v43 = vpack.c.bf16 %v575_v40, %v575_v40  ;;  %v576_v44 = vsel %vm448_vm5, %v384_v26, %v512_v36  ;;  %vm449_vm6 = vcmp.ge.f32.partialorder %v385_v27, 0.0 }
  0x1c   : > { %893 = vst.msk [vmem:[%s1404_s25] sm:$0xf] %vm892_vm0, %v1090_v37  ;;  %894 = vst.msk [vmem:[%s1404_s25 + $0x4] sm:$0xf] %vm892_vm0, %v1091_v38  ;;  %v1094_v46 = vpack.c.bf16 %v576_v44, %v576_v44  ;;  %v513_v47 = vmul.f32 0.2, %v385_v27  ;;  %v1172_v50 = vunpack.c.l.bf16 %v1285_v41  ;;  %v1173_v51 = vunpack.c.h.bf16 %v1285_v41 }
  0x1d   : > { %vm450_vm7 = vcmp.ge.f32.partialorder %v386_v28, 0.0  ;;  %v514_v48 = vmul.f32 0.2, %v386_v28  ;;  %895 = vst.msk [vmem:[%s1404_s25 + $0x8] sm:$0xf] %vm892_vm0, %v1092_v42  ;;  %vm451_vm8 = vcmp.ge.f32.partialorder %v387_v29, 0.0  ;;  %v1176_v54 = vunpack.c.l.bf16 %v1286_v45 }
  0x1e   : > { %896 = vst.msk [vmem:[%s1404_s25 + $0xc] sm:$0xf] %vm892_vm0, %v1093_v43  ;;  %v515_v49 = vmul.f32 0.2, %v387_v29  ;;  %897 = vst.msk [vmem:[%s1404_s25 + $0x10] sm:$0xf] %vm892_vm0, %v1094_v46  ;;  %v577_v52 = vsel %vm449_vm6, %v385_v27, %v513_v47  ;;  %v1177_v55 = vunpack.c.h.bf16 %v1286_v45  ;;  %v317_v61 = vmul.f32 %v1172_v50, %v1372_v0 }
  0x1f   : > { %v578_v53 = vsel %vm450_vm7, %v386_v28, %v514_v48  ;;  %v1095_v58 = vpack.c.bf16 %v577_v52, %v577_v52  ;;  %v318_v63 = vmul.f32 %v1173_v51, %v1372_v0  ;;  %v319_v1 = vmul.f32 %v1176_v54, %v1372_v0  ;;  %v1290_v28 = vld [vmem:[%s1367_s18 + $0x48] sm:$0xff]   ;;  %v1291_v48 = vld [vmem:[%s1367_s18 + $0x50] sm:$0xff]  }
  0x20   : > { %v1096_v59 = vpack.c.bf16 %v578_v53, %v578_v53  ;;  %v579_v60 = vsel %vm451_vm8, %v387_v29, %v515_v49  ;;  %v320_v2 = vmul.f32 %v1177_v55, %v1372_v0  ;;  %v388_v3 = vadd.f32 %v1381_v9, %v317_v61 }
  0x21   : > { %v1097_v62 = vpack.c.bf16 %v579_v60, %v579_v60  ;;  %898 = vst.msk [vmem:[%s1404_s25 + $0x14] sm:$0xf] %vm892_vm0, %v1095_v58  ;;  %v1180_v4 = vunpack.c.l.bf16 %v1287_v56  ;;  %v1181_v5 = vunpack.c.h.bf16 %v1287_v56  ;;  %v1184_v6 = vunpack.c.l.bf16 %v1288_v57 }
  0x22   : > { %899 = vst.msk [vmem:[%s1404_s25 + $0x18] sm:$0xf] %vm892_vm0, %v1096_v59  ;;  %v389_v7 = vadd.f32 %v1381_v9, %v318_v63  ;;  %v390_v8 = vadd.f32 %v1381_v9, %v319_v1  ;;  %v391_v10 = vadd.f32 %v1381_v9, %v320_v2  ;;  %v1185_v11 = vunpack.c.h.bf16 %v1288_v57 }
  0x23   : > { %900 = vst.msk [vmem:[%s1404_s25 + $0x1c] sm:$0xf] %vm892_vm0, %v1097_v62  ;;  %vm452_vm9 = vcmp.ge.f32.partialorder %v388_v3, 0.0  ;;  %v516_v12 = vmul.f32 0.2, %v388_v3  ;;  %v321_v13 = vmul.f32 %v1180_v4, %v1372_v0  ;;  %v322_v14 = vmul.f32 %v1181_v5, %v1372_v0  ;;  %v1292_v4 = vld [vmem:[%s1367_s18 + $0x58] sm:$0xff]  }
  0x24   : > { %vm453_vm10 = vcmp.ge.f32.partialorder %v389_v7, 0.0  ;;  %v517_v15 = vmul.f32 0.2, %v389_v7  ;;  %vm454_vm11 = vcmp.ge.f32.partialorder %v390_v8, 0.0  ;;  %v518_v16 = vmul.f32 0.2, %v390_v8 }
  0x25   : > { %v580_v17 = vsel %vm452_vm9, %v388_v3, %v516_v12  ;;  %vm455_vm12 = vcmp.ge.f32.partialorder %v391_v10, 0.0  ;;  %v519_v18 = vmul.f32 0.2, %v391_v10  ;;  %v392_v19 = vadd.f32 %v1381_v9, %v321_v13 }
  0x26   : > { %v1098_v20 = vpack.c.bf16 %v580_v17, %v580_v17  ;;  %v581_v21 = vsel %vm453_vm10, %v389_v7, %v517_v15  ;;  %v582_v22 = vsel %vm454_vm11, %v390_v8, %v518_v16  ;;  %v393_v23 = vadd.f32 %v1381_v9, %v322_v14 }
  0x27   : > { %v1099_v25 = vpack.c.bf16 %v581_v21, %v581_v21  ;;  %v1100_v26 = vpack.c.bf16 %v582_v22, %v582_v22  ;;  %v583_v27 = vsel %vm455_vm12, %v391_v10, %v519_v18  ;;  %vm456_vm13 = vcmp.ge.f32.partialorder %v392_v19, 0.0  ;;  %v1293_v10 = vld [vmem:[%s1367_s18 + $0x60] sm:$0xff]  }
  0x28   : > { %901 = vst.msk [vmem:[%s1404_s25 + $0x20] sm:$0xf] %vm892_vm0, %v1098_v20  ;;  %v1101_v29 = vpack.c.bf16 %v583_v27, %v583_v27  ;;  %v520_v30 = vmul.f32 0.2, %v392_v19  ;;  %vm457_vm14 = vcmp.ge.f32.partialorder %v393_v23, 0.0  ;;  %v323_v32 = vmul.f32 %v1184_v6, %v1372_v0 }
  0x29   : > { %v521_v31 = vmul.f32 0.2, %v393_v23  ;;  %902 = vst.msk [vmem:[%s1404_s25 + $0x24] sm:$0xf] %vm892_vm0, %v1099_v25  ;;  %903 = vst.msk [vmem:[%s1404_s25 + $0x28] sm:$0xf] %vm892_vm0, %v1100_v26  ;;  %v324_v33 = vmul.f32 %v1185_v11, %v1372_v0  ;;  %v1188_v34 = vunpack.c.l.bf16 %v1289_v24  ;;  %v1189_v35 = vunpack.c.h.bf16 %v1289_v24 }
  0x2a   : > { %904 = vst.msk [vmem:[%s1404_s25 + $0x2c] sm:$0xf] %vm892_vm0, %v1101_v29  ;;  %v584_v36 = vsel %vm456_vm13, %v392_v19, %v520_v30  ;;  %v1192_v38 = vunpack.c.l.bf16 %v1290_v28  ;;  %v1193_v39 = vunpack.c.h.bf16 %v1290_v28  ;;  %v394_v42 = vadd.f32 %v1381_v9, %v323_v32  ;;  %v1294_v19 = vld [vmem:[%s1367_s18 + $0x68] sm:$0xff]  }
  0x2b   : > { %v585_v37 = vsel %vm457_vm14, %v393_v23, %v521_v31  ;;  %v1102_v40 = vpack.c.bf16 %v584_v36, %v584_v36  ;;  %v395_v43 = vadd.f32 %v1381_v9, %v324_v33  ;;  %v325_v44 = vmul.f32 %v1188_v34, %v1372_v0 }
  0x2c   : > { %v1103_v41 = vpack.c.bf16 %v585_v37, %v585_v37  ;;  %v326_v45 = vmul.f32 %v1189_v35, %v1372_v0  ;;  %v327_v46 = vmul.f32 %v1192_v38, %v1372_v0  ;;  %v328_v47 = vmul.f32 %v1193_v39, %v1372_v0 }
  0x2d   : > { %905 = vst.msk [vmem:[%s1404_s25 + $0x30] sm:$0xf] %vm892_vm0, %v1102_v40  ;;  %vm458_vm15 = vcmp.ge.f32.partialorder %v394_v42, 0.0  ;;  %v522_v49 = vmul.f32 0.2, %v394_v42  ;;  %vm459_vm1 = vcmp.ge.f32.partialorder %v395_v43, 0.0  ;;  %v396_v51 = vadd.f32 %v1381_v9, %v325_v44 }
  0x2e   : > { %906 = vst.msk [vmem:[%s1404_s25 + $0x34] sm:$0xf] %vm892_vm0, %v1103_v41  ;;  %v523_v50 = vmul.f32 0.2, %v395_v43  ;;  %v397_v52 = vadd.f32 %v1381_v9, %v326_v45  ;;  %v398_v53 = vadd.f32 %v1381_v9, %v327_v46  ;;  %v399_v54 = vadd.f32 %v1381_v9, %v328_v47  ;;  %v1295_v46 = vld [vmem:[%s1367_s18 + $0x70] sm:$0xff]   ;;  %v1296_v47 = vld [vmem:[%s1367_s18 + $0x78] sm:$0xff]  }
  0x2f   : > { %v586_v55 = vsel %vm458_vm15, %v394_v42, %v522_v49  ;;  %v1196_v57 = vunpack.c.l.bf16 %v1291_v48  ;;  %v1197_v58 = vunpack.c.h.bf16 %v1291_v48  ;;  %vm460_vm2 = vcmp.ge.f32.partialorder %v396_v51, 0.0 }
  0x30   : > { %v587_v56 = vsel %vm459_vm1, %v395_v43, %v523_v50  ;;  %v1104_v59 = vpack.c.bf16 %v586_v55, %v586_v55  ;;  %v524_v61 = vmul.f32 0.2, %v396_v51  ;;  %vm461_vm3 = vcmp.ge.f32.partialorder %v397_v52, 0.0 }
  0x31   : > { %v1105_v60 = vpack.c.bf16 %v587_v56, %v587_v56  ;;  %v525_v62 = vmul.f32 0.2, %v397_v52  ;;  %vm462_vm4 = vcmp.ge.f32.partialorder %v398_v53, 0.0  ;;  %v526_v63 = vmul.f32 0.2, %v398_v53 }
  0x32   : > { %907 = vst.msk [vmem:[%s1404_s25 + $0x38] sm:$0xf] %vm892_vm0, %v1104_v59  ;;  %v588_v1 = vsel %vm460_vm2, %v396_v51, %v524_v61  ;;  %vm463_vm5 = vcmp.ge.f32.partialorder %v399_v54, 0.0  ;;  %v527_v2 = vmul.f32 0.2, %v399_v54  ;;  %v329_v3 = vmul.f32 %v1196_v57, %v1372_v0 }
  0x33   : > { %908 = vst.msk [vmem:[%s1404_s25 + $0x3c] sm:$0xf] %vm892_vm0, %v1105_v60  ;;  %v1106_v5 = vpack.c.bf16 %v588_v1, %v588_v1  ;;  %v589_v6 = vsel %vm461_vm3, %v397_v52, %v525_v62  ;;  %v590_v7 = vsel %vm462_vm4, %v398_v53, %v526_v63  ;;  %v330_v8 = vmul.f32 %v1197_v58, %v1372_v0  ;;  %v1297_v52 = vld [vmem:[%s1367_s18 + $0x80] sm:$0xff]  }
  0x34   : > { %v1107_v11 = vpack.c.bf16 %v589_v6, %v589_v6  ;;  %v1108_v12 = vpack.c.bf16 %v590_v7, %v590_v7  ;;  %v591_v13 = vsel %vm463_vm5, %v399_v54, %v527_v2  ;;  %v400_v14 = vadd.f32 %v1381_v9, %v329_v3 }
  0x35   : > { %909 = vst.msk [vmem:[%s1404_s25 + $0x40] sm:$0xf] %vm892_vm0, %v1106_v5  ;;  %v1109_v15 = vpack.c.bf16 %v591_v13, %v591_v13  ;;  %v401_v16 = vadd.f32 %v1381_v9, %v330_v8  ;;  %v1200_v17 = vunpack.c.l.bf16 %v1292_v4  ;;  %v1201_v18 = vunpack.c.h.bf16 %v1292_v4 }
  0x36   : > { %910 = vst.msk [vmem:[%s1404_s25 + $0x44] sm:$0xf] %vm892_vm0, %v1107_v11  ;;  %911 = vst.msk [vmem:[%s1404_s25 + $0x48] sm:$0xf] %vm892_vm0, %v1108_v12  ;;  %vm464_vm6 = vcmp.ge.f32.partialorder %v400_v14, 0.0  ;;  %v1204_v21 = vunpack.c.l.bf16 %v1293_v10  ;;  %v1205_v22 = vunpack.c.h.bf16 %v1293_v10  ;;  %v1208_v29 = vunpack.c.l.bf16 %v1294_v19 }
  0x37   : > { %v528_v20 = vmul.f32 0.2, %v400_v14  ;;  %912 = vst.msk [vmem:[%s1404_s25 + $0x4c] sm:$0xf] %vm892_vm0, %v1109_v15  ;;  %vm465_vm7 = vcmp.ge.f32.partialorder %v401_v16, 0.0  ;;  %v331_v24 = vmul.f32 %v1200_v17, %v1372_v0  ;;  %v332_v25 = vmul.f32 %v1201_v18, %v1372_v0 }
  0x38   : > { %v529_v23 = vmul.f32 0.2, %v401_v16  ;;  %v333_v27 = vmul.f32 %v1204_v21, %v1372_v0  ;;  %v334_v28 = vmul.f32 %v1205_v22, %v1372_v0  ;;  %v335_v37 = vmul.f32 %v1208_v29, %v1372_v0  ;;  %v1299_v29 = vld [vmem:[%s1367_s18 + $0x90] sm:$0xff]  }
  0x39   : > { %v592_v26 = vsel %vm464_vm6, %v400_v14, %v528_v20  ;;  %v402_v32 = vadd.f32 %v1381_v9, %v331_v24  ;;  %v403_v33 = vadd.f32 %v1381_v9, %v332_v25  ;;  %v1209_v45 = vunpack.c.h.bf16 %v1294_v19  ;;  %v1298_v24 = vld [vmem:[%s1367_s18 + $0x88] sm:$0xff]  }
  0x3a   : > { %v1110_v30 = vpack.c.bf16 %v592_v26, %v592_v26  ;;  %v593_v31 = vsel %vm465_vm7, %v401_v16, %v529_v23  ;;  %v404_v35 = vadd.f32 %v1381_v9, %v333_v27  ;;  %v405_v36 = vadd.f32 %v1381_v9, %v334_v28 }
  0x3b   : > { %v1111_v34 = vpack.c.bf16 %v593_v31, %v593_v31  ;;  %vm466_vm8 = vcmp.ge.f32.partialorder %v402_v32, 0.0  ;;  %v530_v38 = vmul.f32 0.2, %v402_v32  ;;  %vm467_vm9 = vcmp.ge.f32.partialorder %v403_v33, 0.0 }
  0x3c   : > { %913 = vst.msk [vmem:[%s1404_s25 + $0x50] sm:$0xf] %vm892_vm0, %v1110_v30  ;;  %v531_v39 = vmul.f32 0.2, %v403_v33  ;;  %vm468_vm10 = vcmp.ge.f32.partialorder %v404_v35, 0.0  ;;  %vm469_vm11 = vcmp.ge.f32.partialorder %v405_v36, 0.0  ;;  %v406_v44 = vadd.f32 %v1381_v9, %v335_v37 }
  0x3d   : > { %914 = vst.msk [vmem:[%s1404_s25 + $0x54] sm:$0xf] %vm892_vm0, %v1111_v34  ;;  %v532_v40 = vmul.f32 0.2, %v404_v35  ;;  %v533_v41 = vmul.f32 0.2, %v405_v36  ;;  %v594_v42 = vsel %vm466_vm8, %v402_v32, %v530_v38  ;;  %v336_v56 = vmul.f32 %v1209_v45, %v1372_v0 }
  0x3e   : > { %v595_v43 = vsel %vm467_vm9, %v403_v33, %v531_v39  ;;  %v1112_v48 = vpack.c.bf16 %v594_v42, %v594_v42  ;;  %vm470_vm12 = vcmp.ge.f32.partialorder %v406_v44, 0.0  ;;  %v534_v55 = vmul.f32 0.2, %v406_v44  ;;  %v1300_v33 = vld [vmem:[%s1367_s18 + $0x98] sm:$0xff]   ;;  %v1301_v42 = vld [vmem:[%s1367_s18 + $0xa0] sm:$0xff]  }
  0x3f   : > { %v1113_v49 = vpack.c.bf16 %v595_v43, %v595_v43  ;;  %v596_v50 = vsel %vm468_vm10, %v404_v35, %v532_v40  ;;  %v597_v51 = vsel %vm469_vm11, %v405_v36, %v533_v41  ;;  %v1212_v57 = vunpack.c.l.bf16 %v1295_v46 }
  0x40   : > { %v1114_v53 = vpack.c.bf16 %v596_v50, %v596_v50  ;;  %v1115_v54 = vpack.c.bf16 %v597_v51, %v597_v51  ;;  %915 = vst.msk [vmem:[%s1404_s25 + $0x58] sm:$0xf] %vm892_vm0, %v1112_v48  ;;  %v1213_v58 = vunpack.c.h.bf16 %v1295_v46  ;;  %v1216_v59 = vunpack.c.l.bf16 %v1296_v47 }
  0x41   : > { %916 = vst.msk [vmem:[%s1404_s25 + $0x5c] sm:$0xf] %vm892_vm0, %v1113_v49  ;;  %v598_v60 = vsel %vm470_vm12, %v406_v44, %v534_v55  ;;  %v1217_v61 = vunpack.c.h.bf16 %v1296_v47  ;;  %v1220_v62 = vunpack.c.l.bf16 %v1297_v52  ;;  %v1221_v63 = vunpack.c.h.bf16 %v1297_v52 }
  0x42   : > { %917 = vst.msk [vmem:[%s1404_s25 + $0x60] sm:$0xf] %vm892_vm0, %v1114_v53  ;;  %918 = vst.msk [vmem:[%s1404_s25 + $0x64] sm:$0xf] %vm892_vm0, %v1115_v54  ;;  %v1116_v1 = vpack.c.bf16 %v598_v60, %v598_v60  ;;  %v407_v2 = vadd.f32 %v1381_v9, %v336_v56  ;;  %v337_v3 = vmul.f32 %v1212_v57, %v1372_v0  ;;  %v1224_v37 = vunpack.c.l.bf16 %v1298_v24 }
  0x43   : > { %v338_v4 = vmul.f32 %v1213_v58, %v1372_v0  ;;  %v339_v5 = vmul.f32 %v1216_v59, %v1372_v0  ;;  %v340_v6 = vmul.f32 %v1217_v61, %v1372_v0  ;;  %v341_v7 = vmul.f32 %v1220_v62, %v1372_v0 }
  0x44   : > { %v342_v8 = vmul.f32 %v1221_v63, %v1372_v0  ;;  %919 = vst.msk [vmem:[%s1404_s25 + $0x68] sm:$0xf] %vm892_vm0, %v1116_v1  ;;  %vm471_vm13 = vcmp.ge.f32.partialorder %v407_v2, 0.0  ;;  %v535_v10 = vmul.f32 0.2, %v407_v2  ;;  %v408_v11 = vadd.f32 %v1381_v9, %v337_v3 }
  0x45   : > { %v409_v12 = vadd.f32 %v1381_v9, %v338_v4  ;;  %v410_v13 = vadd.f32 %v1381_v9, %v339_v5  ;;  %v411_v14 = vadd.f32 %v1381_v9, %v340_v6  ;;  %v412_v15 = vadd.f32 %v1381_v9, %v341_v7  ;;  %v1302_v7 = vld [vmem:[%s1367_s18 + $0xa8] sm:$0xff]  }
  0x46   : > { %v413_v16 = vadd.f32 %v1381_v9, %v342_v8  ;;  %v599_v17 = vsel %vm471_vm13, %v407_v2, %v535_v10  ;;  %vm472_vm14 = vcmp.ge.f32.partialorder %v408_v11, 0.0  ;;  %v536_v18 = vmul.f32 0.2, %v408_v11 }
  0x47   : > { %vm473_vm15 = vcmp.ge.f32.partialorder %v409_v12, 0.0  ;;  %v1117_v19 = vpack.c.bf16 %v599_v17, %v599_v17  ;;  %v537_v20 = vmul.f32 0.2, %v409_v12  ;;  %vm474_vm1 = vcmp.ge.f32.partialorder %v410_v13, 0.0 }
  0x48   : > { %v538_v21 = vmul.f32 0.2, %v410_v13  ;;  %v600_v22 = vsel %vm472_vm14, %v408_v11, %v536_v18  ;;  %vm475_vm2 = vcmp.ge.f32.partialorder %v411_v14, 0.0  ;;  %v539_v23 = vmul.f32 0.2, %v411_v14 }
  0x49   : > { %vm476_vm3 = vcmp.ge.f32.partialorder %v412_v15, 0.0  ;;  %920 = vst.msk [vmem:[%s1404_s25 + $0x6c] sm:$0xf] %vm892_vm0, %v1117_v19  ;;  %v1118_v25 = vpack.c.bf16 %v600_v22, %v600_v22  ;;  %v601_v26 = vsel %vm473_vm15, %v409_v12, %v537_v20  ;;  %v540_v28 = vmul.f32 0.2, %v412_v15  ;;  %v1303_v12 = vld [vmem:[%s1367_s18 + $0xb0] sm:$0xff]  }
  0x4a   : > { %v602_v27 = vsel %vm474_vm1, %v410_v13, %v538_v21  ;;  %v1119_v30 = vpack.c.bf16 %v601_v26, %v601_v26  ;;  %v603_v32 = vsel %vm475_vm2, %v411_v14, %v539_v23  ;;  %vm477_vm4 = vcmp.ge.f32.partialorder %v413_v16, 0.0 }
  0x4b   : > { %v1120_v31 = vpack.c.bf16 %v602_v27, %v602_v27  ;;  %921 = vst.msk [vmem:[%s1404_s25 + $0x70] sm:$0xf] %vm892_vm0, %v1118_v25  ;;  %v1121_v34 = vpack.c.bf16 %v603_v32, %v603_v32  ;;  %v604_v35 = vsel %vm476_vm3, %v412_v15, %v540_v28  ;;  %v541_v36 = vmul.f32 0.2, %v413_v16 }
  0x4c   : > { %922 = vst.msk [vmem:[%s1404_s25 + $0x74] sm:$0xf] %vm892_vm0, %v1119_v30  ;;  %v1122_v38 = vpack.c.bf16 %v604_v35, %v604_v35  ;;  %v1225_v39 = vunpack.c.h.bf16 %v1298_v24  ;;  %v1228_v40 = vunpack.c.l.bf16 %v1299_v29  ;;  %v1229_v41 = vunpack.c.h.bf16 %v1299_v29  ;;  %v1304_v29 = vld [vmem:[%s1367_s18 + $0xb8] sm:$0xff]  }
  0x4d   : > { %923 = vst.msk [vmem:[%s1404_s25 + $0x78] sm:$0xf] %vm892_vm0, %v1120_v31  ;;  %924 = vst.msk [vmem:[%s1404_s25 + $0x7c] sm:$0xf] %vm892_vm0, %v1121_v34  ;;  %v605_v43 = vsel %vm477_vm4, %v413_v16, %v541_v36  ;;  %v343_v44 = vmul.f32 %v1224_v37, %v1372_v0  ;;  %v1232_v45 = vunpack.c.l.bf16 %v1300_v33  ;;  %v1233_v46 = vunpack.c.h.bf16 %v1300_v33 }
  0x4e   : > { %925 = vst.msk [vmem:[%s1404_s25 + $0x80] sm:$0xf] %vm892_vm0, %v1122_v38  ;;  %v1123_v47 = vpack.c.bf16 %v605_v43, %v605_v43  ;;  %v344_v48 = vmul.f32 %v1225_v39, %v1372_v0  ;;  %v345_v49 = vmul.f32 %v1228_v40, %v1372_v0  ;;  %v346_v50 = vmul.f32 %v1229_v41, %v1372_v0 }
  0x4f   : > { %v414_v51 = vadd.f32 %v1381_v9, %v343_v44  ;;  %v347_v52 = vmul.f32 %v1232_v45, %v1372_v0  ;;  %v348_v53 = vmul.f32 %v1233_v46, %v1372_v0  ;;  %v1236_v54 = vunpack.c.l.bf16 %v1301_v42  ;;  %v1305_v45 = vld [vmem:[%s1367_s18 + $0xc0] sm:$0xff]  }
  0x50   : > { %926 = vst.msk [vmem:[%s1404_s25 + $0x84] sm:$0xf] %vm892_vm0, %v1123_v47  ;;  %v415_v55 = vadd.f32 %v1381_v9, %v344_v48  ;;  %v416_v56 = vadd.f32 %v1381_v9, %v345_v49  ;;  %v417_v57 = vadd.f32 %v1381_v9, %v346_v50  ;;  %v1237_v58 = vunpack.c.h.bf16 %v1301_v42 }
  0x51   : > { %vm478_vm5 = vcmp.ge.f32.partialorder %v414_v51, 0.0  ;;  %v542_v59 = vmul.f32 0.2, %v414_v51  ;;  %v418_v60 = vadd.f32 %v1381_v9, %v347_v52  ;;  %v419_v61 = vadd.f32 %v1381_v9, %v348_v53  ;;  %v1306_v53 = vld [vmem:[%s1367_s18 + $0xc8] sm:$0xff]  }
  0x52   : > { %vm479_vm6 = vcmp.ge.f32.partialorder %v415_v55, 0.0  ;;  %v543_v62 = vmul.f32 0.2, %v415_v55  ;;  %vm480_vm7 = vcmp.ge.f32.partialorder %v416_v56, 0.0  ;;  %v544_v63 = vmul.f32 0.2, %v416_v56 }
  0x53   : > { %v606_v1 = vsel %vm478_vm5, %v414_v51, %v542_v59  ;;  %vm481_vm8 = vcmp.ge.f32.partialorder %v417_v57, 0.0  ;;  %v545_v2 = vmul.f32 0.2, %v417_v57  ;;  %vm482_vm9 = vcmp.ge.f32.partialorder %v418_v60, 0.0 }
  0x54   : > { %v1124_v3 = vpack.c.bf16 %v606_v1, %v606_v1  ;;  %v607_v4 = vsel %vm479_vm6, %v415_v55, %v543_v62  ;;  %v608_v5 = vsel %vm480_vm7, %v416_v56, %v544_v63  ;;  %v546_v6 = vmul.f32 0.2, %v418_v60 }
  0x55   : > { %v1125_v8 = vpack.c.bf16 %v607_v4, %v607_v4  ;;  %v1126_v10 = vpack.c.bf16 %v608_v5, %v608_v5  ;;  %v609_v11 = vsel %vm481_vm8, %v417_v57, %v545_v2  ;;  %vm483_vm10 = vcmp.ge.f32.partialorder %v419_v61, 0.0 }
  0x56   : > { %927 = vst.msk [vmem:[%s1404_s25 + $0x88] sm:$0xf] %vm892_vm0, %v1124_v3  ;;  %v1127_v13 = vpack.c.bf16 %v609_v11, %v609_v11  ;;  %v610_v14 = vsel %vm482_vm9, %v418_v60, %v546_v6  ;;  %v547_v15 = vmul.f32 0.2, %v419_v61  ;;  %v349_v16 = vmul.f32 %v1236_v54, %v1372_v0 }
  0x57   : > { %928 = vst.msk [vmem:[%s1404_s25 + $0x8c] sm:$0xf] %vm892_vm0, %v1125_v8  ;;  %929 = vst.msk [vmem:[%s1404_s25 + $0x90] sm:$0xf] %vm892_vm0, %v1126_v10  ;;  %v1128_v17 = vpack.c.bf16 %v610_v14, %v610_v14  ;;  %v350_v18 = vmul.f32 %v1237_v58, %v1372_v0  ;;  %v1240_v19 = vunpack.c.l.bf16 %v1302_v7  ;;  %v1241_v20 = vunpack.c.h.bf16 %v1302_v7  ;;  %v1590_v58 = vld [vmem:[%s1367_s18 + $0xd0] sm:$0xff]  }
  0x58   : > { %930 = vst.msk [vmem:[%s1404_s25 + $0x94] sm:$0xf] %vm892_vm0, %v1127_v13  ;;  %v611_v21 = vsel %vm483_vm10, %v419_v61, %v547_v15  ;;  %v420_v22 = vadd.f32 %v1381_v9, %v349_v16  ;;  %v1244_v23 = vunpack.c.l.bf16 %v1303_v12  ;;  %v1245_v24 = vunpack.c.h.bf16 %v1303_v12 }
  0x59   : > { %931 = vst.msk [vmem:[%s1404_s25 + $0x98] sm:$0xf] %vm892_vm0, %v1128_v17  ;;  %v1129_v25 = vpack.c.bf16 %v611_v21, %v611_v21  ;;  %v421_v26 = vadd.f32 %v1381_v9, %v350_v18  ;;  %v351_v27 = vmul.f32 %v1240_v19, %v1372_v0  ;;  %v352_v28 = vmul.f32 %v1241_v20, %v1372_v0 }
  0x5a   : > { %vm484_vm11 = vcmp.ge.f32.partialorder %v420_v22, 0.0  ;;  %v548_v30 = vmul.f32 0.2, %v420_v22  ;;  %v353_v31 = vmul.f32 %v1244_v23, %v1372_v0  ;;  %v354_v32 = vmul.f32 %v1245_v24, %v1372_v0 }
  0x5b   : > { %932 = vst.msk [vmem:[%s1404_s25 + $0x9c] sm:$0xf] %vm892_vm0, %v1129_v25  ;;  %vm485_vm12 = vcmp.ge.f32.partialorder %v421_v26, 0.0  ;;  %v549_v33 = vmul.f32 0.2, %v421_v26  ;;  %v422_v34 = vadd.f32 %v1381_v9, %v351_v27  ;;  %v423_v35 = vadd.f32 %v1381_v9, %v352_v28  ;;  %v1308_v25 = vld [vmem:[%s1367_s18 + $0xd8] sm:$0xff]  }
  0x5c   : > { %v612_v36 = vsel %vm484_vm11, %v420_v22, %v548_v30  ;;  %v424_v37 = vadd.f32 %v1381_v9, %v353_v31  ;;  %v425_v38 = vadd.f32 %v1381_v9, %v354_v32  ;;  %v1248_v39 = vunpack.c.l.bf16 %v1304_v29 }
  0x5d   : > { %v1130_v40 = vpack.c.bf16 %v612_v36, %v612_v36  ;;  %v613_v41 = vsel %vm485_vm12, %v421_v26, %v549_v33  ;;  %vm486_vm13 = vcmp.ge.f32.partialorder %v422_v34, 0.0  ;;  %v550_v42 = vmul.f32 0.2, %v422_v34  ;;  %v1310_v36 = vld [vmem:[%s1367_s18 + $0xe8] sm:$0xff]  }
  0x5e   : > { %v1131_v43 = vpack.c.bf16 %v613_v41, %v613_v41  ;;  %vm487_vm14 = vcmp.ge.f32.partialorder %v423_v35, 0.0  ;;  %v551_v44 = vmul.f32 0.2, %v423_v35  ;;  %vm488_vm15 = vcmp.ge.f32.partialorder %v424_v37, 0.0  ;;  %v1311_v41 = vld [vmem:[%s1367_s18 + $0xf0] sm:$0xff]  }
  0x5f   : > { %933 = vst.msk [vmem:[%s1404_s25 + $0xa0] sm:$0xf] %vm892_vm0, %v1130_v40  ;;  %v614_v46 = vsel %vm486_vm13, %v422_v34, %v550_v42  ;;  %v552_v47 = vmul.f32 0.2, %v424_v37  ;;  %vm489_vm1 = vcmp.ge.f32.partialorder %v425_v38, 0.0  ;;  %v355_v51 = vmul.f32 %v1248_v39, %v1372_v0 }
  0x60   : > { %v553_v48 = vmul.f32 0.2, %v425_v38  ;;  %934 = vst.msk [vmem:[%s1404_s25 + $0xa4] sm:$0xf] %vm892_vm0, %v1131_v43  ;;  %v1132_v49 = vpack.c.bf16 %v614_v46, %v614_v46  ;;  %v615_v50 = vsel %vm487_vm14, %v423_v35, %v551_v44  ;;  %v1249_v52 = vunpack.c.h.bf16 %v1304_v29  ;;  %v1309_v35 = vld [vmem:[%s1367_s18 + $0xe0] sm:$0xff]  }
  0x61   : > { %v1133_v54 = vpack.c.bf16 %v615_v50, %v615_v50  ;;  %v616_v55 = vsel %vm488_vm15, %v424_v37, %v552_v47  ;;  %v1252_v57 = vunpack.c.l.bf16 %v1305_v45  ;;  %v426_v61 = vadd.f32 %v1381_v9, %v355_v51 }
  0x62   : > { %v617_v56 = vsel %vm489_vm1, %v425_v38, %v553_v48  ;;  %935 = vst.msk [vmem:[%s1404_s25 + $0xa8] sm:$0xf] %vm892_vm0, %v1132_v49  ;;  %v1134_v59 = vpack.c.bf16 %v616_v55, %v616_v55  ;;  %v356_v62 = vmul.f32 %v1249_v52, %v1372_v0  ;;  %v1253_v1 = vunpack.c.h.bf16 %v1305_v45 }
  0x63   : > { %v1135_v60 = vpack.c.bf16 %v617_v56, %v617_v56  ;;  %936 = vst.msk [vmem:[%s1404_s25 + $0xac] sm:$0xf] %vm892_vm0, %v1133_v54  ;;  %v357_v63 = vmul.f32 %v1252_v57, %v1372_v0  ;;  %v1256_v2 = vunpack.c.l.bf16 %v1306_v53  ;;  %v1257_v3 = vunpack.c.h.bf16 %v1306_v53 }
  0x64   : > { %937 = vst.msk [vmem:[%s1404_s25 + $0xb0] sm:$0xf] %vm892_vm0, %v1134_v59  ;;  %vm490_vm2 = vcmp.ge.f32.partialorder %v426_v61, 0.0  ;;  %v554_v4 = vmul.f32 0.2, %v426_v61  ;;  %v427_v5 = vadd.f32 %v1381_v9, %v356_v62  ;;  %v1260_v6 = vunpack.c.l.bf16 %v1590_v58 }
  0x65   : > { %938 = vst.msk [vmem:[%s1404_s25 + $0xb4] sm:$0xf] %vm892_vm0, %v1135_v60  ;;  %v428_v7 = vadd.f32 %v1381_v9, %v357_v63  ;;  %v358_v8 = vmul.f32 %v1253_v1, %v1372_v0  ;;  %v359_v10 = vmul.f32 %v1256_v2, %v1372_v0  ;;  %v360_v11 = vmul.f32 %v1257_v3, %v1372_v0 }
  0x66   : > { %v618_v12 = vsel %vm490_vm2, %v426_v61, %v554_v4  ;;  %vm491_vm3 = vcmp.ge.f32.partialorder %v427_v5, 0.0  ;;  %v555_v13 = vmul.f32 0.2, %v427_v5  ;;  %v361_v14 = vmul.f32 %v1260_v6, %v1372_v0 }
  0x67   : > { %v1136_v15 = vpack.c.bf16 %v618_v12, %v618_v12  ;;  %vm492_vm4 = vcmp.ge.f32.partialorder %v428_v7, 0.0  ;;  %v556_v16 = vmul.f32 0.2, %v428_v7  ;;  %v429_v17 = vadd.f32 %v1381_v9, %v358_v8 }
  0x68   : > { %v619_v18 = vsel %vm491_vm3, %v427_v5, %v555_v13  ;;  %v430_v19 = vadd.f32 %v1381_v9, %v359_v10  ;;  %v431_v20 = vadd.f32 %v1381_v9, %v360_v11  ;;  %v432_v21 = vadd.f32 %v1381_v9, %v361_v14 }
  0x69   : > { %939 = vst.msk [vmem:[%s1404_s25 + $0xb8] sm:$0xf] %vm892_vm0, %v1136_v15  ;;  %v1137_v22 = vpack.c.bf16 %v619_v18, %v619_v18  ;;  %v620_v23 = vsel %vm492_vm4, %v428_v7, %v556_v16  ;;  %vm493_vm5 = vcmp.ge.f32.partialorder %v429_v17, 0.0  ;;  %v557_v24 = vmul.f32 0.2, %v429_v17  ;;  %v1312_v7 = vld [vmem:[%s1367_s18 + $0xf8] sm:$0xff]  }
  0x6a   : > { %v1138_v26 = vpack.c.bf16 %v620_v23, %v620_v23  ;;  %vm494_vm6 = vcmp.ge.f32.partialorder %v430_v19, 0.0  ;;  %v558_v27 = vmul.f32 0.2, %v430_v19  ;;  %vm495_vm7 = vcmp.ge.f32.partialorder %v431_v20, 0.0 }
  0x6b   : > { %940 = vst.msk [vmem:[%s1404_s25 + $0xbc] sm:$0xf] %vm892_vm0, %v1137_v22  ;;  %v621_v28 = vsel %vm493_vm5, %v429_v17, %v557_v24  ;;  %v559_v29 = vmul.f32 0.2, %v431_v20  ;;  %vm496_vm8 = vcmp.ge.f32.partialorder %v432_v21, 0.0  ;;  %v1261_v33 = vunpack.c.h.bf16 %v1590_v58 }
  0x6c   : > { %v560_v30 = vmul.f32 0.2, %v432_v21  ;;  %941 = vst.msk [vmem:[%s1404_s25 + $0xc0] sm:$0xf] %vm892_vm0, %v1138_v26  ;;  %v1139_v31 = vpack.c.bf16 %v621_v28, %v621_v28  ;;  %v622_v32 = vsel %vm494_vm6, %v430_v19, %v558_v27  ;;  %v1264_v34 = vunpack.c.l.bf16 %v1308_v25 }
  0x6d   : > { %v1140_v37 = vpack.c.bf16 %v622_v32, %v622_v32  ;;  %v623_v38 = vsel %vm495_vm7, %v431_v20, %v559_v29  ;;  %v1265_v40 = vunpack.c.h.bf16 %v1308_v25  ;;  %v362_v44 = vmul.f32 %v1261_v33, %v1372_v0 }
  0x6e   : > { %v624_v39 = vsel %vm496_vm8, %v432_v21, %v560_v30  ;;  %942 = vst.msk [vmem:[%s1404_s25 + $0xc4] sm:$0xf] %vm892_vm0, %v1139_v31  ;;  %v1141_v42 = vpack.c.bf16 %v623_v38, %v623_v38  ;;  %v363_v45 = vmul.f32 %v1264_v34, %v1372_v0  ;;  %v1268_v47 = vunpack.c.l.bf16 %v1309_v35 }
  0x6f   : > { %v1142_v43 = vpack.c.bf16 %v624_v39, %v624_v39  ;;  %943 = vst.msk [vmem:[%s1404_s25 + $0xc8] sm:$0xf] %vm892_vm0, %v1140_v37  ;;  %v364_v46 = vmul.f32 %v1265_v40, %v1372_v0  ;;  %v1269_v48 = vunpack.c.h.bf16 %v1309_v35  ;;  %v1272_v49 = vunpack.c.l.bf16 %v1310_v36 }
  0x70   : > { %944 = vst.msk [vmem:[%s1404_s25 + $0xcc] sm:$0xf] %vm892_vm0, %v1141_v42  ;;  %v433_v50 = vadd.f32 %v1381_v9, %v362_v44  ;;  %v434_v51 = vadd.f32 %v1381_v9, %v363_v45  ;;  %v1273_v52 = vunpack.c.h.bf16 %v1310_v36  ;;  %v1276_v53 = vunpack.c.l.bf16 %v1311_v41 }
  0x71   : > { %945 = vst.msk [vmem:[%s1404_s25 + $0xd0] sm:$0xf] %vm892_vm0, %v1142_v43  ;;  %v435_v54 = vadd.f32 %v1381_v9, %v364_v46  ;;  %v365_v55 = vmul.f32 %v1268_v47, %v1372_v0  ;;  %v366_v56 = vmul.f32 %v1269_v48, %v1372_v0  ;;  %v367_v57 = vmul.f32 %v1272_v49, %v1372_v0 }
  0x72   : > { %vm497_vm9 = vcmp.ge.f32.partialorder %v433_v50, 0.0  ;;  %v561_v58 = vmul.f32 0.2, %v433_v50  ;;  %vm498_vm10 = vcmp.ge.f32.partialorder %v434_v51, 0.0  ;;  %v562_v59 = vmul.f32 0.2, %v434_v51 }
  0x73   : > { %vm499_vm11 = vcmp.ge.f32.partialorder %v435_v54, 0.0  ;;  %v563_v60 = vmul.f32 0.2, %v435_v54  ;;  %v436_v61 = vadd.f32 %v1381_v9, %v365_v55  ;;  %v437_v62 = vadd.f32 %v1381_v9, %v366_v56 }
  0x74   : > { %v625_v63 = vsel %vm497_vm9, %v433_v50, %v561_v58  ;;  %v626_v1 = vsel %vm498_vm10, %v434_v51, %v562_v59  ;;  %v438_v2 = vadd.f32 %v1381_v9, %v367_v57  ;;  %v368_v3 = vmul.f32 %v1273_v52, %v1372_v0 }
  0x75   : > { %v1143_v4 = vpack.c.bf16 %v625_v63, %v625_v63  ;;  %v1144_v5 = vpack.c.bf16 %v626_v1, %v626_v1  ;;  %v627_v6 = vsel %vm499_vm11, %v435_v54, %v563_v60  ;;  %vm500_vm12 = vcmp.ge.f32.partialorder %v436_v61, 0.0 }
  0x76   : > { %v1145_v8 = vpack.c.bf16 %v627_v6, %v627_v6  ;;  %v564_v10 = vmul.f32 0.2, %v436_v61  ;;  %vm501_vm13 = vcmp.ge.f32.partialorder %v437_v62, 0.0  ;;  %v565_v11 = vmul.f32 0.2, %v437_v62 }
  0x77   : > { %946 = vst.msk [vmem:[%s1404_s25 + $0xd4] sm:$0xf] %vm892_vm0, %v1143_v4  ;;  %947 = vst.msk [vmem:[%s1404_s25 + $0xd8] sm:$0xf] %vm892_vm0, %v1144_v5  ;;  %vm502_vm14 = vcmp.ge.f32.partialorder %v438_v2, 0.0  ;;  %v439_v13 = vadd.f32 %v1381_v9, %v368_v3  ;;  %v369_v14 = vmul.f32 %v1276_v53, %v1372_v0  ;;  %v1277_v17 = vunpack.c.h.bf16 %v1311_v41 }
  0x78   : > { %v566_v12 = vmul.f32 0.2, %v438_v2  ;;  %948 = vst.msk [vmem:[%s1404_s25 + $0xdc] sm:$0xf] %vm892_vm0, %v1145_v8  ;;  %v628_v15 = vsel %vm500_vm12, %v436_v61, %v564_v10  ;;  %v629_v16 = vsel %vm501_vm13, %v437_v62, %v565_v11  ;;  %v1280_v18 = vunpack.c.l.bf16 %v1312_v7  ;;  %v1321_v0 = vld [vmem:[%s1682_s1] ss:$0 sm:$0xff] }
  0x79   : > { %v1146_v19 = vpack.c.bf16 %v628_v15, %v628_v15  ;;  %v1147_v20 = vpack.c.bf16 %v629_v16, %v629_v16  ;;  %vm503_vm15 = vcmp.ge.f32.partialorder %v439_v13, 0.0  ;;  %v567_v23 = vmul.f32 0.2, %v439_v13 }
  0x7a   : > { %v630_v21 = vsel %vm502_vm14, %v438_v2, %v566_v12  ;;  %v440_v24 = vadd.f32 %v1381_v9, %v369_v14  ;;  %v370_v25 = vmul.f32 %v1321_v0, %v1277_v17  ;;  %v371_v26 = vmul.f32 %v1321_v0, %v1280_v18  ;;  %v1322_v9 = vld [vmem:[%s1683_s2] ss:$0 sm:$0xff] }
  0x7b   : > { %v1148_v22 = vpack.c.bf16 %v630_v21, %v630_v21  ;;  %949 = vst.msk [vmem:[%s1404_s25 + $0xe0] sm:$0xf] %vm892_vm0, %v1146_v19  ;;  %950 = vst.msk [vmem:[%s1404_s25 + $0xe4] sm:$0xf] %vm892_vm0, %v1147_v20  ;;  %v1281_v27 = vunpack.c.h.bf16 %v1312_v7  ;;  %v631_v28 = vsel %vm503_vm15, %v439_v13, %v567_v23 }
  0x7c   : > { %vm504_vm1 = vcmp.ge.f32.partialorder %v440_v24, 0.0  ;;  %v568_v29 = vmul.f32 0.2, %v440_v24  ;;  %v441_v30 = vadd.f32 %v1322_v9, %v370_v25  ;;  %v1149_v31 = vpack.c.bf16 %v631_v28, %v631_v28 }
  0x7d   : > { %951 = vst.msk [vmem:[%s1404_s25 + $0xe8] sm:$0xf] %vm892_vm0, %v1148_v22  ;;  %v442_v32 = vadd.f32 %v1322_v9, %v371_v26  ;;  %v372_v33 = vmul.f32 %v1321_v0, %v1281_v27 }
  0x7e   : > { %v632_v34 = vsel %vm504_vm1, %v440_v24, %v568_v29  ;;  %vm505_vm2 = vcmp.ge.f32.partialorder %v441_v30, 0.0  ;;  %v569_v35 = vmul.f32 0.2, %v441_v30  ;;  %952 = vst.msk [vmem:[%s1404_s25 + $0xec] sm:$0xf] %vm892_vm0, %v1149_v31 }
  0x7f   : > { %v1150_v36 = vpack.c.bf16 %v632_v34, %v632_v34  ;;  %vm506_vm3 = vcmp.ge.f32.partialorder %v442_v32, 0.0  ;;  %v570_v37 = vmul.f32 0.2, %v442_v32  ;;  %v443_v38 = vadd.f32 %v1322_v9, %v372_v33 }
  0x80   : > { %v633_v39 = vsel %vm505_vm2, %v441_v30, %v569_v35 }
  0x81   : > { %953 = vst.msk [vmem:[%s1404_s25 + $0xf0] sm:$0xf] %vm892_vm0, %v1150_v36  ;;  %v1151_v40 = vpack.c.bf16 %v633_v39, %v633_v39  ;;  %v634_v41 = vsel %vm506_vm3, %v442_v32, %v570_v37  ;;  %vm507_vm4 = vcmp.ge.f32.partialorder %v443_v38, 0.0  ;;  %v571_v42 = vmul.f32 0.2, %v443_v38 }
  0x82   : > { %v1152_v43 = vpack.c.bf16 %v634_v41, %v634_v41 }
  0x83   : > { %954 = vst.msk [vmem:[%s1404_s25 + $0xf4] sm:$0xf] %vm892_vm0, %v1151_v40  ;;  %v635_v44 = vsel %vm507_vm4, %v443_v38, %v571_v42 }
  0x84   : > { %955 = vst.msk [vmem:[%s1404_s25 + $0xf8] sm:$0xf] %vm892_vm0, %v1152_v43  ;;  %v1153_v45 = vpack.c.bf16 %v635_v44, %v635_v44 }
  0x86   : > { %956 = vst.msk [vmem:[%s1404_s25 + $0xfc] sm:$0xf] %vm892_vm0, %v1153_v45 }
  0x87 PF: > { %s13_s12 = sadd.s32 1, %s1329_s12  }
  0x88   : > { %p10_p4 = scmp.ge.s32.totalorder %s13_s12, 4  }
  0x8a   :  { %12 = sbr.rel (!%p10_p4) target bundleno = 1 (0x1), region = 62 }

// kernel: _lambda_.15
= control target key start
LH: loop header
LB: loop body
LE: loop exit
PB: predicated region body
PF: predicated region fallthrough
CT: control target
= control target key end

     0   :  { %s2245_s18 = smov 0   ;;  %s2953_s0 = inlined_call_operand.vmem [shape: bf16[1024,144], index: 0, kind: input, shape index: {}]   ;;  %s2954_s1 = inlined_call_operand.vmem [shape: bf16[144,32], index: 1, kind: input, shape index: {}]   ;;  %s2955_s2 = inlined_call_operand.vmem [shape: f32[1,32], index: 2, kind: input, shape index: {}]   ;;  %s2956_s3 = inlined_call_operand.vmem [shape: bf16[1024,32], index: 3, kind: output, shape index: {0}]   ;;  %s2957_s4 = inlined_call_operand.vmem [shape: f32[2,1,32], index: 4, kind: output, shape index: {1}]   ;;  %s2958_s5 = inlined_call_operand.vmem [shape: f32[2,1,32], index: 5, kind: output, shape index: {2}]  }
   0x1 LB: > { %s2251_s19 = sadd.s32 4294967295, %s2212_s18   ;;  %p1831_p0 = scmp.ge.s32.totalorder %s2212_s18, 1  ;;  %s2212_s18 = sphi %s2245_s18, %s16_s18  }
   0x2   : > { %p194_p1 = scmp.lt.s32.totalorder %s2212_s18, 3 }
   0x4   : > { %p195_p2 = pnand %p1831_p0, %p194_p1 }
   0x5   : > { %v2101_v0 = vld [vmem:[%s2954_s1] sm:$0xff] (!%p195_p2)   ;;  %v2214_v1 = vmov (!%p195_p2), 0   ;;  %s1832_s22 = sshll.u32 (!%p195_p2), %s2251_s19, 6  ;;  %v2102_v2 = vld [vmem:[%s2954_s1 + $0x8] sm:$0xff] (!%p195_p2)   ;;  %v2103_v3 = vld [vmem:[%s2954_s1 + $0x10] sm:$0xff] (!%p195_p2)   ;;  %vm680_vm0 = vcmask (!%p195_p2), 130048  }
   0x6   : > { %198 = sbr.rel (%p195_p2) target bundleno = 460 (0x1cc), region = 32  ;;  %777 = vmatprep.subr.bf16.mxu0 (!%p195_p2), %v2214_v1  ;;  %2074 = vmatprep.subr.bf16.mxu1 (!%p195_p2), %v2214_v1  ;;  %p230_p3 = scmp.lt.s32.totalorder (!%p195_p2), %s1832_s22, 127  ;;  %v2104_v4 = vld [vmem:[%s2954_s1 + $0x18] sm:$0xff] (!%p195_p2)   ;;  %v2105_v6 = vld [vmem:[%s2954_s1 + $0x20] sm:$0xff] (!%p195_p2)   ;;  %v2106_v7 = vld [vmem:[%s2954_s1 + $0x28] sm:$0xff] (!%p195_p2)   ;;  %vm1322_vm1 = vcmask (!%p195_p2), 257024  }
   0x7   : > { %778 = vmatpush1.bf16.msra.mxu0 (!%p195_p2), %v2101_v0  ;;  %2083 = vmatpush1.bf16.msra.mxu1 (!%p195_p2), %v2101_v0  ;;  %v2107_v9 = vld [vmem:[%s2954_s1 + $0x30] sm:$0xff] (!%p195_p2)   ;;  %v2108_v10 = vld [vmem:[%s2954_s1 + $0x38] sm:$0xff] (!%p195_p2)   ;;  %v2109_v11 = vld [vmem:[%s2954_s1 + $0x40] sm:$0xff] (!%p195_p2)   ;;  %vm1387_vm2 = vcmask (!%p195_p2), 261120   ;;  %p242_p4 = scmp.lt.s32.totalorder (!%p195_p2), %s2251_s19, 1  ;;  %vm1521_vm3 = vcmask (!%p195_p2), 253952  }
   0x8   : > { %779 = vmatprep.subr.bf16.mxu0 (!%p195_p2), %v2214_v1  ;;  %2075 = vmatprep.subr.bf16.mxu1 (!%p195_p2), %v2214_v1 }
   0xb   : > { %780 = vmatpush1.bf16.msra.mxu0 (!%p195_p2), %v2102_v2  ;;  %2084 = vmatpush1.bf16.msra.mxu1 (!%p195_p2), %v2102_v2 }
   0xc   : > { %781 = vmatprep.subr.bf16.mxu0 (!%p195_p2), %v2214_v1  ;;  %2076 = vmatprep.subr.bf16.mxu1 (!%p195_p2), %v2214_v1 }
   0xd   : > { %s2960_s22 = smov (!%p230_p3, %s1832_s22), 127  ;;  %s2962_s19 = smov (!%p242_p4, %s2251_s19), 1 }
   0xe   : > { %s2009_s27 = sshll.u32 %s2960_s22, 3  ;;  %s1836_s23 = sshll.u32 %s2960_s22, 2 }
   0xf   : > { %s2271_s30 = scalar_lea.vmem %s2953_s0, %s2009_s27  ;;  %782 = vmatpush1.bf16.msra.mxu0 %v2103_v3  ;;  %2085 = vmatpush1.bf16.msra.mxu1 %v2103_v3  ;;  %s2400_s26 = scalar_lea.vmem %s2956_s3, %s1836_s23 }
  0x10   : > { %v2112_v5 = vld [vmem:[%s2271_s30 + $0x4] ss:$8 sps:$4 sm:$0xff]   ;;  %783 = vmatprep.subr.bf16.mxu0 %v2214_v1  ;;  %2077 = vmatprep.subr.bf16.mxu1 %v2214_v1  ;;  %v2110_v12 = vld [vmem:[%s2271_s30] ss:$8 sps:$4 sm:$0xff]   ;;  %v2113_v13 = vld [vmem:[%s2271_s30 + $0x14] ss:$8 sps:$4 sm:$0xff]   ;;  %s244_s28 = scalar_lea.vmem %s2957_s4, %s2962_s19  ;;  %s247_s6 = scalar_lea.vmem %s2958_s5, %s2962_s19 }
  0x11   : > { %1911 = vmatprep.mubr.msk.bf16.mxu0 %vm680_vm0, %v2112_v5  ;;  %v2136_v8 = vld [vmem:[%s2271_s30 + $0x104] ss:$8 sps:$4 sm:$0xff]   ;;  %v2134_v14 = vld [vmem:[%s2271_s30 + $0x100] ss:$8 sps:$4 sm:$0xff]   ;;  %v2140_v15 = vld [vmem:[%s2271_s30 + $0x114] ss:$8 sps:$4 sm:$0xff]  }
  0x12   : > { %1927 = vmatprep.mubr.msk.bf16.mxu1 %vm680_vm0, %v2136_v8  ;;  %v2115_v16 = vld [vmem:[%s2271_s30 + $0x10] ss:$8 sps:$4 sm:$0xff]   ;;  %v2116_v17 = vld [vmem:[%s2271_s30 + $0x24] ss:$8 sps:$4 sm:$0xff]   ;;  %v2118_v20 = vld [vmem:[%s2271_s30 + $0x20] ss:$8 sps:$4 sm:$0xff]  }
  0x13   : > { %784 = vmatpush1.bf16.msra.mxu0 %v2104_v4  ;;  %2086 = vmatpush1.bf16.msra.mxu1 %v2104_v4  ;;  %v2142_v18 = vld [vmem:[%s2271_s30 + $0x110] ss:$8 sps:$4 sm:$0xff]   ;;  %v2146_v19 = vld [vmem:[%s2271_s30 + $0x124] ss:$8 sps:$4 sm:$0xff]   ;;  %v2119_v21 = vld [vmem:[%s2271_s30 + $0x34] ss:$8 sps:$4 sm:$0xff]  }
  0x14   : > { %785 = vmatprep.subr.bf16.mxu0 %v2214_v1  ;;  %2078 = vmatprep.subr.bf16.mxu1 %v2214_v1  ;;  %v2148_v22 = vld [vmem:[%s2271_s30 + $0x120] ss:$8 sps:$4 sm:$0xff]   ;;  %v2152_v23 = vld [vmem:[%s2271_s30 + $0x134] ss:$8 sps:$4 sm:$0xff]   ;;  %v2121_v24 = vld [vmem:[%s2271_s30 + $0x30] ss:$8 sps:$4 sm:$0xff]  }
  0x15   : > { %v2154_v25 = vld [vmem:[%s2271_s30 + $0x130] ss:$8 sps:$4 sm:$0xff]   ;;  %v2122_v26 = vld [vmem:[%s2271_s30 + $0x44] ss:$8 sps:$4 sm:$0xff]   ;;  %v2124_v28 = vld [vmem:[%s2271_s30 + $0x40] ss:$8 sps:$4 sm:$0xff]  }
  0x16   : > { %v2158_v27 = vld [vmem:[%s2271_s30 + $0x144] ss:$8 sps:$4 sm:$0xff]   ;;  %v2160_v29 = vld [vmem:[%s2271_s30 + $0x140] ss:$8 sps:$4 sm:$0xff]   ;;  %v2125_v30 = vld [vmem:[%s2271_s30 + $0x54] ss:$8 sps:$4 sm:$0xff]  }
  0x17   : > { %786 = vmatpush1.bf16.msra.mxu0 %v2105_v6  ;;  %2087 = vmatpush1.bf16.msra.mxu1 %v2105_v6  ;;  %v2164_v31 = vld [vmem:[%s2271_s30 + $0x154] ss:$8 sps:$4 sm:$0xff]   ;;  %v2127_v32 = vld [vmem:[%s2271_s30 + $0x50] ss:$8 sps:$4 sm:$0xff]   ;;  %v2128_v34 = vld [vmem:[%s2271_s30 + $0x64] ss:$8 sps:$4 sm:$0xff]  }
  0x18   : > { %787 = vmatprep.subr.bf16.mxu0 %v2214_v1  ;;  %2079 = vmatprep.subr.bf16.mxu1 %v2214_v1  ;;  %v2166_v33 = vld [vmem:[%s2271_s30 + $0x150] ss:$8 sps:$4 sm:$0xff]   ;;  %v2170_v35 = vld [vmem:[%s2271_s30 + $0x164] ss:$8 sps:$4 sm:$0xff]   ;;  %v2130_v36 = vld [vmem:[%s2271_s30 + $0x60] ss:$8 sps:$4 sm:$0xff]  }
  0x19   : > { %v2172_v37 = vld [vmem:[%s2271_s30 + $0x160] ss:$8 sps:$4 sm:$0xff]   ;;  %v2131_v38 = vld [vmem:[%s2271_s30 + $0x74] ss:$8 sps:$4 sm:$0xff]   ;;  %v2133_v40 = vld [vmem:[%s2271_s30 + $0x70] ss:$8 sps:$4 sm:$0xff]  }
  0x1a   : > { %v2176_v39 = vld [vmem:[%s2271_s30 + $0x174] ss:$8 sps:$4 sm:$0xff]   ;;  %v2178_v41 = vld [vmem:[%s2271_s30 + $0x170] ss:$8 sps:$4 sm:$0xff]   ;;  %v2137_v42 = vld [vmem:[%s2271_s30 + $0x84] ss:$8 sps:$4 sm:$0xff]  }
  0x1b   : > { %788 = vmatpush1.bf16.msra.mxu0 %v2106_v7  ;;  %2088 = vmatpush1.bf16.msra.mxu1 %v2106_v7  ;;  %v2182_v43 = vld [vmem:[%s2271_s30 + $0x184] ss:$8 sps:$4 sm:$0xff]   ;;  %v2139_v44 = vld [vmem:[%s2271_s30 + $0x80] ss:$8 sps:$4 sm:$0xff]   ;;  %v2143_v46 = vld [vmem:[%s2271_s30 + $0x94] ss:$8 sps:$4 sm:$0xff]  }
  0x1c   : > { %789 = vmatprep.subr.bf16.mxu0 %v2214_v1  ;;  %2080 = vmatprep.subr.bf16.mxu1 %v2214_v1  ;;  %v2184_v45 = vld [vmem:[%s2271_s30 + $0x180] ss:$8 sps:$4 sm:$0xff]   ;;  %v2185_v47 = vld [vmem:[%s2271_s30 + $0x194] ss:$8 sps:$4 sm:$0xff]   ;;  %v2145_v48 = vld [vmem:[%s2271_s30 + $0x90] ss:$8 sps:$4 sm:$0xff]  }
  0x1d   : > { %v2187_v49 = vld [vmem:[%s2271_s30 + $0x190] ss:$8 sps:$4 sm:$0xff]   ;;  %v2149_v50 = vld [vmem:[%s2271_s30 + $0xa4] ss:$8 sps:$4 sm:$0xff]   ;;  %v2151_v52 = vld [vmem:[%s2271_s30 + $0xa0] ss:$8 sps:$4 sm:$0xff]  }
  0x1e   : > { %v2188_v51 = vld [vmem:[%s2271_s30 + $0x1a4] ss:$8 sps:$4 sm:$0xff]   ;;  %v2190_v53 = vld [vmem:[%s2271_s30 + $0x1a0] ss:$8 sps:$4 sm:$0xff]   ;;  %v2155_v54 = vld [vmem:[%s2271_s30 + $0xb4] ss:$8 sps:$4 sm:$0xff]  }
  0x1f   : > { %790 = vmatpush1.bf16.msra.mxu0 %v2107_v9  ;;  %2089 = vmatpush1.bf16.msra.mxu1 %v2107_v9  ;;  %v2191_v55 = vld [vmem:[%s2271_s30 + $0x1b4] ss:$8 sps:$4 sm:$0xff]   ;;  %v2157_v56 = vld [vmem:[%s2271_s30 + $0xb0] ss:$8 sps:$4 sm:$0xff]   ;;  %v2161_v58 = vld [vmem:[%s2271_s30 + $0xc4] ss:$8 sps:$4 sm:$0xff]  }
  0x20   : > { %791 = vmatprep.subr.bf16.mxu0 %v2214_v1  ;;  %2081 = vmatprep.subr.bf16.mxu1 %v2214_v1  ;;  %v2193_v57 = vld [vmem:[%s2271_s30 + $0x1b0] ss:$8 sps:$4 sm:$0xff]   ;;  %v2194_v59 = vld [vmem:[%s2271_s30 + $0x1c4] ss:$8 sps:$4 sm:$0xff]   ;;  %v2163_v60 = vld [vmem:[%s2271_s30 + $0xc0] ss:$8 sps:$4 sm:$0xff]  }
  0x21   : > { %v2196_v61 = vld [vmem:[%s2271_s30 + $0x1c0] ss:$8 sps:$4 sm:$0xff]   ;;  %v2167_v62 = vld [vmem:[%s2271_s30 + $0xd4] ss:$8 sps:$4 sm:$0xff]   ;;  %v2169_v0 = vld [vmem:[%s2271_s30 + $0xd0] ss:$8 sps:$4 sm:$0xff]  }
  0x22   : > { %v2197_v63 = vld [vmem:[%s2271_s30 + $0x1d4] ss:$8 sps:$4 sm:$0xff]   ;;  %v2173_v2 = vld [vmem:[%s2271_s30 + $0xe4] ss:$8 sps:$4 sm:$0xff]   ;;  %v2175_v4 = vld [vmem:[%s2271_s30 + $0xe0] ss:$8 sps:$4 sm:$0xff]  }
  0x23   : > { %792 = vmatpush1.bf16.msra.mxu0 %v2108_v10  ;;  %2090 = vmatpush1.bf16.msra.mxu1 %v2108_v10  ;;  %v2200_v3 = vld [vmem:[%s2271_s30 + $0x1e4] ss:$8 sps:$4 sm:$0xff]   ;;  %v2202_v5 = vld [vmem:[%s2271_s30 + $0x1e0] ss:$8 sps:$4 sm:$0xff]   ;;  %v2179_v6 = vld [vmem:[%s2271_s30 + $0xf4] ss:$8 sps:$4 sm:$0xff]  }
  0x24   : > { %793 = vmatprep.subr.bf16.mxu0 %v2214_v1  ;;  %2082 = vmatprep.subr.bf16.mxu1 %v2214_v1  ;;  %v2199_v1 = vld [vmem:[%s2271_s30 + $0x1d0] ss:$8 sps:$4 sm:$0xff]   ;;  %v2203_v7 = vld [vmem:[%s2271_s30 + $0x1f4] ss:$8 sps:$4 sm:$0xff]   ;;  %v2390_v10 = vld [vmem:[%s2955_s2] ss:$0 sm:$0xff] }
  0x25   : > { %v2181_v8 = vld [vmem:[%s2271_s30 + $0xf0] ss:$8 sps:$4 sm:$0xff]  }
  0x26   : > { %v2205_v9 = vld [vmem:[%s2271_s30 + $0x1f0] ss:$8 sps:$4 sm:$0xff]  }
  0x27   : > { %794 = vmatpush1.bf16.msra.mxu0 %v2109_v11  ;;  %2091 = vmatpush1.bf16.msra.mxu1 %v2109_v11 }
  0x2a   : > { %810 = vmatmul.mubr.bf16.vlgmr.msra.gmra.mrb[0].mxu0 %v2110_v12  ;;  %938 = vmatmul.mubr.bf16.vlgmr.msra.gmra.mrb[0].mxu1 %v2134_v14 }
  0x2b   : > { %1912 = vmatprep.mubr.msk.bf16.mxu0 %vm680_vm0, %v2113_v13  ;;  %1928 = vmatprep.mubr.msk.bf16.mxu1 %vm680_vm0, %v2140_v15 }
  0x32   : > { %818 = vmatmul.mubr.bf16.gmra.mrb[4].mxu0 %v2115_v16  ;;  %946 = vmatmul.mubr.bf16.gmra.mrb[4].mxu1 %v2142_v18 }
  0x33   : > { %1913 = vmatprep.mubr.msk.bf16.mxu0 %vm680_vm0, %v2116_v17  ;;  %1929 = vmatprep.mubr.msk.bf16.mxu1 %vm680_vm0, %v2146_v19 }
  0x3a   : > { %826 = vmatmul.mubr.bf16.gmra.mrb[8].mxu0 %v2118_v20  ;;  %954 = vmatmul.mubr.bf16.gmra.mrb[8].mxu1 %v2148_v22 }
  0x3b   : > { %1914 = vmatprep.mubr.msk.bf16.mxu0 %vm680_vm0, %v2119_v21  ;;  %1930 = vmatprep.mubr.msk.bf16.mxu1 %vm680_vm0, %v2152_v23 }
  0x42   : > { %834 = vmatmul.mubr.bf16.gmra.mrb[12].mxu0 %v2121_v24  ;;  %962 = vmatmul.mubr.bf16.gmra.mrb[12].mxu1 %v2154_v25 }
  0x43   : > { %1915 = vmatprep.mubr.msk.bf16.mxu0 %vm680_vm0, %v2122_v26  ;;  %1931 = vmatprep.mubr.msk.bf16.mxu1 %vm680_vm0, %v2158_v27 }
  0x4a   : > { %842 = vmatmul.mubr.bf16.gmra.mrb[16].mxu0 %v2124_v28  ;;  %970 = vmatmul.mubr.bf16.gmra.mrb[16].mxu1 %v2160_v29 }
  0x4b   : > { %1916 = vmatprep.mubr.msk.bf16.mxu0 %vm680_vm0, %v2125_v30  ;;  %1932 = vmatprep.mubr.msk.bf16.mxu1 %vm680_vm0, %v2164_v31 }
  0x52   : > { %850 = vmatmul.mubr.bf16.gmra.mrb[20].mxu0 %v2127_v32  ;;  %978 = vmatmul.mubr.bf16.gmra.mrb[20].mxu1 %v2166_v33 }
  0x53   : > { %1917 = vmatprep.mubr.msk.bf16.mxu0 %vm680_vm0, %v2128_v34  ;;  %1933 = vmatprep.mubr.msk.bf16.mxu1 %vm680_vm0, %v2170_v35 }
  0x5a   : > { %858 = vmatmul.mubr.bf16.gmra.mrb[24].mxu0 %v2130_v36  ;;  %986 = vmatmul.mubr.bf16.gmra.mrb[24].mxu1 %v2172_v37 }
  0x5b   : > { %1918 = vmatprep.mubr.msk.bf16.mxu0 %vm680_vm0, %v2131_v38  ;;  %1934 = vmatprep.mubr.msk.bf16.mxu1 %vm680_vm0, %v2176_v39 }
  0x62   : > { %866 = vmatmul.mubr.bf16.gmra.mrb[28].mxu0 %v2133_v40  ;;  %994 = vmatmul.mubr.bf16.gmra.mrb[28].mxu1 %v2178_v41 }
  0x63   : > { %1919 = vmatprep.mubr.msk.bf16.mxu0 %vm680_vm0, %v2137_v42  ;;  %1935 = vmatprep.mubr.msk.bf16.mxu1 %vm680_vm0, %v2182_v43 }
  0x6a   : > { %874 = vmatmul.mubr.bf16.gmra.mrb[32].mxu0 %v2139_v44  ;;  %1002 = vmatmul.mubr.bf16.gmra.mrb[32].mxu1 %v2184_v45 }
  0x6b   : > { %1920 = vmatprep.mubr.msk.bf16.mxu0 %vm680_vm0, %v2143_v46  ;;  %1936 = vmatprep.mubr.msk.bf16.mxu1 %vm680_vm0, %v2185_v47 }
  0x72   : > { %882 = vmatmul.mubr.bf16.gmra.mrb[36].mxu0 %v2145_v48  ;;  %1010 = vmatmul.mubr.bf16.gmra.mrb[36].mxu1 %v2187_v49 }
  0x73   : > { %1921 = vmatprep.mubr.msk.bf16.mxu0 %vm680_vm0, %v2149_v50  ;;  %1937 = vmatprep.mubr.msk.bf16.mxu1 %vm680_vm0, %v2188_v51 }
  0x7a   : > { %890 = vmatmul.mubr.bf16.gmra.mrb[40].mxu0 %v2151_v52  ;;  %1018 = vmatmul.mubr.bf16.gmra.mrb[40].mxu1 %v2190_v53 }
  0x7b   : > { %1922 = vmatprep.mubr.msk.bf16.mxu0 %vm680_vm0, %v2155_v54  ;;  %1938 = vmatprep.mubr.msk.bf16.mxu1 %vm680_vm0, %v2191_v55 }
  0x82   : > { %898 = vmatmul.mubr.bf16.gmra.mrb[44].mxu0 %v2157_v56  ;;  %1026 = vmatmul.mubr.bf16.gmra.mrb[44].mxu1 %v2193_v57 }
  0x83   : > { %1923 = vmatprep.mubr.msk.bf16.mxu0 %vm680_vm0, %v2161_v58  ;;  %1939 = vmatprep.mubr.msk.bf16.mxu1 %vm680_vm0, %v2194_v59 }
  0x8a   : > { %906 = vmatmul.mubr.bf16.gmra.mrb[48].mxu0 %v2163_v60  ;;  %1034 = vmatmul.mubr.bf16.gmra.mrb[48].mxu1 %v2196_v61 }
  0x8b   : > { %1924 = vmatprep.mubr.msk.bf16.mxu0 %vm680_vm0, %v2167_v62  ;;  %1940 = vmatprep.mubr.msk.bf16.mxu1 %vm680_vm0, %v2197_v63 }
  0x92   : > { %914 = vmatmul.mubr.bf16.gmra.mrb[52].mxu0 %v2169_v0  ;;  %1042 = vmatmul.mubr.bf16.gmra.mrb[52].mxu1 %v2199_v1 }
  0x93   : > { %1925 = vmatprep.mubr.msk.bf16.mxu0 %vm680_vm0, %v2173_v2  ;;  %1941 = vmatprep.mubr.msk.bf16.mxu1 %vm680_vm0, %v2200_v3 }
  0x9a   : > { %922 = vmatmul.mubr.bf16.gmra.mrb[56].mxu0 %v2175_v4  ;;  %1050 = vmatmul.mubr.bf16.gmra.mrb[56].mxu1 %v2202_v5 }
  0x9b   : > { %1926 = vmatprep.mubr.msk.bf16.mxu0 %vm680_vm0, %v2179_v6  ;;  %1942 = vmatprep.mubr.msk.bf16.mxu1 %vm680_vm0, %v2203_v7 }
  0xa2   : > { %930 = vmatmul.mubr.bf16.gmra.mrb[60].mxu0 %v2181_v8  ;;  %1058 = vmatmul.mubr.bf16.gmra.mrb[60].mxu1 %v2205_v9 }
  0xfd   : > { %v811_v11 = vpop.f32.mrb[0].mxu0  ;;  %v939_v12 = vpop.f32.mrb[0].mxu1 }
  0xfe   : > { %v812_v13 = vadd.f32 %v2390_v10, %v811_v11  ;;  %v813_v14 = vpop.f32.mrb[1].mxu0  ;;  %v2395_v15 = vadd.f32 %v2390_v10, %v939_v12  ;;  %v941_v16 = vpop.f32.mrb[1].mxu1 }
  0xff   : > { %v814_v17 = vpop.f32.mrb[2].mxu0  ;;  %v942_v18 = vpop.f32.mrb[2].mxu1 }
 0x100   : > { %v2010_v19 = vpack.c.bf16 %v812_v13, %v812_v13  ;;  %v1523_v20 = vmul.f32 %v812_v13, %v812_v13  ;;  %v815_v21 = vadd.f32 %v2390_v10, %v814_v17  ;;  %v816_v22 = vpop.f32.mrb[3].mxu0  ;;  %v944_v23 = vpop.f32.mrb[3].mxu1  ;;  %v2042_v24 = vpack.c.bf16 %v2395_v15, %v2395_v15 }
 0x101   : > { %v2406_v25 = vadd.f32 %v2390_v10, %v942_v18  ;;  %v1388_v26 = vsel %vm1387_vm2, %v812_v13, 0.0 }
 0x102   : > { %1323 = vst.msk [vmem:[%s2400_s26] sm:$0xf] %vm1322_vm1, %v2010_v19  ;;  %v2011_v27 = vpack.c.bf16 %v815_v21, %v815_v21  ;;  %v1389_v28 = vsel %vm1387_vm2, %v815_v21, 0.0  ;;  %v1524_v29 = vmul.f32 %v815_v21, %v815_v21  ;;  %1355 = vst.msk [vmem:[%s2400_s26 + $0x80] sm:$0xf] %vm1322_vm1, %v2042_v24  ;;  %v1587_v32 = vsel %vm1387_vm2, %v1523_v20, 0.0 }
 0x103   : > { %v1390_v30 = vadd.f32 %v1389_v28, %v1388_v26  ;;  %v2043_v31 = vpack.c.bf16 %v2406_v25, %v2406_v25 }
 0x104   : > { %1324 = vst.msk [vmem:[%s2400_s26 + $0x4] sm:$0xf] %vm1322_vm1, %v2011_v27  ;;  %v1588_v33 = vsel %vm1387_vm2, %v1524_v29, 0.0 }
 0x105   : > { %v1589_v34 = vadd.f32 %v1588_v33, %v1587_v32  ;;  %v819_v35 = vpop.f32.mrb[4].mxu0  ;;  %1356 = vst.msk [vmem:[%s2400_s26 + $0x84] sm:$0xf] %vm1322_vm1, %v2043_v31  ;;  %v947_v36 = vpop.f32.mrb[4].mxu1 }
 0x106   : > { %v820_v37 = vadd.f32 %v2390_v10, %v819_v35  ;;  %v821_v38 = vpop.f32.mrb[5].mxu0  ;;  %v2424_v39 = vadd.f32 %v2390_v10, %v947_v36  ;;  %v949_v40 = vpop.f32.mrb[5].mxu1 }
 0x107   : > { %v822_v41 = vpop.f32.mrb[6].mxu0  ;;  %v950_v42 = vpop.f32.mrb[6].mxu1 }
 0x108   : > { %v2012_v43 = vpack.c.bf16 %v820_v37, %v820_v37  ;;  %v1391_v44 = vsel %vm1387_vm2, %v820_v37, 0.0  ;;  %v1525_v45 = vmul.f32 %v820_v37, %v820_v37  ;;  %v823_v46 = vadd.f32 %v2390_v10, %v822_v41  ;;  %v824_v47 = vpop.f32.mrb[7].mxu0  ;;  %v952_v48 = vpop.f32.mrb[7].mxu1 }
 0x109   : > { %v1392_v49 = vadd.f32 %v1391_v44, %v1390_v30  ;;  %v2044_v50 = vpack.c.bf16 %v2424_v39, %v2424_v39  ;;  %v2437_v57 = vadd.f32 %v2390_v10, %v950_v42 }
 0x10a   : > { %1325 = vst.msk [vmem:[%s2400_s26 + $0x8] sm:$0xf] %vm1322_vm1, %v2012_v43  ;;  %v1590_v51 = vsel %vm1387_vm2, %v1525_v45, 0.0  ;;  %v2013_v52 = vpack.c.bf16 %v823_v46, %v823_v46  ;;  %v1393_v53 = vsel %vm1387_vm2, %v823_v46, 0.0  ;;  %v1526_v54 = vmul.f32 %v823_v46, %v823_v46 }
 0x10b   : > { %v1591_v55 = vadd.f32 %v1590_v51, %v1589_v34  ;;  %v1394_v56 = vadd.f32 %v1393_v53, %v1392_v49  ;;  %1357 = vst.msk [vmem:[%s2400_s26 + $0x88] sm:$0xf] %vm1322_vm1, %v2044_v50  ;;  %v2045_v61 = vpack.c.bf16 %v2437_v57, %v2437_v57 }
 0x10c   : > { %1326 = vst.msk [vmem:[%s2400_s26 + $0xc] sm:$0xf] %vm1322_vm1, %v2013_v52  ;;  %v1592_v58 = vsel %vm1387_vm2, %v1526_v54, 0.0 }
 0x10d   : > { %v1593_v59 = vadd.f32 %v1592_v58, %v1591_v55  ;;  %v827_v60 = vpop.f32.mrb[8].mxu0  ;;  %v955_v62 = vpop.f32.mrb[8].mxu1  ;;  %1358 = vst.msk [vmem:[%s2400_s26 + $0x8c] sm:$0xf] %vm1322_vm1, %v2045_v61 }
 0x10e   : > { %v828_v63 = vadd.f32 %v2390_v10, %v827_v60  ;;  %v829_v0 = vpop.f32.mrb[9].mxu0  ;;  %v2446_v1 = vadd.f32 %v2390_v10, %v955_v62  ;;  %v957_v2 = vpop.f32.mrb[9].mxu1 }
 0x10f   : > { %v830_v3 = vpop.f32.mrb[10].mxu0  ;;  %v958_v4 = vpop.f32.mrb[10].mxu1 }
 0x110   : > { %v2014_v5 = vpack.c.bf16 %v828_v63, %v828_v63  ;;  %v1395_v6 = vsel %vm1387_vm2, %v828_v63, 0.0  ;;  %v1527_v7 = vmul.f32 %v828_v63, %v828_v63  ;;  %v831_v8 = vadd.f32 %v2390_v10, %v830_v3  ;;  %v832_v9 = vpop.f32.mrb[11].mxu0  ;;  %v960_v11 = vpop.f32.mrb[11].mxu1 }
 0x111   : > { %v1396_v12 = vadd.f32 %v1395_v6, %v1394_v56  ;;  %v2046_v13 = vpack.c.bf16 %v2446_v1, %v2446_v1  ;;  %v2461_v21 = vadd.f32 %v2390_v10, %v958_v4 }
 0x112   : > { %1327 = vst.msk [vmem:[%s2400_s26 + $0x10] sm:$0xf] %vm1322_vm1, %v2014_v5  ;;  %v1594_v14 = vsel %vm1387_vm2, %v1527_v7, 0.0  ;;  %v2015_v16 = vpack.c.bf16 %v831_v8, %v831_v8  ;;  %v1397_v17 = vsel %vm1387_vm2, %v831_v8, 0.0  ;;  %v1528_v18 = vmul.f32 %v831_v8, %v831_v8 }
 0x113   : > { %v1595_v19 = vadd.f32 %v1594_v14, %v1593_v59  ;;  %v1398_v20 = vadd.f32 %v1397_v17, %v1396_v12  ;;  %1359 = vst.msk [vmem:[%s2400_s26 + $0x90] sm:$0xf] %vm1322_vm1, %v2046_v13  ;;  %v2047_v26 = vpack.c.bf16 %v2461_v21, %v2461_v21 }
 0x114   : > { %1328 = vst.msk [vmem:[%s2400_s26 + $0x14] sm:$0xf] %vm1322_vm1, %v2015_v16  ;;  %v1596_v22 = vsel %vm1387_vm2, %v1528_v18, 0.0 }
 0x115   : > { %v1597_v23 = vadd.f32 %v1596_v22, %v1595_v19  ;;  %v835_v24 = vpop.f32.mrb[12].mxu0  ;;  %v963_v27 = vpop.f32.mrb[12].mxu1  ;;  %1360 = vst.msk [vmem:[%s2400_s26 + $0x94] sm:$0xf] %vm1322_vm1, %v2047_v26 }
 0x116   : > { %v836_v28 = vadd.f32 %v2390_v10, %v835_v24  ;;  %v837_v29 = vpop.f32.mrb[13].mxu0  ;;  %v2470_v30 = vadd.f32 %v2390_v10, %v963_v27  ;;  %v965_v31 = vpop.f32.mrb[13].mxu1 }
 0x117   : > { %v838_v32 = vpop.f32.mrb[14].mxu0  ;;  %v966_v33 = vpop.f32.mrb[14].mxu1 }
 0x118   : > { %v2016_v34 = vpack.c.bf16 %v836_v28, %v836_v28  ;;  %v1399_v35 = vsel %vm1387_vm2, %v836_v28, 0.0  ;;  %v1529_v36 = vmul.f32 %v836_v28, %v836_v28  ;;  %v839_v37 = vadd.f32 %v2390_v10, %v838_v32  ;;  %v840_v38 = vpop.f32.mrb[15].mxu0  ;;  %v968_v40 = vpop.f32.mrb[15].mxu1 }
 0x119   : > { %v1400_v41 = vadd.f32 %v1399_v35, %v1398_v20  ;;  %v2048_v42 = vpack.c.bf16 %v2470_v30, %v2470_v30  ;;  %v2485_v49 = vadd.f32 %v2390_v10, %v966_v33 }
 0x11a   : > { %1329 = vst.msk [vmem:[%s2400_s26 + $0x18] sm:$0xf] %vm1322_vm1, %v2016_v34  ;;  %v1598_v43 = vsel %vm1387_vm2, %v1529_v36, 0.0  ;;  %v2017_v44 = vpack.c.bf16 %v839_v37, %v839_v37  ;;  %v1401_v45 = vsel %vm1387_vm2, %v839_v37, 0.0  ;;  %v1530_v46 = vmul.f32 %v839_v37, %v839_v37 }
 0x11b   : > { %v1599_v47 = vadd.f32 %v1598_v43, %v1597_v23  ;;  %v1402_v48 = vadd.f32 %v1401_v45, %v1400_v41  ;;  %1361 = vst.msk [vmem:[%s2400_s26 + $0x98] sm:$0xf] %vm1322_vm1, %v2048_v42  ;;  %v2049_v53 = vpack.c.bf16 %v2485_v49, %v2485_v49 }
 0x11c   : > { %1330 = vst.msk [vmem:[%s2400_s26 + $0x1c] sm:$0xf] %vm1322_vm1, %v2017_v44  ;;  %v1600_v50 = vsel %vm1387_vm2, %v1530_v46, 0.0 }
 0x11d   : > { %v1601_v51 = vadd.f32 %v1600_v50, %v1599_v47  ;;  %v843_v52 = vpop.f32.mrb[16].mxu0  ;;  %v971_v54 = vpop.f32.mrb[16].mxu1  ;;  %1362 = vst.msk [vmem:[%s2400_s26 + $0x9c] sm:$0xf] %vm1322_vm1, %v2049_v53 }
 0x11e   : > { %v844_v55 = vadd.f32 %v2390_v10, %v843_v52  ;;  %v845_v56 = vpop.f32.mrb[17].mxu0  ;;  %v2494_v58 = vadd.f32 %v2390_v10, %v971_v54  ;;  %v973_v59 = vpop.f32.mrb[17].mxu1 }
 0x11f   : > { %v846_v60 = vpop.f32.mrb[18].mxu0  ;;  %v974_v61 = vpop.f32.mrb[18].mxu1 }
 0x120   : > { %v2018_v62 = vpack.c.bf16 %v844_v55, %v844_v55  ;;  %v1403_v63 = vsel %vm1387_vm2, %v844_v55, 0.0  ;;  %v1531_v0 = vmul.f32 %v844_v55, %v844_v55  ;;  %v847_v2 = vadd.f32 %v2390_v10, %v846_v60  ;;  %v848_v3 = vpop.f32.mrb[19].mxu0  ;;  %v976_v4 = vpop.f32.mrb[19].mxu1 }
 0x121   : > { %v1404_v5 = vadd.f32 %v1403_v63, %v1402_v48  ;;  %v2050_v6 = vpack.c.bf16 %v2494_v58, %v2494_v58  ;;  %v2509_v14 = vadd.f32 %v2390_v10, %v974_v61 }
 0x122   : > { %1331 = vst.msk [vmem:[%s2400_s26 + $0x20] sm:$0xf] %vm1322_vm1, %v2018_v62  ;;  %v1602_v7 = vsel %vm1387_vm2, %v1531_v0, 0.0  ;;  %v2019_v8 = vpack.c.bf16 %v847_v2, %v847_v2  ;;  %v1405_v9 = vsel %vm1387_vm2, %v847_v2, 0.0  ;;  %v1532_v11 = vmul.f32 %v847_v2, %v847_v2 }
 0x123   : > { %v1603_v12 = vadd.f32 %v1602_v7, %v1601_v51  ;;  %v1406_v13 = vadd.f32 %v1405_v9, %v1404_v5  ;;  %1363 = vst.msk [vmem:[%s2400_s26 + $0xa0] sm:$0xf] %vm1322_vm1, %v2050_v6  ;;  %v2051_v19 = vpack.c.bf16 %v2509_v14, %v2509_v14 }
 0x124   : > { %1332 = vst.msk [vmem:[%s2400_s26 + $0x24] sm:$0xf] %vm1322_vm1, %v2019_v8  ;;  %v1604_v16 = vsel %vm1387_vm2, %v1532_v11, 0.0 }
 0x125   : > { %v1605_v17 = vadd.f32 %v1604_v16, %v1603_v12  ;;  %v851_v18 = vpop.f32.mrb[20].mxu0  ;;  %v979_v20 = vpop.f32.mrb[20].mxu1  ;;  %1364 = vst.msk [vmem:[%s2400_s26 + $0xa4] sm:$0xf] %vm1322_vm1, %v2051_v19 }
 0x126   : > { %v852_v22 = vadd.f32 %v2390_v10, %v851_v18  ;;  %v853_v23 = vpop.f32.mrb[21].mxu0  ;;  %v2518_v24 = vadd.f32 %v2390_v10, %v979_v20  ;;  %v981_v26 = vpop.f32.mrb[21].mxu1 }
 0x127   : > { %v854_v27 = vpop.f32.mrb[22].mxu0  ;;  %v982_v28 = vpop.f32.mrb[22].mxu1 }
 0x128   : > { %v2020_v29 = vpack.c.bf16 %v852_v22, %v852_v22  ;;  %v1407_v31 = vsel %vm1387_vm2, %v852_v22, 0.0  ;;  %v1533_v32 = vmul.f32 %v852_v22, %v852_v22  ;;  %v855_v33 = vadd.f32 %v2390_v10, %v854_v27  ;;  %v856_v34 = vpop.f32.mrb[23].mxu0  ;;  %v984_v35 = vpop.f32.mrb[23].mxu1 }
 0x129   : > { %v1408_v36 = vadd.f32 %v1407_v31, %v1406_v13  ;;  %v2052_v37 = vpack.c.bf16 %v2518_v24, %v2518_v24  ;;  %v2533_v45 = vadd.f32 %v2390_v10, %v982_v28 }
 0x12a   : > { %1333 = vst.msk [vmem:[%s2400_s26 + $0x28] sm:$0xf] %vm1322_vm1, %v2020_v29  ;;  %v1606_v38 = vsel %vm1387_vm2, %v1533_v32, 0.0  ;;  %v2021_v40 = vpack.c.bf16 %v855_v33, %v855_v33  ;;  %v1409_v41 = vsel %vm1387_vm2, %v855_v33, 0.0  ;;  %v1534_v42 = vmul.f32 %v855_v33, %v855_v33 }
 0x12b   : > { %v1607_v43 = vadd.f32 %v1606_v38, %v1605_v17  ;;  %v1410_v44 = vadd.f32 %v1409_v41, %v1408_v36  ;;  %1365 = vst.msk [vmem:[%s2400_s26 + $0xa8] sm:$0xf] %vm1322_vm1, %v2052_v37  ;;  %v2053_v50 = vpack.c.bf16 %v2533_v45, %v2533_v45 }
 0x12c   : > { %1334 = vst.msk [vmem:[%s2400_s26 + $0x2c] sm:$0xf] %vm1322_vm1, %v2021_v40  ;;  %v1608_v46 = vsel %vm1387_vm2, %v1534_v42, 0.0 }
 0x12d   : > { %v1609_v47 = vadd.f32 %v1608_v46, %v1607_v43  ;;  %v859_v48 = vpop.f32.mrb[24].mxu0  ;;  %v987_v51 = vpop.f32.mrb[24].mxu1  ;;  %1366 = vst.msk [vmem:[%s2400_s26 + $0xac] sm:$0xf] %vm1322_vm1, %v2053_v50 }
 0x12e   : > { %v860_v52 = vadd.f32 %v2390_v10, %v859_v48  ;;  %v861_v53 = vpop.f32.mrb[25].mxu0  ;;  %v2542_v54 = vadd.f32 %v2390_v10, %v987_v51  ;;  %v989_v55 = vpop.f32.mrb[25].mxu1 }
 0x12f   : > { %v862_v56 = vpop.f32.mrb[26].mxu0  ;;  %v990_v59 = vpop.f32.mrb[26].mxu1 }
 0x130   : > { %v2022_v60 = vpack.c.bf16 %v860_v52, %v860_v52  ;;  %v1411_v61 = vsel %vm1387_vm2, %v860_v52, 0.0  ;;  %v1535_v62 = vmul.f32 %v860_v52, %v860_v52  ;;  %v863_v63 = vadd.f32 %v2390_v10, %v862_v56  ;;  %v864_v0 = vpop.f32.mrb[27].mxu0  ;;  %v992_v2 = vpop.f32.mrb[27].mxu1 }
 0x131   : > { %v1412_v3 = vadd.f32 %v1411_v61, %v1410_v44  ;;  %v2054_v4 = vpack.c.bf16 %v2542_v54, %v2542_v54  ;;  %v2557_v12 = vadd.f32 %v2390_v10, %v990_v59 }
 0x132   : > { %1335 = vst.msk [vmem:[%s2400_s26 + $0x30] sm:$0xf] %vm1322_vm1, %v2022_v60  ;;  %v1610_v5 = vsel %vm1387_vm2, %v1535_v62, 0.0  ;;  %v2023_v6 = vpack.c.bf16 %v863_v63, %v863_v63  ;;  %v1413_v7 = vsel %vm1387_vm2, %v863_v63, 0.0  ;;  %v1536_v8 = vmul.f32 %v863_v63, %v863_v63 }
 0x133   : > { %v1611_v9 = vadd.f32 %v1610_v5, %v1609_v47  ;;  %v1414_v11 = vadd.f32 %v1413_v7, %v1412_v3  ;;  %1367 = vst.msk [vmem:[%s2400_s26 + $0xb0] sm:$0xf] %vm1322_vm1, %v2054_v4  ;;  %v2055_v18 = vpack.c.bf16 %v2557_v12, %v2557_v12 }
 0x134   : > { %1336 = vst.msk [vmem:[%s2400_s26 + $0x34] sm:$0xf] %vm1322_vm1, %v2023_v6  ;;  %v1612_v13 = vsel %vm1387_vm2, %v1536_v8, 0.0 }
 0x135   : > { %v1613_v16 = vadd.f32 %v1612_v13, %v1611_v9  ;;  %v867_v17 = vpop.f32.mrb[28].mxu0  ;;  %v995_v19 = vpop.f32.mrb[28].mxu1  ;;  %1368 = vst.msk [vmem:[%s2400_s26 + $0xb4] sm:$0xf] %vm1322_vm1, %v2055_v18 }
 0x136   : > { %v868_v20 = vadd.f32 %v2390_v10, %v867_v17  ;;  %v869_v22 = vpop.f32.mrb[29].mxu0  ;;  %v2566_v23 = vadd.f32 %v2390_v10, %v995_v19  ;;  %v997_v26 = vpop.f32.mrb[29].mxu1 }
 0x137   : > { %v870_v27 = vpop.f32.mrb[30].mxu0  ;;  %v998_v28 = vpop.f32.mrb[30].mxu1 }
 0x138   : > { %v2024_v29 = vpack.c.bf16 %v868_v20, %v868_v20  ;;  %v1415_v31 = vsel %vm1387_vm2, %v868_v20, 0.0  ;;  %v1537_v32 = vmul.f32 %v868_v20, %v868_v20  ;;  %v871_v33 = vadd.f32 %v2390_v10, %v870_v27  ;;  %v872_v34 = vpop.f32.mrb[31].mxu0  ;;  %v1000_v35 = vpop.f32.mrb[31].mxu1 }
 0x139   : > { %v1416_v36 = vadd.f32 %v1415_v31, %v1414_v11  ;;  %v2056_v37 = vpack.c.bf16 %v2566_v23, %v2566_v23  ;;  %v2581_v46 = vadd.f32 %v2390_v10, %v998_v28 }
 0x13a   : > { %1337 = vst.msk [vmem:[%s2400_s26 + $0x38] sm:$0xf] %vm1322_vm1, %v2024_v29  ;;  %v1614_v38 = vsel %vm1387_vm2, %v1537_v32, 0.0  ;;  %v2025_v40 = vpack.c.bf16 %v871_v33, %v871_v33  ;;  %v1417_v41 = vsel %vm1387_vm2, %v871_v33, 0.0  ;;  %v1538_v42 = vmul.f32 %v871_v33, %v871_v33 }
 0x13b   : > { %v1615_v43 = vadd.f32 %v1614_v38, %v1613_v16  ;;  %v1418_v44 = vadd.f32 %v1417_v41, %v1416_v36  ;;  %1369 = vst.msk [vmem:[%s2400_s26 + $0xb8] sm:$0xf] %vm1322_vm1, %v2056_v37  ;;  %v2057_v51 = vpack.c.bf16 %v2581_v46, %v2581_v46 }
 0x13c   : > { %1338 = vst.msk [vmem:[%s2400_s26 + $0x3c] sm:$0xf] %vm1322_vm1, %v2025_v40  ;;  %v1616_v47 = vsel %vm1387_vm2, %v1538_v42, 0.0 }
 0x13d   : > { %v1617_v48 = vadd.f32 %v1616_v47, %v1615_v43  ;;  %v875_v50 = vpop.f32.mrb[32].mxu0  ;;  %v1003_v52 = vpop.f32.mrb[32].mxu1  ;;  %1370 = vst.msk [vmem:[%s2400_s26 + $0xbc] sm:$0xf] %vm1322_vm1, %v2057_v51 }
 0x13e   : > { %v876_v53 = vadd.f32 %v2390_v10, %v875_v50  ;;  %v877_v55 = vpop.f32.mrb[33].mxu0  ;;  %v2590_v56 = vadd.f32 %v2390_v10, %v1003_v52  ;;  %v1005_v59 = vpop.f32.mrb[33].mxu1 }
 0x13f   : > { %v878_v60 = vpop.f32.mrb[34].mxu0  ;;  %v1006_v61 = vpop.f32.mrb[34].mxu1 }
 0x140   : > { %v2026_v62 = vpack.c.bf16 %v876_v53, %v876_v53  ;;  %v1419_v63 = vsel %vm1387_vm2, %v876_v53, 0.0  ;;  %v1539_v0 = vmul.f32 %v876_v53, %v876_v53  ;;  %v879_v2 = vadd.f32 %v2390_v10, %v878_v60  ;;  %v880_v3 = vpop.f32.mrb[35].mxu0  ;;  %v1008_v4 = vpop.f32.mrb[35].mxu1 }
 0x141   : > { %v1420_v5 = vadd.f32 %v1419_v63, %v1418_v44  ;;  %v2058_v6 = vpack.c.bf16 %v2590_v56, %v2590_v56  ;;  %v2605_v17 = vadd.f32 %v2390_v10, %v1006_v61 }
 0x142   : > { %1339 = vst.msk [vmem:[%s2400_s26 + $0x40] sm:$0xf] %vm1322_vm1, %v2026_v62  ;;  %v1618_v7 = vsel %vm1387_vm2, %v1539_v0, 0.0  ;;  %v2027_v8 = vpack.c.bf16 %v879_v2, %v879_v2  ;;  %v1421_v9 = vsel %vm1387_vm2, %v879_v2, 0.0  ;;  %v1540_v11 = vmul.f32 %v879_v2, %v879_v2 }
 0x143   : > { %v1619_v13 = vadd.f32 %v1618_v7, %v1617_v48  ;;  %v1422_v16 = vadd.f32 %v1421_v9, %v1420_v5  ;;  %1371 = vst.msk [vmem:[%s2400_s26 + $0xc0] sm:$0xf] %vm1322_vm1, %v2058_v6  ;;  %v2059_v22 = vpack.c.bf16 %v2605_v17, %v2605_v17 }
 0x144   : > { %1340 = vst.msk [vmem:[%s2400_s26 + $0x44] sm:$0xf] %vm1322_vm1, %v2027_v8  ;;  %v1620_v18 = vsel %vm1387_vm2, %v1540_v11, 0.0 }
 0x145   : > { %v1621_v19 = vadd.f32 %v1620_v18, %v1619_v13  ;;  %v883_v20 = vpop.f32.mrb[36].mxu0  ;;  %v1011_v26 = vpop.f32.mrb[36].mxu1  ;;  %1372 = vst.msk [vmem:[%s2400_s26 + $0xc4] sm:$0xf] %vm1322_vm1, %v2059_v22 }
 0x146   : > { %v884_v27 = vadd.f32 %v2390_v10, %v883_v20  ;;  %v885_v28 = vpop.f32.mrb[37].mxu0  ;;  %v2614_v29 = vadd.f32 %v2390_v10, %v1011_v26  ;;  %v1013_v31 = vpop.f32.mrb[37].mxu1 }
 0x147   : > { %v886_v32 = vpop.f32.mrb[38].mxu0  ;;  %v1014_v33 = vpop.f32.mrb[38].mxu1 }
 0x148   : > { %v2028_v34 = vpack.c.bf16 %v884_v27, %v884_v27  ;;  %v1423_v35 = vsel %vm1387_vm2, %v884_v27, 0.0  ;;  %v1541_v36 = vmul.f32 %v884_v27, %v884_v27  ;;  %v887_v37 = vadd.f32 %v2390_v10, %v886_v32  ;;  %v888_v38 = vpop.f32.mrb[39].mxu0  ;;  %v1016_v40 = vpop.f32.mrb[39].mxu1 }
 0x149   : > { %v1424_v41 = vadd.f32 %v1423_v35, %v1422_v16  ;;  %v2060_v42 = vpack.c.bf16 %v2614_v29, %v2614_v29  ;;  %v2629_v52 = vadd.f32 %v2390_v10, %v1014_v33 }
 0x14a   : > { %1341 = vst.msk [vmem:[%s2400_s26 + $0x48] sm:$0xf] %vm1322_vm1, %v2028_v34  ;;  %v1622_v43 = vsel %vm1387_vm2, %v1541_v36, 0.0  ;;  %v2029_v44 = vpack.c.bf16 %v887_v37, %v887_v37  ;;  %v1425_v47 = vsel %vm1387_vm2, %v887_v37, 0.0  ;;  %v1542_v48 = vmul.f32 %v887_v37, %v887_v37 }
 0x14b   : > { %v1623_v50 = vadd.f32 %v1622_v43, %v1621_v19  ;;  %v1426_v51 = vadd.f32 %v1425_v47, %v1424_v41  ;;  %1373 = vst.msk [vmem:[%s2400_s26 + $0xc8] sm:$0xf] %vm1322_vm1, %v2060_v42  ;;  %v2061_v60 = vpack.c.bf16 %v2629_v52, %v2629_v52 }
 0x14c   : > { %1342 = vst.msk [vmem:[%s2400_s26 + $0x4c] sm:$0xf] %vm1322_vm1, %v2029_v44  ;;  %v1624_v53 = vsel %vm1387_vm2, %v1542_v48, 0.0 }
 0x14d   : > { %v1625_v55 = vadd.f32 %v1624_v53, %v1623_v50  ;;  %v891_v59 = vpop.f32.mrb[40].mxu0  ;;  %v1019_v61 = vpop.f32.mrb[40].mxu1  ;;  %1374 = vst.msk [vmem:[%s2400_s26 + $0xcc] sm:$0xf] %vm1322_vm1, %v2061_v60 }
 0x14e   : > { %v892_v62 = vadd.f32 %v2390_v10, %v891_v59  ;;  %v893_v63 = vpop.f32.mrb[41].mxu0  ;;  %v2638_v0 = vadd.f32 %v2390_v10, %v1019_v61  ;;  %v1021_v2 = vpop.f32.mrb[41].mxu1 }
 0x14f   : > { %v894_v3 = vpop.f32.mrb[42].mxu0  ;;  %v1022_v4 = vpop.f32.mrb[42].mxu1 }
 0x150   : > { %v2030_v5 = vpack.c.bf16 %v892_v62, %v892_v62  ;;  %v1427_v6 = vsel %vm1387_vm2, %v892_v62, 0.0  ;;  %v1543_v7 = vmul.f32 %v892_v62, %v892_v62  ;;  %v895_v8 = vadd.f32 %v2390_v10, %v894_v3  ;;  %v896_v9 = vpop.f32.mrb[43].mxu0  ;;  %v1024_v11 = vpop.f32.mrb[43].mxu1 }
 0x151   : > { %v1428_v13 = vadd.f32 %v1427_v6, %v1426_v51  ;;  %v2062_v16 = vpack.c.bf16 %v2638_v0, %v2638_v0  ;;  %v2653_v28 = vadd.f32 %v2390_v10, %v1022_v4 }
 0x152   : > { %1343 = vst.msk [vmem:[%s2400_s26 + $0x50] sm:$0xf] %vm1322_vm1, %v2030_v5  ;;  %v1626_v18 = vsel %vm1387_vm2, %v1543_v7, 0.0  ;;  %v2031_v19 = vpack.c.bf16 %v895_v8, %v895_v8  ;;  %v1429_v20 = vsel %vm1387_vm2, %v895_v8, 0.0  ;;  %v1544_v22 = vmul.f32 %v895_v8, %v895_v8 }
 0x153   : > { %v1627_v26 = vadd.f32 %v1626_v18, %v1625_v55  ;;  %v1430_v27 = vadd.f32 %v1429_v20, %v1428_v13  ;;  %1375 = vst.msk [vmem:[%s2400_s26 + $0xd0] sm:$0xf] %vm1322_vm1, %v2062_v16  ;;  %v2063_v34 = vpack.c.bf16 %v2653_v28, %v2653_v28 }
 0x154   : > { %1344 = vst.msk [vmem:[%s2400_s26 + $0x54] sm:$0xf] %vm1322_vm1, %v2031_v19  ;;  %v1628_v31 = vsel %vm1387_vm2, %v1544_v22, 0.0 }
 0x155   : > { %v1629_v32 = vadd.f32 %v1628_v31, %v1627_v26  ;;  %v899_v33 = vpop.f32.mrb[44].mxu0  ;;  %v1027_v35 = vpop.f32.mrb[44].mxu1  ;;  %1376 = vst.msk [vmem:[%s2400_s26 + $0xd4] sm:$0xf] %vm1322_vm1, %v2063_v34 }
 0x156   : > { %v900_v36 = vadd.f32 %v2390_v10, %v899_v33  ;;  %v901_v37 = vpop.f32.mrb[45].mxu0  ;;  %v2662_v38 = vadd.f32 %v2390_v10, %v1027_v35  ;;  %v1029_v40 = vpop.f32.mrb[45].mxu1 }
 0x157   : > { %v902_v41 = vpop.f32.mrb[46].mxu0  ;;  %v1030_v42 = vpop.f32.mrb[46].mxu1 }
 0x158   : > { %v2032_v43 = vpack.c.bf16 %v900_v36, %v900_v36  ;;  %v1431_v44 = vsel %vm1387_vm2, %v900_v36, 0.0  ;;  %v1545_v47 = vmul.f32 %v900_v36, %v900_v36  ;;  %v903_v48 = vadd.f32 %v2390_v10, %v902_v41  ;;  %v904_v50 = vpop.f32.mrb[47].mxu0  ;;  %v1032_v51 = vpop.f32.mrb[47].mxu1 }
 0x159   : > { %v1432_v53 = vadd.f32 %v1431_v44, %v1430_v27  ;;  %v2064_v55 = vpack.c.bf16 %v2662_v38, %v2662_v38  ;;  %v2677_v3 = vadd.f32 %v2390_v10, %v1030_v42 }
 0x15a   : > { %1345 = vst.msk [vmem:[%s2400_s26 + $0x58] sm:$0xf] %vm1322_vm1, %v2032_v43  ;;  %v1630_v59 = vsel %vm1387_vm2, %v1545_v47, 0.0  ;;  %v2033_v60 = vpack.c.bf16 %v903_v48, %v903_v48  ;;  %v1433_v61 = vsel %vm1387_vm2, %v903_v48, 0.0  ;;  %v1546_v62 = vmul.f32 %v903_v48, %v903_v48 }
 0x15b   : > { %v1631_v63 = vadd.f32 %v1630_v59, %v1629_v32  ;;  %v1434_v2 = vadd.f32 %v1433_v61, %v1432_v53  ;;  %1377 = vst.msk [vmem:[%s2400_s26 + $0xd8] sm:$0xf] %vm1322_vm1, %v2064_v55  ;;  %v2065_v7 = vpack.c.bf16 %v2677_v3, %v2677_v3 }
 0x15c   : > { %1346 = vst.msk [vmem:[%s2400_s26 + $0x5c] sm:$0xf] %vm1322_vm1, %v2033_v60  ;;  %v1632_v4 = vsel %vm1387_vm2, %v1546_v62, 0.0 }
 0x15d   : > { %v1633_v5 = vadd.f32 %v1632_v4, %v1631_v63  ;;  %v907_v6 = vpop.f32.mrb[48].mxu0  ;;  %v1035_v8 = vpop.f32.mrb[48].mxu1  ;;  %1378 = vst.msk [vmem:[%s2400_s26 + $0xdc] sm:$0xf] %vm1322_vm1, %v2065_v7 }
 0x15e   : > { %v908_v9 = vadd.f32 %v2390_v10, %v907_v6  ;;  %v909_v11 = vpop.f32.mrb[49].mxu0  ;;  %v2686_v13 = vadd.f32 %v2390_v10, %v1035_v8  ;;  %v1037_v16 = vpop.f32.mrb[49].mxu1 }
 0x15f   : > { %v910_v18 = vpop.f32.mrb[50].mxu0  ;;  %v1038_v19 = vpop.f32.mrb[50].mxu1 }
 0x160   : > { %v2034_v20 = vpack.c.bf16 %v908_v9, %v908_v9  ;;  %v1435_v22 = vsel %vm1387_vm2, %v908_v9, 0.0  ;;  %v1547_v26 = vmul.f32 %v908_v9, %v908_v9  ;;  %v911_v27 = vadd.f32 %v2390_v10, %v910_v18  ;;  %v912_v31 = vpop.f32.mrb[51].mxu0  ;;  %v1040_v32 = vpop.f32.mrb[51].mxu1 }
 0x161   : > { %v1436_v33 = vadd.f32 %v1435_v22, %v1434_v2  ;;  %v2066_v34 = vpack.c.bf16 %v2686_v13, %v2686_v13  ;;  %v2701_v43 = vadd.f32 %v2390_v10, %v1038_v19 }
 0x162   : > { %1347 = vst.msk [vmem:[%s2400_s26 + $0x60] sm:$0xf] %vm1322_vm1, %v2034_v20  ;;  %v1634_v35 = vsel %vm1387_vm2, %v1547_v26, 0.0  ;;  %v2035_v36 = vpack.c.bf16 %v911_v27, %v911_v27  ;;  %v1437_v37 = vsel %vm1387_vm2, %v911_v27, 0.0  ;;  %v1548_v40 = vmul.f32 %v911_v27, %v911_v27 }
 0x163   : > { %v1635_v41 = vadd.f32 %v1634_v35, %v1633_v5  ;;  %v1438_v42 = vadd.f32 %v1437_v37, %v1436_v33  ;;  %1379 = vst.msk [vmem:[%s2400_s26 + $0xe0] sm:$0xf] %vm1322_vm1, %v2066_v34  ;;  %v2067_v50 = vpack.c.bf16 %v2701_v43, %v2701_v43 }
 0x164   : > { %1348 = vst.msk [vmem:[%s2400_s26 + $0x64] sm:$0xf] %vm1322_vm1, %v2035_v36  ;;  %v1636_v44 = vsel %vm1387_vm2, %v1548_v40, 0.0 }
 0x165   : > { %v1637_v47 = vadd.f32 %v1636_v44, %v1635_v41  ;;  %v915_v48 = vpop.f32.mrb[52].mxu0  ;;  %v1043_v51 = vpop.f32.mrb[52].mxu1  ;;  %1380 = vst.msk [vmem:[%s2400_s26 + $0xe4] sm:$0xf] %vm1322_vm1, %v2067_v50 }
 0x166   : > { %v916_v53 = vadd.f32 %v2390_v10, %v915_v48  ;;  %v917_v55 = vpop.f32.mrb[53].mxu0  ;;  %v2710_v59 = vadd.f32 %v2390_v10, %v1043_v51  ;;  %v1045_v60 = vpop.f32.mrb[53].mxu1 }
 0x167   : > { %v918_v61 = vpop.f32.mrb[54].mxu0  ;;  %v1046_v62 = vpop.f32.mrb[54].mxu1 }
 0x168   : > { %v2036_v63 = vpack.c.bf16 %v916_v53, %v916_v53  ;;  %v1439_v2 = vsel %vm1387_vm2, %v916_v53, 0.0  ;;  %v1549_v4 = vmul.f32 %v916_v53, %v916_v53  ;;  %v919_v5 = vadd.f32 %v2390_v10, %v918_v61  ;;  %v920_v6 = vpop.f32.mrb[55].mxu0  ;;  %v1048_v7 = vpop.f32.mrb[55].mxu1 }
 0x169   : > { %v1440_v8 = vadd.f32 %v1439_v2, %v1438_v42  ;;  %v2068_v9 = vpack.c.bf16 %v2710_v59, %v2710_v59  ;;  %v2725_v26 = vadd.f32 %v2390_v10, %v1046_v62 }
 0x16a   : > { %1349 = vst.msk [vmem:[%s2400_s26 + $0x68] sm:$0xf] %vm1322_vm1, %v2036_v63  ;;  %v1638_v11 = vsel %vm1387_vm2, %v1549_v4, 0.0  ;;  %v2037_v16 = vpack.c.bf16 %v919_v5, %v919_v5  ;;  %v1441_v18 = vsel %vm1387_vm2, %v919_v5, 0.0  ;;  %v1550_v19 = vmul.f32 %v919_v5, %v919_v5 }
 0x16b   : > { %v1639_v20 = vadd.f32 %v1638_v11, %v1637_v47  ;;  %v1442_v22 = vadd.f32 %v1441_v18, %v1440_v8  ;;  %1381 = vst.msk [vmem:[%s2400_s26 + $0xe8] sm:$0xf] %vm1322_vm1, %v2068_v9  ;;  %v2069_v33 = vpack.c.bf16 %v2725_v26, %v2725_v26 }
 0x16c   : > { %1350 = vst.msk [vmem:[%s2400_s26 + $0x6c] sm:$0xf] %vm1322_vm1, %v2037_v16  ;;  %v1640_v27 = vsel %vm1387_vm2, %v1550_v19, 0.0 }
 0x16d   : > { %v1641_v31 = vadd.f32 %v1640_v27, %v1639_v20  ;;  %v923_v32 = vpop.f32.mrb[56].mxu0  ;;  %v1051_v34 = vpop.f32.mrb[56].mxu1  ;;  %1382 = vst.msk [vmem:[%s2400_s26 + $0xec] sm:$0xf] %vm1322_vm1, %v2069_v33 }
 0x16e   : > { %v924_v35 = vadd.f32 %v2390_v10, %v923_v32  ;;  %v925_v36 = vpop.f32.mrb[57].mxu0  ;;  %v2734_v37 = vadd.f32 %v2390_v10, %v1051_v34  ;;  %v1053_v40 = vpop.f32.mrb[57].mxu1 }
 0x16f   : > { %v926_v41 = vpop.f32.mrb[58].mxu0  ;;  %v1054_v42 = vpop.f32.mrb[58].mxu1 }
 0x170   : > { %v2038_v44 = vpack.c.bf16 %v924_v35, %v924_v35  ;;  %v1443_v47 = vsel %vm1387_vm2, %v924_v35, 0.0  ;;  %v1551_v48 = vmul.f32 %v924_v35, %v924_v35  ;;  %v927_v50 = vadd.f32 %v2390_v10, %v926_v41  ;;  %v928_v51 = vpop.f32.mrb[59].mxu0  ;;  %v1056_v53 = vpop.f32.mrb[59].mxu1 }
 0x171   : > { %v1444_v55 = vadd.f32 %v1443_v47, %v1442_v22  ;;  %v2070_v60 = vpack.c.bf16 %v2734_v37, %v2734_v37  ;;  %v2749_v6 = vadd.f32 %v2390_v10, %v1054_v42  ;;  %v1555_v41 = vmul.f32 %v2395_v15, %v2395_v15 }
 0x172   : > { %1351 = vst.msk [vmem:[%s2400_s26 + $0x70] sm:$0xf] %vm1322_vm1, %v2038_v44  ;;  %v1642_v61 = vsel %vm1387_vm2, %v1551_v48, 0.0  ;;  %v2039_v62 = vpack.c.bf16 %v927_v50, %v927_v50  ;;  %v1445_v63 = vsel %vm1387_vm2, %v927_v50, 0.0  ;;  %v1552_v2 = vmul.f32 %v927_v50, %v927_v50 }
 0x173   : > { %v1643_v4 = vadd.f32 %v1642_v61, %v1641_v31  ;;  %v1446_v5 = vadd.f32 %v1445_v63, %v1444_v55  ;;  %1383 = vst.msk [vmem:[%s2400_s26 + $0xf0] sm:$0xf] %vm1322_vm1, %v2070_v60  ;;  %v2071_v11 = vpack.c.bf16 %v2749_v6, %v2749_v6  ;;  %v1451_v61 = vsel %vm1387_vm2, %v2395_v15, 0.0 }
 0x174   : > { %1352 = vst.msk [vmem:[%s2400_s26 + $0x74] sm:$0xf] %vm1322_vm1, %v2039_v62  ;;  %v1644_v7 = vsel %vm1387_vm2, %v1552_v2, 0.0  ;;  %v1556_v62 = vmul.f32 %v2406_v25, %v2406_v25  ;;  %v1557_v15 = vmul.f32 %v2424_v39, %v2424_v39 }
 0x175   : > { %v1645_v8 = vadd.f32 %v1644_v7, %v1643_v4  ;;  %v931_v9 = vpop.f32.mrb[60].mxu0  ;;  %v1059_v16 = vpop.f32.mrb[60].mxu1  ;;  %1384 = vst.msk [vmem:[%s2400_s26 + $0xf4] sm:$0xf] %vm1322_vm1, %v2071_v11  ;;  %v1650_v7 = vsel %vm1387_vm2, %v1555_v41, 0.0 }
 0x176   : > { %v932_v18 = vadd.f32 %v2390_v10, %v931_v9  ;;  %v933_v19 = vpop.f32.mrb[61].mxu0  ;;  %v2758_v20 = vadd.f32 %v2390_v10, %v1059_v16  ;;  %v1061_v22 = vpop.f32.mrb[61].mxu1  ;;  %v1652_v11 = vsel %vm1387_vm2, %v1556_v62, 0.0  ;;  %v1455_v16 = vsel %vm1387_vm2, %v2424_v39, 0.0 }
 0x177   : > { %v934_v27 = vpop.f32.mrb[62].mxu0  ;;  %v1062_v31 = vpop.f32.mrb[62].mxu1  ;;  %v1459_v39 = vsel %vm1387_vm2, %v2446_v1, 0.0 }
 0x178   : > { %v2040_v32 = vpack.c.bf16 %v932_v18, %v932_v18  ;;  %v1447_v33 = vsel %vm1387_vm2, %v932_v18, 0.0  ;;  %v1553_v34 = vmul.f32 %v932_v18, %v932_v18  ;;  %v935_v35 = vadd.f32 %v2390_v10, %v934_v27  ;;  %v936_v36 = vpop.f32.mrb[63].mxu0  ;;  %v1064_v40 = vpop.f32.mrb[63].mxu1 }
 0x179   : > { %v1448_v42 = vadd.f32 %v1447_v33, %v1446_v5  ;;  %v2072_v44 = vpack.c.bf16 %v2758_v20, %v2758_v20  ;;  %v2775_v60 = vadd.f32 %v2390_v10, %v1062_v31  ;;  %v1453_v10 = vsel %vm1387_vm2, %v2406_v25, 0.0 }
 0x17a   : > { %1353 = vst.msk [vmem:[%s2400_s26 + $0x78] sm:$0xf] %vm1322_vm1, %v2040_v32  ;;  %v1646_v47 = vsel %vm1387_vm2, %v1553_v34, 0.0  ;;  %v2041_v48 = vpack.c.bf16 %v935_v35, %v935_v35  ;;  %v1449_v50 = vsel %vm1387_vm2, %v935_v35, 0.0  ;;  %v1554_v51 = vmul.f32 %v935_v35, %v935_v35 }
 0x17b   : > { %v1647_v53 = vadd.f32 %v1646_v47, %v1645_v8  ;;  %v1450_v55 = vadd.f32 %v1449_v50, %v1448_v42  ;;  %1385 = vst.msk [vmem:[%s2400_s26 + $0xf8] sm:$0xf] %vm1322_vm1, %v2072_v44  ;;  %v2073_v5 = vpack.c.bf16 %v2775_v60, %v2775_v60  ;;  %v1558_v18 = vmul.f32 %v2437_v57, %v2437_v57 }
 0x17c   : > { %1354 = vst.msk [vmem:[%s2400_s26 + $0x7c] sm:$0xf] %vm1322_vm1, %v2041_v48  ;;  %v1648_v63 = vsel %vm1387_vm2, %v1554_v51, 0.0  ;;  %v1654_v27 = vsel %vm1387_vm2, %v1557_v15, 0.0  ;;  %v1457_v25 = vsel %vm1387_vm2, %v2437_v57, 0.0  ;;  %v1559_v31 = vmul.f32 %v2446_v1, %v2446_v1 }
 0x17d   : > { %v1452_v2 = vadd.f32 %v1451_v61, %v1450_v55  ;;  %v1649_v4 = vadd.f32 %v1648_v63, %v1647_v53  ;;  %1386 = vst.msk [vmem:[%s2400_s26 + $0xfc] sm:$0xf] %vm1322_vm1, %v2073_v5  ;;  %v1656_v34 = vsel %vm1387_vm2, %v1558_v18, 0.0  ;;  %v1560_v35 = vmul.f32 %v2461_v21, %v2461_v21 }
 0x17e   : > { %v1658_v41 = vsel %vm1387_vm2, %v1559_v31, 0.0  ;;  %v1461_v57 = vsel %vm1387_vm2, %v2461_v21, 0.0  ;;  %v1561_v42 = vmul.f32 %v2470_v30, %v2470_v30  ;;  %v1463_v1 = vsel %vm1387_vm2, %v2470_v30, 0.0 }
 0x17f   : > { %v1454_v8 = vadd.f32 %v1453_v10, %v1452_v2  ;;  %v1651_v9 = vadd.f32 %v1650_v7, %v1649_v4  ;;  %v1660_v48 = vsel %vm1387_vm2, %v1560_v35, 0.0  ;;  %v1562_v50 = vmul.f32 %v2485_v49, %v2485_v49 }
 0x180   : > { %v1662_v55 = vsel %vm1387_vm2, %v1561_v42, 0.0  ;;  %v1465_v21 = vsel %vm1387_vm2, %v2485_v49, 0.0  ;;  %v1563_v61 = vmul.f32 %v2494_v58, %v2494_v58  ;;  %v1467_v30 = vsel %vm1387_vm2, %v2494_v58, 0.0 }
 0x181   : > { %v1456_v19 = vadd.f32 %v1455_v16, %v1454_v8  ;;  %v1653_v22 = vadd.f32 %v1652_v11, %v1651_v9  ;;  %v1664_v2 = vsel %vm1387_vm2, %v1562_v50, 0.0  ;;  %v1564_v4 = vmul.f32 %v2509_v14, %v2509_v14 }
 0x182   : > { %v1666_v10 = vsel %vm1387_vm2, %v1563_v61, 0.0  ;;  %v1469_v49 = vsel %vm1387_vm2, %v2509_v14, 0.0  ;;  %v1565_v15 = vmul.f32 %v2518_v24, %v2518_v24  ;;  %v1471_v58 = vsel %vm1387_vm2, %v2518_v24, 0.0 }
 0x183   : > { %v1458_v32 = vadd.f32 %v1457_v25, %v1456_v19  ;;  %v1655_v33 = vadd.f32 %v1654_v27, %v1653_v22  ;;  %v1668_v11 = vsel %vm1387_vm2, %v1564_v4, 0.0  ;;  %v1566_v16 = vmul.f32 %v2533_v45, %v2533_v45 }
 0x184   : > { %v1670_v22 = vsel %vm1387_vm2, %v1565_v15, 0.0  ;;  %v1473_v14 = vsel %vm1387_vm2, %v2533_v45, 0.0  ;;  %v1567_v27 = vmul.f32 %v2542_v54, %v2542_v54  ;;  %v1475_v24 = vsel %vm1387_vm2, %v2542_v54, 0.0 }
 0x185   : > { %v1460_v36 = vadd.f32 %v1459_v39, %v1458_v32  ;;  %v1657_v40 = vadd.f32 %v1656_v34, %v1655_v33  ;;  %v1672_v32 = vsel %vm1387_vm2, %v1566_v16, 0.0  ;;  %v1568_v33 = vmul.f32 %v2557_v12, %v2557_v12 }
 0x186   : > { %v1674_v35 = vsel %vm1387_vm2, %v1567_v27, 0.0  ;;  %v1477_v45 = vsel %vm1387_vm2, %v2557_v12, 0.0  ;;  %v1479_v54 = vsel %vm1387_vm2, %v2566_v23, 0.0  ;;  %v1570_v42 = vmul.f32 %v2581_v46, %v2581_v46 }
 0x187   : > { %v1462_v44 = vadd.f32 %v1461_v57, %v1460_v36  ;;  %v1659_v47 = vadd.f32 %v1658_v41, %v1657_v40  ;;  %v1569_v36 = vmul.f32 %v2566_v23, %v2566_v23  ;;  %v1676_v57 = vsel %vm1387_vm2, %v1568_v33, 0.0 }
 0x188   : > { %v1481_v12 = vsel %vm1387_vm2, %v2581_v46, 0.0  ;;  %v1483_v23 = vsel %vm1387_vm2, %v2590_v56, 0.0  ;;  %v1485_v46 = vsel %vm1387_vm2, %v2605_v17, 0.0  ;;  %v1575_v15 = vmul.f32 %v2638_v0, %v2638_v0 }
 0x189   : > { %v1464_v51 = vadd.f32 %v1463_v1, %v1462_v44  ;;  %v1661_v53 = vadd.f32 %v1660_v48, %v1659_v47  ;;  %v1678_v48 = vsel %vm1387_vm2, %v1569_v36, 0.0  ;;  %v1571_v1 = vmul.f32 %v2590_v56, %v2590_v56 }
 0x18a   : > { %v1487_v56 = vsel %vm1387_vm2, %v2614_v29, 0.0  ;;  %v1580_v36 = vmul.f32 %v2701_v43, %v2701_v43 }
 0x18b   : > { %v1466_v62 = vadd.f32 %v1465_v21, %v1464_v51  ;;  %v1663_v63 = vadd.f32 %v1662_v55, %v1661_v53  ;;  %v1680_v53 = vsel %vm1387_vm2, %v1570_v42, 0.0  ;;  %v1572_v55 = vmul.f32 %v2605_v17, %v2605_v17 }
 0x18c   : > { %v1489_v17 = vsel %vm1387_vm2, %v2629_v52, 0.0 }
 0x18d   : > { %v1665_v5 = vadd.f32 %v1664_v2, %v1663_v63  ;;  %v1468_v7 = vadd.f32 %v1467_v30, %v1466_v62  ;;  %v1682_v62 = vsel %vm1387_vm2, %v1571_v1, 0.0  ;;  %v1573_v63 = vmul.f32 %v2614_v29, %v2614_v29 }
 0x18e   : > { %v1684_v4 = vsel %vm1387_vm2, %v1572_v55, 0.0  ;;  %v1491_v29 = vsel %vm1387_vm2, %v2638_v0, 0.0  ;;  %v1495_v0 = vsel %vm1387_vm2, %v2662_v38, 0.0 }
 0x18f   : > { %v1470_v8 = vadd.f32 %v1469_v49, %v1468_v7  ;;  %v1667_v9 = vadd.f32 %v1666_v10, %v1665_v5  ;;  %v1574_v5 = vmul.f32 %v2629_v52, %v2629_v52  ;;  %v1686_v49 = vsel %vm1387_vm2, %v1573_v63, 0.0 }
 0x190   : > { %v1493_v52 = vsel %vm1387_vm2, %v2653_v28, 0.0  ;;  %v1509_v63 = vsel %vm1387_vm2, %v2749_v6, 0.0 }
 0x191   : > { %v1472_v18 = vadd.f32 %v1471_v58, %v1470_v8  ;;  %v1669_v19 = vadd.f32 %v1668_v11, %v1667_v9  ;;  %v1688_v11 = vsel %vm1387_vm2, %v1574_v5, 0.0  ;;  %v1576_v58 = vmul.f32 %v2653_v28, %v2653_v28 }
 0x192   : > { %v1497_v28 = vsel %vm1387_vm2, %v2677_v3, 0.0  ;;  %v1586_v5 = vmul.f32 %v2775_v60, %v2775_v60 }
 0x193   : > { %v1474_v25 = vadd.f32 %v1473_v14, %v1472_v18  ;;  %v1671_v31 = vadd.f32 %v1670_v22, %v1669_v19  ;;  %v1690_v19 = vsel %vm1387_vm2, %v1575_v15, 0.0  ;;  %v1577_v22 = vmul.f32 %v2662_v38, %v2662_v38 }
 0x194   : > { %v1499_v38 = vsel %vm1387_vm2, %v2686_v13, 0.0  ;;  %v1712_v15 = vsel %vm1387_vm2, %v1586_v5, 0.0 }
 0x195   : > { %v1476_v34 = vadd.f32 %v1475_v24, %v1474_v25  ;;  %v1673_v39 = vadd.f32 %v1672_v32, %v1671_v31  ;;  %v1692_v25 = vsel %vm1387_vm2, %v1576_v58, 0.0  ;;  %v1578_v31 = vmul.f32 %v2677_v3, %v2677_v3 }
 0x196   : > { %v1694_v33 = vsel %vm1387_vm2, %v1577_v22, 0.0  ;;  %v1501_v3 = vsel %vm1387_vm2, %v2701_v43, 0.0  ;;  %v1505_v43 = vsel %vm1387_vm2, %v2725_v26, 0.0 }
 0x197   : > { %v1478_v40 = vadd.f32 %v1477_v45, %v1476_v34  ;;  %v1675_v41 = vadd.f32 %v1674_v35, %v1673_v39  ;;  %v1579_v34 = vmul.f32 %v2686_v13, %v2686_v13  ;;  %v1696_v45 = vsel %vm1387_vm2, %v1578_v31, 0.0 }
 0x198   : > { %v1503_v13 = vsel %vm1387_vm2, %v2710_v59, 0.0 }
 0x199   : > { %v1480_v44 = vadd.f32 %v1479_v54, %v1478_v40  ;;  %v1677_v47 = vadd.f32 %v1676_v57, %v1675_v41  ;;  %v1698_v57 = vsel %vm1387_vm2, %v1579_v34, 0.0  ;;  %v1581_v54 = vmul.f32 %v2710_v59, %v2710_v59 }
 0x19a   : > { %v1507_v59 = vsel %vm1387_vm2, %v2734_v37, 0.0 }
 0x19b   : > { %v1482_v50 = vadd.f32 %v1481_v12, %v1480_v44  ;;  %v1679_v51 = vadd.f32 %v1678_v48, %v1677_v47  ;;  %v1700_v47 = vsel %vm1387_vm2, %v1580_v36, 0.0  ;;  %v1582_v48 = vmul.f32 %v2725_v26, %v2725_v26 }
 0x19d   : > { %v1484_v21 = vadd.f32 %v1483_v23, %v1482_v50  ;;  %v1681_v61 = vadd.f32 %v1680_v53, %v1679_v51  ;;  %v1702_v50 = vsel %vm1387_vm2, %v1581_v54, 0.0  ;;  %v1583_v51 = vmul.f32 %v2734_v37, %v2734_v37 }
 0x19e   : > { %v1704_v55 = vsel %vm1387_vm2, %v1582_v48, 0.0 }
 0x19f   : > { %v1683_v2 = vadd.f32 %v1682_v62, %v1681_v61  ;;  %v1486_v30 = vadd.f32 %v1485_v46, %v1484_v21  ;;  %v1584_v21 = vmul.f32 %v2749_v6, %v2749_v6  ;;  %v1585_v61 = vmul.f32 %v2758_v20, %v2758_v20 }
 0x1a0   : > { %v1706_v26 = vsel %vm1387_vm2, %v1583_v51, 0.0 }
 0x1a1   : > { %v1685_v7 = vadd.f32 %v1684_v4, %v1683_v2  ;;  %v1488_v10 = vadd.f32 %v1487_v56, %v1486_v30  ;;  %v1511_v2 = vsel %vm1387_vm2, %v2758_v20, 0.0  ;;  %v1708_v37 = vsel %vm1387_vm2, %v1584_v21, 0.0 }
 0x1a2   : > { %v1710_v56 = vsel %vm1387_vm2, %v1585_v61, 0.0 }
 0x1a3   : > { %v1687_v8 = vadd.f32 %v1686_v49, %v1685_v7  ;;  %v1490_v9 = vadd.f32 %v1489_v17, %v1488_v10  ;;  %v1513_v49 = vsel %vm1387_vm2, %v2775_v60, 0.0 }
 0x1a5   : > { %v1689_v16 = vadd.f32 %v1688_v11, %v1687_v8  ;;  %v1492_v18 = vadd.f32 %v1491_v29, %v1490_v9 }
 0x1a7   : > { %v1691_v14 = vadd.f32 %v1690_v19, %v1689_v16  ;;  %v1494_v27 = vadd.f32 %v1493_v52, %v1492_v18 }
 0x1a9   : > { %v1693_v32 = vadd.f32 %v1692_v25, %v1691_v14  ;;  %v1496_v24 = vadd.f32 %v1495_v0, %v1494_v27 }
 0x1ab   : > { %v1695_v39 = vadd.f32 %v1694_v33, %v1693_v32  ;;  %v1498_v35 = vadd.f32 %v1497_v28, %v1496_v24 }
 0x1ad   : > { %v1697_v40 = vadd.f32 %v1696_v45, %v1695_v39  ;;  %v1500_v41 = vadd.f32 %v1499_v38, %v1498_v35 }
 0x1af   : > { %v1699_v42 = vadd.f32 %v1698_v57, %v1697_v40  ;;  %v1502_v44 = vadd.f32 %v1501_v3, %v1500_v41 }
 0x1b1   : > { %v1701_v12 = vadd.f32 %v1700_v47, %v1699_v42  ;;  %v1504_v1 = vadd.f32 %v1503_v13, %v1502_v44 }
 0x1b3   : > { %v1703_v53 = vadd.f32 %v1702_v50, %v1701_v12  ;;  %v1506_v23 = vadd.f32 %v1505_v43, %v1504_v1 }
 0x1b5   : > { %v1705_v62 = vadd.f32 %v1704_v55, %v1703_v53  ;;  %v1508_v46 = vadd.f32 %v1507_v59, %v1506_v23 }
 0x1b7   : > { %v1707_v30 = vadd.f32 %v1706_v26, %v1705_v62  ;;  %v1510_v4 = vadd.f32 %v1509_v63, %v1508_v46 }
 0x1b9   : > { %v1709_v7 = vadd.f32 %v1708_v37, %v1707_v30  ;;  %v1512_v10 = vadd.f32 %v1511_v2, %v1510_v4 }
 0x1bb   : > { %v1711_v17 = vadd.f32 %v1710_v56, %v1709_v7  ;;  %v1514_v6 = vadd.f32 %v1513_v49, %v1512_v10 }
 0x1bd   : > { %v1515_v20 = vrot.slane %v1514_v6, 4  ;;  %v1713_v8 = vadd.f32 %v1712_v15, %v1711_v17 }
 0x1bf   : > { %v1516_v9 = vadd.f32 %v1515_v20, %v1514_v6  ;;  %v1714_v11 = vrot.slane %v1713_v8, 4 }
 0x1c1   : > { %v1517_v29 = vrot.slane %v1516_v9, 2  ;;  %v1715_v58 = vadd.f32 %v1714_v11, %v1713_v8 }
 0x1c3   : > { %v1518_v16 = vadd.f32 %v1517_v29, %v1516_v9  ;;  %v1716_v18 = vrot.slane %v1715_v58, 2 }
 0x1c5   : > { %v1519_v19 = vrot.slane %v1518_v16, 1  ;;  %v1717_v52 = vadd.f32 %v1716_v18, %v1715_v58 }
 0x1c7   : > { %v1520_v60 = vadd.f32 %v1519_v19, %v1518_v16  ;;  %v1718_v22 = vrot.slane %v1717_v52, 1 }
 0x1c9   : > { %1522 = vst.msk [vmem:[%s244_s28] sm:$0x1] %vm1521_vm3, %v1520_v60  ;;  %v1719_v14 = vadd.f32 %v1718_v22, %v1717_v52 }
 0x1cb   : > { %1720 = vst.msk [vmem:[%s247_s6] sm:$0x1] %vm1521_vm3, %v1719_v14 }
 0x1cc PF: > { %s16_s18 = sadd.s32 1, %s2212_s18  }
 0x1cd   : > { %p13_p5 = scmp.ge.s32.totalorder %s16_s18, 4  }
 0x1cf   :  { %15 = sbr.rel (!%p13_p5) target bundleno = 1 (0x1), region = 86 }

// kernel: _lambda_.16
= control target key start
LH: loop header
LB: loop body
LE: loop exit
PB: predicated region body
PF: predicated region fallthrough
CT: control target
= control target key end

     0   :  { %s1351_s12 = smov 0   ;;  %s1681_s0 = inlined_call_operand.vmem [shape: bf16[1024,32], index: 0, kind: input, shape index: {}]   ;;  %s1682_s1 = inlined_call_operand.vmem [shape: f32[1,32], index: 1, kind: input, shape index: {}]   ;;  %s1683_s2 = inlined_call_operand.vmem [shape: f32[1,32], index: 2, kind: input, shape index: {}]   ;;  %s1684_s3 = inlined_call_operand.vmem [shape: bf16[1024,32], index: 3, kind: output, shape index: {}]  }
   0x1 LB: > { %s1013_s13 = sadd.s32 4294967295, %s1329_s12   ;;  %p1017_p0 = scmp.ge.s32.totalorder %s1329_s12, 1  ;;  %s1329_s12 = sphi %s1351_s12, %s13_s12  }
   0x2   : > { %p138_p1 = scmp.lt.s32.totalorder %s1329_s12, 3 }
   0x4   : > { %p139_p2 = pnand %p1017_p0, %p138_p1 }
   0x5   : > { %s1018_s14 = sshll.u32 (!%p139_p2), %s1013_s13, 6  ;;  %v1372_v0 = vld [vmem:[%s1682_s1] ss:$0 sm:$0xff] (!%p139_p2)  ;;  %vm892_vm0 = vcmask (!%p139_p2), 257024  }
   0x6   : > { %142 = sbr.rel (%p139_p2) target bundleno = 135 (0x87), region = 32  ;;  %p163_p3 = scmp.lt.s32.totalorder (!%p139_p2), %s1018_s14, 127  ;;  %v1381_v9 = vld [vmem:[%s1683_s2] ss:$0 sm:$0xff] (!%p139_p2) }
   0xd   : > { %s1686_s14 = smov (!%p163_p3, %s1018_s14), 127 }
   0xe   : > { %s1019_s15 = sshll.u32 %s1686_s14, 2 }
   0xf   : > { %s1367_s18 = scalar_lea.vmem %s1681_s0, %s1019_s15  ;;  %s1404_s25 = scalar_lea.vmem %s1684_s3, %s1019_s15 }
  0x10   : > { %v1155_v1 = vld [vmem:[%s1367_s18] sm:$0xff]   ;;  %v1282_v2 = vld [vmem:[%s1367_s18 + $0x8] sm:$0xff]   ;;  %v1283_v3 = vld [vmem:[%s1367_s18 + $0x10] sm:$0xff]  }
  0x11   : > { %v1156_v4 = vunpack.c.l.bf16 %v1155_v1  ;;  %v1157_v5 = vunpack.c.h.bf16 %v1155_v1  ;;  %v1160_v6 = vunpack.c.l.bf16 %v1282_v2  ;;  %v1161_v7 = vunpack.c.h.bf16 %v1282_v2  ;;  %v1284_v8 = vld [vmem:[%s1367_s18 + $0x18] sm:$0xff]   ;;  %v1285_v41 = vld [vmem:[%s1367_s18 + $0x20] sm:$0xff]   ;;  %v1286_v45 = vld [vmem:[%s1367_s18 + $0x28] sm:$0xff]  }
  0x12   : > { %v1164_v10 = vunpack.c.l.bf16 %v1283_v3  ;;  %v1165_v11 = vunpack.c.h.bf16 %v1283_v3  ;;  %v1168_v12 = vunpack.c.l.bf16 %v1284_v8  ;;  %v1169_v13 = vunpack.c.h.bf16 %v1284_v8  ;;  %v1287_v56 = vld [vmem:[%s1367_s18 + $0x30] sm:$0xff]   ;;  %v1288_v57 = vld [vmem:[%s1367_s18 + $0x38] sm:$0xff]  }
  0x13   : > { %v309_v14 = vmul.f32 %v1156_v4, %v1372_v0  ;;  %v310_v15 = vmul.f32 %v1157_v5, %v1372_v0  ;;  %v311_v16 = vmul.f32 %v1160_v6, %v1372_v0  ;;  %v312_v17 = vmul.f32 %v1161_v7, %v1372_v0 }
  0x14   : > { %v313_v18 = vmul.f32 %v1164_v10, %v1372_v0  ;;  %v314_v19 = vmul.f32 %v1165_v11, %v1372_v0  ;;  %v315_v20 = vmul.f32 %v1168_v12, %v1372_v0  ;;  %v316_v21 = vmul.f32 %v1169_v13, %v1372_v0 }
  0x15   : > { %v380_v22 = vadd.f32 %v1381_v9, %v309_v14  ;;  %v381_v23 = vadd.f32 %v1381_v9, %v310_v15  ;;  %v382_v24 = vadd.f32 %v1381_v9, %v311_v16  ;;  %v383_v25 = vadd.f32 %v1381_v9, %v312_v17 }
  0x16   : > { %v384_v26 = vadd.f32 %v1381_v9, %v313_v18  ;;  %v385_v27 = vadd.f32 %v1381_v9, %v314_v19  ;;  %v386_v28 = vadd.f32 %v1381_v9, %v315_v20  ;;  %v387_v29 = vadd.f32 %v1381_v9, %v316_v21 }
  0x17   : > { %vm444_vm1 = vcmp.ge.f32.partialorder %v380_v22, 0.0  ;;  %v508_v30 = vmul.f32 0.2, %v380_v22  ;;  %vm445_vm2 = vcmp.ge.f32.partialorder %v381_v23, 0.0  ;;  %v509_v31 = vmul.f32 0.2, %v381_v23 }
  0x18   : > { %vm446_vm3 = vcmp.ge.f32.partialorder %v382_v24, 0.0  ;;  %v510_v32 = vmul.f32 0.2, %v382_v24  ;;  %vm447_vm4 = vcmp.ge.f32.partialorder %v383_v25, 0.0  ;;  %v511_v33 = vmul.f32 0.2, %v383_v25 }
  0x19   : > { %v572_v34 = vsel %vm444_vm1, %v380_v22, %v508_v30  ;;  %v573_v35 = vsel %vm445_vm2, %v381_v23, %v509_v31  ;;  %vm448_vm5 = vcmp.ge.f32.partialorder %v384_v26, 0.0  ;;  %v512_v36 = vmul.f32 0.2, %v384_v26 }
  0x1a   : > { %v1090_v37 = vpack.c.bf16 %v572_v34, %v572_v34  ;;  %v1091_v38 = vpack.c.bf16 %v573_v35, %v573_v35  ;;  %v574_v39 = vsel %vm446_vm3, %v382_v24, %v510_v32  ;;  %v575_v40 = vsel %vm447_vm4, %v383_v25, %v511_v33  ;;  %v1289_v24 = vld [vmem:[%s1367_s18 + $0x40] sm:$0xff]  }
  0x1b   : > { %v1092_v42 = vpack.c.bf16 %v574_v39, %v574_v39  ;;  %v1093_v43 = vpack.c.bf16 %v575_v40, %v575_v40  ;;  %v576_v44 = vsel %vm448_vm5, %v384_v26, %v512_v36  ;;  %vm449_vm6 = vcmp.ge.f32.partialorder %v385_v27, 0.0 }
  0x1c   : > { %893 = vst.msk [vmem:[%s1404_s25] sm:$0xf] %vm892_vm0, %v1090_v37  ;;  %894 = vst.msk [vmem:[%s1404_s25 + $0x4] sm:$0xf] %vm892_vm0, %v1091_v38  ;;  %v1094_v46 = vpack.c.bf16 %v576_v44, %v576_v44  ;;  %v513_v47 = vmul.f32 0.2, %v385_v27  ;;  %v1172_v50 = vunpack.c.l.bf16 %v1285_v41  ;;  %v1173_v51 = vunpack.c.h.bf16 %v1285_v41 }
  0x1d   : > { %vm450_vm7 = vcmp.ge.f32.partialorder %v386_v28, 0.0  ;;  %v514_v48 = vmul.f32 0.2, %v386_v28  ;;  %895 = vst.msk [vmem:[%s1404_s25 + $0x8] sm:$0xf] %vm892_vm0, %v1092_v42  ;;  %vm451_vm8 = vcmp.ge.f32.partialorder %v387_v29, 0.0  ;;  %v1176_v54 = vunpack.c.l.bf16 %v1286_v45 }
  0x1e   : > { %896 = vst.msk [vmem:[%s1404_s25 + $0xc] sm:$0xf] %vm892_vm0, %v1093_v43  ;;  %v515_v49 = vmul.f32 0.2, %v387_v29  ;;  %897 = vst.msk [vmem:[%s1404_s25 + $0x10] sm:$0xf] %vm892_vm0, %v1094_v46  ;;  %v577_v52 = vsel %vm449_vm6, %v385_v27, %v513_v47  ;;  %v1177_v55 = vunpack.c.h.bf16 %v1286_v45  ;;  %v317_v61 = vmul.f32 %v1172_v50, %v1372_v0 }
  0x1f   : > { %v578_v53 = vsel %vm450_vm7, %v386_v28, %v514_v48  ;;  %v1095_v58 = vpack.c.bf16 %v577_v52, %v577_v52  ;;  %v318_v63 = vmul.f32 %v1173_v51, %v1372_v0  ;;  %v319_v1 = vmul.f32 %v1176_v54, %v1372_v0  ;;  %v1290_v28 = vld [vmem:[%s1367_s18 + $0x48] sm:$0xff]   ;;  %v1291_v48 = vld [vmem:[%s1367_s18 + $0x50] sm:$0xff]  }
  0x20   : > { %v1096_v59 = vpack.c.bf16 %v578_v53, %v578_v53  ;;  %v579_v60 = vsel %vm451_vm8, %v387_v29, %v515_v49  ;;  %v320_v2 = vmul.f32 %v1177_v55, %v1372_v0  ;;  %v388_v3 = vadd.f32 %v1381_v9, %v317_v61 }
  0x21   : > { %v1097_v62 = vpack.c.bf16 %v579_v60, %v579_v60  ;;  %898 = vst.msk [vmem:[%s1404_s25 + $0x14] sm:$0xf] %vm892_vm0, %v1095_v58  ;;  %v1180_v4 = vunpack.c.l.bf16 %v1287_v56  ;;  %v1181_v5 = vunpack.c.h.bf16 %v1287_v56  ;;  %v1184_v6 = vunpack.c.l.bf16 %v1288_v57 }
  0x22   : > { %899 = vst.msk [vmem:[%s1404_s25 + $0x18] sm:$0xf] %vm892_vm0, %v1096_v59  ;;  %v389_v7 = vadd.f32 %v1381_v9, %v318_v63  ;;  %v390_v8 = vadd.f32 %v1381_v9, %v319_v1  ;;  %v391_v10 = vadd.f32 %v1381_v9, %v320_v2  ;;  %v1185_v11 = vunpack.c.h.bf16 %v1288_v57 }
  0x23   : > { %900 = vst.msk [vmem:[%s1404_s25 + $0x1c] sm:$0xf] %vm892_vm0, %v1097_v62  ;;  %vm452_vm9 = vcmp.ge.f32.partialorder %v388_v3, 0.0  ;;  %v516_v12 = vmul.f32 0.2, %v388_v3  ;;  %v321_v13 = vmul.f32 %v1180_v4, %v1372_v0  ;;  %v322_v14 = vmul.f32 %v1181_v5, %v1372_v0  ;;  %v1292_v4 = vld [vmem:[%s1367_s18 + $0x58] sm:$0xff]  }
  0x24   : > { %vm453_vm10 = vcmp.ge.f32.partialorder %v389_v7, 0.0  ;;  %v517_v15 = vmul.f32 0.2, %v389_v7  ;;  %vm454_vm11 = vcmp.ge.f32.partialorder %v390_v8, 0.0  ;;  %v518_v16 = vmul.f32 0.2, %v390_v8 }
  0x25   : > { %v580_v17 = vsel %vm452_vm9, %v388_v3, %v516_v12  ;;  %vm455_vm12 = vcmp.ge.f32.partialorder %v391_v10, 0.0  ;;  %v519_v18 = vmul.f32 0.2, %v391_v10  ;;  %v392_v19 = vadd.f32 %v1381_v9, %v321_v13 }
  0x26   : > { %v1098_v20 = vpack.c.bf16 %v580_v17, %v580_v17  ;;  %v581_v21 = vsel %vm453_vm10, %v389_v7, %v517_v15  ;;  %v582_v22 = vsel %vm454_vm11, %v390_v8, %v518_v16  ;;  %v393_v23 = vadd.f32 %v1381_v9, %v322_v14 }
  0x27   : > { %v1099_v25 = vpack.c.bf16 %v581_v21, %v581_v21  ;;  %v1100_v26 = vpack.c.bf16 %v582_v22, %v582_v22  ;;  %v583_v27 = vsel %vm455_vm12, %v391_v10, %v519_v18  ;;  %vm456_vm13 = vcmp.ge.f32.partialorder %v392_v19, 0.0  ;;  %v1293_v10 = vld [vmem:[%s1367_s18 + $0x60] sm:$0xff]  }
  0x28   : > { %901 = vst.msk [vmem:[%s1404_s25 + $0x20] sm:$0xf] %vm892_vm0, %v1098_v20  ;;  %v1101_v29 = vpack.c.bf16 %v583_v27, %v583_v27  ;;  %v520_v30 = vmul.f32 0.2, %v392_v19  ;;  %vm457_vm14 = vcmp.ge.f32.partialorder %v393_v23, 0.0  ;;  %v323_v32 = vmul.f32 %v1184_v6, %v1372_v0 }
  0x29   : > { %v521_v31 = vmul.f32 0.2, %v393_v23  ;;  %902 = vst.msk [vmem:[%s1404_s25 + $0x24] sm:$0xf] %vm892_vm0, %v1099_v25  ;;  %903 = vst.msk [vmem:[%s1404_s25 + $0x28] sm:$0xf] %vm892_vm0, %v1100_v26  ;;  %v324_v33 = vmul.f32 %v1185_v11, %v1372_v0  ;;  %v1188_v34 = vunpack.c.l.bf16 %v1289_v24  ;;  %v1189_v35 = vunpack.c.h.bf16 %v1289_v24 }
  0x2a   : > { %904 = vst.msk [vmem:[%s1404_s25 + $0x2c] sm:$0xf] %vm892_vm0, %v1101_v29  ;;  %v584_v36 = vsel %vm456_vm13, %v392_v19, %v520_v30  ;;  %v1192_v38 = vunpack.c.l.bf16 %v1290_v28  ;;  %v1193_v39 = vunpack.c.h.bf16 %v1290_v28  ;;  %v394_v42 = vadd.f32 %v1381_v9, %v323_v32  ;;  %v1294_v19 = vld [vmem:[%s1367_s18 + $0x68] sm:$0xff]  }
  0x2b   : > { %v585_v37 = vsel %vm457_vm14, %v393_v23, %v521_v31  ;;  %v1102_v40 = vpack.c.bf16 %v584_v36, %v584_v36  ;;  %v395_v43 = vadd.f32 %v1381_v9, %v324_v33  ;;  %v325_v44 = vmul.f32 %v1188_v34, %v1372_v0 }
  0x2c   : > { %v1103_v41 = vpack.c.bf16 %v585_v37, %v585_v37  ;;  %v326_v45 = vmul.f32 %v1189_v35, %v1372_v0  ;;  %v327_v46 = vmul.f32 %v1192_v38, %v1372_v0  ;;  %v328_v47 = vmul.f32 %v1193_v39, %v1372_v0 }
  0x2d   : > { %905 = vst.msk [vmem:[%s1404_s25 + $0x30] sm:$0xf] %vm892_vm0, %v1102_v40  ;;  %vm458_vm15 = vcmp.ge.f32.partialorder %v394_v42, 0.0  ;;  %v522_v49 = vmul.f32 0.2, %v394_v42  ;;  %vm459_vm1 = vcmp.ge.f32.partialorder %v395_v43, 0.0  ;;  %v396_v51 = vadd.f32 %v1381_v9, %v325_v44 }
  0x2e   : > { %906 = vst.msk [vmem:[%s1404_s25 + $0x34] sm:$0xf] %vm892_vm0, %v1103_v41  ;;  %v523_v50 = vmul.f32 0.2, %v395_v43  ;;  %v397_v52 = vadd.f32 %v1381_v9, %v326_v45  ;;  %v398_v53 = vadd.f32 %v1381_v9, %v327_v46  ;;  %v399_v54 = vadd.f32 %v1381_v9, %v328_v47  ;;  %v1295_v46 = vld [vmem:[%s1367_s18 + $0x70] sm:$0xff]   ;;  %v1296_v47 = vld [vmem:[%s1367_s18 + $0x78] sm:$0xff]  }
  0x2f   : > { %v586_v55 = vsel %vm458_vm15, %v394_v42, %v522_v49  ;;  %v1196_v57 = vunpack.c.l.bf16 %v1291_v48  ;;  %v1197_v58 = vunpack.c.h.bf16 %v1291_v48  ;;  %vm460_vm2 = vcmp.ge.f32.partialorder %v396_v51, 0.0 }
  0x30   : > { %v587_v56 = vsel %vm459_vm1, %v395_v43, %v523_v50  ;;  %v1104_v59 = vpack.c.bf16 %v586_v55, %v586_v55  ;;  %v524_v61 = vmul.f32 0.2, %v396_v51  ;;  %vm461_vm3 = vcmp.ge.f32.partialorder %v397_v52, 0.0 }
  0x31   : > { %v1105_v60 = vpack.c.bf16 %v587_v56, %v587_v56  ;;  %v525_v62 = vmul.f32 0.2, %v397_v52  ;;  %vm462_vm4 = vcmp.ge.f32.partialorder %v398_v53, 0.0  ;;  %v526_v63 = vmul.f32 0.2, %v398_v53 }
  0x32   : > { %907 = vst.msk [vmem:[%s1404_s25 + $0x38] sm:$0xf] %vm892_vm0, %v1104_v59  ;;  %v588_v1 = vsel %vm460_vm2, %v396_v51, %v524_v61  ;;  %vm463_vm5 = vcmp.ge.f32.partialorder %v399_v54, 0.0  ;;  %v527_v2 = vmul.f32 0.2, %v399_v54  ;;  %v329_v3 = vmul.f32 %v1196_v57, %v1372_v0 }
  0x33   : > { %908 = vst.msk [vmem:[%s1404_s25 + $0x3c] sm:$0xf] %vm892_vm0, %v1105_v60  ;;  %v1106_v5 = vpack.c.bf16 %v588_v1, %v588_v1  ;;  %v589_v6 = vsel %vm461_vm3, %v397_v52, %v525_v62  ;;  %v590_v7 = vsel %vm462_vm4, %v398_v53, %v526_v63  ;;  %v330_v8 = vmul.f32 %v1197_v58, %v1372_v0  ;;  %v1297_v52 = vld [vmem:[%s1367_s18 + $0x80] sm:$0xff]  }
  0x34   : > { %v1107_v11 = vpack.c.bf16 %v589_v6, %v589_v6  ;;  %v1108_v12 = vpack.c.bf16 %v590_v7, %v590_v7  ;;  %v591_v13 = vsel %vm463_vm5, %v399_v54, %v527_v2  ;;  %v400_v14 = vadd.f32 %v1381_v9, %v329_v3 }
  0x35   : > { %909 = vst.msk [vmem:[%s1404_s25 + $0x40] sm:$0xf] %vm892_vm0, %v1106_v5  ;;  %v1109_v15 = vpack.c.bf16 %v591_v13, %v591_v13  ;;  %v401_v16 = vadd.f32 %v1381_v9, %v330_v8  ;;  %v1200_v17 = vunpack.c.l.bf16 %v1292_v4  ;;  %v1201_v18 = vunpack.c.h.bf16 %v1292_v4 }
  0x36   : > { %910 = vst.msk [vmem:[%s1404_s25 + $0x44] sm:$0xf] %vm892_vm0, %v1107_v11  ;;  %911 = vst.msk [vmem:[%s1404_s25 + $0x48] sm:$0xf] %vm892_vm0, %v1108_v12  ;;  %vm464_vm6 = vcmp.ge.f32.partialorder %v400_v14, 0.0  ;;  %v1204_v21 = vunpack.c.l.bf16 %v1293_v10  ;;  %v1205_v22 = vunpack.c.h.bf16 %v1293_v10  ;;  %v1208_v29 = vunpack.c.l.bf16 %v1294_v19 }
  0x37   : > { %v528_v20 = vmul.f32 0.2, %v400_v14  ;;  %912 = vst.msk [vmem:[%s1404_s25 + $0x4c] sm:$0xf] %vm892_vm0, %v1109_v15  ;;  %vm465_vm7 = vcmp.ge.f32.partialorder %v401_v16, 0.0  ;;  %v331_v24 = vmul.f32 %v1200_v17, %v1372_v0  ;;  %v332_v25 = vmul.f32 %v1201_v18, %v1372_v0 }
  0x38   : > { %v529_v23 = vmul.f32 0.2, %v401_v16  ;;  %v333_v27 = vmul.f32 %v1204_v21, %v1372_v0  ;;  %v334_v28 = vmul.f32 %v1205_v22, %v1372_v0  ;;  %v335_v37 = vmul.f32 %v1208_v29, %v1372_v0  ;;  %v1299_v29 = vld [vmem:[%s1367_s18 + $0x90] sm:$0xff]  }
  0x39   : > { %v592_v26 = vsel %vm464_vm6, %v400_v14, %v528_v20  ;;  %v402_v32 = vadd.f32 %v1381_v9, %v331_v24  ;;  %v403_v33 = vadd.f32 %v1381_v9, %v332_v25  ;;  %v1209_v45 = vunpack.c.h.bf16 %v1294_v19  ;;  %v1298_v24 = vld [vmem:[%s1367_s18 + $0x88] sm:$0xff]  }
  0x3a   : > { %v1110_v30 = vpack.c.bf16 %v592_v26, %v592_v26  ;;  %v593_v31 = vsel %vm465_vm7, %v401_v16, %v529_v23  ;;  %v404_v35 = vadd.f32 %v1381_v9, %v333_v27  ;;  %v405_v36 = vadd.f32 %v1381_v9, %v334_v28 }
  0x3b   : > { %v1111_v34 = vpack.c.bf16 %v593_v31, %v593_v31  ;;  %vm466_vm8 = vcmp.ge.f32.partialorder %v402_v32, 0.0  ;;  %v530_v38 = vmul.f32 0.2, %v402_v32  ;;  %vm467_vm9 = vcmp.ge.f32.partialorder %v403_v33, 0.0 }
  0x3c   : > { %913 = vst.msk [vmem:[%s1404_s25 + $0x50] sm:$0xf] %vm892_vm0, %v1110_v30  ;;  %v531_v39 = vmul.f32 0.2, %v403_v33  ;;  %vm468_vm10 = vcmp.ge.f32.partialorder %v404_v35, 0.0  ;;  %vm469_vm11 = vcmp.ge.f32.partialorder %v405_v36, 0.0  ;;  %v406_v44 = vadd.f32 %v1381_v9, %v335_v37 }
  0x3d   : > { %914 = vst.msk [vmem:[%s1404_s25 + $0x54] sm:$0xf] %vm892_vm0, %v1111_v34  ;;  %v532_v40 = vmul.f32 0.2, %v404_v35  ;;  %v533_v41 = vmul.f32 0.2, %v405_v36  ;;  %v594_v42 = vsel %vm466_vm8, %v402_v32, %v530_v38  ;;  %v336_v56 = vmul.f32 %v1209_v45, %v1372_v0 }
  0x3e   : > { %v595_v43 = vsel %vm467_vm9, %v403_v33, %v531_v39  ;;  %v1112_v48 = vpack.c.bf16 %v594_v42, %v594_v42  ;;  %vm470_vm12 = vcmp.ge.f32.partialorder %v406_v44, 0.0  ;;  %v534_v55 = vmul.f32 0.2, %v406_v44  ;;  %v1300_v33 = vld [vmem:[%s1367_s18 + $0x98] sm:$0xff]   ;;  %v1301_v42 = vld [vmem:[%s1367_s18 + $0xa0] sm:$0xff]  }
  0x3f   : > { %v1113_v49 = vpack.c.bf16 %v595_v43, %v595_v43  ;;  %v596_v50 = vsel %vm468_vm10, %v404_v35, %v532_v40  ;;  %v597_v51 = vsel %vm469_vm11, %v405_v36, %v533_v41  ;;  %v1212_v57 = vunpack.c.l.bf16 %v1295_v46 }
  0x40   : > { %v1114_v53 = vpack.c.bf16 %v596_v50, %v596_v50  ;;  %v1115_v54 = vpack.c.bf16 %v597_v51, %v597_v51  ;;  %915 = vst.msk [vmem:[%s1404_s25 + $0x58] sm:$0xf] %vm892_vm0, %v1112_v48  ;;  %v1213_v58 = vunpack.c.h.bf16 %v1295_v46  ;;  %v1216_v59 = vunpack.c.l.bf16 %v1296_v47 }
  0x41   : > { %916 = vst.msk [vmem:[%s1404_s25 + $0x5c] sm:$0xf] %vm892_vm0, %v1113_v49  ;;  %v598_v60 = vsel %vm470_vm12, %v406_v44, %v534_v55  ;;  %v1217_v61 = vunpack.c.h.bf16 %v1296_v47  ;;  %v1220_v62 = vunpack.c.l.bf16 %v1297_v52  ;;  %v1221_v63 = vunpack.c.h.bf16 %v1297_v52 }
  0x42   : > { %917 = vst.msk [vmem:[%s1404_s25 + $0x60] sm:$0xf] %vm892_vm0, %v1114_v53  ;;  %918 = vst.msk [vmem:[%s1404_s25 + $0x64] sm:$0xf] %vm892_vm0, %v1115_v54  ;;  %v1116_v1 = vpack.c.bf16 %v598_v60, %v598_v60  ;;  %v407_v2 = vadd.f32 %v1381_v9, %v336_v56  ;;  %v337_v3 = vmul.f32 %v1212_v57, %v1372_v0  ;;  %v1224_v37 = vunpack.c.l.bf16 %v1298_v24 }
  0x43   : > { %v338_v4 = vmul.f32 %v1213_v58, %v1372_v0  ;;  %v339_v5 = vmul.f32 %v1216_v59, %v1372_v0  ;;  %v340_v6 = vmul.f32 %v1217_v61, %v1372_v0  ;;  %v341_v7 = vmul.f32 %v1220_v62, %v1372_v0 }
  0x44   : > { %v342_v8 = vmul.f32 %v1221_v63, %v1372_v0  ;;  %919 = vst.msk [vmem:[%s1404_s25 + $0x68] sm:$0xf] %vm892_vm0, %v1116_v1  ;;  %vm471_vm13 = vcmp.ge.f32.partialorder %v407_v2, 0.0  ;;  %v535_v10 = vmul.f32 0.2, %v407_v2  ;;  %v408_v11 = vadd.f32 %v1381_v9, %v337_v3 }
  0x45   : > { %v409_v12 = vadd.f32 %v1381_v9, %v338_v4  ;;  %v410_v13 = vadd.f32 %v1381_v9, %v339_v5  ;;  %v411_v14 = vadd.f32 %v1381_v9, %v340_v6  ;;  %v412_v15 = vadd.f32 %v1381_v9, %v341_v7  ;;  %v1302_v7 = vld [vmem:[%s1367_s18 + $0xa8] sm:$0xff]  }
  0x46   : > { %v413_v16 = vadd.f32 %v1381_v9, %v342_v8  ;;  %v599_v17 = vsel %vm471_vm13, %v407_v2, %v535_v10  ;;  %vm472_vm14 = vcmp.ge.f32.partialorder %v408_v11, 0.0  ;;  %v536_v18 = vmul.f32 0.2, %v408_v11 }
  0x47   : > { %vm473_vm15 = vcmp.ge.f32.partialorder %v409_v12, 0.0  ;;  %v1117_v19 = vpack.c.bf16 %v599_v17, %v599_v17  ;;  %v537_v20 = vmul.f32 0.2, %v409_v12  ;;  %vm474_vm1 = vcmp.ge.f32.partialorder %v410_v13, 0.0 }
  0x48   : > { %v538_v21 = vmul.f32 0.2, %v410_v13  ;;  %v600_v22 = vsel %vm472_vm14, %v408_v11, %v536_v18  ;;  %vm475_vm2 = vcmp.ge.f32.partialorder %v411_v14, 0.0  ;;  %v539_v23 = vmul.f32 0.2, %v411_v14 }
  0x49   : > { %vm476_vm3 = vcmp.ge.f32.partialorder %v412_v15, 0.0  ;;  %920 = vst.msk [vmem:[%s1404_s25 + $0x6c] sm:$0xf] %vm892_vm0, %v1117_v19  ;;  %v1118_v25 = vpack.c.bf16 %v600_v22, %v600_v22  ;;  %v601_v26 = vsel %vm473_vm15, %v409_v12, %v537_v20  ;;  %v540_v28 = vmul.f32 0.2, %v412_v15  ;;  %v1303_v12 = vld [vmem:[%s1367_s18 + $0xb0] sm:$0xff]  }
  0x4a   : > { %v602_v27 = vsel %vm474_vm1, %v410_v13, %v538_v21  ;;  %v1119_v30 = vpack.c.bf16 %v601_v26, %v601_v26  ;;  %v603_v32 = vsel %vm475_vm2, %v411_v14, %v539_v23  ;;  %vm477_vm4 = vcmp.ge.f32.partialorder %v413_v16, 0.0 }
  0x4b   : > { %v1120_v31 = vpack.c.bf16 %v602_v27, %v602_v27  ;;  %921 = vst.msk [vmem:[%s1404_s25 + $0x70] sm:$0xf] %vm892_vm0, %v1118_v25  ;;  %v1121_v34 = vpack.c.bf16 %v603_v32, %v603_v32  ;;  %v604_v35 = vsel %vm476_vm3, %v412_v15, %v540_v28  ;;  %v541_v36 = vmul.f32 0.2, %v413_v16 }
  0x4c   : > { %922 = vst.msk [vmem:[%s1404_s25 + $0x74] sm:$0xf] %vm892_vm0, %v1119_v30  ;;  %v1122_v38 = vpack.c.bf16 %v604_v35, %v604_v35  ;;  %v1225_v39 = vunpack.c.h.bf16 %v1298_v24  ;;  %v1228_v40 = vunpack.c.l.bf16 %v1299_v29  ;;  %v1229_v41 = vunpack.c.h.bf16 %v1299_v29  ;;  %v1304_v29 = vld [vmem:[%s1367_s18 + $0xb8] sm:$0xff]  }
  0x4d   : > { %923 = vst.msk [vmem:[%s1404_s25 + $0x78] sm:$0xf] %vm892_vm0, %v1120_v31  ;;  %924 = vst.msk [vmem:[%s1404_s25 + $0x7c] sm:$0xf] %vm892_vm0, %v1121_v34  ;;  %v605_v43 = vsel %vm477_vm4, %v413_v16, %v541_v36  ;;  %v343_v44 = vmul.f32 %v1224_v37, %v1372_v0  ;;  %v1232_v45 = vunpack.c.l.bf16 %v1300_v33  ;;  %v1233_v46 = vunpack.c.h.bf16 %v1300_v33 }
  0x4e   : > { %925 = vst.msk [vmem:[%s1404_s25 + $0x80] sm:$0xf] %vm892_vm0, %v1122_v38  ;;  %v1123_v47 = vpack.c.bf16 %v605_v43, %v605_v43  ;;  %v344_v48 = vmul.f32 %v1225_v39, %v1372_v0  ;;  %v345_v49 = vmul.f32 %v1228_v40, %v1372_v0  ;;  %v346_v50 = vmul.f32 %v1229_v41, %v1372_v0 }
  0x4f   : > { %v414_v51 = vadd.f32 %v1381_v9, %v343_v44  ;;  %v347_v52 = vmul.f32 %v1232_v45, %v1372_v0  ;;  %v348_v53 = vmul.f32 %v1233_v46, %v1372_v0  ;;  %v1236_v54 = vunpack.c.l.bf16 %v1301_v42  ;;  %v1305_v45 = vld [vmem:[%s1367_s18 + $0xc0] sm:$0xff]  }
  0x50   : > { %926 = vst.msk [vmem:[%s1404_s25 + $0x84] sm:$0xf] %vm892_vm0, %v1123_v47  ;;  %v415_v55 = vadd.f32 %v1381_v9, %v344_v48  ;;  %v416_v56 = vadd.f32 %v1381_v9, %v345_v49  ;;  %v417_v57 = vadd.f32 %v1381_v9, %v346_v50  ;;  %v1237_v58 = vunpack.c.h.bf16 %v1301_v42 }
  0x51   : > { %vm478_vm5 = vcmp.ge.f32.partialorder %v414_v51, 0.0  ;;  %v542_v59 = vmul.f32 0.2, %v414_v51  ;;  %v418_v60 = vadd.f32 %v1381_v9, %v347_v52  ;;  %v419_v61 = vadd.f32 %v1381_v9, %v348_v53  ;;  %v1306_v53 = vld [vmem:[%s1367_s18 + $0xc8] sm:$0xff]  }
  0x52   : > { %vm479_vm6 = vcmp.ge.f32.partialorder %v415_v55, 0.0  ;;  %v543_v62 = vmul.f32 0.2, %v415_v55  ;;  %vm480_vm7 = vcmp.ge.f32.partialorder %v416_v56, 0.0  ;;  %v544_v63 = vmul.f32 0.2, %v416_v56 }
  0x53   : > { %v606_v1 = vsel %vm478_vm5, %v414_v51, %v542_v59  ;;  %vm481_vm8 = vcmp.ge.f32.partialorder %v417_v57, 0.0  ;;  %v545_v2 = vmul.f32 0.2, %v417_v57  ;;  %vm482_vm9 = vcmp.ge.f32.partialorder %v418_v60, 0.0 }
  0x54   : > { %v1124_v3 = vpack.c.bf16 %v606_v1, %v606_v1  ;;  %v607_v4 = vsel %vm479_vm6, %v415_v55, %v543_v62  ;;  %v608_v5 = vsel %vm480_vm7, %v416_v56, %v544_v63  ;;  %v546_v6 = vmul.f32 0.2, %v418_v60 }
  0x55   : > { %v1125_v8 = vpack.c.bf16 %v607_v4, %v607_v4  ;;  %v1126_v10 = vpack.c.bf16 %v608_v5, %v608_v5  ;;  %v609_v11 = vsel %vm481_vm8, %v417_v57, %v545_v2  ;;  %vm483_vm10 = vcmp.ge.f32.partialorder %v419_v61, 0.0 }
  0x56   : > { %927 = vst.msk [vmem:[%s1404_s25 + $0x88] sm:$0xf] %vm892_vm0, %v1124_v3  ;;  %v1127_v13 = vpack.c.bf16 %v609_v11, %v609_v11  ;;  %v610_v14 = vsel %vm482_vm9, %v418_v60, %v546_v6  ;;  %v547_v15 = vmul.f32 0.2, %v419_v61  ;;  %v349_v16 = vmul.f32 %v1236_v54, %v1372_v0 }
  0x57   : > { %928 = vst.msk [vmem:[%s1404_s25 + $0x8c] sm:$0xf] %vm892_vm0, %v1125_v8  ;;  %929 = vst.msk [vmem:[%s1404_s25 + $0x90] sm:$0xf] %vm892_vm0, %v1126_v10  ;;  %v1128_v17 = vpack.c.bf16 %v610_v14, %v610_v14  ;;  %v350_v18 = vmul.f32 %v1237_v58, %v1372_v0  ;;  %v1240_v19 = vunpack.c.l.bf16 %v1302_v7  ;;  %v1241_v20 = vunpack.c.h.bf16 %v1302_v7  ;;  %v1590_v58 = vld [vmem:[%s1367_s18 + $0xd0] sm:$0xff]  }
  0x58   : > { %930 = vst.msk [vmem:[%s1404_s25 + $0x94] sm:$0xf] %vm892_vm0, %v1127_v13  ;;  %v611_v21 = vsel %vm483_vm10, %v419_v61, %v547_v15  ;;  %v420_v22 = vadd.f32 %v1381_v9, %v349_v16  ;;  %v1244_v23 = vunpack.c.l.bf16 %v1303_v12  ;;  %v1245_v24 = vunpack.c.h.bf16 %v1303_v12 }
  0x59   : > { %931 = vst.msk [vmem:[%s1404_s25 + $0x98] sm:$0xf] %vm892_vm0, %v1128_v17  ;;  %v1129_v25 = vpack.c.bf16 %v611_v21, %v611_v21  ;;  %v421_v26 = vadd.f32 %v1381_v9, %v350_v18  ;;  %v351_v27 = vmul.f32 %v1240_v19, %v1372_v0  ;;  %v352_v28 = vmul.f32 %v1241_v20, %v1372_v0 }
  0x5a   : > { %vm484_vm11 = vcmp.ge.f32.partialorder %v420_v22, 0.0  ;;  %v548_v30 = vmul.f32 0.2, %v420_v22  ;;  %v353_v31 = vmul.f32 %v1244_v23, %v1372_v0  ;;  %v354_v32 = vmul.f32 %v1245_v24, %v1372_v0 }
  0x5b   : > { %932 = vst.msk [vmem:[%s1404_s25 + $0x9c] sm:$0xf] %vm892_vm0, %v1129_v25  ;;  %vm485_vm12 = vcmp.ge.f32.partialorder %v421_v26, 0.0  ;;  %v549_v33 = vmul.f32 0.2, %v421_v26  ;;  %v422_v34 = vadd.f32 %v1381_v9, %v351_v27  ;;  %v423_v35 = vadd.f32 %v1381_v9, %v352_v28  ;;  %v1308_v25 = vld [vmem:[%s1367_s18 + $0xd8] sm:$0xff]  }
  0x5c   : > { %v612_v36 = vsel %vm484_vm11, %v420_v22, %v548_v30  ;;  %v424_v37 = vadd.f32 %v1381_v9, %v353_v31  ;;  %v425_v38 = vadd.f32 %v1381_v9, %v354_v32  ;;  %v1248_v39 = vunpack.c.l.bf16 %v1304_v29 }
  0x5d   : > { %v1130_v40 = vpack.c.bf16 %v612_v36, %v612_v36  ;;  %v613_v41 = vsel %vm485_vm12, %v421_v26, %v549_v33  ;;  %vm486_vm13 = vcmp.ge.f32.partialorder %v422_v34, 0.0  ;;  %v550_v42 = vmul.f32 0.2, %v422_v34  ;;  %v1310_v36 = vld [vmem:[%s1367_s18 + $0xe8] sm:$0xff]  }
  0x5e   : > { %v1131_v43 = vpack.c.bf16 %v613_v41, %v613_v41  ;;  %vm487_vm14 = vcmp.ge.f32.partialorder %v423_v35, 0.0  ;;  %v551_v44 = vmul.f32 0.2, %v423_v35  ;;  %vm488_vm15 = vcmp.ge.f32.partialorder %v424_v37, 0.0  ;;  %v1311_v41 = vld [vmem:[%s1367_s18 + $0xf0] sm:$0xff]  }
  0x5f   : > { %933 = vst.msk [vmem:[%s1404_s25 + $0xa0] sm:$0xf] %vm892_vm0, %v1130_v40  ;;  %v614_v46 = vsel %vm486_vm13, %v422_v34, %v550_v42  ;;  %v552_v47 = vmul.f32 0.2, %v424_v37  ;;  %vm489_vm1 = vcmp.ge.f32.partialorder %v425_v38, 0.0  ;;  %v355_v51 = vmul.f32 %v1248_v39, %v1372_v0 }
  0x60   : > { %v553_v48 = vmul.f32 0.2, %v425_v38  ;;  %934 = vst.msk [vmem:[%s1404_s25 + $0xa4] sm:$0xf] %vm892_vm0, %v1131_v43  ;;  %v1132_v49 = vpack.c.bf16 %v614_v46, %v614_v46  ;;  %v615_v50 = vsel %vm487_vm14, %v423_v35, %v551_v44  ;;  %v1249_v52 = vunpack.c.h.bf16 %v1304_v29  ;;  %v1309_v35 = vld [vmem:[%s1367_s18 + $0xe0] sm:$0xff]  }
  0x61   : > { %v1133_v54 = vpack.c.bf16 %v615_v50, %v615_v50  ;;  %v616_v55 = vsel %vm488_vm15, %v424_v37, %v552_v47  ;;  %v1252_v57 = vunpack.c.l.bf16 %v1305_v45  ;;  %v426_v61 = vadd.f32 %v1381_v9, %v355_v51 }
  0x62   : > { %v617_v56 = vsel %vm489_vm1, %v425_v38, %v553_v48  ;;  %935 = vst.msk [vmem:[%s1404_s25 + $0xa8] sm:$0xf] %vm892_vm0, %v1132_v49  ;;  %v1134_v59 = vpack.c.bf16 %v616_v55, %v616_v55  ;;  %v356_v62 = vmul.f32 %v1249_v52, %v1372_v0  ;;  %v1253_v1 = vunpack.c.h.bf16 %v1305_v45 }
  0x63   : > { %v1135_v60 = vpack.c.bf16 %v617_v56, %v617_v56  ;;  %936 = vst.msk [vmem:[%s1404_s25 + $0xac] sm:$0xf] %vm892_vm0, %v1133_v54  ;;  %v357_v63 = vmul.f32 %v1252_v57, %v1372_v0  ;;  %v1256_v2 = vunpack.c.l.bf16 %v1306_v53  ;;  %v1257_v3 = vunpack.c.h.bf16 %v1306_v53 }
  0x64   : > { %937 = vst.msk [vmem:[%s1404_s25 + $0xb0] sm:$0xf] %vm892_vm0, %v1134_v59  ;;  %vm490_vm2 = vcmp.ge.f32.partialorder %v426_v61, 0.0  ;;  %v554_v4 = vmul.f32 0.2, %v426_v61  ;;  %v427_v5 = vadd.f32 %v1381_v9, %v356_v62  ;;  %v1260_v6 = vunpack.c.l.bf16 %v1590_v58 }
  0x65   : > { %938 = vst.msk [vmem:[%s1404_s25 + $0xb4] sm:$0xf] %vm892_vm0, %v1135_v60  ;;  %v428_v7 = vadd.f32 %v1381_v9, %v357_v63  ;;  %v358_v8 = vmul.f32 %v1253_v1, %v1372_v0  ;;  %v359_v10 = vmul.f32 %v1256_v2, %v1372_v0  ;;  %v360_v11 = vmul.f32 %v1257_v3, %v1372_v0 }
  0x66   : > { %v618_v12 = vsel %vm490_vm2, %v426_v61, %v554_v4  ;;  %vm491_vm3 = vcmp.ge.f32.partialorder %v427_v5, 0.0  ;;  %v555_v13 = vmul.f32 0.2, %v427_v5  ;;  %v361_v14 = vmul.f32 %v1260_v6, %v1372_v0 }
  0x67   : > { %v1136_v15 = vpack.c.bf16 %v618_v12, %v618_v12  ;;  %vm492_vm4 = vcmp.ge.f32.partialorder %v428_v7, 0.0  ;;  %v556_v16 = vmul.f32 0.2, %v428_v7  ;;  %v429_v17 = vadd.f32 %v1381_v9, %v358_v8 }
  0x68   : > { %v619_v18 = vsel %vm491_vm3, %v427_v5, %v555_v13  ;;  %v430_v19 = vadd.f32 %v1381_v9, %v359_v10  ;;  %v431_v20 = vadd.f32 %v1381_v9, %v360_v11  ;;  %v432_v21 = vadd.f32 %v1381_v9, %v361_v14 }
  0x69   : > { %939 = vst.msk [vmem:[%s1404_s25 + $0xb8] sm:$0xf] %vm892_vm0, %v1136_v15  ;;  %v1137_v22 = vpack.c.bf16 %v619_v18, %v619_v18  ;;  %v620_v23 = vsel %vm492_vm4, %v428_v7, %v556_v16  ;;  %vm493_vm5 = vcmp.ge.f32.partialorder %v429_v17, 0.0  ;;  %v557_v24 = vmul.f32 0.2, %v429_v17  ;;  %v1312_v7 = vld [vmem:[%s1367_s18 + $0xf8] sm:$0xff]  }
  0x6a   : > { %v1138_v26 = vpack.c.bf16 %v620_v23, %v620_v23  ;;  %vm494_vm6 = vcmp.ge.f32.partialorder %v430_v19, 0.0  ;;  %v558_v27 = vmul.f32 0.2, %v430_v19  ;;  %vm495_vm7 = vcmp.ge.f32.partialorder %v431_v20, 0.0 }
  0x6b   : > { %940 = vst.msk [vmem:[%s1404_s25 + $0xbc] sm:$0xf] %vm892_vm0, %v1137_v22  ;;  %v621_v28 = vsel %vm493_vm5, %v429_v17, %v557_v24  ;;  %v559_v29 = vmul.f32 0.2, %v431_v20  ;;  %vm496_vm8 = vcmp.ge.f32.partialorder %v432_v21, 0.0  ;;  %v1261_v33 = vunpack.c.h.bf16 %v1590_v58 }
  0x6c   : > { %v560_v30 = vmul.f32 0.2, %v432_v21  ;;  %941 = vst.msk [vmem:[%s1404_s25 + $0xc0] sm:$0xf] %vm892_vm0, %v1138_v26  ;;  %v1139_v31 = vpack.c.bf16 %v621_v28, %v621_v28  ;;  %v622_v32 = vsel %vm494_vm6, %v430_v19, %v558_v27  ;;  %v1264_v34 = vunpack.c.l.bf16 %v1308_v25 }
  0x6d   : > { %v1140_v37 = vpack.c.bf16 %v622_v32, %v622_v32  ;;  %v623_v38 = vsel %vm495_vm7, %v431_v20, %v559_v29  ;;  %v1265_v40 = vunpack.c.h.bf16 %v1308_v25  ;;  %v362_v44 = vmul.f32 %v1261_v33, %v1372_v0 }
  0x6e   : > { %v624_v39 = vsel %vm496_vm8, %v432_v21, %v560_v30  ;;  %942 = vst.msk [vmem:[%s1404_s25 + $0xc4] sm:$0xf] %vm892_vm0, %v1139_v31  ;;  %v1141_v42 = vpack.c.bf16 %v623_v38, %v623_v38  ;;  %v363_v45 = vmul.f32 %v1264_v34, %v1372_v0  ;;  %v1268_v47 = vunpack.c.l.bf16 %v1309_v35 }
  0x6f   : > { %v1142_v43 = vpack.c.bf16 %v624_v39, %v624_v39  ;;  %943 = vst.msk [vmem:[%s1404_s25 + $0xc8] sm:$0xf] %vm892_vm0, %v1140_v37  ;;  %v364_v46 = vmul.f32 %v1265_v40, %v1372_v0  ;;  %v1269_v48 = vunpack.c.h.bf16 %v1309_v35  ;;  %v1272_v49 = vunpack.c.l.bf16 %v1310_v36 }
  0x70   : > { %944 = vst.msk [vmem:[%s1404_s25 + $0xcc] sm:$0xf] %vm892_vm0, %v1141_v42  ;;  %v433_v50 = vadd.f32 %v1381_v9, %v362_v44  ;;  %v434_v51 = vadd.f32 %v1381_v9, %v363_v45  ;;  %v1273_v52 = vunpack.c.h.bf16 %v1310_v36  ;;  %v1276_v53 = vunpack.c.l.bf16 %v1311_v41 }
  0x71   : > { %945 = vst.msk [vmem:[%s1404_s25 + $0xd0] sm:$0xf] %vm892_vm0, %v1142_v43  ;;  %v435_v54 = vadd.f32 %v1381_v9, %v364_v46  ;;  %v365_v55 = vmul.f32 %v1268_v47, %v1372_v0  ;;  %v366_v56 = vmul.f32 %v1269_v48, %v1372_v0  ;;  %v367_v57 = vmul.f32 %v1272_v49, %v1372_v0 }
  0x72   : > { %vm497_vm9 = vcmp.ge.f32.partialorder %v433_v50, 0.0  ;;  %v561_v58 = vmul.f32 0.2, %v433_v50  ;;  %vm498_vm10 = vcmp.ge.f32.partialorder %v434_v51, 0.0  ;;  %v562_v59 = vmul.f32 0.2, %v434_v51 }
  0x73   : > { %vm499_vm11 = vcmp.ge.f32.partialorder %v435_v54, 0.0  ;;  %v563_v60 = vmul.f32 0.2, %v435_v54  ;;  %v436_v61 = vadd.f32 %v1381_v9, %v365_v55  ;;  %v437_v62 = vadd.f32 %v1381_v9, %v366_v56 }
  0x74   : > { %v625_v63 = vsel %vm497_vm9, %v433_v50, %v561_v58  ;;  %v626_v1 = vsel %vm498_vm10, %v434_v51, %v562_v59  ;;  %v438_v2 = vadd.f32 %v1381_v9, %v367_v57  ;;  %v368_v3 = vmul.f32 %v1273_v52, %v1372_v0 }
  0x75   : > { %v1143_v4 = vpack.c.bf16 %v625_v63, %v625_v63  ;;  %v1144_v5 = vpack.c.bf16 %v626_v1, %v626_v1  ;;  %v627_v6 = vsel %vm499_vm11, %v435_v54, %v563_v60  ;;  %vm500_vm12 = vcmp.ge.f32.partialorder %v436_v61, 0.0 }
  0x76   : > { %v1145_v8 = vpack.c.bf16 %v627_v6, %v627_v6  ;;  %v564_v10 = vmul.f32 0.2, %v436_v61  ;;  %vm501_vm13 = vcmp.ge.f32.partialorder %v437_v62, 0.0  ;;  %v565_v11 = vmul.f32 0.2, %v437_v62 }
  0x77   : > { %946 = vst.msk [vmem:[%s1404_s25 + $0xd4] sm:$0xf] %vm892_vm0, %v1143_v4  ;;  %947 = vst.msk [vmem:[%s1404_s25 + $0xd8] sm:$0xf] %vm892_vm0, %v1144_v5  ;;  %vm502_vm14 = vcmp.ge.f32.partialorder %v438_v2, 0.0  ;;  %v439_v13 = vadd.f32 %v1381_v9, %v368_v3  ;;  %v369_v14 = vmul.f32 %v1276_v53, %v1372_v0  ;;  %v1277_v17 = vunpack.c.h.bf16 %v1311_v41 }
  0x78   : > { %v566_v12 = vmul.f32 0.2, %v438_v2  ;;  %948 = vst.msk [vmem:[%s1404_s25 + $0xdc] sm:$0xf] %vm892_vm0, %v1145_v8  ;;  %v628_v15 = vsel %vm500_vm12, %v436_v61, %v564_v10  ;;  %v629_v16 = vsel %vm501_vm13, %v437_v62, %v565_v11  ;;  %v1280_v18 = vunpack.c.l.bf16 %v1312_v7  ;;  %v1321_v0 = vld [vmem:[%s1682_s1] ss:$0 sm:$0xff] }
  0x79   : > { %v1146_v19 = vpack.c.bf16 %v628_v15, %v628_v15  ;;  %v1147_v20 = vpack.c.bf16 %v629_v16, %v629_v16  ;;  %vm503_vm15 = vcmp.ge.f32.partialorder %v439_v13, 0.0  ;;  %v567_v23 = vmul.f32 0.2, %v439_v13 }
  0x7a   : > { %v630_v21 = vsel %vm502_vm14, %v438_v2, %v566_v12  ;;  %v440_v24 = vadd.f32 %v1381_v9, %v369_v14  ;;  %v370_v25 = vmul.f32 %v1321_v0, %v1277_v17  ;;  %v371_v26 = vmul.f32 %v1321_v0, %v1280_v18  ;;  %v1322_v9 = vld [vmem:[%s1683_s2] ss:$0 sm:$0xff] }
  0x7b   : > { %v1148_v22 = vpack.c.bf16 %v630_v21, %v630_v21  ;;  %949 = vst.msk [vmem:[%s1404_s25 + $0xe0] sm:$0xf] %vm892_vm0, %v1146_v19  ;;  %950 = vst.msk [vmem:[%s1404_s25 + $0xe4] sm:$0xf] %vm892_vm0, %v1147_v20  ;;  %v1281_v27 = vunpack.c.h.bf16 %v1312_v7  ;;  %v631_v28 = vsel %vm503_vm15, %v439_v13, %v567_v23 }
  0x7c   : > { %vm504_vm1 = vcmp.ge.f32.partialorder %v440_v24, 0.0  ;;  %v568_v29 = vmul.f32 0.2, %v440_v24  ;;  %v441_v30 = vadd.f32 %v1322_v9, %v370_v25  ;;  %v1149_v31 = vpack.c.bf16 %v631_v28, %v631_v28 }
  0x7d   : > { %951 = vst.msk [vmem:[%s1404_s25 + $0xe8] sm:$0xf] %vm892_vm0, %v1148_v22  ;;  %v442_v32 = vadd.f32 %v1322_v9, %v371_v26  ;;  %v372_v33 = vmul.f32 %v1321_v0, %v1281_v27 }
  0x7e   : > { %v632_v34 = vsel %vm504_vm1, %v440_v24, %v568_v29  ;;  %vm505_vm2 = vcmp.ge.f32.partialorder %v441_v30, 0.0  ;;  %v569_v35 = vmul.f32 0.2, %v441_v30  ;;  %952 = vst.msk [vmem:[%s1404_s25 + $0xec] sm:$0xf] %vm892_vm0, %v1149_v31 }
  0x7f   : > { %v1150_v36 = vpack.c.bf16 %v632_v34, %v632_v34  ;;  %vm506_vm3 = vcmp.ge.f32.partialorder %v442_v32, 0.0  ;;  %v570_v37 = vmul.f32 0.2, %v442_v32  ;;  %v443_v38 = vadd.f32 %v1322_v9, %v372_v33 }
  0x80   : > { %v633_v39 = vsel %vm505_vm2, %v441_v30, %v569_v35 }
  0x81   : > { %953 = vst.msk [vmem:[%s1404_s25 + $0xf0] sm:$0xf] %vm892_vm0, %v1150_v36  ;;  %v1151_v40 = vpack.c.bf16 %v633_v39, %v633_v39  ;;  %v634_v41 = vsel %vm506_vm3, %v442_v32, %v570_v37  ;;  %vm507_vm4 = vcmp.ge.f32.partialorder %v443_v38, 0.0  ;;  %v571_v42 = vmul.f32 0.2, %v443_v38 }
  0x82   : > { %v1152_v43 = vpack.c.bf16 %v634_v41, %v634_v41 }
  0x83   : > { %954 = vst.msk [vmem:[%s1404_s25 + $0xf4] sm:$0xf] %vm892_vm0, %v1151_v40  ;;  %v635_v44 = vsel %vm507_vm4, %v443_v38, %v571_v42 }
  0x84   : > { %955 = vst.msk [vmem:[%s1404_s25 + $0xf8] sm:$0xf] %vm892_vm0, %v1152_v43  ;;  %v1153_v45 = vpack.c.bf16 %v635_v44, %v635_v44 }
  0x86   : > { %956 = vst.msk [vmem:[%s1404_s25 + $0xfc] sm:$0xf] %vm892_vm0, %v1153_v45 }
  0x87 PF: > { %s13_s12 = sadd.s32 1, %s1329_s12  }
  0x88   : > { %p10_p4 = scmp.ge.s32.totalorder %s13_s12, 4  }
  0x8a   :  { %12 = sbr.rel (!%p10_p4) target bundleno = 1 (0x1), region = 62 }

// kernel: _lambda_.18
= control target key start
LH: loop header
LB: loop body
LE: loop exit
PB: predicated region body
PF: predicated region fallthrough
CT: control target
= control target key end

     0   :  { %vm380_vm0 = vcmask 257024   ;;  %s832_s0 = inlined_call_operand.vmem [shape: bf16[256,32], index: 0, kind: input, shape index: {}]   ;;  %s833_s1 = inlined_call_operand.vmem [shape: f32[1,32], index: 1, kind: input, shape index: {}]   ;;  %s834_s2 = inlined_call_operand.vmem [shape: f32[1,32], index: 2, kind: input, shape index: {}]   ;;  %s835_s3 = inlined_call_operand.vmem [shape: bf16[256,32], index: 3, kind: output, shape index: {}]  }
   0x1   :  { %v484_v0 = vld [vmem:[%s832_s0] sm:$0xff]   ;;  %v547_v4 = vld [vmem:[%s832_s0 + $0x8] sm:$0xff]   ;;  %v548_v5 = vld [vmem:[%s832_s0 + $0x10] sm:$0xff]  }
   0x2   :  { %v588_v1 = vld [vmem:[%s833_s1] ss:$0 sm:$0xff]  ;;  %v485_v2 = vunpack.c.l.bf16 %v484_v0  ;;  %v486_v3 = vunpack.c.h.bf16 %v484_v0  ;;  %v549_v6 = vld [vmem:[%s832_s0 + $0x18] sm:$0xff]   ;;  %v489_v8 = vunpack.c.l.bf16 %v547_v4  ;;  %v490_v9 = vunpack.c.h.bf16 %v547_v4  ;;  %v551_v40 = vld [vmem:[%s832_s0 + $0x28] sm:$0xff]  }
   0x3   :  { %v602_v7 = vld [vmem:[%s834_s2] ss:$0 sm:$0xff]  ;;  %v493_v10 = vunpack.c.l.bf16 %v548_v5  ;;  %v494_v11 = vunpack.c.h.bf16 %v548_v5  ;;  %v497_v14 = vunpack.c.l.bf16 %v549_v6  ;;  %v498_v15 = vunpack.c.h.bf16 %v549_v6  ;;  %v552_v52 = vld [vmem:[%s832_s0 + $0x30] sm:$0xff]  }
   0x4   :  { %v85_v12 = vmul.f32 %v485_v2, %v588_v1  ;;  %v86_v13 = vmul.f32 %v486_v3, %v588_v1  ;;  %v87_v16 = vmul.f32 %v489_v8, %v588_v1  ;;  %v88_v17 = vmul.f32 %v490_v9, %v588_v1  ;;  %v550_v39 = vld [vmem:[%s832_s0 + $0x20] sm:$0xff]  }
   0x5   :  { %v89_v18 = vmul.f32 %v493_v10, %v588_v1  ;;  %v90_v19 = vmul.f32 %v494_v11, %v588_v1  ;;  %v91_v22 = vmul.f32 %v497_v14, %v588_v1  ;;  %v92_v23 = vmul.f32 %v498_v15, %v588_v1 }
   0x6   :  { %v124_v20 = vadd.f32 %v602_v7, %v85_v12  ;;  %v125_v21 = vadd.f32 %v602_v7, %v86_v13  ;;  %v126_v24 = vadd.f32 %v602_v7, %v87_v16  ;;  %v127_v25 = vadd.f32 %v602_v7, %v88_v17  ;;  %v553_v17 = vld [vmem:[%s832_s0 + $0x38] sm:$0xff]  }
   0x7   :  { %v128_v26 = vadd.f32 %v602_v7, %v89_v18  ;;  %v129_v27 = vadd.f32 %v602_v7, %v90_v19  ;;  %v130_v46 = vadd.f32 %v602_v7, %v91_v22  ;;  %v131_v47 = vadd.f32 %v602_v7, %v92_v23  ;;  %v554_v18 = vld [vmem:[%s832_s0 + $0x40] sm:$0xff]   ;;  %v555_v23 = vld [vmem:[%s832_s0 + $0x48] sm:$0xff]  }
   0x8   :  { %vm156_vm1 = vcmp.ge.f32.partialorder %v124_v20, 0.0  ;;  %v188_v28 = vmul.f32 0.2, %v124_v20  ;;  %vm157_vm2 = vcmp.ge.f32.partialorder %v125_v21, 0.0  ;;  %v189_v29 = vmul.f32 0.2, %v125_v21 }
   0x9   :  { %vm158_vm3 = vcmp.ge.f32.partialorder %v126_v24, 0.0  ;;  %v190_v30 = vmul.f32 0.2, %v126_v24  ;;  %vm159_vm4 = vcmp.ge.f32.partialorder %v127_v25, 0.0  ;;  %v191_v31 = vmul.f32 0.2, %v127_v25 }
   0xa   :  { %v220_v32 = vsel %vm156_vm1, %v124_v20, %v188_v28  ;;  %v221_v33 = vsel %vm157_vm2, %v125_v21, %v189_v29  ;;  %vm160_vm5 = vcmp.ge.f32.partialorder %v128_v26, 0.0  ;;  %v192_v34 = vmul.f32 0.2, %v128_v26 }
   0xb   :  { %v451_v35 = vpack.c.bf16 %v220_v32, %v220_v32  ;;  %v452_v36 = vpack.c.bf16 %v221_v33, %v221_v33  ;;  %v222_v37 = vsel %vm158_vm3, %v126_v24, %v190_v30  ;;  %v223_v38 = vsel %vm159_vm4, %v127_v25, %v191_v31 }
   0xc   :  { %v453_v41 = vpack.c.bf16 %v222_v37, %v222_v37  ;;  %v454_v42 = vpack.c.bf16 %v223_v38, %v223_v38  ;;  %v224_v43 = vsel %vm160_vm5, %v128_v26, %v192_v34  ;;  %vm161_vm6 = vcmp.ge.f32.partialorder %v129_v27, 0.0 }
   0xd   :  { %381 = vst.msk [vmem:[%s835_s3] sm:$0xf] %vm380_vm0, %v451_v35  ;;  %382 = vst.msk [vmem:[%s835_s3 + $0x4] sm:$0xf] %vm380_vm0, %v452_v36  ;;  %v455_v44 = vpack.c.bf16 %v224_v43, %v224_v43  ;;  %v193_v45 = vmul.f32 0.2, %v129_v27  ;;  %v501_v48 = vunpack.c.l.bf16 %v550_v39  ;;  %v502_v49 = vunpack.c.h.bf16 %v550_v39 }
   0xe   :  { %383 = vst.msk [vmem:[%s835_s3 + $0x8] sm:$0xf] %vm380_vm0, %v453_v41  ;;  %384 = vst.msk [vmem:[%s835_s3 + $0xc] sm:$0xf] %vm380_vm0, %v454_v42  ;;  %v505_v50 = vunpack.c.l.bf16 %v551_v40  ;;  %v506_v51 = vunpack.c.h.bf16 %v551_v40  ;;  %vm162_vm7 = vcmp.ge.f32.partialorder %v130_v46, 0.0  ;;  %vm163_vm8 = vcmp.ge.f32.partialorder %v131_v47, 0.0 }
   0xf   :  { %385 = vst.msk [vmem:[%s835_s3 + $0x10] sm:$0xf] %vm380_vm0, %v455_v44  ;;  %v225_v53 = vsel %vm161_vm6, %v129_v27, %v193_v45  ;;  %v194_v54 = vmul.f32 0.2, %v130_v46  ;;  %v195_v56 = vmul.f32 0.2, %v131_v47  ;;  %v93_v57 = vmul.f32 %v501_v48, %v588_v1 }
  0x10   :  { %v456_v55 = vpack.c.bf16 %v225_v53, %v225_v53  ;;  %v94_v58 = vmul.f32 %v502_v49, %v588_v1  ;;  %v95_v60 = vmul.f32 %v505_v50, %v588_v1  ;;  %v96_v61 = vmul.f32 %v506_v51, %v588_v1 }
  0x11   :  { %v226_v59 = vsel %vm162_vm7, %v130_v46, %v194_v54  ;;  %v509_v62 = vunpack.c.l.bf16 %v552_v52  ;;  %v227_v0 = vsel %vm163_vm8, %v131_v47, %v195_v56  ;;  %v132_v2 = vadd.f32 %v602_v7, %v93_v57  ;;  %v556_v57 = vld [vmem:[%s832_s0 + $0x50] sm:$0xff]  }
  0x12   :  { %386 = vst.msk [vmem:[%s835_s3 + $0x14] sm:$0xf] %vm380_vm0, %v456_v55  ;;  %v457_v63 = vpack.c.bf16 %v226_v59, %v226_v59  ;;  %v133_v3 = vadd.f32 %v602_v7, %v94_v58  ;;  %v458_v4 = vpack.c.bf16 %v227_v0, %v227_v0  ;;  %v134_v5 = vadd.f32 %v602_v7, %v95_v60 }
  0x13   :  { %v135_v6 = vadd.f32 %v602_v7, %v96_v61  ;;  %v97_v8 = vmul.f32 %v509_v62, %v588_v1  ;;  %vm164_vm9 = vcmp.ge.f32.partialorder %v132_v2, 0.0  ;;  %v196_v9 = vmul.f32 0.2, %v132_v2  ;;  %v557_v62 = vld [vmem:[%s832_s0 + $0x58] sm:$0xff]  }
  0x14   :  { %387 = vst.msk [vmem:[%s835_s3 + $0x18] sm:$0xf] %vm380_vm0, %v457_v63  ;;  %vm165_vm10 = vcmp.ge.f32.partialorder %v133_v3, 0.0  ;;  %v197_v10 = vmul.f32 0.2, %v133_v3  ;;  %vm166_vm11 = vcmp.ge.f32.partialorder %v134_v5, 0.0  ;;  %v510_v16 = vunpack.c.h.bf16 %v552_v52 }
  0x15   :  { %388 = vst.msk [vmem:[%s835_s3 + $0x1c] sm:$0xf] %vm380_vm0, %v458_v4  ;;  %v198_v11 = vmul.f32 0.2, %v134_v5  ;;  %vm167_vm12 = vcmp.ge.f32.partialorder %v135_v6, 0.0  ;;  %v228_v13 = vsel %vm164_vm9, %v132_v2, %v196_v9  ;;  %v136_v15 = vadd.f32 %v602_v7, %v97_v8 }
  0x16   :  { %v199_v12 = vmul.f32 0.2, %v135_v6  ;;  %v229_v14 = vsel %vm165_vm10, %v133_v3, %v197_v10  ;;  %v459_v19 = vpack.c.bf16 %v228_v13, %v228_v13  ;;  %v98_v27 = vmul.f32 %v510_v16, %v588_v1  ;;  %v558_v3 = vld [vmem:[%s832_s0 + $0x60] sm:$0xff]   ;;  %v559_v13 = vld [vmem:[%s832_s0 + $0x68] sm:$0xff]  }
  0x17   :  { %v460_v20 = vpack.c.bf16 %v229_v14, %v229_v14  ;;  %v230_v21 = vsel %vm166_vm11, %v134_v5, %v198_v11  ;;  %vm168_vm13 = vcmp.ge.f32.partialorder %v136_v15, 0.0  ;;  %v200_v26 = vmul.f32 0.2, %v136_v15 }
  0x18   :  { %v231_v22 = vsel %vm167_vm12, %v135_v6, %v199_v12  ;;  %v461_v24 = vpack.c.bf16 %v230_v21, %v230_v21  ;;  %389 = vst.msk [vmem:[%s835_s3 + $0x20] sm:$0xf] %vm380_vm0, %v459_v19  ;;  %v513_v28 = vunpack.c.l.bf16 %v553_v17  ;;  %v514_v29 = vunpack.c.h.bf16 %v553_v17 }
  0x19   :  { %v462_v25 = vpack.c.bf16 %v231_v22, %v231_v22  ;;  %390 = vst.msk [vmem:[%s835_s3 + $0x24] sm:$0xf] %vm380_vm0, %v460_v20  ;;  %v517_v30 = vunpack.c.l.bf16 %v554_v18  ;;  %v232_v31 = vsel %vm168_vm13, %v136_v15, %v200_v26  ;;  %v518_v32 = vunpack.c.h.bf16 %v554_v18 }
  0x1a   :  { %391 = vst.msk [vmem:[%s835_s3 + $0x28] sm:$0xf] %vm380_vm0, %v461_v24  ;;  %v521_v33 = vunpack.c.l.bf16 %v555_v23  ;;  %v522_v34 = vunpack.c.h.bf16 %v555_v23  ;;  %v463_v35 = vpack.c.bf16 %v232_v31, %v232_v31  ;;  %v137_v36 = vadd.f32 %v602_v7, %v98_v27 }
  0x1b   :  { %392 = vst.msk [vmem:[%s835_s3 + $0x2c] sm:$0xf] %vm380_vm0, %v462_v25  ;;  %v99_v37 = vmul.f32 %v513_v28, %v588_v1  ;;  %v100_v38 = vmul.f32 %v514_v29, %v588_v1  ;;  %v101_v39 = vmul.f32 %v517_v30, %v588_v1  ;;  %v102_v40 = vmul.f32 %v518_v32, %v588_v1 }
  0x1c   :  { %v103_v41 = vmul.f32 %v521_v33, %v588_v1  ;;  %v104_v42 = vmul.f32 %v522_v34, %v588_v1  ;;  %393 = vst.msk [vmem:[%s835_s3 + $0x30] sm:$0xf] %vm380_vm0, %v463_v35  ;;  %vm169_vm14 = vcmp.ge.f32.partialorder %v137_v36, 0.0  ;;  %v201_v43 = vmul.f32 0.2, %v137_v36 }
  0x1d   :  { %v138_v44 = vadd.f32 %v602_v7, %v99_v37  ;;  %v139_v45 = vadd.f32 %v602_v7, %v100_v38  ;;  %v140_v46 = vadd.f32 %v602_v7, %v101_v39  ;;  %v141_v47 = vadd.f32 %v602_v7, %v102_v40 }
  0x1e   :  { %v142_v48 = vadd.f32 %v602_v7, %v103_v41  ;;  %v143_v49 = vadd.f32 %v602_v7, %v104_v42  ;;  %v233_v50 = vsel %vm169_vm14, %v137_v36, %v201_v43  ;;  %v525_v8 = vunpack.c.l.bf16 %v556_v57  ;;  %v560_v41 = vld [vmem:[%s832_s0 + $0x70] sm:$0xff]  }
  0x1f   :  { %vm170_vm15 = vcmp.ge.f32.partialorder %v138_v44, 0.0  ;;  %v202_v51 = vmul.f32 0.2, %v138_v44  ;;  %vm171_vm1 = vcmp.ge.f32.partialorder %v139_v45, 0.0  ;;  %v464_v52 = vpack.c.bf16 %v233_v50, %v233_v50 }
  0x20   :  { %v203_v53 = vmul.f32 0.2, %v139_v45  ;;  %vm172_vm2 = vcmp.ge.f32.partialorder %v140_v46, 0.0  ;;  %v204_v54 = vmul.f32 0.2, %v140_v46  ;;  %vm173_vm3 = vcmp.ge.f32.partialorder %v141_v47, 0.0 }
  0x21   :  { %v234_v55 = vsel %vm170_vm15, %v138_v44, %v202_v51  ;;  %v205_v56 = vmul.f32 0.2, %v141_v47  ;;  %vm174_vm4 = vcmp.ge.f32.partialorder %v142_v48, 0.0  ;;  %394 = vst.msk [vmem:[%s835_s3 + $0x34] sm:$0xf] %vm380_vm0, %v464_v52  ;;  %vm175_vm5 = vcmp.ge.f32.partialorder %v143_v49, 0.0 }
  0x22   :  { %v465_v58 = vpack.c.bf16 %v234_v55, %v234_v55  ;;  %v235_v59 = vsel %vm171_vm1, %v139_v45, %v203_v53  ;;  %v236_v60 = vsel %vm172_vm2, %v140_v46, %v204_v54  ;;  %v206_v61 = vmul.f32 0.2, %v142_v48  ;;  %v561_v45 = vld [vmem:[%s832_s0 + $0x78] sm:$0xff]  }
  0x23   :  { %v466_v63 = vpack.c.bf16 %v235_v59, %v235_v59  ;;  %v467_v0 = vpack.c.bf16 %v236_v60, %v236_v60  ;;  %v237_v2 = vsel %vm173_vm3, %v141_v47, %v205_v56  ;;  %v207_v6 = vmul.f32 0.2, %v143_v49 }
  0x24   :  { %395 = vst.msk [vmem:[%s835_s3 + $0x38] sm:$0xf] %vm380_vm0, %v465_v58  ;;  %v468_v4 = vpack.c.bf16 %v237_v2, %v237_v2  ;;  %v238_v5 = vsel %vm174_vm4, %v142_v48, %v206_v61  ;;  %v526_v10 = vunpack.c.h.bf16 %v556_v57  ;;  %v529_v11 = vunpack.c.l.bf16 %v557_v62 }
  0x25   :  { %396 = vst.msk [vmem:[%s835_s3 + $0x3c] sm:$0xf] %vm380_vm0, %v466_v63  ;;  %397 = vst.msk [vmem:[%s835_s3 + $0x40] sm:$0xf] %vm380_vm0, %v467_v0  ;;  %v469_v9 = vpack.c.bf16 %v238_v5, %v238_v5  ;;  %v530_v12 = vunpack.c.h.bf16 %v557_v62  ;;  %v239_v14 = vsel %vm175_vm5, %v143_v49, %v207_v6  ;;  %v105_v15 = vmul.f32 %v525_v8, %v588_v1 }
  0x26   :  { %398 = vst.msk [vmem:[%s835_s3 + $0x44] sm:$0xf] %vm380_vm0, %v468_v4  ;;  %v533_v16 = vunpack.c.l.bf16 %v558_v3  ;;  %v534_v17 = vunpack.c.h.bf16 %v558_v3  ;;  %v470_v18 = vpack.c.bf16 %v239_v14, %v239_v14  ;;  %v106_v19 = vmul.f32 %v526_v10, %v588_v1 }
  0x27   :  { %399 = vst.msk [vmem:[%s835_s3 + $0x48] sm:$0xf] %vm380_vm0, %v469_v9  ;;  %v107_v20 = vmul.f32 %v529_v11, %v588_v1  ;;  %v108_v21 = vmul.f32 %v530_v12, %v588_v1  ;;  %v144_v22 = vadd.f32 %v602_v7, %v105_v15  ;;  %v537_v25 = vunpack.c.l.bf16 %v559_v13 }
  0x28   :  { %v109_v23 = vmul.f32 %v533_v16, %v588_v1  ;;  %v110_v24 = vmul.f32 %v534_v17, %v588_v1  ;;  %400 = vst.msk [vmem:[%s835_s3 + $0x4c] sm:$0xf] %vm380_vm0, %v470_v18  ;;  %v145_v26 = vadd.f32 %v602_v7, %v106_v19  ;;  %v538_v29 = vunpack.c.h.bf16 %v559_v13 }
  0x29   :  { %v146_v27 = vadd.f32 %v602_v7, %v107_v20  ;;  %v147_v28 = vadd.f32 %v602_v7, %v108_v21  ;;  %vm176_vm6 = vcmp.ge.f32.partialorder %v144_v22, 0.0  ;;  %v208_v30 = vmul.f32 0.2, %v144_v22 }
  0x2a   :  { %v148_v31 = vadd.f32 %v602_v7, %v109_v23  ;;  %v149_v32 = vadd.f32 %v602_v7, %v110_v24  ;;  %vm177_vm7 = vcmp.ge.f32.partialorder %v145_v26, 0.0  ;;  %v209_v33 = vmul.f32 0.2, %v145_v26 }
  0x2b   :  { %vm178_vm8 = vcmp.ge.f32.partialorder %v146_v27, 0.0  ;;  %v210_v34 = vmul.f32 0.2, %v146_v27  ;;  %v240_v35 = vsel %vm176_vm6, %v144_v22, %v208_v30  ;;  %vm179_vm9 = vcmp.ge.f32.partialorder %v147_v28, 0.0 }
  0x2c   :  { %v211_v36 = vmul.f32 0.2, %v147_v28  ;;  %vm180_vm10 = vcmp.ge.f32.partialorder %v148_v31, 0.0  ;;  %v471_v37 = vpack.c.bf16 %v240_v35, %v240_v35  ;;  %v241_v38 = vsel %vm177_vm7, %v145_v26, %v209_v33 }
  0x2d   :  { %v242_v39 = vsel %vm178_vm8, %v146_v27, %v210_v34  ;;  %v212_v40 = vmul.f32 0.2, %v148_v31  ;;  %v472_v42 = vpack.c.bf16 %v241_v38, %v241_v38  ;;  %vm181_vm11 = vcmp.ge.f32.partialorder %v149_v32, 0.0 }
  0x2e   :  { %v473_v43 = vpack.c.bf16 %v242_v39, %v242_v39  ;;  %v243_v44 = vsel %vm179_vm9, %v147_v28, %v211_v36  ;;  %401 = vst.msk [vmem:[%s835_s3 + $0x50] sm:$0xf] %vm380_vm0, %v471_v37  ;;  %v213_v48 = vmul.f32 0.2, %v149_v32  ;;  %v111_v49 = vmul.f32 %v537_v25, %v588_v1 }
  0x2f   :  { %v474_v46 = vpack.c.bf16 %v243_v44, %v243_v44  ;;  %v244_v47 = vsel %vm180_vm10, %v148_v31, %v212_v40  ;;  %402 = vst.msk [vmem:[%s835_s3 + $0x54] sm:$0xf] %vm380_vm0, %v472_v42  ;;  %v112_v51 = vmul.f32 %v538_v29, %v588_v1  ;;  %v541_v52 = vunpack.c.l.bf16 %v560_v41 }
  0x30   :  { %403 = vst.msk [vmem:[%s835_s3 + $0x58] sm:$0xf] %vm380_vm0, %v473_v43  ;;  %v475_v50 = vpack.c.bf16 %v244_v47, %v244_v47  ;;  %v542_v53 = vunpack.c.h.bf16 %v560_v41  ;;  %v245_v54 = vsel %vm181_vm11, %v149_v32, %v213_v48  ;;  %v150_v55 = vadd.f32 %v602_v7, %v111_v49 }
  0x31   :  { %404 = vst.msk [vmem:[%s835_s3 + $0x5c] sm:$0xf] %vm380_vm0, %v474_v46  ;;  %v545_v56 = vunpack.c.l.bf16 %v561_v45  ;;  %v546_v57 = vunpack.c.h.bf16 %v561_v45  ;;  %v476_v58 = vpack.c.bf16 %v245_v54, %v245_v54  ;;  %v151_v59 = vadd.f32 %v602_v7, %v112_v51 }
  0x32   :  { %405 = vst.msk [vmem:[%s835_s3 + $0x60] sm:$0xf] %vm380_vm0, %v475_v50  ;;  %v113_v60 = vmul.f32 %v541_v52, %v588_v1  ;;  %v114_v61 = vmul.f32 %v542_v53, %v588_v1  ;;  %vm182_vm12 = vcmp.ge.f32.partialorder %v150_v55, 0.0  ;;  %v214_v62 = vmul.f32 0.2, %v150_v55 }
  0x33   :  { %v115_v63 = vmul.f32 %v545_v56, %v588_v1  ;;  %v116_v0 = vmul.f32 %v546_v57, %v588_v1  ;;  %406 = vst.msk [vmem:[%s835_s3 + $0x64] sm:$0xf] %vm380_vm0, %v476_v58  ;;  %vm183_vm13 = vcmp.ge.f32.partialorder %v151_v59, 0.0  ;;  %v215_v2 = vmul.f32 0.2, %v151_v59 }
  0x34   :  { %v152_v3 = vadd.f32 %v602_v7, %v113_v60  ;;  %v153_v4 = vadd.f32 %v602_v7, %v114_v61  ;;  %v246_v5 = vsel %vm182_vm12, %v150_v55, %v214_v62 }
  0x35   :  { %v154_v6 = vadd.f32 %v602_v7, %v115_v63  ;;  %v155_v8 = vadd.f32 %v602_v7, %v116_v0  ;;  %v477_v9 = vpack.c.bf16 %v246_v5, %v246_v5  ;;  %v247_v10 = vsel %vm183_vm13, %v151_v59, %v215_v2 }
  0x36   :  { %vm184_vm14 = vcmp.ge.f32.partialorder %v152_v3, 0.0  ;;  %v216_v1 = vmul.f32 0.2, %v152_v3  ;;  %v478_v11 = vpack.c.bf16 %v247_v10, %v247_v10  ;;  %vm185_vm15 = vcmp.ge.f32.partialorder %v153_v4, 0.0 }
  0x37   :  { %v217_v12 = vmul.f32 0.2, %v153_v4  ;;  %vm186_vm1 = vcmp.ge.f32.partialorder %v154_v6, 0.0  ;;  %407 = vst.msk [vmem:[%s835_s3 + $0x68] sm:$0xf] %vm380_vm0, %v477_v9  ;;  %vm187_vm2 = vcmp.ge.f32.partialorder %v155_v8, 0.0 }
  0x38   :  { %v248_v13 = vsel %vm184_vm14, %v152_v3, %v216_v1  ;;  %v218_v14 = vmul.f32 0.2, %v154_v6  ;;  %v219_v15 = vmul.f32 0.2, %v155_v8  ;;  %408 = vst.msk [vmem:[%s835_s3 + $0x6c] sm:$0xf] %vm380_vm0, %v478_v11 }
  0x39   :  { %v479_v7 = vpack.c.bf16 %v248_v13, %v248_v13  ;;  %v249_v16 = vsel %vm185_vm15, %v153_v4, %v217_v12 }
  0x3a   :  { %v480_v17 = vpack.c.bf16 %v249_v16, %v249_v16  ;;  %v250_v18 = vsel %vm186_vm1, %v154_v6, %v218_v14  ;;  %v251_v19 = vsel %vm187_vm2, %v155_v8, %v219_v15 }
  0x3b   :  { %409 = vst.msk [vmem:[%s835_s3 + $0x70] sm:$0xf] %vm380_vm0, %v479_v7  ;;  %v481_v20 = vpack.c.bf16 %v250_v18, %v250_v18  ;;  %v482_v21 = vpack.c.bf16 %v251_v19, %v251_v19 }
  0x3c   :  { %410 = vst.msk [vmem:[%s835_s3 + $0x74] sm:$0xf] %vm380_vm0, %v480_v17 }
  0x3d   :  { %411 = vst.msk [vmem:[%s835_s3 + $0x78] sm:$0xf] %vm380_vm0, %v481_v20  ;;  %412 = vst.msk [vmem:[%s835_s3 + $0x7c] sm:$0xf] %vm380_vm0, %v482_v21 }

// kernel: _lambda_.17
= control target key start
LH: loop header
LB: loop body
LE: loop exit
PB: predicated region body
PF: predicated region fallthrough
CT: control target
= control target key end

     0   :  { %vm473_vm0 = vcmask 261120   ;;  %vm972_vm1 = vcmask 257024   ;;  %vm1074_vm2 = vcmask 253952   ;;  %s2152_s1 = inlined_call_operand.vmem [shape: bf16[288,32], index: 1, kind: input, shape index: {}]   ;;  %s2153_s0 = inlined_call_operand.vmem [shape: bf16[256,288], index: 0, kind: input, shape index: {}]   ;;  %s2154_s2 = inlined_call_operand.vmem [shape: f32[1,32], index: 2, kind: input, shape index: {}]   ;;  %s2155_s3 = inlined_call_operand.vmem [shape: bf16[256,32], index: 3, kind: output, shape index: {0}]   ;;  %s2156_s4 = inlined_call_operand.vmem [shape: f32[1,1,32], index: 4, kind: output, shape index: {1}]   ;;  %s2157_s5 = inlined_call_operand.vmem [shape: f32[1,1,32], index: 5, kind: output, shape index: {2}]  }
   0x1   :  { %v1519_v0 = vld [vmem:[%s2152_s1 + $0x40] sm:$0xff]   ;;  %v1521_v2 = vld [vmem:[%s2152_s1 + $0x48] sm:$0xff]   ;;  %v1523_v4 = vld [vmem:[%s2152_s1 + $0x50] sm:$0xff]  }
   0x2   :  { %v1520_v1 = vld [vmem:[%s2152_s1] sm:$0xff]   ;;  %1337 = vmatprep.subr.bf16.mxu0 %v1519_v0  ;;  %1503 = vmatprep.subr.bf16.mxu1 %v1519_v0  ;;  %v1522_v3 = vld [vmem:[%s2152_s1 + $0x8] sm:$0xff]   ;;  %v1524_v5 = vld [vmem:[%s2152_s1 + $0x10] sm:$0xff]  }
   0x3   :  { %1338 = vmatpush3.bf16.msra.mxu0 %v1520_v1  ;;  %1511 = vmatpush3.bf16.msra.mxu1 %v1520_v1  ;;  %v1525_v6 = vld [vmem:[%s2152_s1 + $0x58] sm:$0xff]   ;;  %v1527_v8 = vld [vmem:[%s2152_s1 + $0x60] sm:$0xff]   ;;  %v1529_v10 = vld [vmem:[%s2152_s1 + $0x68] sm:$0xff]  }
   0x4   :  { %1339 = vmatprep.subr.bf16.mxu0 %v1521_v2  ;;  %1504 = vmatprep.subr.bf16.mxu1 %v1521_v2  ;;  %v1526_v7 = vld [vmem:[%s2152_s1 + $0x18] sm:$0xff]   ;;  %v1528_v9 = vld [vmem:[%s2152_s1 + $0x20] sm:$0xff]   ;;  %v1530_v13 = vld [vmem:[%s2152_s1 + $0x28] sm:$0xff]  }
   0x5   :  { %v1537_v11 = vld [vmem:[%s2153_s0 + $0x4] ss:$12 sps:$4 sm:$0xff]   ;;  %v1533_v16 = vld [vmem:[%s2152_s1 + $0x78] sm:$0xff]   ;;  %v1535_v19 = vld [vmem:[%s2153_s0] ss:$12 sps:$4 sm:$0xff]  }
   0x6   :  { %v1540_v12 = vld [vmem:[%s2153_s0 + $0x124] ss:$12 sps:$4 sm:$0xff]   ;;  %554 = vmatprep.mubr.bf16.mxu0 %v1537_v11  ;;  %v1534_v17 = vld [vmem:[%s2152_s1 + $0x38] sm:$0xff]   ;;  %v1538_v20 = vld [vmem:[%s2153_s0 + $0x120] ss:$12 sps:$4 sm:$0xff]  }
   0x7   :  { %1340 = vmatpush3.bf16.msra.mxu0 %v1522_v3  ;;  %1512 = vmatpush3.bf16.msra.mxu1 %v1522_v3  ;;  %v1531_v14 = vld [vmem:[%s2152_s1 + $0x70] sm:$0xff]   ;;  %v1551_v18 = vld [vmem:[%s2152_s1 + $0x80] sm:$0xff]   ;;  %v1541_v21 = vld [vmem:[%s2153_s0 + $0x1c] ss:$12 sps:$4 sm:$0xff]  }
   0x8   :  { %1341 = vmatprep.subr.bf16.mxu0 %v1523_v4  ;;  %1505 = vmatprep.subr.bf16.mxu1 %v1523_v4  ;;  %v1532_v15 = vld [vmem:[%s2152_s1 + $0x30] sm:$0xff]   ;;  %v1543_v22 = vld [vmem:[%s2153_s0 + $0x13c] ss:$12 sps:$4 sm:$0xff]   ;;  %v1545_v24 = vld [vmem:[%s2153_s0 + $0x18] ss:$12 sps:$4 sm:$0xff]  }
   0x9   :  { %650 = vmatprep.mubr.bf16.mxu1 %v1540_v12  ;;  %v1560_v23 = vld [vmem:[%s2152_s1 + $0x88] sm:$0xff]   ;;  %v1546_v25 = vld [vmem:[%s2153_s0 + $0x138] ss:$12 sps:$4 sm:$0xff]   ;;  %v1547_v26 = vld [vmem:[%s2153_s0 + $0x34] ss:$12 sps:$4 sm:$0xff]  }
   0xa   :  { %v1549_v27 = vld [vmem:[%s2153_s0 + $0x154] ss:$12 sps:$4 sm:$0xff]   ;;  %v1552_v28 = vld [vmem:[%s2153_s0 + $0x30] ss:$12 sps:$4 sm:$0xff]   ;;  %v1554_v30 = vld [vmem:[%s2153_s0 + $0x4c] ss:$12 sps:$4 sm:$0xff]  }
   0xb   :  { %1342 = vmatpush3.bf16.msra.mxu0 %v1524_v5  ;;  %1513 = vmatpush3.bf16.msra.mxu1 %v1524_v5  ;;  %v1553_v29 = vld [vmem:[%s2153_s0 + $0x150] ss:$12 sps:$4 sm:$0xff]   ;;  %v1556_v31 = vld [vmem:[%s2153_s0 + $0x16c] ss:$12 sps:$4 sm:$0xff]   ;;  %v1558_v32 = vld [vmem:[%s2153_s0 + $0x48] ss:$12 sps:$4 sm:$0xff]  }
   0xc   :  { %1343 = vmatprep.subr.bf16.mxu0 %v1525_v6  ;;  %1506 = vmatprep.subr.bf16.mxu1 %v1525_v6  ;;  %v1559_v33 = vld [vmem:[%s2153_s0 + $0x168] ss:$12 sps:$4 sm:$0xff]   ;;  %v1561_v34 = vld [vmem:[%s2153_s0 + $0x64] ss:$12 sps:$4 sm:$0xff]   ;;  %v1564_v36 = vld [vmem:[%s2153_s0 + $0x60] ss:$12 sps:$4 sm:$0xff]  }
   0xd   :  { %v1563_v35 = vld [vmem:[%s2153_s0 + $0x8] ss:$12 sps:$4 sm:$0xff]   ;;  %v1565_v37 = vld [vmem:[%s2153_s0 + $0x20] ss:$12 sps:$4 sm:$0xff]   ;;  %v1568_v39 = vld [vmem:[%s2153_s0 + $0x38] ss:$12 sps:$4 sm:$0xff]  }
   0xe   :  { %v1566_v38 = vld [vmem:[%s2153_s0 + $0x7c] ss:$12 sps:$4 sm:$0xff]   ;;  %v1569_v40 = vld [vmem:[%s2153_s0 + $0x78] ss:$12 sps:$4 sm:$0xff]   ;;  %v1571_v42 = vld [vmem:[%s2153_s0 + $0x94] ss:$12 sps:$4 sm:$0xff]  }
   0xf   :  { %1344 = vmatpush3.bf16.msra.mxu0 %v1526_v7  ;;  %1514 = vmatpush3.bf16.msra.mxu1 %v1526_v7  ;;  %v1570_v41 = vld [vmem:[%s2153_s0 + $0x50] ss:$12 sps:$4 sm:$0xff]   ;;  %v1573_v43 = vld [vmem:[%s2153_s0 + $0x68] ss:$12 sps:$4 sm:$0xff]   ;;  %v1575_v45 = vld [vmem:[%s2153_s0 + $0x80] ss:$12 sps:$4 sm:$0xff]  }
  0x10   :  { %1345 = vmatprep.subr.bf16.mxu0 %v1527_v8  ;;  %1507 = vmatprep.subr.bf16.mxu1 %v1527_v8  ;;  %v1574_v44 = vld [vmem:[%s2153_s0 + $0x90] ss:$12 sps:$4 sm:$0xff]   ;;  %v1576_v46 = vld [vmem:[%s2153_s0 + $0xac] ss:$12 sps:$4 sm:$0xff]   ;;  %v1579_v48 = vld [vmem:[%s2153_s0 + $0xa8] ss:$12 sps:$4 sm:$0xff]  }
  0x11   :  { %v1578_v47 = vld [vmem:[%s2153_s0 + $0x98] ss:$12 sps:$4 sm:$0xff]   ;;  %v1580_v49 = vld [vmem:[%s2153_s0 + $0xb0] ss:$12 sps:$4 sm:$0xff]   ;;  %v1583_v51 = vld [vmem:[%s2153_s0 + $0xc8] ss:$12 sps:$4 sm:$0xff]  }
  0x12   :  { %v1581_v50 = vld [vmem:[%s2153_s0 + $0xc4] ss:$12 sps:$4 sm:$0xff]   ;;  %v1584_v52 = vld [vmem:[%s2153_s0 + $0xc0] ss:$12 sps:$4 sm:$0xff]   ;;  %v1586_v54 = vld [vmem:[%s2153_s0 + $0xdc] ss:$12 sps:$4 sm:$0xff]  }
  0x13   :  { %1346 = vmatpush3.bf16.msra.mxu0 %v1528_v9  ;;  %1515 = vmatpush3.bf16.msra.mxu1 %v1528_v9  ;;  %v1585_v53 = vld [vmem:[%s2153_s0 + $0xe0] ss:$12 sps:$4 sm:$0xff]   ;;  %v1588_v55 = vld [vmem:[%s2153_s0 + $0xf8] ss:$12 sps:$4 sm:$0xff]   ;;  %v1590_v57 = vld [vmem:[%s2153_s0 + $0x110] ss:$12 sps:$4 sm:$0xff]  }
  0x14   :  { %1347 = vmatprep.subr.bf16.mxu0 %v1529_v10  ;;  %1508 = vmatprep.subr.bf16.mxu1 %v1529_v10  ;;  %v1589_v56 = vld [vmem:[%s2153_s0 + $0xd8] ss:$12 sps:$4 sm:$0xff]   ;;  %v1591_v58 = vld [vmem:[%s2153_s0 + $0xf4] ss:$12 sps:$4 sm:$0xff]   ;;  %v1594_v60 = vld [vmem:[%s2153_s0 + $0xf0] ss:$12 sps:$4 sm:$0xff]  }
  0x15   :  { %v1593_v59 = vld [vmem:[%s2153_s0 + $0x128] ss:$12 sps:$4 sm:$0xff]   ;;  %v1595_v61 = vld [vmem:[%s2153_s0 + $0x140] ss:$12 sps:$4 sm:$0xff]   ;;  %v1598_v63 = vld [vmem:[%s2153_s0 + $0x158] ss:$12 sps:$4 sm:$0xff]  }
  0x16   :  { %v1596_v62 = vld [vmem:[%s2153_s0 + $0x10c] ss:$12 sps:$4 sm:$0xff]   ;;  %v1599_v0 = vld [vmem:[%s2153_s0 + $0x108] ss:$12 sps:$4 sm:$0xff]   ;;  %v1600_v1 = vld [vmem:[%s2153_s0 + $0x170] ss:$12 sps:$4 sm:$0xff]  }
  0x17   :  { %1348 = vmatpush3.bf16.msra.mxu0 %v1530_v13  ;;  %1516 = vmatpush3.bf16.msra.mxu1 %v1530_v13 }
  0x18   :  { %1349 = vmatprep.subr.bf16.mxu0 %v1531_v14  ;;  %1509 = vmatprep.subr.bf16.mxu1 %v1531_v14 }
  0x1b   :  { %1350 = vmatpush3.bf16.msra.mxu0 %v1532_v15  ;;  %1517 = vmatpush3.bf16.msra.mxu1 %v1532_v15 }
  0x1c   :  { %1351 = vmatprep.subr.bf16.mxu0 %v1533_v16  ;;  %1510 = vmatprep.subr.bf16.mxu1 %v1533_v16 }
  0x1f   :  { %1352 = vmatpush3.bf16.msra.mxu0 %v1534_v17  ;;  %1518 = vmatpush3.bf16.msra.mxu1 %v1534_v17 }
  0x20   :  { %1467 = vmatprep.subr.bf16.mxu1 %v1551_v18 }
  0x22   :  { %555 = vmatmul.mubr.bf16.vlgmr.msra.gmra.mrb[0].mxu0 %v1535_v19  ;;  %651 = vmatmul.mubr.bf16.vlgmr.msra.gmra.mrb[0].mxu1 %v1538_v20 }
  0x23   :  { %562 = vmatprep.mubr.bf16.mxu0 %v1541_v21  ;;  %658 = vmatprep.mubr.bf16.mxu1 %v1543_v22 }
  0x24   :  { %1468 = vmatpush3.bf16.msra.mxu1 %v1551_v18 }
  0x25   :  { %1469 = vmatprep.subr.bf16.mxu1 %v1560_v23 }
  0x28   :  { %1470 = vmatpush3.bf16.msra.mxu1 %v1560_v23 }
  0x2a   :  { %563 = vmatmul.mubr.bf16.gmra.mrb[4].mxu0 %v1545_v24  ;;  %659 = vmatmul.mubr.bf16.gmra.mrb[4].mxu1 %v1546_v25 }
  0x2b   :  { %570 = vmatprep.mubr.bf16.mxu0 %v1547_v26  ;;  %666 = vmatprep.mubr.bf16.mxu1 %v1549_v27 }
  0x32   :  { %571 = vmatmul.mubr.bf16.gmra.mrb[8].mxu0 %v1552_v28  ;;  %667 = vmatmul.mubr.bf16.gmra.mrb[8].mxu1 %v1553_v29 }
  0x33   :  { %578 = vmatprep.mubr.bf16.mxu0 %v1554_v30  ;;  %674 = vmatprep.mubr.bf16.mxu1 %v1556_v31 }
  0x3a   :  { %579 = vmatmul.mubr.bf16.gmra.mrb[12].mxu0 %v1558_v32  ;;  %675 = vmatmul.mubr.bf16.gmra.mrb[12].mxu1 %v1559_v33 }
  0x3b   :  { %586 = vmatprep.mubr.bf16.mxu0 %v1561_v34  ;;  %1471 = vmatprep.mubr.msk.bf16.mxu1 %vm473_vm0, %v1563_v35 }
  0x42   :  { %587 = vmatmul.mubr.bf16.gmra.mrb[16].mxu0 %v1564_v36  ;;  %1472 = vmatmul.mubr.msk.bf16.vlgmr.msra.gmra.mrb[16].mxu1 %vm473_vm0, %v1565_v37 }
  0x43   :  { %594 = vmatprep.mubr.bf16.mxu0 %v1566_v38  ;;  %1475 = vmatprep.mubr.msk.bf16.mxu1 %vm473_vm0, %v1568_v39 }
  0x4a   :  { %595 = vmatmul.mubr.bf16.gmra.mrb[20].mxu0 %v1569_v40  ;;  %1476 = vmatmul.mubr.msk.bf16.gmra.mrb[20].mxu1 %vm473_vm0, %v1570_v41 }
  0x4b   :  { %602 = vmatprep.mubr.bf16.mxu0 %v1571_v42  ;;  %1479 = vmatprep.mubr.msk.bf16.mxu1 %vm473_vm0, %v1573_v43 }
  0x52   :  { %603 = vmatmul.mubr.bf16.gmra.mrb[24].mxu0 %v1574_v44  ;;  %1480 = vmatmul.mubr.msk.bf16.gmra.mrb[24].mxu1 %vm473_vm0, %v1575_v45 }
  0x53   :  { %610 = vmatprep.mubr.bf16.mxu0 %v1576_v46  ;;  %1483 = vmatprep.mubr.msk.bf16.mxu1 %vm473_vm0, %v1578_v47 }
  0x5a   :  { %611 = vmatmul.mubr.bf16.gmra.mrb[28].mxu0 %v1579_v48  ;;  %1484 = vmatmul.mubr.msk.bf16.gmra.mrb[28].mxu1 %vm473_vm0, %v1580_v49 }
  0x5b   :  { %618 = vmatprep.mubr.bf16.mxu0 %v1581_v50  ;;  %1487 = vmatprep.mubr.msk.bf16.mxu1 %vm473_vm0, %v1583_v51  ;;  %v1864_v50 = vld [vmem:[%s2154_s2] ss:$0 sm:$0xff] }
  0x62   :  { %619 = vmatmul.mubr.bf16.gmra.mrb[32].mxu0 %v1584_v52  ;;  %1488 = vmatmul.mubr.msk.bf16.gmra.mrb[32].mxu1 %vm473_vm0, %v1585_v53 }
  0x63   :  { %626 = vmatprep.mubr.bf16.mxu0 %v1586_v54  ;;  %1491 = vmatprep.mubr.msk.bf16.mxu1 %vm473_vm0, %v1588_v55 }
  0x6a   :  { %627 = vmatmul.mubr.bf16.gmra.mrb[36].mxu0 %v1589_v56  ;;  %1492 = vmatmul.mubr.msk.bf16.gmra.mrb[36].mxu1 %vm473_vm0, %v1590_v57 }
  0x6b   :  { %634 = vmatprep.mubr.bf16.mxu0 %v1591_v58  ;;  %1495 = vmatprep.mubr.msk.bf16.mxu1 %vm473_vm0, %v1593_v59 }
  0x72   :  { %635 = vmatmul.mubr.bf16.gmra.mrb[40].mxu0 %v1594_v60  ;;  %1496 = vmatmul.mubr.msk.bf16.gmra.mrb[40].mxu1 %vm473_vm0, %v1595_v61 }
  0x73   :  { %642 = vmatprep.mubr.bf16.mxu0 %v1596_v62  ;;  %1499 = vmatprep.mubr.msk.bf16.mxu1 %vm473_vm0, %v1598_v63 }
  0x7a   :  { %643 = vmatmul.mubr.bf16.gmra.mrb[44].mxu0 %v1599_v0  ;;  %1500 = vmatmul.mubr.msk.bf16.gmra.mrb[44].mxu1 %vm473_vm0, %v1600_v1 }
  0xf5   :  { %v1353_v2 = vpop.f32.mrb[0].mxu0  ;;  %v1425_v3 = vpop.f32.mrb[0].mxu1 }
  0xf6   :  { %v1354_v4 = vpop.f32.mrb[1].mxu0  ;;  %v1426_v5 = vpop.f32.mrb[1].mxu1 }
  0xf7   :  { %v1355_v6 = vadd.f32 %v1354_v4, %v1353_v2  ;;  %v1356_v7 = vpop.f32.mrb[2].mxu0  ;;  %v1845_v8 = vadd.f32 %v1426_v5, %v1425_v3  ;;  %v1428_v9 = vpop.f32.mrb[2].mxu1 }
  0xf8   :  { %v1357_v10 = vpop.f32.mrb[3].mxu0  ;;  %v1429_v11 = vpop.f32.mrb[3].mxu1 }
  0xf9   :  { %v1358_v12 = vadd.f32 %v1357_v10, %v1356_v7  ;;  %v1847_v13 = vadd.f32 %v1429_v11, %v1428_v9  ;;  %v557_v54 = vadd.f32 %v1355_v6, %v1864_v50 }
  0xfb   :  { %v560_v7 = vadd.f32 %v1358_v12, %v1864_v50 }
  0xfd   :  { %v1359_v14 = vpop.f32.mrb[4].mxu0  ;;  %v1431_v15 = vpop.f32.mrb[4].mxu1 }
  0xfe   :  { %v1360_v16 = vpop.f32.mrb[5].mxu0  ;;  %v1432_v17 = vpop.f32.mrb[5].mxu1 }
  0xff   :  { %v1361_v18 = vadd.f32 %v1360_v16, %v1359_v14  ;;  %v1362_v19 = vpop.f32.mrb[6].mxu0  ;;  %v1849_v20 = vadd.f32 %v1432_v17, %v1431_v15  ;;  %v1434_v21 = vpop.f32.mrb[6].mxu1 }
 0x100   :  { %v1363_v22 = vpop.f32.mrb[7].mxu0  ;;  %v1435_v23 = vpop.f32.mrb[7].mxu1 }
 0x101   :  { %v1364_v24 = vadd.f32 %v1363_v22, %v1362_v19  ;;  %v1851_v25 = vadd.f32 %v1435_v23, %v1434_v21  ;;  %v565_v51 = vadd.f32 %v1361_v18, %v1864_v50 }
 0x103   :  { %v568_v58 = vadd.f32 %v1364_v24, %v1864_v50 }
 0x105   :  { %v1365_v26 = vpop.f32.mrb[8].mxu0  ;;  %v1437_v27 = vpop.f32.mrb[8].mxu1 }
 0x106   :  { %v1366_v28 = vpop.f32.mrb[9].mxu0  ;;  %v1438_v29 = vpop.f32.mrb[9].mxu1 }
 0x107   :  { %v1367_v30 = vadd.f32 %v1366_v28, %v1365_v26  ;;  %v1368_v31 = vpop.f32.mrb[10].mxu0  ;;  %v1853_v32 = vadd.f32 %v1438_v29, %v1437_v27  ;;  %v1440_v33 = vpop.f32.mrb[10].mxu1 }
 0x108   :  { %v1369_v34 = vpop.f32.mrb[11].mxu0  ;;  %v1441_v35 = vpop.f32.mrb[11].mxu1 }
 0x109   :  { %v1370_v36 = vadd.f32 %v1369_v34, %v1368_v31  ;;  %v1855_v37 = vadd.f32 %v1441_v35, %v1440_v33  ;;  %v573_v14 = vadd.f32 %v1367_v30, %v1864_v50 }
 0x10b   :  { %v576_v15 = vadd.f32 %v1370_v36, %v1864_v50 }
 0x10d   :  { %v1371_v38 = vpop.f32.mrb[12].mxu0  ;;  %v1443_v39 = vpop.f32.mrb[12].mxu1 }
 0x10e   :  { %v1372_v40 = vpop.f32.mrb[13].mxu0  ;;  %v1444_v41 = vpop.f32.mrb[13].mxu1 }
 0x10f   :  { %v1373_v42 = vadd.f32 %v1372_v40, %v1371_v38  ;;  %v1374_v43 = vpop.f32.mrb[14].mxu0  ;;  %v1857_v44 = vadd.f32 %v1444_v41, %v1443_v39  ;;  %v1446_v45 = vpop.f32.mrb[14].mxu1 }
 0x110   :  { %v1375_v46 = vpop.f32.mrb[15].mxu0  ;;  %v1447_v47 = vpop.f32.mrb[15].mxu1 }
 0x111   :  { %v1376_v48 = vadd.f32 %v1375_v46, %v1374_v43  ;;  %v1859_v49 = vadd.f32 %v1447_v47, %v1446_v45  ;;  %v581_v11 = vadd.f32 %v1373_v42, %v1864_v50 }
 0x113   :  { %v584_v18 = vadd.f32 %v1376_v48, %v1864_v50 }
 0x115   :  { %v1377_v52 = vpop.f32.mrb[16].mxu0  ;;  %v1473_v53 = vpop.f32.mrb[16].mxu1 }
 0x116   :  { %v726_v55 = vadd.f32 %v1473_v53, %v565_v51  ;;  %v1378_v56 = vpop.f32.mrb[17].mxu0  ;;  %v717_v57 = vpop.f32.mrb[17].mxu1 }
 0x117   :  { %v1379_v59 = vadd.f32 %v1378_v56, %v1377_v52  ;;  %v718_v60 = vadd.f32 %v717_v57, %v557_v54  ;;  %v1380_v61 = vpop.f32.mrb[18].mxu0  ;;  %v1474_v62 = vpop.f32.mrb[18].mxu1 }
 0x118   :  { %v1307_v63 = vpack.c.bf16 %v726_v55, %v726_v55  ;;  %v1078_v0 = vmul.f32 %v726_v55, %v726_v55  ;;  %v729_v1 = vadd.f32 %v1474_v62, %v568_v58  ;;  %v1381_v2 = vpop.f32.mrb[19].mxu0  ;;  %v720_v3 = vpop.f32.mrb[19].mxu1  ;;  %v1008_v12 = vsel %vm473_vm0, %v726_v55, 0.0 }
 0x119   :  { %v1305_v4 = vpack.c.bf16 %v718_v60, %v718_v60  ;;  %v1382_v5 = vadd.f32 %v1381_v2, %v1380_v61  ;;  %v1076_v6 = vmul.f32 %v718_v60, %v718_v60  ;;  %v721_v10 = vadd.f32 %v720_v3, %v560_v7 }
 0x11a   :  { %975 = vst.msk [vmem:[%s2155_s3 + $0x8] sm:$0xf] %vm972_vm1, %v1307_v63  ;;  %v1308_v9 = vpack.c.bf16 %v729_v1, %v729_v1  ;;  %v1111_v16 = vsel %vm473_vm0, %v1078_v0, 0.0  ;;  %v1005_v17 = vsel %vm473_vm0, %v718_v60, 0.0  ;;  %v1010_v19 = vsel %vm473_vm0, %v729_v1, 0.0 }
 0x11b   :  { %973 = vst.msk [vmem:[%s2155_s3] sm:$0xf] %vm972_vm1, %v1305_v4  ;;  %v1306_v21 = vpack.c.bf16 %v721_v10, %v721_v10  ;;  %v1006_v22 = vsel %vm473_vm0, %v721_v10, 0.0  ;;  %v1077_v23 = vmul.f32 %v721_v10, %v721_v10  ;;  %v1108_v27 = vsel %vm473_vm0, %v1076_v6, 0.0 }
 0x11c   :  { %976 = vst.msk [vmem:[%s2155_s3 + $0xc] sm:$0xf] %vm972_vm1, %v1308_v9  ;;  %v1079_v28 = vmul.f32 %v729_v1, %v729_v1  ;;  %v1007_v29 = vadd.f32 %v1006_v22, %v1005_v17  ;;  %v589_v40 = vadd.f32 %v1379_v59, %v1864_v50  ;;  %v592_v47 = vadd.f32 %v1382_v5, %v1864_v50 }
 0x11d   :  { %v1383_v24 = vpop.f32.mrb[20].mxu0  ;;  %v1477_v26 = vpop.f32.mrb[20].mxu1  ;;  %974 = vst.msk [vmem:[%s2155_s3 + $0x4] sm:$0xf] %vm972_vm1, %v1306_v21  ;;  %v1109_v34 = vsel %vm473_vm0, %v1077_v23, 0.0 }
 0x11e   :  { %v742_v30 = vadd.f32 %v1477_v26, %v581_v11  ;;  %v1384_v31 = vpop.f32.mrb[21].mxu0  ;;  %v733_v33 = vpop.f32.mrb[21].mxu1  ;;  %v1009_v41 = vadd.f32 %v1008_v12, %v1007_v29  ;;  %v1110_v42 = vadd.f32 %v1109_v34, %v1108_v27  ;;  %v1113_v58 = vsel %vm473_vm0, %v1079_v28, 0.0 }
 0x11f   :  { %v1385_v35 = vadd.f32 %v1384_v31, %v1383_v24  ;;  %v734_v36 = vadd.f32 %v733_v33, %v573_v14  ;;  %v1386_v38 = vpop.f32.mrb[22].mxu0  ;;  %v1478_v39 = vpop.f32.mrb[22].mxu1 }
 0x120   :  { %v1311_v43 = vpack.c.bf16 %v742_v30, %v742_v30  ;;  %v1387_v45 = vpop.f32.mrb[23].mxu0  ;;  %v736_v46 = vpop.f32.mrb[23].mxu1  ;;  %v1082_v48 = vmul.f32 %v742_v30, %v742_v30  ;;  %v1112_v54 = vadd.f32 %v1111_v16, %v1110_v42  ;;  %v1011_v55 = vadd.f32 %v1010_v19, %v1009_v41 }
 0x121   :  { %v1309_v51 = vpack.c.bf16 %v734_v36, %v734_v36  ;;  %v1012_v52 = vsel %vm473_vm0, %v734_v36, 0.0  ;;  %v1080_v53 = vmul.f32 %v734_v36, %v734_v36  ;;  %v745_v56 = vadd.f32 %v1478_v39, %v584_v18 }
 0x122   :  { %979 = vst.msk [vmem:[%s2155_s3 + $0x18] sm:$0xf] %vm972_vm1, %v1311_v43  ;;  %v1388_v57 = vadd.f32 %v1387_v45, %v1386_v38  ;;  %v1016_v59 = vsel %vm473_vm0, %v742_v30, 0.0  ;;  %v737_v61 = vadd.f32 %v736_v46, %v576_v15  ;;  %v1013_v62 = vadd.f32 %v1012_v52, %v1011_v55 }
 0x123   :  { %977 = vst.msk [vmem:[%s2155_s3 + $0x10] sm:$0xf] %vm972_vm1, %v1309_v51  ;;  %v1115_v60 = vsel %vm473_vm0, %v1080_v53, 0.0  ;;  %v1114_v63 = vadd.f32 %v1113_v58, %v1112_v54  ;;  %v1312_v0 = vpack.c.bf16 %v745_v56, %v745_v56  ;;  %v597_v1 = vadd.f32 %v1385_v35, %v1864_v50 }
 0x124   :  { %v1119_v2 = vsel %vm473_vm0, %v1082_v48, 0.0  ;;  %v1310_v3 = vpack.c.bf16 %v737_v61, %v737_v61  ;;  %v1014_v4 = vsel %vm473_vm0, %v737_v61, 0.0  ;;  %v1081_v5 = vmul.f32 %v737_v61, %v737_v61 }
 0x125   :  { %v1389_v7 = vpop.f32.mrb[24].mxu0  ;;  %v1481_v6 = vpop.f32.mrb[24].mxu1  ;;  %v1116_v9 = vadd.f32 %v1115_v60, %v1114_v63  ;;  %980 = vst.msk [vmem:[%s2155_s3 + $0x1c] sm:$0xf] %vm972_vm1, %v1312_v0  ;;  %v1018_v10 = vsel %vm473_vm0, %v745_v56, 0.0  ;;  %v1015_v11 = vadd.f32 %v1014_v4, %v1013_v62  ;;  %v1083_v16 = vmul.f32 %v745_v56, %v745_v56 }
 0x126   :  { %v758_v14 = vadd.f32 %v1481_v6, %v597_v1  ;;  %v1390_v15 = vpop.f32.mrb[25].mxu0  ;;  %v749_v12 = vpop.f32.mrb[25].mxu1  ;;  %978 = vst.msk [vmem:[%s2155_s3 + $0x14] sm:$0xf] %vm972_vm1, %v1310_v3  ;;  %v1117_v17 = vsel %vm473_vm0, %v1081_v5, 0.0  ;;  %v600_v27 = vadd.f32 %v1388_v57, %v1864_v50 }
 0x127   :  { %v1391_v18 = vadd.f32 %v1390_v15, %v1389_v7  ;;  %v750_v19 = vadd.f32 %v749_v12, %v589_v40  ;;  %v1392_v21 = vpop.f32.mrb[26].mxu0  ;;  %v1482_v22 = vpop.f32.mrb[26].mxu1  ;;  %v1017_v23 = vadd.f32 %v1016_v59, %v1015_v11  ;;  %v1118_v24 = vadd.f32 %v1117_v17, %v1116_v9 }
 0x128   :  { %v1315_v26 = vpack.c.bf16 %v758_v14, %v758_v14  ;;  %v1393_v28 = vpop.f32.mrb[27].mxu0  ;;  %v752_v29 = vpop.f32.mrb[27].mxu1  ;;  %v1086_v30 = vmul.f32 %v758_v14, %v758_v14  ;;  %v761_v38 = vadd.f32 %v1482_v22, %v600_v27  ;;  %v1121_v40 = vsel %vm473_vm0, %v1083_v16, 0.0 }
 0x129   :  { %v1313_v31 = vpack.c.bf16 %v750_v19, %v750_v19  ;;  %v1020_v33 = vsel %vm473_vm0, %v750_v19, 0.0  ;;  %v1084_v34 = vmul.f32 %v750_v19, %v750_v19  ;;  %v1120_v35 = vadd.f32 %v1119_v2, %v1118_v24 }
 0x12a   :  { %983 = vst.msk [vmem:[%s2155_s3 + $0x28] sm:$0xf] %vm972_vm1, %v1315_v26  ;;  %v1019_v36 = vadd.f32 %v1018_v10, %v1017_v23  ;;  %v1394_v39 = vadd.f32 %v1393_v28, %v1392_v21  ;;  %v753_v42 = vadd.f32 %v752_v29, %v592_v47  ;;  %v1316_v46 = vpack.c.bf16 %v761_v38, %v761_v38 }
 0x12b   :  { %981 = vst.msk [vmem:[%s2155_s3 + $0x20] sm:$0xf] %vm972_vm1, %v1313_v31  ;;  %v1123_v41 = vsel %vm473_vm0, %v1084_v34, 0.0  ;;  %v1122_v45 = vadd.f32 %v1121_v40, %v1120_v35  ;;  %v605_v55 = vadd.f32 %v1391_v18, %v1864_v50  ;;  %v1024_v56 = vsel %vm473_vm0, %v758_v14, 0.0 }
 0x12c   :  { %v1021_v43 = vadd.f32 %v1020_v33, %v1019_v36  ;;  %v1314_v48 = vpack.c.bf16 %v753_v42, %v753_v42  ;;  %v1022_v51 = vsel %vm473_vm0, %v753_v42, 0.0  ;;  %v1085_v52 = vmul.f32 %v753_v42, %v753_v42  ;;  %984 = vst.msk [vmem:[%s2155_s3 + $0x2c] sm:$0xf] %vm972_vm1, %v1316_v46 }
 0x12d   :  { %v1395_v53 = vpop.f32.mrb[28].mxu0  ;;  %v1485_v54 = vpop.f32.mrb[28].mxu1  ;;  %v1127_v57 = vsel %vm473_vm0, %v1086_v30, 0.0  ;;  %v1124_v58 = vadd.f32 %v1123_v41, %v1122_v45  ;;  %v1087_v61 = vmul.f32 %v761_v38, %v761_v38  ;;  %v1026_v3 = vsel %vm473_vm0, %v761_v38, 0.0 }
 0x12e   :  { %v1023_v47 = vadd.f32 %v1022_v51, %v1021_v43  ;;  %v1396_v59 = vpop.f32.mrb[29].mxu0  ;;  %v765_v60 = vpop.f32.mrb[29].mxu1  ;;  %982 = vst.msk [vmem:[%s2155_s3 + $0x24] sm:$0xf] %vm972_vm1, %v1314_v48  ;;  %v1125_v62 = vsel %vm473_vm0, %v1085_v52, 0.0  ;;  %v608_v6 = vadd.f32 %v1394_v39, %v1864_v50 }
 0x12f   :  { %v1397_v63 = vadd.f32 %v1396_v59, %v1395_v53  ;;  %v766_v0 = vadd.f32 %v765_v60, %v605_v55  ;;  %v1398_v1 = vpop.f32.mrb[30].mxu0  ;;  %v1486_v2 = vpop.f32.mrb[30].mxu1  ;;  %v1126_v5 = vadd.f32 %v1125_v62, %v1124_v58  ;;  %v1129_v19 = vsel %vm473_vm0, %v1087_v61, 0.0 }
 0x130   :  { %v1025_v4 = vadd.f32 %v1024_v56, %v1023_v47  ;;  %v1399_v7 = vpop.f32.mrb[31].mxu0  ;;  %v768_v9 = vpop.f32.mrb[31].mxu1 }
 0x131   :  { %v613_v10 = vadd.f32 %v1397_v63, %v1864_v50  ;;  %v1317_v11 = vpack.c.bf16 %v766_v0, %v766_v0  ;;  %v1028_v14 = vsel %vm473_vm0, %v766_v0, 0.0  ;;  %v1088_v15 = vmul.f32 %v766_v0, %v766_v0 }
 0x132   :  { %v1128_v12 = vadd.f32 %v1127_v57, %v1126_v5  ;;  %v1027_v16 = vadd.f32 %v1026_v3, %v1025_v4  ;;  %v1400_v17 = vadd.f32 %v1399_v7, %v1398_v1  ;;  %v769_v18 = vadd.f32 %v768_v9, %v608_v6 }
 0x133   :  { %v774_v21 = vadd.f32 %v1485_v54, %v613_v10  ;;  %985 = vst.msk [vmem:[%s2155_s3 + $0x30] sm:$0xf] %vm972_vm1, %v1317_v11  ;;  %v1131_v22 = vsel %vm473_vm0, %v1088_v15, 0.0 }
 0x134   :  { %v1029_v23 = vadd.f32 %v1028_v14, %v1027_v16  ;;  %v1130_v24 = vadd.f32 %v1129_v19, %v1128_v12  ;;  %v616_v26 = vadd.f32 %v1400_v17, %v1864_v50  ;;  %v1318_v27 = vpack.c.bf16 %v769_v18, %v769_v18 }
 0x135   :  { %v1319_v28 = vpack.c.bf16 %v774_v21, %v774_v21  ;;  %v1090_v29 = vmul.f32 %v774_v21, %v774_v21  ;;  %v1030_v30 = vsel %vm473_vm0, %v769_v18, 0.0  ;;  %v1032_v31 = vsel %vm473_vm0, %v774_v21, 0.0  ;;  %v1401_v33 = vpop.f32.mrb[32].mxu0  ;;  %v1489_v34 = vpop.f32.mrb[32].mxu1 }
 0x136   :  { %v1132_v35 = vadd.f32 %v1131_v22, %v1130_v24  ;;  %v777_v36 = vadd.f32 %v1486_v2, %v616_v26  ;;  %986 = vst.msk [vmem:[%s2155_s3 + $0x34] sm:$0xf] %vm972_vm1, %v1318_v27  ;;  %v1031_v38 = vadd.f32 %v1030_v30, %v1029_v23  ;;  %v1089_v39 = vmul.f32 %v769_v18, %v769_v18  ;;  %v1402_v40 = vpop.f32.mrb[33].mxu0  ;;  %v781_v41 = vpop.f32.mrb[33].mxu1 }
 0x137   :  { %987 = vst.msk [vmem:[%s2155_s3 + $0x38] sm:$0xf] %vm972_vm1, %v1319_v28  ;;  %v1135_v42 = vsel %vm473_vm0, %v1090_v29, 0.0  ;;  %v1403_v43 = vadd.f32 %v1402_v40, %v1401_v33  ;;  %v1404_v45 = vpop.f32.mrb[34].mxu0  ;;  %v1490_v46 = vpop.f32.mrb[34].mxu1 }
 0x138   :  { %v1320_v48 = vpack.c.bf16 %v777_v36, %v777_v36  ;;  %v1091_v51 = vmul.f32 %v777_v36, %v777_v36  ;;  %v1033_v52 = vadd.f32 %v1032_v31, %v1031_v38  ;;  %v1133_v53 = vsel %vm473_vm0, %v1089_v39, 0.0  ;;  %v1405_v54 = vpop.f32.mrb[35].mxu0  ;;  %v784_v55 = vpop.f32.mrb[35].mxu1 }
 0x139   :  { %v1134_v56 = vadd.f32 %v1133_v53, %v1132_v35  ;;  %v1406_v57 = vadd.f32 %v1405_v54, %v1404_v45  ;;  %v621_v58 = vadd.f32 %v1403_v43, %v1864_v50  ;;  %v1034_v47 = vsel %vm473_vm0, %v777_v36, 0.0 }
 0x13a   :  { %988 = vst.msk [vmem:[%s2155_s3 + $0x3c] sm:$0xf] %vm972_vm1, %v1320_v48  ;;  %v1035_v59 = vadd.f32 %v1034_v47, %v1033_v52  ;;  %v1137_v60 = vsel %vm473_vm0, %v1091_v51, 0.0  ;;  %v661_v31 = vadd.f32 %v1849_v20, %v1864_v50  ;;  %v653_v45 = vadd.f32 %v1845_v8, %v1864_v50 }
 0x13b   :  { %v1136_v61 = vadd.f32 %v1135_v42, %v1134_v56  ;;  %v782_v62 = vadd.f32 %v781_v41, %v621_v58  ;;  %v624_v63 = vadd.f32 %v1406_v57, %v1864_v50  ;;  %v656_v48 = vadd.f32 %v1847_v13, %v1864_v50 }
 0x13c   :  { %v664_v13 = vadd.f32 %v1851_v25, %v1864_v50 }
 0x13d   :  { %v1321_v0 = vpack.c.bf16 %v782_v62, %v782_v62  ;;  %v1036_v1 = vsel %vm473_vm0, %v782_v62, 0.0  ;;  %v1092_v2 = vmul.f32 %v782_v62, %v782_v62  ;;  %v1138_v3 = vadd.f32 %v1137_v60, %v1136_v61  ;;  %v1407_v4 = vpop.f32.mrb[36].mxu0  ;;  %v1981_v5 = vpop.f32.mrb[36].mxu1 }
 0x13e   :  { %v1037_v7 = vadd.f32 %v1036_v1, %v1035_v59  ;;  %v785_v6 = vadd.f32 %v784_v55, %v624_v63  ;;  %v1408_v9 = vpop.f32.mrb[37].mxu0  ;;  %v797_v10 = vpop.f32.mrb[37].mxu1 }
 0x13f   :  { %989 = vst.msk [vmem:[%s2155_s3 + $0x40] sm:$0xf] %vm972_vm1, %v1321_v0  ;;  %v1139_v11 = vsel %vm473_vm0, %v1092_v2, 0.0  ;;  %v1409_v14 = vadd.f32 %v1408_v9, %v1407_v4  ;;  %v1410_v15 = vpop.f32.mrb[38].mxu0  ;;  %v1988_v12 = vpop.f32.mrb[38].mxu1 }
 0x140   :  { %v1140_v16 = vadd.f32 %v1139_v11, %v1138_v3  ;;  %v1322_v17 = vpack.c.bf16 %v785_v6, %v785_v6  ;;  %v1038_v18 = vsel %vm473_vm0, %v785_v6, 0.0  ;;  %v1093_v19 = vmul.f32 %v785_v6, %v785_v6  ;;  %v1411_v21 = vpop.f32.mrb[39].mxu0  ;;  %v800_v22 = vpop.f32.mrb[39].mxu1 }
 0x141   :  { %v1039_v23 = vadd.f32 %v1038_v18, %v1037_v7  ;;  %v629_v24 = vadd.f32 %v1409_v14, %v1864_v50  ;;  %v1412_v26 = vadd.f32 %v1411_v21, %v1410_v15  ;;  %v677_v3 = vadd.f32 %v1857_v44, %v1864_v50 }
 0x142   :  { %990 = vst.msk [vmem:[%s2155_s3 + $0x44] sm:$0xf] %vm972_vm1, %v1322_v17  ;;  %v1141_v27 = vsel %vm473_vm0, %v1093_v19, 0.0 }
 0x143   :  { %v1142_v28 = vadd.f32 %v1141_v27, %v1140_v16  ;;  %v790_v29 = vadd.f32 %v1489_v34, %v629_v24  ;;  %v632_v30 = vadd.f32 %v1412_v26, %v1864_v50  ;;  %v669_v26 = vadd.f32 %v1853_v32, %v1864_v50 }
 0x144   :  { %v680_v27 = vadd.f32 %v1859_v49, %v1864_v50  ;;  %v672_v49 = vadd.f32 %v1855_v37, %v1864_v50 }
 0x145   :  { %v1323_v33 = vpack.c.bf16 %v790_v29, %v790_v29  ;;  %v1040_v35 = vsel %vm473_vm0, %v790_v29, 0.0  ;;  %v1094_v36 = vmul.f32 %v790_v29, %v790_v29  ;;  %v793_v38 = vadd.f32 %v1490_v46, %v632_v30  ;;  %v1413_v39 = vpop.f32.mrb[40].mxu0  ;;  %v1497_v40 = vpop.f32.mrb[40].mxu1 }
 0x146   :  { %v1041_v41 = vadd.f32 %v1040_v35, %v1039_v23  ;;  %v2001_v42 = vadd.f32 %v1497_v40, %v661_v31  ;;  %v1414_v43 = vpop.f32.mrb[41].mxu0  ;;  %v813_v34 = vpop.f32.mrb[41].mxu1 }
 0x147   :  { %991 = vst.msk [vmem:[%s2155_s3 + $0x48] sm:$0xf] %vm972_vm1, %v1323_v33  ;;  %v1143_v20 = vsel %vm473_vm0, %v1094_v36, 0.0  ;;  %v1324_v46 = vpack.c.bf16 %v793_v38, %v793_v38  ;;  %v1042_v51 = vsel %vm473_vm0, %v793_v38, 0.0  ;;  %v1095_v52 = vmul.f32 %v793_v38, %v793_v38  ;;  %v1416_v53 = vpop.f32.mrb[42].mxu0  ;;  %v1498_v54 = vpop.f32.mrb[42].mxu1 }
 0x148   :  { %v1144_v55 = vadd.f32 %v1143_v20, %v1142_v28  ;;  %v1043_v56 = vadd.f32 %v1042_v51, %v1041_v41  ;;  %v1331_v8 = vpack.c.bf16 %v2001_v42, %v2001_v42  ;;  %v1417_v57 = vpop.f32.mrb[43].mxu0  ;;  %v816_v58 = vpop.f32.mrb[43].mxu1  ;;  %v1415_v59 = vadd.f32 %v1414_v43, %v1413_v39 }
 0x149   :  { %992 = vst.msk [vmem:[%s2155_s3 + $0x4c] sm:$0xf] %vm972_vm1, %v1324_v46  ;;  %v1145_v47 = vsel %vm473_vm0, %v1095_v52, 0.0  ;;  %v2022_v60 = vadd.f32 %v813_v34, %v653_v45  ;;  %v2028_v62 = vadd.f32 %v1498_v54, %v664_v13  ;;  %v1418_v25 = vadd.f32 %v1417_v57, %v1416_v53 }
 0x14a   :  { %v1146_v61 = vadd.f32 %v1145_v47, %v1144_v55  ;;  %999 = vst.msk [vmem:[%s2155_s3 + $0x68] sm:$0xf] %vm972_vm1, %v1331_v8  ;;  %v2030_v63 = vadd.f32 %v816_v58, %v656_v48  ;;  %v637_v0 = vadd.f32 %v1415_v59, %v1864_v50 }
 0x14b   :  { %v1329_v1 = vpack.c.bf16 %v2022_v60, %v2022_v60  ;;  %v1332_v2 = vpack.c.bf16 %v2028_v62, %v2028_v62  ;;  %v640_v7 = vadd.f32 %v1418_v25, %v1864_v50  ;;  %v1052_v47 = vsel %vm473_vm0, %v2022_v60, 0.0 }
 0x14c   :  { %v798_v4 = vadd.f32 %v797_v10, %v637_v0  ;;  %v1330_v6 = vpack.c.bf16 %v2030_v63, %v2030_v63  ;;  %v1101_v59 = vmul.f32 %v2030_v63, %v2030_v63 }
 0x14d   :  { %997 = vst.msk [vmem:[%s2155_s3 + $0x60] sm:$0xf] %vm972_vm1, %v1329_v1  ;;  %v1419_v9 = vpop.f32.mrb[44].mxu0  ;;  %v1501_v11 = vpop.f32.mrb[44].mxu1  ;;  %1000 = vst.msk [vmem:[%s2155_s3 + $0x6c] sm:$0xf] %vm972_vm1, %v1332_v2  ;;  %v801_v18 = vadd.f32 %v800_v22, %v640_v7  ;;  %v1102_v1 = vmul.f32 %v2001_v42, %v2001_v42 }
 0x14e   :  { %v2050_v14 = vadd.f32 %v1501_v11, %v677_v3  ;;  %v1420_v44 = vpop.f32.mrb[45].mxu0  ;;  %v829_v10 = vpop.f32.mrb[45].mxu1  ;;  %v1325_v15 = vpack.c.bf16 %v798_v4, %v798_v4  ;;  %v1044_v16 = vsel %vm473_vm0, %v798_v4, 0.0  ;;  %v1096_v17 = vmul.f32 %v798_v4, %v798_v4  ;;  %998 = vst.msk [vmem:[%s2155_s3 + $0x64] sm:$0xf] %vm972_vm1, %v1330_v6 }
 0x14f   :  { %v1422_v19 = vpop.f32.mrb[46].mxu0  ;;  %v1502_v21 = vpop.f32.mrb[46].mxu1  ;;  %v1045_v23 = vadd.f32 %v1044_v16, %v1043_v56  ;;  %v1326_v30 = vpack.c.bf16 %v801_v18, %v801_v18  ;;  %v1046_v31 = vsel %vm473_vm0, %v801_v18, 0.0  ;;  %v1097_v33 = vmul.f32 %v801_v18, %v801_v18 }
 0x150   :  { %v1335_v24 = vpack.c.bf16 %v2050_v14, %v2050_v14  ;;  %v1423_v28 = vpop.f32.mrb[47].mxu0  ;;  %v832_v29 = vpop.f32.mrb[47].mxu1  ;;  %993 = vst.msk [vmem:[%s2155_s3 + $0x50] sm:$0xf] %vm972_vm1, %v1325_v15  ;;  %v1147_v22 = vsel %vm473_vm0, %v1096_v17, 0.0  ;;  %v1421_v32 = vadd.f32 %v1420_v44, %v1419_v9  ;;  %v830_v39 = vadd.f32 %v829_v10, %v669_v26 }
 0x151   :  { %v1148_v35 = vadd.f32 %v1147_v22, %v1146_v61  ;;  %v1047_v36 = vadd.f32 %v1046_v31, %v1045_v23  ;;  %994 = vst.msk [vmem:[%s2155_s3 + $0x54] sm:$0xf] %vm972_vm1, %v1326_v30  ;;  %v1149_v38 = vsel %vm473_vm0, %v1097_v33, 0.0  ;;  %v2080_v40 = vadd.f32 %v1502_v21, %v680_v27 }
 0x152   :  { %1003 = vst.msk [vmem:[%s2155_s3 + $0x78] sm:$0xf] %vm972_vm1, %v1335_v24  ;;  %v1424_v41 = vadd.f32 %v1423_v28, %v1422_v19  ;;  %v645_v45 = vadd.f32 %v1421_v32, %v1864_v50  ;;  %v833_v34 = vadd.f32 %v832_v29, %v672_v49  ;;  %v1333_v48 = vpack.c.bf16 %v830_v39, %v830_v39 }
 0x153   :  { %v1150_v43 = vadd.f32 %v1149_v38, %v1148_v35  ;;  %v1336_v20 = vpack.c.bf16 %v2080_v40, %v2080_v40  ;;  %v1056_v7 = vsel %vm473_vm0, %v2001_v42, 0.0  ;;  %v1103_v6 = vmul.f32 %v2028_v62, %v2028_v62 }
 0x154   :  { %v806_v37 = vadd.f32 %v1981_v5, %v645_v45  ;;  %v648_v46 = vadd.f32 %v1424_v41, %v1864_v50  ;;  %1001 = vst.msk [vmem:[%s2155_s3 + $0x70] sm:$0xf] %vm972_vm1, %v1333_v48  ;;  %v1334_v51 = vpack.c.bf16 %v833_v34, %v833_v34  ;;  %v1100_v50 = vmul.f32 %v2022_v60, %v2022_v60 }
 0x155   :  { %1004 = vst.msk [vmem:[%s2155_s3 + $0x7c] sm:$0xf] %vm972_vm1, %v1336_v20  ;;  %v1054_v60 = vsel %vm473_vm0, %v2030_v63, 0.0  ;;  %v1157_v9 = vsel %vm473_vm0, %v1101_v59, 0.0  ;;  %v1159_v10 = vsel %vm473_vm0, %v1102_v1, 0.0  ;;  %v1058_v15 = vsel %vm473_vm0, %v2028_v62, 0.0 }
 0x156   :  { %v1327_v52 = vpack.c.bf16 %v806_v37, %v806_v37  ;;  %v1048_v53 = vsel %vm473_vm0, %v806_v37, 0.0  ;;  %v1098_v54 = vmul.f32 %v806_v37, %v806_v37  ;;  %v809_v5 = vadd.f32 %v1988_v12, %v648_v46  ;;  %1002 = vst.msk [vmem:[%s2155_s3 + $0x74] sm:$0xf] %vm972_vm1, %v1334_v51 }
 0x157   :  { %v1049_v55 = vadd.f32 %v1048_v53, %v1047_v36  ;;  %v1155_v2 = vsel %vm473_vm0, %v1100_v50, 0.0  ;;  %v1104_v16 = vmul.f32 %v830_v39, %v830_v39  ;;  %v1161_v18 = vsel %vm473_vm0, %v1103_v6, 0.0 }
 0x158   :  { %995 = vst.msk [vmem:[%s2155_s3 + $0x58] sm:$0xf] %vm972_vm1, %v1327_v52  ;;  %v1151_v56 = vsel %vm473_vm0, %v1098_v54, 0.0  ;;  %v1328_v13 = vpack.c.bf16 %v809_v5, %v809_v5  ;;  %v1050_v57 = vsel %vm473_vm0, %v809_v5, 0.0  ;;  %v1099_v12 = vmul.f32 %v809_v5, %v809_v5 }
 0x159   :  { %v1152_v8 = vadd.f32 %v1151_v56, %v1150_v43  ;;  %v1051_v58 = vadd.f32 %v1050_v57, %v1049_v55  ;;  %v1060_v19 = vsel %vm473_vm0, %v830_v39, 0.0  ;;  %v1105_v42 = vmul.f32 %v833_v34, %v833_v34 }
 0x15a   :  { %996 = vst.msk [vmem:[%s2155_s3 + $0x5c] sm:$0xf] %vm972_vm1, %v1328_v13  ;;  %v1153_v61 = vsel %vm473_vm0, %v1099_v12, 0.0  ;;  %v1106_v24 = vmul.f32 %v2050_v14, %v2050_v14  ;;  %v1163_v26 = vsel %vm473_vm0, %v1104_v16, 0.0  ;;  %v1062_v27 = vsel %vm473_vm0, %v833_v34, 0.0 }
 0x15b   :  { %v1053_v25 = vadd.f32 %v1052_v47, %v1051_v58  ;;  %v1154_v0 = vadd.f32 %v1153_v61, %v1152_v8  ;;  %v1064_v62 = vsel %vm473_vm0, %v2050_v14, 0.0  ;;  %v1107_v22 = vmul.f32 %v2080_v40, %v2080_v40 }
 0x15c   :  { %v1165_v30 = vsel %vm473_vm0, %v1105_v42, 0.0  ;;  %v1167_v35 = vsel %vm473_vm0, %v1106_v24, 0.0  ;;  %v1066_v36 = vsel %vm473_vm0, %v2080_v40, 0.0 }
 0x15d   :  { %v1156_v3 = vadd.f32 %v1155_v2, %v1154_v0  ;;  %v1055_v4 = vadd.f32 %v1054_v60, %v1053_v25  ;;  %v1169_v38 = vsel %vm473_vm0, %v1107_v22, 0.0 }
 0x15f   :  { %v1057_v11 = vadd.f32 %v1056_v7, %v1055_v4  ;;  %v1158_v44 = vadd.f32 %v1157_v9, %v1156_v3 }
 0x161   :  { %v1059_v17 = vadd.f32 %v1058_v15, %v1057_v11  ;;  %v1160_v63 = vadd.f32 %v1159_v10, %v1158_v44 }
 0x163   :  { %v1061_v21 = vadd.f32 %v1060_v19, %v1059_v17  ;;  %v1162_v23 = vadd.f32 %v1161_v18, %v1160_v63 }
 0x165   :  { %v1063_v28 = vadd.f32 %v1062_v27, %v1061_v21  ;;  %v1164_v29 = vadd.f32 %v1163_v26, %v1162_v23 }
 0x167   :  { %v1065_v31 = vadd.f32 %v1064_v62, %v1063_v28  ;;  %v1166_v33 = vadd.f32 %v1165_v30, %v1164_v29 }
 0x169   :  { %v1067_v32 = vadd.f32 %v1066_v36, %v1065_v31  ;;  %v1168_v49 = vadd.f32 %v1167_v35, %v1166_v33 }
 0x16b   :  { %v1068_v39 = vrot.slane %v1067_v32, 4  ;;  %v1170_v41 = vadd.f32 %v1169_v38, %v1168_v49 }
 0x16d   :  { %v1069_v43 = vadd.f32 %v1068_v39, %v1067_v32  ;;  %v1171_v14 = vrot.slane %v1170_v41, 4 }
 0x16f   :  { %v1070_v45 = vrot.slane %v1069_v43, 2  ;;  %v1172_v34 = vadd.f32 %v1171_v14, %v1170_v41 }
 0x171   :  { %v1071_v48 = vadd.f32 %v1070_v45, %v1069_v43  ;;  %v1173_v20 = vrot.slane %v1172_v34, 2 }
 0x173   :  { %v1072_v37 = vrot.slane %v1071_v48, 1  ;;  %v1174_v46 = vadd.f32 %v1173_v20, %v1172_v34 }
 0x175   :  { %v1073_v51 = vadd.f32 %v1072_v37, %v1071_v48  ;;  %v1175_v52 = vrot.slane %v1174_v46, 1 }
 0x177   :  { %1075 = vst.msk [vmem:[%s2156_s4] sm:$0x1] %vm1074_vm2, %v1073_v51  ;;  %v1176_v40 = vadd.f32 %v1175_v52, %v1174_v46 }
 0x179   :  { %1177 = vst.msk [vmem:[%s2157_s5] sm:$0x1] %vm1074_vm2, %v1176_v40 }

// kernel: _lambda_.19
= control target key start
LH: loop header
LB: loop body
LE: loop exit
PB: predicated region body
PF: predicated region fallthrough
CT: control target
= control target key end

     0   :  { %vm473_vm0 = vcmask 261120   ;;  %vm972_vm1 = vcmask 519168   ;;  %vm1005_vm2 = vcmask 523264   ;;  %vm1075_vm3 = vcmask 516096   ;;  %s2153_s1 = inlined_call_operand.vmem [shape: bf16[288,64], index: 1, kind: input, shape index: {}]   ;;  %s2154_s0 = inlined_call_operand.vmem [shape: bf16[256,288], index: 0, kind: input, shape index: {}]   ;;  %s2155_s2 = inlined_call_operand.vmem [shape: f32[1,64], index: 2, kind: input, shape index: {}]   ;;  %s2156_s3 = inlined_call_operand.vmem [shape: bf16[256,64], index: 3, kind: output, shape index: {0}]   ;;  %s2157_s4 = inlined_call_operand.vmem [shape: f32[1,1,64], index: 4, kind: output, shape index: {1}]   ;;  %s2158_s5 = inlined_call_operand.vmem [shape: f32[1,1,64], index: 5, kind: output, shape index: {2}]  }
   0x1   :  { %v1520_v0 = vld [vmem:[%s2153_s1 + $0x40] sm:$0xff]   ;;  %v1522_v2 = vld [vmem:[%s2153_s1 + $0x48] sm:$0xff]   ;;  %v1524_v4 = vld [vmem:[%s2153_s1 + $0x50] sm:$0xff]  }
   0x2   :  { %v1521_v1 = vld [vmem:[%s2153_s1] sm:$0xff]   ;;  %1338 = vmatprep.subr.bf16.mxu0 %v1520_v0  ;;  %1504 = vmatprep.subr.bf16.mxu1 %v1520_v0  ;;  %v1523_v3 = vld [vmem:[%s2153_s1 + $0x8] sm:$0xff]   ;;  %v1525_v5 = vld [vmem:[%s2153_s1 + $0x10] sm:$0xff]  }
   0x3   :  { %1339 = vmatpush3.bf16.msra.mxu0 %v1521_v1  ;;  %1512 = vmatpush3.bf16.msra.mxu1 %v1521_v1  ;;  %v1526_v6 = vld [vmem:[%s2153_s1 + $0x58] sm:$0xff]   ;;  %v1528_v8 = vld [vmem:[%s2153_s1 + $0x60] sm:$0xff]   ;;  %v1530_v10 = vld [vmem:[%s2153_s1 + $0x68] sm:$0xff]  }
   0x4   :  { %1340 = vmatprep.subr.bf16.mxu0 %v1522_v2  ;;  %1505 = vmatprep.subr.bf16.mxu1 %v1522_v2  ;;  %v1527_v7 = vld [vmem:[%s2153_s1 + $0x18] sm:$0xff]   ;;  %v1529_v9 = vld [vmem:[%s2153_s1 + $0x20] sm:$0xff]   ;;  %v1531_v13 = vld [vmem:[%s2153_s1 + $0x28] sm:$0xff]  }
   0x5   :  { %v1538_v11 = vld [vmem:[%s2154_s0 + $0x4] ss:$12 sps:$4 sm:$0xff]   ;;  %v1534_v16 = vld [vmem:[%s2153_s1 + $0x78] sm:$0xff]   ;;  %v1536_v19 = vld [vmem:[%s2154_s0] ss:$12 sps:$4 sm:$0xff]  }
   0x6   :  { %v1541_v12 = vld [vmem:[%s2154_s0 + $0x124] ss:$12 sps:$4 sm:$0xff]   ;;  %554 = vmatprep.mubr.bf16.mxu0 %v1538_v11  ;;  %v1535_v17 = vld [vmem:[%s2153_s1 + $0x38] sm:$0xff]   ;;  %v1539_v20 = vld [vmem:[%s2154_s0 + $0x120] ss:$12 sps:$4 sm:$0xff]  }
   0x7   :  { %1341 = vmatpush3.bf16.msra.mxu0 %v1523_v3  ;;  %1513 = vmatpush3.bf16.msra.mxu1 %v1523_v3  ;;  %v1532_v14 = vld [vmem:[%s2153_s1 + $0x70] sm:$0xff]   ;;  %v1552_v18 = vld [vmem:[%s2153_s1 + $0x80] sm:$0xff]   ;;  %v1542_v21 = vld [vmem:[%s2154_s0 + $0x1c] ss:$12 sps:$4 sm:$0xff]  }
   0x8   :  { %1342 = vmatprep.subr.bf16.mxu0 %v1524_v4  ;;  %1506 = vmatprep.subr.bf16.mxu1 %v1524_v4  ;;  %v1533_v15 = vld [vmem:[%s2153_s1 + $0x30] sm:$0xff]   ;;  %v1544_v22 = vld [vmem:[%s2154_s0 + $0x13c] ss:$12 sps:$4 sm:$0xff]   ;;  %v1546_v24 = vld [vmem:[%s2154_s0 + $0x18] ss:$12 sps:$4 sm:$0xff]  }
   0x9   :  { %650 = vmatprep.mubr.bf16.mxu1 %v1541_v12  ;;  %v1561_v23 = vld [vmem:[%s2153_s1 + $0x88] sm:$0xff]   ;;  %v1547_v25 = vld [vmem:[%s2154_s0 + $0x138] ss:$12 sps:$4 sm:$0xff]   ;;  %v1548_v26 = vld [vmem:[%s2154_s0 + $0x34] ss:$12 sps:$4 sm:$0xff]  }
   0xa   :  { %v1550_v27 = vld [vmem:[%s2154_s0 + $0x154] ss:$12 sps:$4 sm:$0xff]   ;;  %v1553_v28 = vld [vmem:[%s2154_s0 + $0x30] ss:$12 sps:$4 sm:$0xff]   ;;  %v1555_v30 = vld [vmem:[%s2154_s0 + $0x4c] ss:$12 sps:$4 sm:$0xff]  }
   0xb   :  { %1343 = vmatpush3.bf16.msra.mxu0 %v1525_v5  ;;  %1514 = vmatpush3.bf16.msra.mxu1 %v1525_v5  ;;  %v1554_v29 = vld [vmem:[%s2154_s0 + $0x150] ss:$12 sps:$4 sm:$0xff]   ;;  %v1557_v31 = vld [vmem:[%s2154_s0 + $0x16c] ss:$12 sps:$4 sm:$0xff]   ;;  %v1559_v32 = vld [vmem:[%s2154_s0 + $0x48] ss:$12 sps:$4 sm:$0xff]  }
   0xc   :  { %1344 = vmatprep.subr.bf16.mxu0 %v1526_v6  ;;  %1507 = vmatprep.subr.bf16.mxu1 %v1526_v6  ;;  %v1560_v33 = vld [vmem:[%s2154_s0 + $0x168] ss:$12 sps:$4 sm:$0xff]   ;;  %v1562_v34 = vld [vmem:[%s2154_s0 + $0x64] ss:$12 sps:$4 sm:$0xff]   ;;  %v1565_v36 = vld [vmem:[%s2154_s0 + $0x60] ss:$12 sps:$4 sm:$0xff]  }
   0xd   :  { %v1564_v35 = vld [vmem:[%s2154_s0 + $0x8] ss:$12 sps:$4 sm:$0xff]   ;;  %v1566_v37 = vld [vmem:[%s2154_s0 + $0x20] ss:$12 sps:$4 sm:$0xff]   ;;  %v1569_v39 = vld [vmem:[%s2154_s0 + $0x38] ss:$12 sps:$4 sm:$0xff]  }
   0xe   :  { %v1567_v38 = vld [vmem:[%s2154_s0 + $0x7c] ss:$12 sps:$4 sm:$0xff]   ;;  %v1570_v40 = vld [vmem:[%s2154_s0 + $0x78] ss:$12 sps:$4 sm:$0xff]   ;;  %v1572_v42 = vld [vmem:[%s2154_s0 + $0x94] ss:$12 sps:$4 sm:$0xff]  }
   0xf   :  { %1345 = vmatpush3.bf16.msra.mxu0 %v1527_v7  ;;  %1515 = vmatpush3.bf16.msra.mxu1 %v1527_v7  ;;  %v1571_v41 = vld [vmem:[%s2154_s0 + $0x50] ss:$12 sps:$4 sm:$0xff]   ;;  %v1574_v43 = vld [vmem:[%s2154_s0 + $0x68] ss:$12 sps:$4 sm:$0xff]   ;;  %v1576_v45 = vld [vmem:[%s2154_s0 + $0x80] ss:$12 sps:$4 sm:$0xff]  }
  0x10   :  { %1346 = vmatprep.subr.bf16.mxu0 %v1528_v8  ;;  %1508 = vmatprep.subr.bf16.mxu1 %v1528_v8  ;;  %v1575_v44 = vld [vmem:[%s2154_s0 + $0x90] ss:$12 sps:$4 sm:$0xff]   ;;  %v1577_v46 = vld [vmem:[%s2154_s0 + $0xac] ss:$12 sps:$4 sm:$0xff]   ;;  %v1580_v48 = vld [vmem:[%s2154_s0 + $0xa8] ss:$12 sps:$4 sm:$0xff]  }
  0x11   :  { %v1579_v47 = vld [vmem:[%s2154_s0 + $0x98] ss:$12 sps:$4 sm:$0xff]   ;;  %v1581_v49 = vld [vmem:[%s2154_s0 + $0xb0] ss:$12 sps:$4 sm:$0xff]   ;;  %v1584_v51 = vld [vmem:[%s2154_s0 + $0xc8] ss:$12 sps:$4 sm:$0xff]  }
  0x12   :  { %v1582_v50 = vld [vmem:[%s2154_s0 + $0xc4] ss:$12 sps:$4 sm:$0xff]   ;;  %v1585_v52 = vld [vmem:[%s2154_s0 + $0xc0] ss:$12 sps:$4 sm:$0xff]   ;;  %v1587_v54 = vld [vmem:[%s2154_s0 + $0xdc] ss:$12 sps:$4 sm:$0xff]  }
  0x13   :  { %1347 = vmatpush3.bf16.msra.mxu0 %v1529_v9  ;;  %1516 = vmatpush3.bf16.msra.mxu1 %v1529_v9  ;;  %v1586_v53 = vld [vmem:[%s2154_s0 + $0xe0] ss:$12 sps:$4 sm:$0xff]   ;;  %v1589_v55 = vld [vmem:[%s2154_s0 + $0xf8] ss:$12 sps:$4 sm:$0xff]   ;;  %v1591_v57 = vld [vmem:[%s2154_s0 + $0x110] ss:$12 sps:$4 sm:$0xff]  }
  0x14   :  { %1348 = vmatprep.subr.bf16.mxu0 %v1530_v10  ;;  %1509 = vmatprep.subr.bf16.mxu1 %v1530_v10  ;;  %v1590_v56 = vld [vmem:[%s2154_s0 + $0xd8] ss:$12 sps:$4 sm:$0xff]   ;;  %v1592_v58 = vld [vmem:[%s2154_s0 + $0xf4] ss:$12 sps:$4 sm:$0xff]   ;;  %v1595_v60 = vld [vmem:[%s2154_s0 + $0xf0] ss:$12 sps:$4 sm:$0xff]  }
  0x15   :  { %v1594_v59 = vld [vmem:[%s2154_s0 + $0x128] ss:$12 sps:$4 sm:$0xff]   ;;  %v1596_v61 = vld [vmem:[%s2154_s0 + $0x140] ss:$12 sps:$4 sm:$0xff]   ;;  %v1599_v63 = vld [vmem:[%s2154_s0 + $0x158] ss:$12 sps:$4 sm:$0xff]  }
  0x16   :  { %v1597_v62 = vld [vmem:[%s2154_s0 + $0x10c] ss:$12 sps:$4 sm:$0xff]   ;;  %v1600_v0 = vld [vmem:[%s2154_s0 + $0x108] ss:$12 sps:$4 sm:$0xff]   ;;  %v1601_v1 = vld [vmem:[%s2154_s0 + $0x170] ss:$12 sps:$4 sm:$0xff]  }
  0x17   :  { %1349 = vmatpush3.bf16.msra.mxu0 %v1531_v13  ;;  %1517 = vmatpush3.bf16.msra.mxu1 %v1531_v13 }
  0x18   :  { %1350 = vmatprep.subr.bf16.mxu0 %v1532_v14  ;;  %1510 = vmatprep.subr.bf16.mxu1 %v1532_v14 }
  0x1b   :  { %1351 = vmatpush3.bf16.msra.mxu0 %v1533_v15  ;;  %1518 = vmatpush3.bf16.msra.mxu1 %v1533_v15 }
  0x1c   :  { %1352 = vmatprep.subr.bf16.mxu0 %v1534_v16  ;;  %1511 = vmatprep.subr.bf16.mxu1 %v1534_v16 }
  0x1f   :  { %1353 = vmatpush3.bf16.msra.mxu0 %v1535_v17  ;;  %1519 = vmatpush3.bf16.msra.mxu1 %v1535_v17 }
  0x20   :  { %1468 = vmatprep.subr.bf16.mxu1 %v1552_v18 }
  0x22   :  { %555 = vmatmul.mubr.bf16.vlgmr.msra.gmra.mrb[0].mxu0 %v1536_v19  ;;  %651 = vmatmul.mubr.bf16.vlgmr.msra.gmra.mrb[0].mxu1 %v1539_v20 }
  0x23   :  { %562 = vmatprep.mubr.bf16.mxu0 %v1542_v21  ;;  %658 = vmatprep.mubr.bf16.mxu1 %v1544_v22 }
  0x24   :  { %1469 = vmatpush3.bf16.msra.mxu1 %v1552_v18 }
  0x25   :  { %1470 = vmatprep.subr.bf16.mxu1 %v1561_v23 }
  0x28   :  { %1471 = vmatpush3.bf16.msra.mxu1 %v1561_v23 }
  0x2a   :  { %563 = vmatmul.mubr.bf16.gmra.mrb[4].mxu0 %v1546_v24  ;;  %659 = vmatmul.mubr.bf16.gmra.mrb[4].mxu1 %v1547_v25 }
  0x2b   :  { %570 = vmatprep.mubr.bf16.mxu0 %v1548_v26  ;;  %666 = vmatprep.mubr.bf16.mxu1 %v1550_v27 }
  0x32   :  { %571 = vmatmul.mubr.bf16.gmra.mrb[8].mxu0 %v1553_v28  ;;  %667 = vmatmul.mubr.bf16.gmra.mrb[8].mxu1 %v1554_v29 }
  0x33   :  { %578 = vmatprep.mubr.bf16.mxu0 %v1555_v30  ;;  %674 = vmatprep.mubr.bf16.mxu1 %v1557_v31 }
  0x3a   :  { %579 = vmatmul.mubr.bf16.gmra.mrb[12].mxu0 %v1559_v32  ;;  %675 = vmatmul.mubr.bf16.gmra.mrb[12].mxu1 %v1560_v33 }
  0x3b   :  { %586 = vmatprep.mubr.bf16.mxu0 %v1562_v34  ;;  %1472 = vmatprep.mubr.msk.bf16.mxu1 %vm473_vm0, %v1564_v35 }
  0x42   :  { %587 = vmatmul.mubr.bf16.gmra.mrb[16].mxu0 %v1565_v36  ;;  %1473 = vmatmul.mubr.msk.bf16.vlgmr.msra.gmra.mrb[16].mxu1 %vm473_vm0, %v1566_v37 }
  0x43   :  { %594 = vmatprep.mubr.bf16.mxu0 %v1567_v38  ;;  %1476 = vmatprep.mubr.msk.bf16.mxu1 %vm473_vm0, %v1569_v39 }
  0x4a   :  { %595 = vmatmul.mubr.bf16.gmra.mrb[20].mxu0 %v1570_v40  ;;  %1477 = vmatmul.mubr.msk.bf16.gmra.mrb[20].mxu1 %vm473_vm0, %v1571_v41 }
  0x4b   :  { %602 = vmatprep.mubr.bf16.mxu0 %v1572_v42  ;;  %1480 = vmatprep.mubr.msk.bf16.mxu1 %vm473_vm0, %v1574_v43 }
  0x52   :  { %603 = vmatmul.mubr.bf16.gmra.mrb[24].mxu0 %v1575_v44  ;;  %1481 = vmatmul.mubr.msk.bf16.gmra.mrb[24].mxu1 %vm473_vm0, %v1576_v45 }
  0x53   :  { %610 = vmatprep.mubr.bf16.mxu0 %v1577_v46  ;;  %1484 = vmatprep.mubr.msk.bf16.mxu1 %vm473_vm0, %v1579_v47 }
  0x5a   :  { %611 = vmatmul.mubr.bf16.gmra.mrb[28].mxu0 %v1580_v48  ;;  %1485 = vmatmul.mubr.msk.bf16.gmra.mrb[28].mxu1 %vm473_vm0, %v1581_v49 }
  0x5b   :  { %618 = vmatprep.mubr.bf16.mxu0 %v1582_v50  ;;  %1488 = vmatprep.mubr.msk.bf16.mxu1 %vm473_vm0, %v1584_v51  ;;  %v1865_v50 = vld [vmem:[%s2155_s2] ss:$0 sm:$0xff] }
  0x62   :  { %619 = vmatmul.mubr.bf16.gmra.mrb[32].mxu0 %v1585_v52  ;;  %1489 = vmatmul.mubr.msk.bf16.gmra.mrb[32].mxu1 %vm473_vm0, %v1586_v53 }
  0x63   :  { %626 = vmatprep.mubr.bf16.mxu0 %v1587_v54  ;;  %1492 = vmatprep.mubr.msk.bf16.mxu1 %vm473_vm0, %v1589_v55 }
  0x6a   :  { %627 = vmatmul.mubr.bf16.gmra.mrb[36].mxu0 %v1590_v56  ;;  %1493 = vmatmul.mubr.msk.bf16.gmra.mrb[36].mxu1 %vm473_vm0, %v1591_v57 }
  0x6b   :  { %634 = vmatprep.mubr.bf16.mxu0 %v1592_v58  ;;  %1496 = vmatprep.mubr.msk.bf16.mxu1 %vm473_vm0, %v1594_v59 }
  0x72   :  { %635 = vmatmul.mubr.bf16.gmra.mrb[40].mxu0 %v1595_v60  ;;  %1497 = vmatmul.mubr.msk.bf16.gmra.mrb[40].mxu1 %vm473_vm0, %v1596_v61 }
  0x73   :  { %642 = vmatprep.mubr.bf16.mxu0 %v1597_v62  ;;  %1500 = vmatprep.mubr.msk.bf16.mxu1 %vm473_vm0, %v1599_v63 }
  0x7a   :  { %643 = vmatmul.mubr.bf16.gmra.mrb[44].mxu0 %v1600_v0  ;;  %1501 = vmatmul.mubr.msk.bf16.gmra.mrb[44].mxu1 %vm473_vm0, %v1601_v1 }
  0xf5   :  { %v1354_v2 = vpop.f32.mrb[0].mxu0  ;;  %v1426_v3 = vpop.f32.mrb[0].mxu1 }
  0xf6   :  { %v1355_v4 = vpop.f32.mrb[1].mxu0  ;;  %v1427_v5 = vpop.f32.mrb[1].mxu1 }
  0xf7   :  { %v1356_v6 = vadd.f32 %v1355_v4, %v1354_v2  ;;  %v1357_v7 = vpop.f32.mrb[2].mxu0  ;;  %v1846_v8 = vadd.f32 %v1427_v5, %v1426_v3  ;;  %v1429_v9 = vpop.f32.mrb[2].mxu1 }
  0xf8   :  { %v1358_v10 = vpop.f32.mrb[3].mxu0  ;;  %v1430_v11 = vpop.f32.mrb[3].mxu1 }
  0xf9   :  { %v1359_v12 = vadd.f32 %v1358_v10, %v1357_v7  ;;  %v1848_v13 = vadd.f32 %v1430_v11, %v1429_v9  ;;  %v557_v54 = vadd.f32 %v1356_v6, %v1865_v50 }
  0xfb   :  { %v560_v6 = vadd.f32 %v1359_v12, %v1865_v50 }
  0xfd   :  { %v1360_v14 = vpop.f32.mrb[4].mxu0  ;;  %v1432_v15 = vpop.f32.mrb[4].mxu1 }
  0xfe   :  { %v1361_v16 = vpop.f32.mrb[5].mxu0  ;;  %v1433_v17 = vpop.f32.mrb[5].mxu1 }
  0xff   :  { %v1362_v18 = vadd.f32 %v1361_v16, %v1360_v14  ;;  %v1363_v19 = vpop.f32.mrb[6].mxu0  ;;  %v1850_v20 = vadd.f32 %v1433_v17, %v1432_v15  ;;  %v1435_v21 = vpop.f32.mrb[6].mxu1 }
 0x100   :  { %v1364_v22 = vpop.f32.mrb[7].mxu0  ;;  %v1436_v23 = vpop.f32.mrb[7].mxu1 }
 0x101   :  { %v1365_v24 = vadd.f32 %v1364_v22, %v1363_v19  ;;  %v1852_v25 = vadd.f32 %v1436_v23, %v1435_v21  ;;  %v565_v51 = vadd.f32 %v1362_v18, %v1865_v50 }
 0x103   :  { %v568_v58 = vadd.f32 %v1365_v24, %v1865_v50 }
 0x105   :  { %v1366_v26 = vpop.f32.mrb[8].mxu0  ;;  %v1438_v27 = vpop.f32.mrb[8].mxu1 }
 0x106   :  { %v1367_v28 = vpop.f32.mrb[9].mxu0  ;;  %v1439_v29 = vpop.f32.mrb[9].mxu1 }
 0x107   :  { %v1368_v30 = vadd.f32 %v1367_v28, %v1366_v26  ;;  %v1369_v31 = vpop.f32.mrb[10].mxu0  ;;  %v1854_v32 = vadd.f32 %v1439_v29, %v1438_v27  ;;  %v1441_v33 = vpop.f32.mrb[10].mxu1 }
 0x108   :  { %v1370_v34 = vpop.f32.mrb[11].mxu0  ;;  %v1442_v35 = vpop.f32.mrb[11].mxu1 }
 0x109   :  { %v1371_v36 = vadd.f32 %v1370_v34, %v1369_v31  ;;  %v1856_v37 = vadd.f32 %v1442_v35, %v1441_v33  ;;  %v573_v14 = vadd.f32 %v1368_v30, %v1865_v50 }
 0x10b   :  { %v576_v15 = vadd.f32 %v1371_v36, %v1865_v50 }
 0x10d   :  { %v1372_v38 = vpop.f32.mrb[12].mxu0  ;;  %v1444_v39 = vpop.f32.mrb[12].mxu1 }
 0x10e   :  { %v1373_v40 = vpop.f32.mrb[13].mxu0  ;;  %v1445_v41 = vpop.f32.mrb[13].mxu1 }
 0x10f   :  { %v1374_v42 = vadd.f32 %v1373_v40, %v1372_v38  ;;  %v1375_v43 = vpop.f32.mrb[14].mxu0  ;;  %v1858_v44 = vadd.f32 %v1445_v41, %v1444_v39  ;;  %v1447_v45 = vpop.f32.mrb[14].mxu1 }
 0x110   :  { %v1376_v46 = vpop.f32.mrb[15].mxu0  ;;  %v1448_v47 = vpop.f32.mrb[15].mxu1 }
 0x111   :  { %v1377_v48 = vadd.f32 %v1376_v46, %v1375_v43  ;;  %v1860_v49 = vadd.f32 %v1448_v47, %v1447_v45  ;;  %v581_v11 = vadd.f32 %v1374_v42, %v1865_v50 }
 0x113   :  { %v584_v18 = vadd.f32 %v1377_v48, %v1865_v50 }
 0x115   :  { %v1378_v52 = vpop.f32.mrb[16].mxu0  ;;  %v1474_v53 = vpop.f32.mrb[16].mxu1 }
 0x116   :  { %v726_v55 = vadd.f32 %v1474_v53, %v565_v51  ;;  %v1379_v56 = vpop.f32.mrb[17].mxu0  ;;  %v717_v57 = vpop.f32.mrb[17].mxu1 }
 0x117   :  { %v1380_v59 = vadd.f32 %v1379_v56, %v1378_v52  ;;  %v718_v60 = vadd.f32 %v717_v57, %v557_v54  ;;  %v1381_v61 = vpop.f32.mrb[18].mxu0  ;;  %v1475_v62 = vpop.f32.mrb[18].mxu1 }
 0x118   :  { %v1308_v63 = vpack.c.bf16 %v726_v55, %v726_v55  ;;  %v1079_v0 = vmul.f32 %v726_v55, %v726_v55  ;;  %v729_v1 = vadd.f32 %v1475_v62, %v568_v58  ;;  %v1382_v2 = vpop.f32.mrb[19].mxu0  ;;  %v720_v3 = vpop.f32.mrb[19].mxu1  ;;  %v1009_v12 = vsel %vm1005_vm2, %v726_v55, 0.0 }
 0x119   :  { %v1306_v4 = vpack.c.bf16 %v718_v60, %v718_v60  ;;  %v1383_v5 = vadd.f32 %v1382_v2, %v1381_v61  ;;  %v1077_v7 = vmul.f32 %v718_v60, %v718_v60  ;;  %v721_v10 = vadd.f32 %v720_v3, %v560_v6 }
 0x11a   :  { %975 = vst.msk [vmem:[%s2156_s3 + $0x8] sm:$0xf] %vm972_vm1, %v1308_v63  ;;  %v1309_v9 = vpack.c.bf16 %v729_v1, %v729_v1  ;;  %v1112_v16 = vsel %vm1005_vm2, %v1079_v0, 0.0  ;;  %v1006_v17 = vsel %vm1005_vm2, %v718_v60, 0.0  ;;  %v1011_v19 = vsel %vm1005_vm2, %v729_v1, 0.0 }
 0x11b   :  { %973 = vst.msk [vmem:[%s2156_s3] sm:$0xf] %vm972_vm1, %v1306_v4  ;;  %v1307_v21 = vpack.c.bf16 %v721_v10, %v721_v10  ;;  %v1007_v22 = vsel %vm1005_vm2, %v721_v10, 0.0  ;;  %v1078_v23 = vmul.f32 %v721_v10, %v721_v10  ;;  %v1109_v27 = vsel %vm1005_vm2, %v1077_v7, 0.0 }
 0x11c   :  { %976 = vst.msk [vmem:[%s2156_s3 + $0xc] sm:$0xf] %vm972_vm1, %v1309_v9  ;;  %v1080_v28 = vmul.f32 %v729_v1, %v729_v1  ;;  %v1008_v29 = vadd.f32 %v1007_v22, %v1006_v17  ;;  %v589_v40 = vadd.f32 %v1380_v59, %v1865_v50  ;;  %v592_v47 = vadd.f32 %v1383_v5, %v1865_v50 }
 0x11d   :  { %v1384_v24 = vpop.f32.mrb[20].mxu0  ;;  %v1478_v26 = vpop.f32.mrb[20].mxu1  ;;  %974 = vst.msk [vmem:[%s2156_s3 + $0x4] sm:$0xf] %vm972_vm1, %v1307_v21  ;;  %v1110_v34 = vsel %vm1005_vm2, %v1078_v23, 0.0 }
 0x11e   :  { %v742_v30 = vadd.f32 %v1478_v26, %v581_v11  ;;  %v1385_v31 = vpop.f32.mrb[21].mxu0  ;;  %v733_v33 = vpop.f32.mrb[21].mxu1  ;;  %v1010_v41 = vadd.f32 %v1009_v12, %v1008_v29  ;;  %v1111_v42 = vadd.f32 %v1110_v34, %v1109_v27  ;;  %v1114_v58 = vsel %vm1005_vm2, %v1080_v28, 0.0 }
 0x11f   :  { %v1386_v35 = vadd.f32 %v1385_v31, %v1384_v24  ;;  %v734_v36 = vadd.f32 %v733_v33, %v573_v14  ;;  %v1387_v38 = vpop.f32.mrb[22].mxu0  ;;  %v1479_v39 = vpop.f32.mrb[22].mxu1 }
 0x120   :  { %v1312_v43 = vpack.c.bf16 %v742_v30, %v742_v30  ;;  %v1388_v45 = vpop.f32.mrb[23].mxu0  ;;  %v736_v46 = vpop.f32.mrb[23].mxu1  ;;  %v1083_v48 = vmul.f32 %v742_v30, %v742_v30  ;;  %v1113_v54 = vadd.f32 %v1112_v16, %v1111_v42  ;;  %v1012_v55 = vadd.f32 %v1011_v19, %v1010_v41 }
 0x121   :  { %v1310_v51 = vpack.c.bf16 %v734_v36, %v734_v36  ;;  %v1013_v52 = vsel %vm1005_vm2, %v734_v36, 0.0  ;;  %v1081_v53 = vmul.f32 %v734_v36, %v734_v36  ;;  %v745_v56 = vadd.f32 %v1479_v39, %v584_v18 }
 0x122   :  { %979 = vst.msk [vmem:[%s2156_s3 + $0x18] sm:$0xf] %vm972_vm1, %v1312_v43  ;;  %v1389_v57 = vadd.f32 %v1388_v45, %v1387_v38  ;;  %v1017_v59 = vsel %vm1005_vm2, %v742_v30, 0.0  ;;  %v737_v61 = vadd.f32 %v736_v46, %v576_v15  ;;  %v1014_v62 = vadd.f32 %v1013_v52, %v1012_v55 }
 0x123   :  { %977 = vst.msk [vmem:[%s2156_s3 + $0x10] sm:$0xf] %vm972_vm1, %v1310_v51  ;;  %v1116_v60 = vsel %vm1005_vm2, %v1081_v53, 0.0  ;;  %v1115_v63 = vadd.f32 %v1114_v58, %v1113_v54  ;;  %v1313_v0 = vpack.c.bf16 %v745_v56, %v745_v56  ;;  %v597_v1 = vadd.f32 %v1386_v35, %v1865_v50 }
 0x124   :  { %v1120_v2 = vsel %vm1005_vm2, %v1083_v48, 0.0  ;;  %v1311_v3 = vpack.c.bf16 %v737_v61, %v737_v61  ;;  %v1015_v4 = vsel %vm1005_vm2, %v737_v61, 0.0  ;;  %v1082_v5 = vmul.f32 %v737_v61, %v737_v61 }
 0x125   :  { %v1390_v6 = vpop.f32.mrb[24].mxu0  ;;  %v1482_v7 = vpop.f32.mrb[24].mxu1  ;;  %v1117_v9 = vadd.f32 %v1116_v60, %v1115_v63  ;;  %980 = vst.msk [vmem:[%s2156_s3 + $0x1c] sm:$0xf] %vm972_vm1, %v1313_v0  ;;  %v1019_v10 = vsel %vm1005_vm2, %v745_v56, 0.0  ;;  %v1016_v11 = vadd.f32 %v1015_v4, %v1014_v62  ;;  %v1084_v16 = vmul.f32 %v745_v56, %v745_v56 }
 0x126   :  { %v758_v14 = vadd.f32 %v1482_v7, %v597_v1  ;;  %v1391_v15 = vpop.f32.mrb[25].mxu0  ;;  %v749_v12 = vpop.f32.mrb[25].mxu1  ;;  %978 = vst.msk [vmem:[%s2156_s3 + $0x14] sm:$0xf] %vm972_vm1, %v1311_v3  ;;  %v1118_v17 = vsel %vm1005_vm2, %v1082_v5, 0.0  ;;  %v600_v27 = vadd.f32 %v1389_v57, %v1865_v50 }
 0x127   :  { %v1392_v18 = vadd.f32 %v1391_v15, %v1390_v6  ;;  %v750_v19 = vadd.f32 %v749_v12, %v589_v40  ;;  %v1393_v21 = vpop.f32.mrb[26].mxu0  ;;  %v1483_v22 = vpop.f32.mrb[26].mxu1  ;;  %v1018_v23 = vadd.f32 %v1017_v59, %v1016_v11  ;;  %v1119_v24 = vadd.f32 %v1118_v17, %v1117_v9 }
 0x128   :  { %v1316_v26 = vpack.c.bf16 %v758_v14, %v758_v14  ;;  %v1394_v28 = vpop.f32.mrb[27].mxu0  ;;  %v752_v29 = vpop.f32.mrb[27].mxu1  ;;  %v1087_v30 = vmul.f32 %v758_v14, %v758_v14  ;;  %v761_v38 = vadd.f32 %v1483_v22, %v600_v27  ;;  %v1122_v40 = vsel %vm1005_vm2, %v1084_v16, 0.0 }
 0x129   :  { %v1314_v31 = vpack.c.bf16 %v750_v19, %v750_v19  ;;  %v1021_v33 = vsel %vm1005_vm2, %v750_v19, 0.0  ;;  %v1085_v34 = vmul.f32 %v750_v19, %v750_v19  ;;  %v1121_v35 = vadd.f32 %v1120_v2, %v1119_v24 }
 0x12a   :  { %983 = vst.msk [vmem:[%s2156_s3 + $0x28] sm:$0xf] %vm972_vm1, %v1316_v26  ;;  %v1020_v36 = vadd.f32 %v1019_v10, %v1018_v23  ;;  %v1395_v39 = vadd.f32 %v1394_v28, %v1393_v21  ;;  %v753_v42 = vadd.f32 %v752_v29, %v592_v47  ;;  %v1317_v46 = vpack.c.bf16 %v761_v38, %v761_v38 }
 0x12b   :  { %981 = vst.msk [vmem:[%s2156_s3 + $0x20] sm:$0xf] %vm972_vm1, %v1314_v31  ;;  %v1124_v41 = vsel %vm1005_vm2, %v1085_v34, 0.0  ;;  %v1123_v45 = vadd.f32 %v1122_v40, %v1121_v35  ;;  %v605_v55 = vadd.f32 %v1392_v18, %v1865_v50  ;;  %v1025_v56 = vsel %vm1005_vm2, %v758_v14, 0.0 }
 0x12c   :  { %v1022_v43 = vadd.f32 %v1021_v33, %v1020_v36  ;;  %v1315_v48 = vpack.c.bf16 %v753_v42, %v753_v42  ;;  %v1023_v51 = vsel %vm1005_vm2, %v753_v42, 0.0  ;;  %v1086_v52 = vmul.f32 %v753_v42, %v753_v42  ;;  %984 = vst.msk [vmem:[%s2156_s3 + $0x2c] sm:$0xf] %vm972_vm1, %v1317_v46 }
 0x12d   :  { %v1396_v53 = vpop.f32.mrb[28].mxu0  ;;  %v1486_v54 = vpop.f32.mrb[28].mxu1  ;;  %v1128_v57 = vsel %vm1005_vm2, %v1087_v30, 0.0  ;;  %v1125_v58 = vadd.f32 %v1124_v41, %v1123_v45  ;;  %v1088_v61 = vmul.f32 %v761_v38, %v761_v38  ;;  %v1027_v3 = vsel %vm1005_vm2, %v761_v38, 0.0 }
 0x12e   :  { %v1024_v47 = vadd.f32 %v1023_v51, %v1022_v43  ;;  %v1397_v59 = vpop.f32.mrb[29].mxu0  ;;  %v765_v60 = vpop.f32.mrb[29].mxu1  ;;  %982 = vst.msk [vmem:[%s2156_s3 + $0x24] sm:$0xf] %vm972_vm1, %v1315_v48  ;;  %v1126_v62 = vsel %vm1005_vm2, %v1086_v52, 0.0  ;;  %v608_v7 = vadd.f32 %v1395_v39, %v1865_v50 }
 0x12f   :  { %v1398_v63 = vadd.f32 %v1397_v59, %v1396_v53  ;;  %v766_v0 = vadd.f32 %v765_v60, %v605_v55  ;;  %v1399_v1 = vpop.f32.mrb[30].mxu0  ;;  %v1487_v2 = vpop.f32.mrb[30].mxu1  ;;  %v1127_v5 = vadd.f32 %v1126_v62, %v1125_v58  ;;  %v1130_v19 = vsel %vm1005_vm2, %v1088_v61, 0.0 }
 0x130   :  { %v1026_v4 = vadd.f32 %v1025_v56, %v1024_v47  ;;  %v1400_v6 = vpop.f32.mrb[31].mxu0  ;;  %v768_v9 = vpop.f32.mrb[31].mxu1 }
 0x131   :  { %v613_v10 = vadd.f32 %v1398_v63, %v1865_v50  ;;  %v1318_v11 = vpack.c.bf16 %v766_v0, %v766_v0  ;;  %v1029_v14 = vsel %vm1005_vm2, %v766_v0, 0.0  ;;  %v1089_v15 = vmul.f32 %v766_v0, %v766_v0 }
 0x132   :  { %v1129_v12 = vadd.f32 %v1128_v57, %v1127_v5  ;;  %v1028_v16 = vadd.f32 %v1027_v3, %v1026_v4  ;;  %v1401_v17 = vadd.f32 %v1400_v6, %v1399_v1  ;;  %v769_v18 = vadd.f32 %v768_v9, %v608_v7 }
 0x133   :  { %v774_v21 = vadd.f32 %v1486_v54, %v613_v10  ;;  %985 = vst.msk [vmem:[%s2156_s3 + $0x30] sm:$0xf] %vm972_vm1, %v1318_v11  ;;  %v1132_v22 = vsel %vm1005_vm2, %v1089_v15, 0.0 }
 0x134   :  { %v1030_v23 = vadd.f32 %v1029_v14, %v1028_v16  ;;  %v1131_v24 = vadd.f32 %v1130_v19, %v1129_v12  ;;  %v616_v26 = vadd.f32 %v1401_v17, %v1865_v50  ;;  %v1319_v27 = vpack.c.bf16 %v769_v18, %v769_v18 }
 0x135   :  { %v1320_v28 = vpack.c.bf16 %v774_v21, %v774_v21  ;;  %v1091_v29 = vmul.f32 %v774_v21, %v774_v21  ;;  %v1031_v30 = vsel %vm1005_vm2, %v769_v18, 0.0  ;;  %v1033_v31 = vsel %vm1005_vm2, %v774_v21, 0.0  ;;  %v1402_v33 = vpop.f32.mrb[32].mxu0  ;;  %v1490_v34 = vpop.f32.mrb[32].mxu1 }
 0x136   :  { %v1133_v35 = vadd.f32 %v1132_v22, %v1131_v24  ;;  %v777_v36 = vadd.f32 %v1487_v2, %v616_v26  ;;  %986 = vst.msk [vmem:[%s2156_s3 + $0x34] sm:$0xf] %vm972_vm1, %v1319_v27  ;;  %v1032_v38 = vadd.f32 %v1031_v30, %v1030_v23  ;;  %v1090_v39 = vmul.f32 %v769_v18, %v769_v18  ;;  %v1403_v40 = vpop.f32.mrb[33].mxu0  ;;  %v781_v41 = vpop.f32.mrb[33].mxu1 }
 0x137   :  { %987 = vst.msk [vmem:[%s2156_s3 + $0x38] sm:$0xf] %vm972_vm1, %v1320_v28  ;;  %v1136_v42 = vsel %vm1005_vm2, %v1091_v29, 0.0  ;;  %v1404_v43 = vadd.f32 %v1403_v40, %v1402_v33  ;;  %v1405_v45 = vpop.f32.mrb[34].mxu0  ;;  %v1491_v46 = vpop.f32.mrb[34].mxu1 }
 0x138   :  { %v1321_v48 = vpack.c.bf16 %v777_v36, %v777_v36  ;;  %v1092_v51 = vmul.f32 %v777_v36, %v777_v36  ;;  %v1034_v52 = vadd.f32 %v1033_v31, %v1032_v38  ;;  %v1134_v53 = vsel %vm1005_vm2, %v1090_v39, 0.0  ;;  %v1406_v54 = vpop.f32.mrb[35].mxu0  ;;  %v784_v55 = vpop.f32.mrb[35].mxu1 }
 0x139   :  { %v1135_v56 = vadd.f32 %v1134_v53, %v1133_v35  ;;  %v1407_v57 = vadd.f32 %v1406_v54, %v1405_v45  ;;  %v621_v58 = vadd.f32 %v1404_v43, %v1865_v50  ;;  %v1035_v47 = vsel %vm1005_vm2, %v777_v36, 0.0 }
 0x13a   :  { %988 = vst.msk [vmem:[%s2156_s3 + $0x3c] sm:$0xf] %vm972_vm1, %v1321_v48  ;;  %v1036_v59 = vadd.f32 %v1035_v47, %v1034_v52  ;;  %v1138_v60 = vsel %vm1005_vm2, %v1092_v51, 0.0  ;;  %v661_v31 = vadd.f32 %v1850_v20, %v1865_v50  ;;  %v653_v45 = vadd.f32 %v1846_v8, %v1865_v50 }
 0x13b   :  { %v1137_v61 = vadd.f32 %v1136_v42, %v1135_v56  ;;  %v782_v62 = vadd.f32 %v781_v41, %v621_v58  ;;  %v624_v63 = vadd.f32 %v1407_v57, %v1865_v50  ;;  %v656_v48 = vadd.f32 %v1848_v13, %v1865_v50 }
 0x13c   :  { %v664_v13 = vadd.f32 %v1852_v25, %v1865_v50 }
 0x13d   :  { %v1322_v0 = vpack.c.bf16 %v782_v62, %v782_v62  ;;  %v1037_v1 = vsel %vm1005_vm2, %v782_v62, 0.0  ;;  %v1093_v2 = vmul.f32 %v782_v62, %v782_v62  ;;  %v1139_v3 = vadd.f32 %v1138_v60, %v1137_v61  ;;  %v1408_v4 = vpop.f32.mrb[36].mxu0  ;;  %v1982_v5 = vpop.f32.mrb[36].mxu1 }
 0x13e   :  { %v1038_v6 = vadd.f32 %v1037_v1, %v1036_v59  ;;  %v785_v7 = vadd.f32 %v784_v55, %v624_v63  ;;  %v1409_v9 = vpop.f32.mrb[37].mxu0  ;;  %v797_v10 = vpop.f32.mrb[37].mxu1 }
 0x13f   :  { %989 = vst.msk [vmem:[%s2156_s3 + $0x40] sm:$0xf] %vm972_vm1, %v1322_v0  ;;  %v1140_v11 = vsel %vm1005_vm2, %v1093_v2, 0.0  ;;  %v1410_v14 = vadd.f32 %v1409_v9, %v1408_v4  ;;  %v1411_v15 = vpop.f32.mrb[38].mxu0  ;;  %v1989_v12 = vpop.f32.mrb[38].mxu1 }
 0x140   :  { %v1141_v16 = vadd.f32 %v1140_v11, %v1139_v3  ;;  %v1323_v17 = vpack.c.bf16 %v785_v7, %v785_v7  ;;  %v1039_v18 = vsel %vm1005_vm2, %v785_v7, 0.0  ;;  %v1094_v19 = vmul.f32 %v785_v7, %v785_v7  ;;  %v1412_v21 = vpop.f32.mrb[39].mxu0  ;;  %v800_v22 = vpop.f32.mrb[39].mxu1 }
 0x141   :  { %v1040_v23 = vadd.f32 %v1039_v18, %v1038_v6  ;;  %v629_v24 = vadd.f32 %v1410_v14, %v1865_v50  ;;  %v1413_v26 = vadd.f32 %v1412_v21, %v1411_v15  ;;  %v677_v3 = vadd.f32 %v1858_v44, %v1865_v50 }
 0x142   :  { %990 = vst.msk [vmem:[%s2156_s3 + $0x44] sm:$0xf] %vm972_vm1, %v1323_v17  ;;  %v1142_v27 = vsel %vm1005_vm2, %v1094_v19, 0.0 }
 0x143   :  { %v1143_v28 = vadd.f32 %v1142_v27, %v1141_v16  ;;  %v790_v29 = vadd.f32 %v1490_v34, %v629_v24  ;;  %v632_v30 = vadd.f32 %v1413_v26, %v1865_v50  ;;  %v669_v26 = vadd.f32 %v1854_v32, %v1865_v50 }
 0x144   :  { %v680_v27 = vadd.f32 %v1860_v49, %v1865_v50  ;;  %v672_v49 = vadd.f32 %v1856_v37, %v1865_v50 }
 0x145   :  { %v1324_v33 = vpack.c.bf16 %v790_v29, %v790_v29  ;;  %v1041_v35 = vsel %vm1005_vm2, %v790_v29, 0.0  ;;  %v1095_v36 = vmul.f32 %v790_v29, %v790_v29  ;;  %v793_v38 = vadd.f32 %v1491_v46, %v632_v30  ;;  %v1414_v39 = vpop.f32.mrb[40].mxu0  ;;  %v1498_v40 = vpop.f32.mrb[40].mxu1 }
 0x146   :  { %v1042_v41 = vadd.f32 %v1041_v35, %v1040_v23  ;;  %v2002_v42 = vadd.f32 %v1498_v40, %v661_v31  ;;  %v1415_v43 = vpop.f32.mrb[41].mxu0  ;;  %v813_v34 = vpop.f32.mrb[41].mxu1 }
 0x147   :  { %991 = vst.msk [vmem:[%s2156_s3 + $0x48] sm:$0xf] %vm972_vm1, %v1324_v33  ;;  %v1144_v20 = vsel %vm1005_vm2, %v1095_v36, 0.0  ;;  %v1325_v46 = vpack.c.bf16 %v793_v38, %v793_v38  ;;  %v1043_v51 = vsel %vm1005_vm2, %v793_v38, 0.0  ;;  %v1096_v52 = vmul.f32 %v793_v38, %v793_v38  ;;  %v1417_v53 = vpop.f32.mrb[42].mxu0  ;;  %v1499_v54 = vpop.f32.mrb[42].mxu1 }
 0x148   :  { %v1145_v55 = vadd.f32 %v1144_v20, %v1143_v28  ;;  %v1044_v56 = vadd.f32 %v1043_v51, %v1042_v41  ;;  %v1332_v8 = vpack.c.bf16 %v2002_v42, %v2002_v42  ;;  %v1418_v57 = vpop.f32.mrb[43].mxu0  ;;  %v816_v58 = vpop.f32.mrb[43].mxu1  ;;  %v1416_v59 = vadd.f32 %v1415_v43, %v1414_v39 }
 0x149   :  { %992 = vst.msk [vmem:[%s2156_s3 + $0x4c] sm:$0xf] %vm972_vm1, %v1325_v46  ;;  %v1146_v47 = vsel %vm1005_vm2, %v1096_v52, 0.0  ;;  %v2023_v60 = vadd.f32 %v813_v34, %v653_v45  ;;  %v2029_v62 = vadd.f32 %v1499_v54, %v664_v13  ;;  %v1419_v25 = vadd.f32 %v1418_v57, %v1417_v53 }
 0x14a   :  { %v1147_v61 = vadd.f32 %v1146_v47, %v1145_v55  ;;  %999 = vst.msk [vmem:[%s2156_s3 + $0x68] sm:$0xf] %vm972_vm1, %v1332_v8  ;;  %v2031_v63 = vadd.f32 %v816_v58, %v656_v48  ;;  %v637_v0 = vadd.f32 %v1416_v59, %v1865_v50 }
 0x14b   :  { %v1330_v1 = vpack.c.bf16 %v2023_v60, %v2023_v60  ;;  %v1333_v2 = vpack.c.bf16 %v2029_v62, %v2029_v62  ;;  %v640_v6 = vadd.f32 %v1419_v25, %v1865_v50  ;;  %v1053_v47 = vsel %vm1005_vm2, %v2023_v60, 0.0 }
 0x14c   :  { %v798_v4 = vadd.f32 %v797_v10, %v637_v0  ;;  %v1331_v7 = vpack.c.bf16 %v2031_v63, %v2031_v63  ;;  %v1102_v59 = vmul.f32 %v2031_v63, %v2031_v63 }
 0x14d   :  { %997 = vst.msk [vmem:[%s2156_s3 + $0x60] sm:$0xf] %vm972_vm1, %v1330_v1  ;;  %v1420_v9 = vpop.f32.mrb[44].mxu0  ;;  %v1502_v11 = vpop.f32.mrb[44].mxu1  ;;  %1000 = vst.msk [vmem:[%s2156_s3 + $0x6c] sm:$0xf] %vm972_vm1, %v1333_v2  ;;  %v801_v18 = vadd.f32 %v800_v22, %v640_v6  ;;  %v1103_v1 = vmul.f32 %v2002_v42, %v2002_v42 }
 0x14e   :  { %v2051_v14 = vadd.f32 %v1502_v11, %v677_v3  ;;  %v1421_v44 = vpop.f32.mrb[45].mxu0  ;;  %v829_v10 = vpop.f32.mrb[45].mxu1  ;;  %v1326_v15 = vpack.c.bf16 %v798_v4, %v798_v4  ;;  %v1045_v16 = vsel %vm1005_vm2, %v798_v4, 0.0  ;;  %v1097_v17 = vmul.f32 %v798_v4, %v798_v4  ;;  %998 = vst.msk [vmem:[%s2156_s3 + $0x64] sm:$0xf] %vm972_vm1, %v1331_v7 }
 0x14f   :  { %v1423_v19 = vpop.f32.mrb[46].mxu0  ;;  %v1503_v21 = vpop.f32.mrb[46].mxu1  ;;  %v1046_v23 = vadd.f32 %v1045_v16, %v1044_v56  ;;  %v1327_v30 = vpack.c.bf16 %v801_v18, %v801_v18  ;;  %v1047_v31 = vsel %vm1005_vm2, %v801_v18, 0.0  ;;  %v1098_v33 = vmul.f32 %v801_v18, %v801_v18 }
 0x150   :  { %v1336_v24 = vpack.c.bf16 %v2051_v14, %v2051_v14  ;;  %v1424_v28 = vpop.f32.mrb[47].mxu0  ;;  %v832_v29 = vpop.f32.mrb[47].mxu1  ;;  %993 = vst.msk [vmem:[%s2156_s3 + $0x50] sm:$0xf] %vm972_vm1, %v1326_v15  ;;  %v1148_v22 = vsel %vm1005_vm2, %v1097_v17, 0.0  ;;  %v1422_v32 = vadd.f32 %v1421_v44, %v1420_v9  ;;  %v830_v39 = vadd.f32 %v829_v10, %v669_v26 }
 0x151   :  { %v1149_v35 = vadd.f32 %v1148_v22, %v1147_v61  ;;  %v1048_v36 = vadd.f32 %v1047_v31, %v1046_v23  ;;  %994 = vst.msk [vmem:[%s2156_s3 + $0x54] sm:$0xf] %vm972_vm1, %v1327_v30  ;;  %v1150_v38 = vsel %vm1005_vm2, %v1098_v33, 0.0  ;;  %v2081_v40 = vadd.f32 %v1503_v21, %v680_v27 }
 0x152   :  { %1003 = vst.msk [vmem:[%s2156_s3 + $0x78] sm:$0xf] %vm972_vm1, %v1336_v24  ;;  %v1425_v41 = vadd.f32 %v1424_v28, %v1423_v19  ;;  %v645_v45 = vadd.f32 %v1422_v32, %v1865_v50  ;;  %v833_v34 = vadd.f32 %v832_v29, %v672_v49  ;;  %v1334_v48 = vpack.c.bf16 %v830_v39, %v830_v39 }
 0x153   :  { %v1151_v43 = vadd.f32 %v1150_v38, %v1149_v35  ;;  %v1337_v20 = vpack.c.bf16 %v2081_v40, %v2081_v40  ;;  %v1057_v6 = vsel %vm1005_vm2, %v2002_v42, 0.0  ;;  %v1104_v7 = vmul.f32 %v2029_v62, %v2029_v62 }
 0x154   :  { %v806_v37 = vadd.f32 %v1982_v5, %v645_v45  ;;  %v648_v46 = vadd.f32 %v1425_v41, %v1865_v50  ;;  %1001 = vst.msk [vmem:[%s2156_s3 + $0x70] sm:$0xf] %vm972_vm1, %v1334_v48  ;;  %v1335_v51 = vpack.c.bf16 %v833_v34, %v833_v34  ;;  %v1101_v50 = vmul.f32 %v2023_v60, %v2023_v60 }
 0x155   :  { %1004 = vst.msk [vmem:[%s2156_s3 + $0x7c] sm:$0xf] %vm972_vm1, %v1337_v20  ;;  %v1055_v60 = vsel %vm1005_vm2, %v2031_v63, 0.0  ;;  %v1158_v9 = vsel %vm1005_vm2, %v1102_v59, 0.0  ;;  %v1160_v10 = vsel %vm1005_vm2, %v1103_v1, 0.0  ;;  %v1059_v15 = vsel %vm1005_vm2, %v2029_v62, 0.0 }
 0x156   :  { %v1328_v52 = vpack.c.bf16 %v806_v37, %v806_v37  ;;  %v1049_v53 = vsel %vm1005_vm2, %v806_v37, 0.0  ;;  %v1099_v54 = vmul.f32 %v806_v37, %v806_v37  ;;  %v809_v5 = vadd.f32 %v1989_v12, %v648_v46  ;;  %1002 = vst.msk [vmem:[%s2156_s3 + $0x74] sm:$0xf] %vm972_vm1, %v1335_v51 }
 0x157   :  { %v1050_v55 = vadd.f32 %v1049_v53, %v1048_v36  ;;  %v1156_v2 = vsel %vm1005_vm2, %v1101_v50, 0.0  ;;  %v1105_v16 = vmul.f32 %v830_v39, %v830_v39  ;;  %v1162_v18 = vsel %vm1005_vm2, %v1104_v7, 0.0 }
 0x158   :  { %995 = vst.msk [vmem:[%s2156_s3 + $0x58] sm:$0xf] %vm972_vm1, %v1328_v52  ;;  %v1152_v56 = vsel %vm1005_vm2, %v1099_v54, 0.0  ;;  %v1329_v13 = vpack.c.bf16 %v809_v5, %v809_v5  ;;  %v1051_v57 = vsel %vm1005_vm2, %v809_v5, 0.0  ;;  %v1100_v12 = vmul.f32 %v809_v5, %v809_v5 }
 0x159   :  { %v1153_v8 = vadd.f32 %v1152_v56, %v1151_v43  ;;  %v1052_v58 = vadd.f32 %v1051_v57, %v1050_v55  ;;  %v1061_v19 = vsel %vm1005_vm2, %v830_v39, 0.0  ;;  %v1106_v42 = vmul.f32 %v833_v34, %v833_v34 }
 0x15a   :  { %996 = vst.msk [vmem:[%s2156_s3 + $0x5c] sm:$0xf] %vm972_vm1, %v1329_v13  ;;  %v1154_v61 = vsel %vm1005_vm2, %v1100_v12, 0.0  ;;  %v1107_v24 = vmul.f32 %v2051_v14, %v2051_v14  ;;  %v1164_v26 = vsel %vm1005_vm2, %v1105_v16, 0.0  ;;  %v1063_v27 = vsel %vm1005_vm2, %v833_v34, 0.0 }
 0x15b   :  { %v1054_v25 = vadd.f32 %v1053_v47, %v1052_v58  ;;  %v1155_v0 = vadd.f32 %v1154_v61, %v1153_v8  ;;  %v1065_v62 = vsel %vm1005_vm2, %v2051_v14, 0.0  ;;  %v1108_v22 = vmul.f32 %v2081_v40, %v2081_v40 }
 0x15c   :  { %v1166_v30 = vsel %vm1005_vm2, %v1106_v42, 0.0  ;;  %v1168_v35 = vsel %vm1005_vm2, %v1107_v24, 0.0  ;;  %v1067_v36 = vsel %vm1005_vm2, %v2081_v40, 0.0 }
 0x15d   :  { %v1157_v3 = vadd.f32 %v1156_v2, %v1155_v0  ;;  %v1056_v4 = vadd.f32 %v1055_v60, %v1054_v25  ;;  %v1170_v38 = vsel %vm1005_vm2, %v1108_v22, 0.0 }
 0x15f   :  { %v1058_v11 = vadd.f32 %v1057_v6, %v1056_v4  ;;  %v1159_v44 = vadd.f32 %v1158_v9, %v1157_v3 }
 0x161   :  { %v1060_v17 = vadd.f32 %v1059_v15, %v1058_v11  ;;  %v1161_v63 = vadd.f32 %v1160_v10, %v1159_v44 }
 0x163   :  { %v1062_v21 = vadd.f32 %v1061_v19, %v1060_v17  ;;  %v1163_v23 = vadd.f32 %v1162_v18, %v1161_v63 }
 0x165   :  { %v1064_v28 = vadd.f32 %v1063_v27, %v1062_v21  ;;  %v1165_v29 = vadd.f32 %v1164_v26, %v1163_v23 }
 0x167   :  { %v1066_v31 = vadd.f32 %v1065_v62, %v1064_v28  ;;  %v1167_v33 = vadd.f32 %v1166_v30, %v1165_v29 }
 0x169   :  { %v1068_v32 = vadd.f32 %v1067_v36, %v1066_v31  ;;  %v1169_v49 = vadd.f32 %v1168_v35, %v1167_v33 }
 0x16b   :  { %v1069_v39 = vrot.slane %v1068_v32, 4  ;;  %v1171_v41 = vadd.f32 %v1170_v38, %v1169_v49 }
 0x16d   :  { %v1070_v43 = vadd.f32 %v1069_v39, %v1068_v32  ;;  %v1172_v14 = vrot.slane %v1171_v41, 4 }
 0x16f   :  { %v1071_v45 = vrot.slane %v1070_v43, 2  ;;  %v1173_v34 = vadd.f32 %v1172_v14, %v1171_v41 }
 0x171   :  { %v1072_v48 = vadd.f32 %v1071_v45, %v1070_v43  ;;  %v1174_v20 = vrot.slane %v1173_v34, 2 }
 0x173   :  { %v1073_v37 = vrot.slane %v1072_v48, 1  ;;  %v1175_v46 = vadd.f32 %v1174_v20, %v1173_v34 }
 0x175   :  { %v1074_v51 = vadd.f32 %v1073_v37, %v1072_v48  ;;  %v1176_v52 = vrot.slane %v1175_v46, 1 }
 0x177   :  { %1076 = vst.msk [vmem:[%s2157_s4] sm:$0x1] %vm1075_vm3, %v1074_v51  ;;  %v1177_v40 = vadd.f32 %v1176_v52, %v1175_v46 }
 0x179   :  { %1178 = vst.msk [vmem:[%s2158_s5] sm:$0x1] %vm1075_vm3, %v1177_v40 }

// kernel: _lambda_.20
= control target key start
LH: loop header
LB: loop body
LE: loop exit
PB: predicated region body
PF: predicated region fallthrough
CT: control target
= control target key end

     0   :  { %vm380_vm0 = vcmask 519168   ;;  %s832_s0 = inlined_call_operand.vmem [shape: bf16[256,64], index: 0, kind: input, shape index: {}]   ;;  %s833_s1 = inlined_call_operand.vmem [shape: f32[1,64], index: 1, kind: input, shape index: {}]   ;;  %s834_s2 = inlined_call_operand.vmem [shape: f32[1,64], index: 2, kind: input, shape index: {}]   ;;  %s835_s3 = inlined_call_operand.vmem [shape: bf16[256,64], index: 3, kind: output, shape index: {}]  }
   0x1   :  { %v484_v0 = vld [vmem:[%s832_s0] sm:$0xff]   ;;  %v547_v4 = vld [vmem:[%s832_s0 + $0x8] sm:$0xff]   ;;  %v548_v5 = vld [vmem:[%s832_s0 + $0x10] sm:$0xff]  }
   0x2   :  { %v588_v1 = vld [vmem:[%s833_s1] ss:$0 sm:$0xff]  ;;  %v485_v2 = vunpack.c.l.bf16 %v484_v0  ;;  %v486_v3 = vunpack.c.h.bf16 %v484_v0  ;;  %v549_v6 = vld [vmem:[%s832_s0 + $0x18] sm:$0xff]   ;;  %v489_v8 = vunpack.c.l.bf16 %v547_v4  ;;  %v490_v9 = vunpack.c.h.bf16 %v547_v4  ;;  %v551_v40 = vld [vmem:[%s832_s0 + $0x28] sm:$0xff]  }
   0x3   :  { %v602_v7 = vld [vmem:[%s834_s2] ss:$0 sm:$0xff]  ;;  %v493_v10 = vunpack.c.l.bf16 %v548_v5  ;;  %v494_v11 = vunpack.c.h.bf16 %v548_v5  ;;  %v497_v14 = vunpack.c.l.bf16 %v549_v6  ;;  %v498_v15 = vunpack.c.h.bf16 %v549_v6  ;;  %v552_v52 = vld [vmem:[%s832_s0 + $0x30] sm:$0xff]  }
   0x4   :  { %v85_v12 = vmul.f32 %v485_v2, %v588_v1  ;;  %v86_v13 = vmul.f32 %v486_v3, %v588_v1  ;;  %v87_v16 = vmul.f32 %v489_v8, %v588_v1  ;;  %v88_v17 = vmul.f32 %v490_v9, %v588_v1  ;;  %v550_v39 = vld [vmem:[%s832_s0 + $0x20] sm:$0xff]  }
   0x5   :  { %v89_v18 = vmul.f32 %v493_v10, %v588_v1  ;;  %v90_v19 = vmul.f32 %v494_v11, %v588_v1  ;;  %v91_v22 = vmul.f32 %v497_v14, %v588_v1  ;;  %v92_v23 = vmul.f32 %v498_v15, %v588_v1 }
   0x6   :  { %v124_v20 = vadd.f32 %v602_v7, %v85_v12  ;;  %v125_v21 = vadd.f32 %v602_v7, %v86_v13  ;;  %v126_v24 = vadd.f32 %v602_v7, %v87_v16  ;;  %v127_v25 = vadd.f32 %v602_v7, %v88_v17  ;;  %v553_v17 = vld [vmem:[%s832_s0 + $0x38] sm:$0xff]  }
   0x7   :  { %v128_v26 = vadd.f32 %v602_v7, %v89_v18  ;;  %v129_v27 = vadd.f32 %v602_v7, %v90_v19  ;;  %v130_v46 = vadd.f32 %v602_v7, %v91_v22  ;;  %v131_v47 = vadd.f32 %v602_v7, %v92_v23  ;;  %v554_v18 = vld [vmem:[%s832_s0 + $0x40] sm:$0xff]   ;;  %v555_v23 = vld [vmem:[%s832_s0 + $0x48] sm:$0xff]  }
   0x8   :  { %vm156_vm1 = vcmp.ge.f32.partialorder %v124_v20, 0.0  ;;  %v188_v28 = vmul.f32 0.2, %v124_v20  ;;  %vm157_vm2 = vcmp.ge.f32.partialorder %v125_v21, 0.0  ;;  %v189_v29 = vmul.f32 0.2, %v125_v21 }
   0x9   :  { %vm158_vm3 = vcmp.ge.f32.partialorder %v126_v24, 0.0  ;;  %v190_v30 = vmul.f32 0.2, %v126_v24  ;;  %vm159_vm4 = vcmp.ge.f32.partialorder %v127_v25, 0.0  ;;  %v191_v31 = vmul.f32 0.2, %v127_v25 }
   0xa   :  { %v220_v32 = vsel %vm156_vm1, %v124_v20, %v188_v28  ;;  %v221_v33 = vsel %vm157_vm2, %v125_v21, %v189_v29  ;;  %vm160_vm5 = vcmp.ge.f32.partialorder %v128_v26, 0.0  ;;  %v192_v34 = vmul.f32 0.2, %v128_v26 }
   0xb   :  { %v451_v35 = vpack.c.bf16 %v220_v32, %v220_v32  ;;  %v452_v36 = vpack.c.bf16 %v221_v33, %v221_v33  ;;  %v222_v37 = vsel %vm158_vm3, %v126_v24, %v190_v30  ;;  %v223_v38 = vsel %vm159_vm4, %v127_v25, %v191_v31 }
   0xc   :  { %v453_v41 = vpack.c.bf16 %v222_v37, %v222_v37  ;;  %v454_v42 = vpack.c.bf16 %v223_v38, %v223_v38  ;;  %v224_v43 = vsel %vm160_vm5, %v128_v26, %v192_v34  ;;  %vm161_vm6 = vcmp.ge.f32.partialorder %v129_v27, 0.0 }
   0xd   :  { %381 = vst.msk [vmem:[%s835_s3] sm:$0xf] %vm380_vm0, %v451_v35  ;;  %382 = vst.msk [vmem:[%s835_s3 + $0x4] sm:$0xf] %vm380_vm0, %v452_v36  ;;  %v455_v44 = vpack.c.bf16 %v224_v43, %v224_v43  ;;  %v193_v45 = vmul.f32 0.2, %v129_v27  ;;  %v501_v48 = vunpack.c.l.bf16 %v550_v39  ;;  %v502_v49 = vunpack.c.h.bf16 %v550_v39 }
   0xe   :  { %383 = vst.msk [vmem:[%s835_s3 + $0x8] sm:$0xf] %vm380_vm0, %v453_v41  ;;  %384 = vst.msk [vmem:[%s835_s3 + $0xc] sm:$0xf] %vm380_vm0, %v454_v42  ;;  %v505_v50 = vunpack.c.l.bf16 %v551_v40  ;;  %v506_v51 = vunpack.c.h.bf16 %v551_v40  ;;  %vm162_vm7 = vcmp.ge.f32.partialorder %v130_v46, 0.0  ;;  %vm163_vm8 = vcmp.ge.f32.partialorder %v131_v47, 0.0 }
   0xf   :  { %385 = vst.msk [vmem:[%s835_s3 + $0x10] sm:$0xf] %vm380_vm0, %v455_v44  ;;  %v225_v53 = vsel %vm161_vm6, %v129_v27, %v193_v45  ;;  %v194_v54 = vmul.f32 0.2, %v130_v46  ;;  %v195_v56 = vmul.f32 0.2, %v131_v47  ;;  %v93_v57 = vmul.f32 %v501_v48, %v588_v1 }
  0x10   :  { %v456_v55 = vpack.c.bf16 %v225_v53, %v225_v53  ;;  %v94_v58 = vmul.f32 %v502_v49, %v588_v1  ;;  %v95_v60 = vmul.f32 %v505_v50, %v588_v1  ;;  %v96_v61 = vmul.f32 %v506_v51, %v588_v1 }
  0x11   :  { %v226_v59 = vsel %vm162_vm7, %v130_v46, %v194_v54  ;;  %v509_v62 = vunpack.c.l.bf16 %v552_v52  ;;  %v227_v0 = vsel %vm163_vm8, %v131_v47, %v195_v56  ;;  %v132_v2 = vadd.f32 %v602_v7, %v93_v57  ;;  %v556_v57 = vld [vmem:[%s832_s0 + $0x50] sm:$0xff]  }
  0x12   :  { %386 = vst.msk [vmem:[%s835_s3 + $0x14] sm:$0xf] %vm380_vm0, %v456_v55  ;;  %v457_v63 = vpack.c.bf16 %v226_v59, %v226_v59  ;;  %v133_v3 = vadd.f32 %v602_v7, %v94_v58  ;;  %v458_v4 = vpack.c.bf16 %v227_v0, %v227_v0  ;;  %v134_v5 = vadd.f32 %v602_v7, %v95_v60 }
  0x13   :  { %v135_v6 = vadd.f32 %v602_v7, %v96_v61  ;;  %v97_v8 = vmul.f32 %v509_v62, %v588_v1  ;;  %vm164_vm9 = vcmp.ge.f32.partialorder %v132_v2, 0.0  ;;  %v196_v9 = vmul.f32 0.2, %v132_v2  ;;  %v557_v62 = vld [vmem:[%s832_s0 + $0x58] sm:$0xff]  }
  0x14   :  { %387 = vst.msk [vmem:[%s835_s3 + $0x18] sm:$0xf] %vm380_vm0, %v457_v63  ;;  %vm165_vm10 = vcmp.ge.f32.partialorder %v133_v3, 0.0  ;;  %v197_v10 = vmul.f32 0.2, %v133_v3  ;;  %vm166_vm11 = vcmp.ge.f32.partialorder %v134_v5, 0.0  ;;  %v510_v16 = vunpack.c.h.bf16 %v552_v52 }
  0x15   :  { %388 = vst.msk [vmem:[%s835_s3 + $0x1c] sm:$0xf] %vm380_vm0, %v458_v4  ;;  %v198_v11 = vmul.f32 0.2, %v134_v5  ;;  %vm167_vm12 = vcmp.ge.f32.partialorder %v135_v6, 0.0  ;;  %v228_v13 = vsel %vm164_vm9, %v132_v2, %v196_v9  ;;  %v136_v15 = vadd.f32 %v602_v7, %v97_v8 }
  0x16   :  { %v199_v12 = vmul.f32 0.2, %v135_v6  ;;  %v229_v14 = vsel %vm165_vm10, %v133_v3, %v197_v10  ;;  %v459_v19 = vpack.c.bf16 %v228_v13, %v228_v13  ;;  %v98_v27 = vmul.f32 %v510_v16, %v588_v1  ;;  %v558_v3 = vld [vmem:[%s832_s0 + $0x60] sm:$0xff]   ;;  %v559_v13 = vld [vmem:[%s832_s0 + $0x68] sm:$0xff]  }
  0x17   :  { %v460_v20 = vpack.c.bf16 %v229_v14, %v229_v14  ;;  %v230_v21 = vsel %vm166_vm11, %v134_v5, %v198_v11  ;;  %vm168_vm13 = vcmp.ge.f32.partialorder %v136_v15, 0.0  ;;  %v200_v26 = vmul.f32 0.2, %v136_v15 }
  0x18   :  { %v231_v22 = vsel %vm167_vm12, %v135_v6, %v199_v12  ;;  %v461_v24 = vpack.c.bf16 %v230_v21, %v230_v21  ;;  %389 = vst.msk [vmem:[%s835_s3 + $0x20] sm:$0xf] %vm380_vm0, %v459_v19  ;;  %v513_v28 = vunpack.c.l.bf16 %v553_v17  ;;  %v514_v29 = vunpack.c.h.bf16 %v553_v17 }
  0x19   :  { %v462_v25 = vpack.c.bf16 %v231_v22, %v231_v22  ;;  %390 = vst.msk [vmem:[%s835_s3 + $0x24] sm:$0xf] %vm380_vm0, %v460_v20  ;;  %v517_v30 = vunpack.c.l.bf16 %v554_v18  ;;  %v232_v31 = vsel %vm168_vm13, %v136_v15, %v200_v26  ;;  %v518_v32 = vunpack.c.h.bf16 %v554_v18 }
  0x1a   :  { %391 = vst.msk [vmem:[%s835_s3 + $0x28] sm:$0xf] %vm380_vm0, %v461_v24  ;;  %v521_v33 = vunpack.c.l.bf16 %v555_v23  ;;  %v522_v34 = vunpack.c.h.bf16 %v555_v23  ;;  %v463_v35 = vpack.c.bf16 %v232_v31, %v232_v31  ;;  %v137_v36 = vadd.f32 %v602_v7, %v98_v27 }
  0x1b   :  { %392 = vst.msk [vmem:[%s835_s3 + $0x2c] sm:$0xf] %vm380_vm0, %v462_v25  ;;  %v99_v37 = vmul.f32 %v513_v28, %v588_v1  ;;  %v100_v38 = vmul.f32 %v514_v29, %v588_v1  ;;  %v101_v39 = vmul.f32 %v517_v30, %v588_v1  ;;  %v102_v40 = vmul.f32 %v518_v32, %v588_v1 }
  0x1c   :  { %v103_v41 = vmul.f32 %v521_v33, %v588_v1  ;;  %v104_v42 = vmul.f32 %v522_v34, %v588_v1  ;;  %393 = vst.msk [vmem:[%s835_s3 + $0x30] sm:$0xf] %vm380_vm0, %v463_v35  ;;  %vm169_vm14 = vcmp.ge.f32.partialorder %v137_v36, 0.0  ;;  %v201_v43 = vmul.f32 0.2, %v137_v36 }
  0x1d   :  { %v138_v44 = vadd.f32 %v602_v7, %v99_v37  ;;  %v139_v45 = vadd.f32 %v602_v7, %v100_v38  ;;  %v140_v46 = vadd.f32 %v602_v7, %v101_v39  ;;  %v141_v47 = vadd.f32 %v602_v7, %v102_v40 }
  0x1e   :  { %v142_v48 = vadd.f32 %v602_v7, %v103_v41  ;;  %v143_v49 = vadd.f32 %v602_v7, %v104_v42  ;;  %v233_v50 = vsel %vm169_vm14, %v137_v36, %v201_v43  ;;  %v525_v8 = vunpack.c.l.bf16 %v556_v57  ;;  %v560_v41 = vld [vmem:[%s832_s0 + $0x70] sm:$0xff]  }
  0x1f   :  { %vm170_vm15 = vcmp.ge.f32.partialorder %v138_v44, 0.0  ;;  %v202_v51 = vmul.f32 0.2, %v138_v44  ;;  %vm171_vm1 = vcmp.ge.f32.partialorder %v139_v45, 0.0  ;;  %v464_v52 = vpack.c.bf16 %v233_v50, %v233_v50 }
  0x20   :  { %v203_v53 = vmul.f32 0.2, %v139_v45  ;;  %vm172_vm2 = vcmp.ge.f32.partialorder %v140_v46, 0.0  ;;  %v204_v54 = vmul.f32 0.2, %v140_v46  ;;  %vm173_vm3 = vcmp.ge.f32.partialorder %v141_v47, 0.0 }
  0x21   :  { %v234_v55 = vsel %vm170_vm15, %v138_v44, %v202_v51  ;;  %v205_v56 = vmul.f32 0.2, %v141_v47  ;;  %vm174_vm4 = vcmp.ge.f32.partialorder %v142_v48, 0.0  ;;  %394 = vst.msk [vmem:[%s835_s3 + $0x34] sm:$0xf] %vm380_vm0, %v464_v52  ;;  %vm175_vm5 = vcmp.ge.f32.partialorder %v143_v49, 0.0 }
  0x22   :  { %v465_v58 = vpack.c.bf16 %v234_v55, %v234_v55  ;;  %v235_v59 = vsel %vm171_vm1, %v139_v45, %v203_v53  ;;  %v236_v60 = vsel %vm172_vm2, %v140_v46, %v204_v54  ;;  %v206_v61 = vmul.f32 0.2, %v142_v48  ;;  %v561_v45 = vld [vmem:[%s832_s0 + $0x78] sm:$0xff]  }
  0x23   :  { %v466_v63 = vpack.c.bf16 %v235_v59, %v235_v59  ;;  %v467_v0 = vpack.c.bf16 %v236_v60, %v236_v60  ;;  %v237_v2 = vsel %vm173_vm3, %v141_v47, %v205_v56  ;;  %v207_v6 = vmul.f32 0.2, %v143_v49 }
  0x24   :  { %395 = vst.msk [vmem:[%s835_s3 + $0x38] sm:$0xf] %vm380_vm0, %v465_v58  ;;  %v468_v4 = vpack.c.bf16 %v237_v2, %v237_v2  ;;  %v238_v5 = vsel %vm174_vm4, %v142_v48, %v206_v61  ;;  %v526_v10 = vunpack.c.h.bf16 %v556_v57  ;;  %v529_v11 = vunpack.c.l.bf16 %v557_v62 }
  0x25   :  { %396 = vst.msk [vmem:[%s835_s3 + $0x3c] sm:$0xf] %vm380_vm0, %v466_v63  ;;  %397 = vst.msk [vmem:[%s835_s3 + $0x40] sm:$0xf] %vm380_vm0, %v467_v0  ;;  %v469_v9 = vpack.c.bf16 %v238_v5, %v238_v5  ;;  %v530_v12 = vunpack.c.h.bf16 %v557_v62  ;;  %v239_v14 = vsel %vm175_vm5, %v143_v49, %v207_v6  ;;  %v105_v15 = vmul.f32 %v525_v8, %v588_v1 }
  0x26   :  { %398 = vst.msk [vmem:[%s835_s3 + $0x44] sm:$0xf] %vm380_vm0, %v468_v4  ;;  %v533_v16 = vunpack.c.l.bf16 %v558_v3  ;;  %v534_v17 = vunpack.c.h.bf16 %v558_v3  ;;  %v470_v18 = vpack.c.bf16 %v239_v14, %v239_v14  ;;  %v106_v19 = vmul.f32 %v526_v10, %v588_v1 }
  0x27   :  { %399 = vst.msk [vmem:[%s835_s3 + $0x48] sm:$0xf] %vm380_vm0, %v469_v9  ;;  %v107_v20 = vmul.f32 %v529_v11, %v588_v1  ;;  %v108_v21 = vmul.f32 %v530_v12, %v588_v1  ;;  %v144_v22 = vadd.f32 %v602_v7, %v105_v15  ;;  %v537_v25 = vunpack.c.l.bf16 %v559_v13 }
  0x28   :  { %v109_v23 = vmul.f32 %v533_v16, %v588_v1  ;;  %v110_v24 = vmul.f32 %v534_v17, %v588_v1  ;;  %400 = vst.msk [vmem:[%s835_s3 + $0x4c] sm:$0xf] %vm380_vm0, %v470_v18  ;;  %v145_v26 = vadd.f32 %v602_v7, %v106_v19  ;;  %v538_v29 = vunpack.c.h.bf16 %v559_v13 }
  0x29   :  { %v146_v27 = vadd.f32 %v602_v7, %v107_v20  ;;  %v147_v28 = vadd.f32 %v602_v7, %v108_v21  ;;  %vm176_vm6 = vcmp.ge.f32.partialorder %v144_v22, 0.0  ;;  %v208_v30 = vmul.f32 0.2, %v144_v22 }
  0x2a   :  { %v148_v31 = vadd.f32 %v602_v7, %v109_v23  ;;  %v149_v32 = vadd.f32 %v602_v7, %v110_v24  ;;  %vm177_vm7 = vcmp.ge.f32.partialorder %v145_v26, 0.0  ;;  %v209_v33 = vmul.f32 0.2, %v145_v26 }
  0x2b   :  { %vm178_vm8 = vcmp.ge.f32.partialorder %v146_v27, 0.0  ;;  %v210_v34 = vmul.f32 0.2, %v146_v27  ;;  %v240_v35 = vsel %vm176_vm6, %v144_v22, %v208_v30  ;;  %vm179_vm9 = vcmp.ge.f32.partialorder %v147_v28, 0.0 }
  0x2c   :  { %v211_v36 = vmul.f32 0.2, %v147_v28  ;;  %vm180_vm10 = vcmp.ge.f32.partialorder %v148_v31, 0.0  ;;  %v471_v37 = vpack.c.bf16 %v240_v35, %v240_v35  ;;  %v241_v38 = vsel %vm177_vm7, %v145_v26, %v209_v33 }
  0x2d   :  { %v242_v39 = vsel %vm178_vm8, %v146_v27, %v210_v34  ;;  %v212_v40 = vmul.f32 0.2, %v148_v31  ;;  %v472_v42 = vpack.c.bf16 %v241_v38, %v241_v38  ;;  %vm181_vm11 = vcmp.ge.f32.partialorder %v149_v32, 0.0 }
  0x2e   :  { %v473_v43 = vpack.c.bf16 %v242_v39, %v242_v39  ;;  %v243_v44 = vsel %vm179_vm9, %v147_v28, %v211_v36  ;;  %401 = vst.msk [vmem:[%s835_s3 + $0x50] sm:$0xf] %vm380_vm0, %v471_v37  ;;  %v213_v48 = vmul.f32 0.2, %v149_v32  ;;  %v111_v49 = vmul.f32 %v537_v25, %v588_v1 }
  0x2f   :  { %v474_v46 = vpack.c.bf16 %v243_v44, %v243_v44  ;;  %v244_v47 = vsel %vm180_vm10, %v148_v31, %v212_v40  ;;  %402 = vst.msk [vmem:[%s835_s3 + $0x54] sm:$0xf] %vm380_vm0, %v472_v42  ;;  %v112_v51 = vmul.f32 %v538_v29, %v588_v1  ;;  %v541_v52 = vunpack.c.l.bf16 %v560_v41 }
  0x30   :  { %403 = vst.msk [vmem:[%s835_s3 + $0x58] sm:$0xf] %vm380_vm0, %v473_v43  ;;  %v475_v50 = vpack.c.bf16 %v244_v47, %v244_v47  ;;  %v542_v53 = vunpack.c.h.bf16 %v560_v41  ;;  %v245_v54 = vsel %vm181_vm11, %v149_v32, %v213_v48  ;;  %v150_v55 = vadd.f32 %v602_v7, %v111_v49 }
  0x31   :  { %404 = vst.msk [vmem:[%s835_s3 + $0x5c] sm:$0xf] %vm380_vm0, %v474_v46  ;;  %v545_v56 = vunpack.c.l.bf16 %v561_v45  ;;  %v546_v57 = vunpack.c.h.bf16 %v561_v45  ;;  %v476_v58 = vpack.c.bf16 %v245_v54, %v245_v54  ;;  %v151_v59 = vadd.f32 %v602_v7, %v112_v51 }
  0x32   :  { %405 = vst.msk [vmem:[%s835_s3 + $0x60] sm:$0xf] %vm380_vm0, %v475_v50  ;;  %v113_v60 = vmul.f32 %v541_v52, %v588_v1  ;;  %v114_v61 = vmul.f32 %v542_v53, %v588_v1  ;;  %vm182_vm12 = vcmp.ge.f32.partialorder %v150_v55, 0.0  ;;  %v214_v62 = vmul.f32 0.2, %v150_v55 }
  0x33   :  { %v115_v63 = vmul.f32 %v545_v56, %v588_v1  ;;  %v116_v0 = vmul.f32 %v546_v57, %v588_v1  ;;  %406 = vst.msk [vmem:[%s835_s3 + $0x64] sm:$0xf] %vm380_vm0, %v476_v58  ;;  %vm183_vm13 = vcmp.ge.f32.partialorder %v151_v59, 0.0  ;;  %v215_v2 = vmul.f32 0.2, %v151_v59 }
  0x34   :  { %v152_v3 = vadd.f32 %v602_v7, %v113_v60  ;;  %v153_v4 = vadd.f32 %v602_v7, %v114_v61  ;;  %v246_v5 = vsel %vm182_vm12, %v150_v55, %v214_v62 }
  0x35   :  { %v154_v6 = vadd.f32 %v602_v7, %v115_v63  ;;  %v155_v8 = vadd.f32 %v602_v7, %v116_v0  ;;  %v477_v9 = vpack.c.bf16 %v246_v5, %v246_v5  ;;  %v247_v10 = vsel %vm183_vm13, %v151_v59, %v215_v2 }
  0x36   :  { %vm184_vm14 = vcmp.ge.f32.partialorder %v152_v3, 0.0  ;;  %v216_v1 = vmul.f32 0.2, %v152_v3  ;;  %v478_v11 = vpack.c.bf16 %v247_v10, %v247_v10  ;;  %vm185_vm15 = vcmp.ge.f32.partialorder %v153_v4, 0.0 }
  0x37   :  { %v217_v12 = vmul.f32 0.2, %v153_v4  ;;  %vm186_vm1 = vcmp.ge.f32.partialorder %v154_v6, 0.0  ;;  %407 = vst.msk [vmem:[%s835_s3 + $0x68] sm:$0xf] %vm380_vm0, %v477_v9  ;;  %vm187_vm2 = vcmp.ge.f32.partialorder %v155_v8, 0.0 }
  0x38   :  { %v248_v13 = vsel %vm184_vm14, %v152_v3, %v216_v1  ;;  %v218_v14 = vmul.f32 0.2, %v154_v6  ;;  %v219_v15 = vmul.f32 0.2, %v155_v8  ;;  %408 = vst.msk [vmem:[%s835_s3 + $0x6c] sm:$0xf] %vm380_vm0, %v478_v11 }
  0x39   :  { %v479_v7 = vpack.c.bf16 %v248_v13, %v248_v13  ;;  %v249_v16 = vsel %vm185_vm15, %v153_v4, %v217_v12 }
  0x3a   :  { %v480_v17 = vpack.c.bf16 %v249_v16, %v249_v16  ;;  %v250_v18 = vsel %vm186_vm1, %v154_v6, %v218_v14  ;;  %v251_v19 = vsel %vm187_vm2, %v155_v8, %v219_v15 }
  0x3b   :  { %409 = vst.msk [vmem:[%s835_s3 + $0x70] sm:$0xf] %vm380_vm0, %v479_v7  ;;  %v481_v20 = vpack.c.bf16 %v250_v18, %v250_v18  ;;  %v482_v21 = vpack.c.bf16 %v251_v19, %v251_v19 }
  0x3c   :  { %410 = vst.msk [vmem:[%s835_s3 + $0x74] sm:$0xf] %vm380_vm0, %v480_v17 }
  0x3d   :  { %411 = vst.msk [vmem:[%s835_s3 + $0x78] sm:$0xf] %vm380_vm0, %v481_v20  ;;  %412 = vst.msk [vmem:[%s835_s3 + $0x7c] sm:$0xf] %vm380_vm0, %v482_v21 }

// kernel: _lambda_.22
= control target key start
LH: loop header
LB: loop body
LE: loop exit
PB: predicated region body
PF: predicated region fallthrough
CT: control target
= control target key end

     0   :  { %vm116_vm0 = vcmask 519168   ;;  %s236_s0 = inlined_call_operand.vmem [shape: bf16[64,64], index: 0, kind: input, shape index: {}]   ;;  %s237_s1 = inlined_call_operand.vmem [shape: f32[1,64], index: 1, kind: input, shape index: {}]   ;;  %s238_s2 = inlined_call_operand.vmem [shape: f32[1,64], index: 2, kind: input, shape index: {}]   ;;  %s239_s3 = inlined_call_operand.vmem [shape: bf16[64,64], index: 3, kind: output, shape index: {}]  }
   0x1   :  { %v148_v0 = vld [vmem:[%s236_s0] sm:$0xff]   ;;  %v163_v4 = vld [vmem:[%s236_s0 + $0x8] sm:$0xff]   ;;  %v164_v5 = vld [vmem:[%s236_s0 + $0x10] sm:$0xff]  }
   0x2   :  { %v129_v1 = vld [vmem:[%s237_s1] ss:$0 sm:$0xff]  ;;  %v149_v2 = vunpack.c.l.bf16 %v148_v0  ;;  %v150_v3 = vunpack.c.h.bf16 %v148_v0  ;;  %v165_v6 = vld [vmem:[%s236_s0 + $0x18] sm:$0xff]   ;;  %v153_v8 = vunpack.c.l.bf16 %v163_v4  ;;  %v154_v9 = vunpack.c.h.bf16 %v163_v4 }
   0x3   :  { %v130_v7 = vld [vmem:[%s238_s2] ss:$0 sm:$0xff]  ;;  %v157_v10 = vunpack.c.l.bf16 %v164_v5  ;;  %v158_v11 = vunpack.c.h.bf16 %v164_v5  ;;  %v161_v14 = vunpack.c.l.bf16 %v165_v6  ;;  %v162_v15 = vunpack.c.h.bf16 %v165_v6 }
   0x4   :  { %v37_v12 = vmul.f32 %v149_v2, %v129_v1  ;;  %v38_v13 = vmul.f32 %v150_v3, %v129_v1  ;;  %v39_v16 = vmul.f32 %v153_v8, %v129_v1  ;;  %v40_v17 = vmul.f32 %v154_v9, %v129_v1 }
   0x5   :  { %v41_v18 = vmul.f32 %v157_v10, %v129_v1  ;;  %v42_v19 = vmul.f32 %v158_v11, %v129_v1  ;;  %v43_v22 = vmul.f32 %v161_v14, %v129_v1  ;;  %v44_v23 = vmul.f32 %v162_v15, %v129_v1 }
   0x6   :  { %v52_v20 = vadd.f32 %v130_v7, %v37_v12  ;;  %v53_v21 = vadd.f32 %v130_v7, %v38_v13  ;;  %v54_v24 = vadd.f32 %v130_v7, %v39_v16  ;;  %v55_v25 = vadd.f32 %v130_v7, %v40_v17 }
   0x7   :  { %v56_v26 = vadd.f32 %v130_v7, %v41_v18  ;;  %v57_v27 = vadd.f32 %v130_v7, %v42_v19  ;;  %v58_v44 = vadd.f32 %v130_v7, %v43_v22  ;;  %v59_v45 = vadd.f32 %v130_v7, %v44_v23 }
   0x8   :  { %vm60_vm1 = vcmp.ge.f32.partialorder %v52_v20, 0.0  ;;  %v68_v28 = vmul.f32 0.2, %v52_v20  ;;  %vm61_vm2 = vcmp.ge.f32.partialorder %v53_v21, 0.0  ;;  %v69_v29 = vmul.f32 0.2, %v53_v21 }
   0x9   :  { %vm62_vm3 = vcmp.ge.f32.partialorder %v54_v24, 0.0  ;;  %v70_v30 = vmul.f32 0.2, %v54_v24  ;;  %vm63_vm4 = vcmp.ge.f32.partialorder %v55_v25, 0.0  ;;  %v71_v31 = vmul.f32 0.2, %v55_v25 }
   0xa   :  { %v76_v32 = vsel %vm60_vm1, %v52_v20, %v68_v28  ;;  %v77_v33 = vsel %vm61_vm2, %v53_v21, %v69_v29  ;;  %vm64_vm5 = vcmp.ge.f32.partialorder %v56_v26, 0.0  ;;  %v72_v34 = vmul.f32 0.2, %v56_v26 }
   0xb   :  { %v139_v35 = vpack.c.bf16 %v76_v32, %v76_v32  ;;  %v140_v36 = vpack.c.bf16 %v77_v33, %v77_v33  ;;  %v78_v37 = vsel %vm62_vm3, %v54_v24, %v70_v30  ;;  %v79_v38 = vsel %vm63_vm4, %v55_v25, %v71_v31 }
   0xc   :  { %v141_v39 = vpack.c.bf16 %v78_v37, %v78_v37  ;;  %v142_v40 = vpack.c.bf16 %v79_v38, %v79_v38  ;;  %v80_v41 = vsel %vm64_vm5, %v56_v26, %v72_v34  ;;  %vm65_vm6 = vcmp.ge.f32.partialorder %v57_v27, 0.0 }
   0xd   :  { %117 = vst.msk [vmem:[%s239_s3] sm:$0xf] %vm116_vm0, %v139_v35  ;;  %118 = vst.msk [vmem:[%s239_s3 + $0x4] sm:$0xf] %vm116_vm0, %v140_v36  ;;  %v143_v42 = vpack.c.bf16 %v80_v41, %v80_v41  ;;  %v73_v43 = vmul.f32 0.2, %v57_v27 }
   0xe   :  { %119 = vst.msk [vmem:[%s239_s3 + $0x8] sm:$0xf] %vm116_vm0, %v141_v39  ;;  %120 = vst.msk [vmem:[%s239_s3 + $0xc] sm:$0xf] %vm116_vm0, %v142_v40  ;;  %vm66_vm7 = vcmp.ge.f32.partialorder %v58_v44, 0.0  ;;  %vm67_vm8 = vcmp.ge.f32.partialorder %v59_v45, 0.0 }
   0xf   :  { %121 = vst.msk [vmem:[%s239_s3 + $0x10] sm:$0xf] %vm116_vm0, %v143_v42  ;;  %v81_v46 = vsel %vm65_vm6, %v57_v27, %v73_v43  ;;  %v74_v47 = vmul.f32 0.2, %v58_v44  ;;  %v75_v49 = vmul.f32 0.2, %v59_v45 }
  0x10   :  { %v144_v48 = vpack.c.bf16 %v81_v46, %v81_v46 }
  0x11   :  { %v82_v50 = vsel %vm66_vm7, %v58_v44, %v74_v47  ;;  %v83_v52 = vsel %vm67_vm8, %v59_v45, %v75_v49 }
  0x12   :  { %122 = vst.msk [vmem:[%s239_s3 + $0x14] sm:$0xf] %vm116_vm0, %v144_v48  ;;  %v145_v51 = vpack.c.bf16 %v82_v50, %v82_v50  ;;  %v146_v53 = vpack.c.bf16 %v83_v52, %v83_v52 }
  0x14   :  { %123 = vst.msk [vmem:[%s239_s3 + $0x18] sm:$0xf] %vm116_vm0, %v145_v51  ;;  %124 = vst.msk [vmem:[%s239_s3 + $0x1c] sm:$0xf] %vm116_vm0, %v146_v53 }

// kernel: _lambda_.23
= control target key start
LH: loop header
LB: loop body
LE: loop exit
PB: predicated region body
PF: predicated region fallthrough
CT: control target
= control target key end

     0   :  { %v397_v0 = vmov 0.0   ;;  %vm398_vm0 = vmmov 0   ;;  %vm39_vm1 = vcmask 523264   ;;  %vm108_vm2 = vcmask 1041409   ;;  %s509_s1 = inlined_call_operand.vmem [shape: bf16[64,128], index: 1, kind: input, shape index: {}]   ;;  %s510_s0 = inlined_call_operand.vmem [shape: bf16[4,16,64], index: 0, kind: input, shape index: {}]   ;;  %s511_s3 = inlined_call_operand.vmem [shape: bf16[128,1], index: 3, kind: input, shape index: {}]   ;;  %s512_s4 = inlined_call_operand.<no memory space> [shape: f32[1,1], index: 4, kind: input, shape index: {}]   ;;  %s513_s2 = inlined_call_operand.vmem [shape: f32[1,128], index: 2, kind: input, shape index: {}]   ;;  %s514_s5 = inlined_call_operand.vmem [shape: f32[4,1], index: 5, kind: output, shape index: {}]  }
   0x1   :  { %351 = vmatprep.subr.bf16.mxu0 %v397_v0  ;;  %v385_v1 = vld [vmem:[%s509_s1] sm:$0xff]   ;;  %359 = vmatprep.mubr.msk.bf16.mxu0 %vm398_vm0, %v397_v0  ;;  %v386_v2 = vld [vmem:[%s509_s1 + $0x8] sm:$0xff]   ;;  %v387_v3 = vld [vmem:[%s509_s1 + $0x10] sm:$0xff]   ;;  %vm110_vm3 = vcmask 1042434   ;;  %vm112_vm4 = vcmask 1043459   ;;  %vm297_vm6 = vcmask 3072  }
   0x2   :  { %363 = vmatprep.subr.bf16.mxu1 %v397_v0  ;;  %379 = vmatprep.mubr.msk.bf16.mxu1 %vm398_vm0, %v397_v0  ;;  %v319_v4 = vld [vmem:[%s510_s0] sm:$0xff]   ;;  %v334_v5 = vld [vmem:[%s510_s0 + $0x8] sm:$0xff]   ;;  %v335_v6 = vld [vmem:[%s510_s0 + $0x10] sm:$0xff]  }
   0x3   :  { %352 = vmatpush3.bf16.msra.mxu0 %v385_v1  ;;  %v320_v7 = vunpack.c.l.bf16 %v319_v4  ;;  %v321_v8 = vunpack.c.h.bf16 %v319_v4  ;;  %v324_v9 = vunpack.c.l.bf16 %v334_v5  ;;  %v325_v10 = vunpack.c.h.bf16 %v334_v5  ;;  %v336_v11 = vld [vmem:[%s510_s0 + $0x18] sm:$0xff]   ;;  %v389_v16 = vld [vmem:[%s511_s3] sm:$0xff]   ;;  %v390_v21 = vld [vmem:[%s511_s3 + $0x8] sm:$0xff]  }
   0x4   :  { %353 = vmatprep.subr.bf16.mxu0 %v397_v0  ;;  %v328_v12 = vunpack.c.l.bf16 %v335_v6  ;;  %v329_v13 = vunpack.c.h.bf16 %v335_v6  ;;  %v332_v14 = vunpack.c.l.bf16 %v336_v11  ;;  %v333_v15 = vunpack.c.h.bf16 %v336_v11  ;;  %364 = vmatpush3.bf16.msra.mxu1 %v389_v16  ;;  %v388_v29 = vld [vmem:[%s509_s1 + $0x18] sm:$0xff]   ;;  %v391_v37 = vld [vmem:[%s511_s3 + $0x10] sm:$0xff]   ;;  %v393_v55 = vld [vmem:[%s511_s3 + $0x20] sm:$0xff]  }
   0x5   :  { %v40_v17 = vsel %vm39_vm1, %v320_v7, 0.0  ;;  %v41_v18 = vsel %vm39_vm1, %v321_v8, 0.0  ;;  %v49_v19 = vsel %vm39_vm1, %v324_v9, 0.0  ;;  %v50_v20 = vsel %vm39_vm1, %v325_v10, 0.0  ;;  %365 = vmatprep.subr.bf16.mxu1 %v397_v0  ;;  %v392_v46 = vld [vmem:[%s511_s3 + $0x18] sm:$0xff]   ;;  %v394_v1 = vld [vmem:[%s511_s3 + $0x28] sm:$0xff]  }
   0x6   :  { %v42_v22 = vadd.f32 %v41_v18, %v40_v17  ;;  %v51_v23 = vadd.f32 %v50_v20, %v49_v19  ;;  %v58_v24 = vsel %vm39_vm1, %v328_v12, 0.0  ;;  %v59_v25 = vsel %vm39_vm1, %v329_v13, 0.0  ;;  %v395_v12 = vld [vmem:[%s511_s3 + $0x30] sm:$0xff]   ;;  %v396_v13 = vld [vmem:[%s511_s3 + $0x38] sm:$0xff]  }
   0x7   :  { %354 = vmatpush3.bf16.msra.mxu0 %v386_v2  ;;  %v60_v26 = vadd.f32 %v59_v25, %v58_v24  ;;  %v67_v27 = vsel %vm39_vm1, %v332_v14, 0.0  ;;  %v68_v28 = vsel %vm39_vm1, %v333_v15, 0.0  ;;  %v10_v14 = vstv %s512_s4  ;;  %v303_v15 = vld [vmem:[%s513_s2] ss:$0 sm:$0xff] }
   0x8   :  { %355 = vmatprep.subr.bf16.mxu0 %v397_v0  ;;  %v43_v30 = vrot.slane %v42_v22, 4  ;;  %v52_v31 = vrot.slane %v51_v23, 4  ;;  %v69_v32 = vadd.f32 %v68_v28, %v67_v27  ;;  %366 = vmatpush3.bf16.msra.mxu1 %v390_v21  ;;  %11 = vst [vmem:[#allocation2] sm:$0x1] %v10_v14 }
   0x9   :  { %v61_v33 = vrot.slane %v60_v26, 4  ;;  %367 = vmatprep.subr.bf16.mxu1 %v397_v0 }
   0xa   :  { %v44_v34 = vadd.f32 %v43_v30, %v42_v22  ;;  %v53_v35 = vadd.f32 %v52_v31, %v51_v23  ;;  %v70_v36 = vrot.slane %v69_v32, 4 }
   0xb   :  { %356 = vmatpush3.bf16.msra.mxu0 %v387_v3  ;;  %v62_v38 = vadd.f32 %v61_v33, %v60_v26 }
   0xc   :  { %357 = vmatprep.subr.bf16.mxu0 %v397_v0  ;;  %v45_v39 = vrot.slane %v44_v34, 2  ;;  %v54_v40 = vrot.slane %v53_v35, 2  ;;  %v71_v41 = vadd.f32 %v70_v36, %v69_v32  ;;  %368 = vmatpush3.bf16.msra.mxu1 %v391_v37 }
   0xd   :  { %v63_v42 = vrot.slane %v62_v38, 2  ;;  %369 = vmatprep.subr.bf16.mxu1 %v397_v0 }
   0xe   :  { %v46_v43 = vadd.f32 %v45_v39, %v44_v34  ;;  %v55_v44 = vadd.f32 %v54_v40, %v53_v35  ;;  %v72_v45 = vrot.slane %v71_v41, 2 }
   0xf   :  { %358 = vmatpush3.bf16.msra.mxu0 %v388_v29  ;;  %v64_v47 = vadd.f32 %v63_v42, %v62_v38  ;;  %v309_v23 = vld [vmem:[#allocation2] ss:$0 sm:$0xff] }
  0x10   :  { %v47_v48 = vrot.slane %v46_v43, 1  ;;  %v56_v49 = vrot.slane %v55_v44, 1  ;;  %v73_v50 = vadd.f32 %v72_v45, %v71_v41  ;;  %370 = vmatpush3.bf16.msra.mxu1 %v392_v46 }
  0x11   :  { %v65_v51 = vrot.slane %v64_v47, 1  ;;  %371 = vmatprep.subr.bf16.mxu1 %v397_v0 }
  0x12   :  { %v48_v52 = vadd.f32 %v47_v48, %v46_v43  ;;  %v57_v53 = vadd.f32 %v56_v49, %v55_v44  ;;  %v74_v54 = vrot.slane %v73_v50, 1 }
  0x13   :  { %v66_v56 = vadd.f32 %v65_v51, %v64_v47 }
  0x14   :  { %v75_v57 = vadd.f32 %v74_v54, %v73_v50  ;;  %v77_v58 = vmul.f32 0.0625, %v48_v52  ;;  %v78_v59 = vmul.f32 0.0625, %v57_v53  ;;  %372 = vmatpush3.bf16.msra.mxu1 %v393_v55 }
  0x15   :  { %v79_v60 = vmul.f32 0.0625, %v66_v56  ;;  %373 = vmatprep.subr.bf16.mxu1 %v397_v0 }
  0x16   :  { %v80_v61 = vmul.f32 0.0625, %v75_v57  ;;  %v81_v62 = vpack.c.bf16 %v77_v58, %v77_v58  ;;  %v82_v63 = vpack.c.bf16 %v78_v59, %v78_v59 }
  0x17   :  { %v83_v2 = vpack.c.bf16 %v79_v60, %v79_v60 }
  0x18   :  { %v84_v3 = vpack.c.bf16 %v80_v61, %v80_v61  ;;  %v104_v4 = vunpack.c.l.b16 %v81_v62  ;;  %v105_v5 = vunpack.c.l.b16 %v82_v63  ;;  %374 = vmatpush3.bf16.msra.mxu1 %v394_v1 }
  0x19   :  { %v106_v6 = vunpack.c.l.b16 %v83_v2  ;;  %375 = vmatprep.subr.bf16.mxu1 %v397_v0 }
  0x1a   :  { %v107_v7 = vunpack.c.l.b16 %v84_v3  ;;  %v109_v8 = vsel %vm108_vm2, %v105_v5, %v104_v4 }
  0x1b   :  { %v111_v9 = vsel %vm110_vm3, %v106_v6, %v109_v8 }
  0x1c   :  { %v113_v10 = vsel %vm112_vm4, %v107_v7, %v111_v9  ;;  %376 = vmatpush3.bf16.msra.mxu1 %v395_v12 }
  0x1d   :  { %v114_v11 = vpack.c.b16 %v113_v10, %v113_v10  ;;  %377 = vmatprep.subr.bf16.mxu1 %v397_v0 }
  0x1f   :  { %360 = vmatmul.mubr.msk.bf16.vlgmr.msra.gmra.mrb[0].mxu0 %vm39_vm1, %v114_v11 }
  0x20   :  { %378 = vmatpush3.bf16.msra.mxu1 %v396_v13 }
  0xf2   :  { %v176_v16 = vpop.f32.mrb[0].mxu0 }
  0xf3   :  { %v177_v17 = vadd.f32 %v303_v15, %v176_v16  ;;  %v361_v18 = vpop.f32.mrb[1].mxu0 }
  0xf4   :  { %v179_v19 = vpop.f32.mrb[2].mxu0 }
  0xf5   :  { %vm182_vm5 = vcmp.ge.f32.partialorder %v177_v17, 0.0  ;;  %v183_v0 = vmul.f32 0.2, %v177_v17  ;;  %v362_v20 = vpop.f32.mrb[3].mxu0 }
  0xf7   :  { %v184_v21 = vsel %vm182_vm5, %v177_v17, %v183_v0 }
  0xf8   :  { %v185_v22 = vpack.c.bf16 %v184_v21, %v184_v21 }
  0xfa   :  { %380 = vmatmul.mubr.bf16.vlgmr.msra.gmra.mrb[0].mxu1 %v185_v22 }
 0x1cd   :  { %v291_v24 = vpop.f32.mrb[0].mxu1 }
 0x1ce   :  { %v292_v25 = vadd.f32 %v309_v23, %v291_v24  ;;  %v381_v26 = vpop.f32.mrb[1].mxu1 }
 0x1cf   :  { %v294_v27 = vpop.f32.mrb[2].mxu1 }
 0x1d0   :  { %298 = vst.msk [vmem:[%s514_s5] sm:$0xf] %vm297_vm6, %v292_v25  ;;  %v382_v28 = vpop.f32.mrb[3].mxu1 }

// kernel: _lambda_.21
= control target key start
LH: loop header
LB: loop body
LE: loop exit
PB: predicated region body
PF: predicated region fallthrough
CT: control target
= control target key end

     0   :  { %vm437_vm0 = vcmask 523264   ;;  %vm677_vm1 = vcmask 519168   ;;  %vm707_vm2 = vcmask 516096   ;;  %s1266_s1 = inlined_call_operand.vmem [shape: bf16[576,64], index: 1, kind: input, shape index: {}]   ;;  %s1267_s0 = inlined_call_operand.vmem [shape: bf16[64,576], index: 0, kind: input, shape index: {}]   ;;  %s1268_s2 = inlined_call_operand.vmem [shape: f32[1,64], index: 2, kind: input, shape index: {}]   ;;  %s1269_s3 = inlined_call_operand.vmem [shape: bf16[64,64], index: 3, kind: output, shape index: {0}]   ;;  %s1270_s4 = inlined_call_operand.vmem [shape: f32[1,1,64], index: 4, kind: output, shape index: {1}]   ;;  %s1271_s5 = inlined_call_operand.vmem [shape: f32[1,1,64], index: 5, kind: output, shape index: {2}]  }
   0x1   :  { %v940_v0 = vld [vmem:[%s1266_s1 + $0x40] sm:$0xff]   ;;  %v944_v4 = vld [vmem:[%s1266_s1 + $0x48] sm:$0xff]   ;;  %v948_v8 = vld [vmem:[%s1266_s1 + $0x50] sm:$0xff]  }
   0x2   :  { %v941_v1 = vld [vmem:[%s1266_s1 + $0xc0] sm:$0xff]   ;;  %828 = vmatprep.subr.bf16.mxu0 %v940_v0  ;;  %v945_v5 = vld [vmem:[%s1266_s1 + $0xc8] sm:$0xff]   ;;  %v949_v9 = vld [vmem:[%s1266_s1 + $0xd0] sm:$0xff]  }
   0x3   :  { %v942_v2 = vld [vmem:[%s1266_s1] sm:$0xff]   ;;  %868 = vmatprep.subr.bf16.mxu1 %v941_v1  ;;  %v946_v6 = vld [vmem:[%s1266_s1 + $0x8] sm:$0xff]   ;;  %v950_v10 = vld [vmem:[%s1266_s1 + $0x10] sm:$0xff]  }
   0x4   :  { %v943_v3 = vld [vmem:[%s1266_s1 + $0x80] sm:$0xff]   ;;  %829 = vmatpush3.bf16.msra.mxu0 %v942_v2  ;;  %v947_v7 = vld [vmem:[%s1266_s1 + $0x88] sm:$0xff]   ;;  %v951_v11 = vld [vmem:[%s1266_s1 + $0x90] sm:$0xff]  }
   0x5   :  { %869 = vmatpush3.bf16.msra.mxu1 %v943_v3  ;;  %830 = vmatprep.subr.bf16.mxu0 %v944_v4  ;;  %v952_v12 = vld [vmem:[%s1266_s1 + $0x58] sm:$0xff]   ;;  %v956_v16 = vld [vmem:[%s1266_s1 + $0x60] sm:$0xff]   ;;  %v960_v20 = vld [vmem:[%s1266_s1 + $0x68] sm:$0xff]  }
   0x6   :  { %870 = vmatprep.subr.bf16.mxu1 %v945_v5  ;;  %v953_v13 = vld [vmem:[%s1266_s1 + $0xd8] sm:$0xff]   ;;  %v957_v17 = vld [vmem:[%s1266_s1 + $0xe0] sm:$0xff]   ;;  %v961_v21 = vld [vmem:[%s1266_s1 + $0xe8] sm:$0xff]  }
   0x7   :  { %v954_v14 = vld [vmem:[%s1266_s1 + $0x18] sm:$0xff]   ;;  %v958_v18 = vld [vmem:[%s1266_s1 + $0x20] sm:$0xff]   ;;  %v962_v22 = vld [vmem:[%s1266_s1 + $0x28] sm:$0xff]  }
   0x8   :  { %831 = vmatpush3.bf16.msra.mxu0 %v946_v6  ;;  %v955_v15 = vld [vmem:[%s1266_s1 + $0x98] sm:$0xff]   ;;  %v959_v19 = vld [vmem:[%s1266_s1 + $0xa0] sm:$0xff]   ;;  %v963_v23 = vld [vmem:[%s1266_s1 + $0xa8] sm:$0xff]  }
   0x9   :  { %871 = vmatpush3.bf16.msra.mxu1 %v947_v7  ;;  %832 = vmatprep.subr.bf16.mxu0 %v948_v8  ;;  %v964_v24 = vld [vmem:[%s1266_s1 + $0x70] sm:$0xff]   ;;  %v968_v28 = vld [vmem:[%s1266_s1 + $0x78] sm:$0xff]   ;;  %v977_v35 = vld [vmem:[%s1267_s0 + $0xc] ss:$20 sps:$4 sm:$0xff]  }
   0xa   :  { %872 = vmatprep.subr.bf16.mxu1 %v949_v9  ;;  %v965_v25 = vld [vmem:[%s1266_s1 + $0xf0] sm:$0xff]   ;;  %v969_v29 = vld [vmem:[%s1266_s1 + $0xf8] sm:$0xff]   ;;  %v978_v36 = vld [vmem:[%s1266_s1 + $0x100] sm:$0xff]   ;;  %547 = vmatprep.mubr.bf16.mxu1 %v977_v35 }
   0xb   :  { %v966_v26 = vld [vmem:[%s1266_s1 + $0x30] sm:$0xff]   ;;  %v970_v30 = vld [vmem:[%s1266_s1 + $0x38] sm:$0xff]   ;;  %v979_v37 = vld [vmem:[%s1267_s0 + $0x2c] ss:$20 sps:$4 sm:$0xff]  }
   0xc   :  { %833 = vmatpush3.bf16.msra.mxu0 %v950_v10  ;;  %v967_v27 = vld [vmem:[%s1266_s1 + $0xb0] sm:$0xff]   ;;  %v971_v31 = vld [vmem:[%s1266_s1 + $0xb8] sm:$0xff]   ;;  %v985_v39 = vld [vmem:[%s1266_s1 + $0x108] sm:$0xff]  }
   0xd   :  { %873 = vmatpush3.bf16.msra.mxu1 %v951_v11  ;;  %834 = vmatprep.subr.bf16.mxu0 %v952_v12  ;;  %v972_v32 = vld [vmem:[%s1267_s0] ss:$20 sps:$4 sm:$0xff]   ;;  %v974_v33 = vld [vmem:[%s1267_s0 + $0x4] ss:$20 sps:$4 sm:$0xff]   ;;  %v975_v34 = vld [vmem:[%s1267_s0 + $0x8] ss:$20 sps:$4 sm:$0xff]  }
   0xe   :  { %874 = vmatprep.subr.bf16.mxu1 %v953_v13  ;;  %482 = vmatprep.mubr.bf16.mxu0 %v974_v33  ;;  %v981_v38 = vld [vmem:[%s1267_s0 + $0x34] ss:$20 sps:$4 sm:$0xff]   ;;  %v984_v41 = vld [vmem:[%s1267_s0 + $0x30] ss:$20 sps:$4 sm:$0xff]   ;;  %v999_v45 = vld [vmem:[%s1266_s1 + $0x118] sm:$0xff]  }
   0xf   :  { %v983_v40 = vld [vmem:[%s1267_s0 + $0x28] ss:$20 sps:$4 sm:$0xff]   ;;  %v992_v44 = vld [vmem:[%s1266_s1 + $0x110] sm:$0xff]   ;;  %v991_v47 = vld [vmem:[%s1267_s0 + $0x58] ss:$20 sps:$4 sm:$0xff]  }
  0x10   :  { %835 = vmatpush3.bf16.msra.mxu0 %v954_v14  ;;  %v986_v42 = vld [vmem:[%s1267_s0 + $0x54] ss:$20 sps:$4 sm:$0xff]   ;;  %v988_v43 = vld [vmem:[%s1267_s0 + $0x5c] ss:$20 sps:$4 sm:$0xff]   ;;  %v995_v49 = vld [vmem:[%s1267_s0 + $0x84] ss:$20 sps:$4 sm:$0xff]  }
  0x11   :  { %875 = vmatpush3.bf16.msra.mxu1 %v955_v15  ;;  %836 = vmatprep.subr.bf16.mxu0 %v956_v16  ;;  %v990_v46 = vld [vmem:[%s1267_s0 + $0x50] ss:$20 sps:$4 sm:$0xff]   ;;  %v997_v50 = vld [vmem:[%s1267_s0 + $0x78] ss:$20 sps:$4 sm:$0xff]   ;;  %v998_v51 = vld [vmem:[%s1267_s0 + $0x80] ss:$20 sps:$4 sm:$0xff]  }
  0x12   :  { %876 = vmatprep.subr.bf16.mxu1 %v957_v17  ;;  %v993_v48 = vld [vmem:[%s1267_s0 + $0x7c] ss:$20 sps:$4 sm:$0xff]   ;;  %v1001_v53 = vld [vmem:[%s1267_s0 + $0x60] ss:$20 sps:$4 sm:$0xff]   ;;  %v1002_v54 = vld [vmem:[%s1267_s0 + $0x38] ss:$20 sps:$4 sm:$0xff]  }
  0x13   :  { %v1000_v52 = vld [vmem:[%s1267_s0 + $0x10] ss:$20 sps:$4 sm:$0xff]   ;;  %v1003_v55 = vld [vmem:[%s1267_s0 + $0x88] ss:$20 sps:$4 sm:$0xff]   ;;  %v751_v57 = vld [vmem:[%s1268_s2] ss:$0 sm:$0xff] }
  0x14   :  { %837 = vmatpush3.bf16.msra.mxu0 %v958_v18 }
  0x15   :  { %877 = vmatpush3.bf16.msra.mxu1 %v959_v19  ;;  %838 = vmatprep.subr.bf16.mxu0 %v960_v20 }
  0x16   :  { %878 = vmatprep.subr.bf16.mxu1 %v961_v21 }
  0x18   :  { %839 = vmatpush3.bf16.msra.mxu0 %v962_v22 }
  0x19   :  { %879 = vmatpush3.bf16.msra.mxu1 %v963_v23  ;;  %840 = vmatprep.subr.bf16.mxu0 %v964_v24 }
  0x1a   :  { %880 = vmatprep.subr.bf16.mxu1 %v965_v25 }
  0x1c   :  { %841 = vmatpush3.bf16.msra.mxu0 %v966_v26 }
  0x1d   :  { %881 = vmatpush3.bf16.msra.mxu1 %v967_v27  ;;  %842 = vmatprep.subr.bf16.mxu0 %v968_v28 }
  0x1e   :  { %882 = vmatprep.subr.bf16.mxu1 %v969_v29 }
  0x20   :  { %843 = vmatpush3.bf16.msra.mxu0 %v970_v30 }
  0x21   :  { %883 = vmatpush3.bf16.msra.mxu1 %v971_v31  ;;  %916 = vmatprep.subr.bf16.mxu0 %v978_v36 }
  0x22   :  { %932 = vmatprep.subr.bf16.mxu1 %v978_v36 }
  0x23   :  { %483 = vmatmul.mubr.bf16.vlgmr.msra.gmra.mrb[0].mxu0 %v972_v32 }
  0x24   :  { %548 = vmatmul.mubr.bf16.vlgmr.msra.gmra.mrb[0].mxu1 %v975_v34  ;;  %917 = vmatpush3.bf16.msra.mxu0 %v978_v36 }
  0x25   :  { %490 = vmatprep.mubr.bf16.mxu0 %v979_v37  ;;  %555 = vmatprep.mubr.bf16.mxu1 %v981_v38 }
  0x26   :  { %936 = vmatpush3.bf16.msra.mxu1 %v978_v36  ;;  %918 = vmatprep.subr.bf16.mxu0 %v985_v39 }
  0x27   :  { %933 = vmatprep.subr.bf16.mxu1 %v985_v39 }
  0x28   :  { %919 = vmatpush3.bf16.msra.mxu0 %v985_v39 }
  0x29   :  { %920 = vmatprep.subr.bf16.mxu0 %v992_v44 }
  0x2a   :  { %937 = vmatpush3.bf16.msra.mxu1 %v985_v39 }
  0x2b   :  { %491 = vmatmul.mubr.bf16.gmra.mrb[4].mxu0 %v983_v40  ;;  %934 = vmatprep.subr.bf16.mxu1 %v992_v44 }
  0x2c   :  { %556 = vmatmul.mubr.bf16.gmra.mrb[4].mxu1 %v984_v41  ;;  %498 = vmatprep.mubr.bf16.mxu0 %v986_v42 }
  0x2d   :  { %563 = vmatprep.mubr.bf16.mxu1 %v988_v43  ;;  %921 = vmatpush3.bf16.msra.mxu0 %v992_v44 }
  0x2e   :  { %922 = vmatprep.subr.bf16.mxu0 %v999_v45  ;;  %938 = vmatpush3.bf16.msra.mxu1 %v992_v44 }
  0x2f   :  { %935 = vmatprep.subr.bf16.mxu1 %v999_v45 }
  0x31   :  { %923 = vmatpush3.bf16.msra.mxu0 %v999_v45 }
  0x32   :  { %939 = vmatpush3.bf16.msra.mxu1 %v999_v45 }
  0x33   :  { %499 = vmatmul.mubr.bf16.gmra.mrb[8].mxu0 %v990_v46 }
  0x34   :  { %564 = vmatmul.mubr.bf16.gmra.mrb[8].mxu1 %v991_v47  ;;  %506 = vmatprep.mubr.bf16.mxu0 %v993_v48 }
  0x35   :  { %571 = vmatprep.mubr.bf16.mxu1 %v995_v49 }
  0x3b   :  { %507 = vmatmul.mubr.bf16.gmra.mrb[12].mxu0 %v997_v50 }
  0x3c   :  { %572 = vmatmul.mubr.bf16.gmra.mrb[12].mxu1 %v998_v51  ;;  %924 = vmatprep.mubr.msk.bf16.mxu0 %vm437_vm0, %v1000_v52 }
  0x3d   :  { %928 = vmatprep.mubr.msk.bf16.mxu1 %vm437_vm0, %v1001_v53 }
  0x43   :  { %925 = vmatmul.mubr.msk.bf16.vlgmr.msra.gmra.mrb[16].mxu0 %vm437_vm0, %v1002_v54 }
  0x44   :  { %929 = vmatmul.mubr.msk.bf16.vlgmr.msra.gmra.mrb[16].mxu1 %vm437_vm0, %v1003_v55 }
  0xf6   :  { %v844_v56 = vpop.f32.mrb[0].mxu0 }
  0xf7   :  { %v845_v58 = vpop.f32.mrb[1].mxu0  ;;  %v884_v59 = vpop.f32.mrb[0].mxu1 }
  0xf8   :  { %v846_v60 = vadd.f32 %v845_v58, %v844_v56  ;;  %v847_v61 = vpop.f32.mrb[2].mxu0  ;;  %v885_v62 = vpop.f32.mrb[1].mxu1 }
  0xf9   :  { %v848_v63 = vpop.f32.mrb[3].mxu0  ;;  %v886_v0 = vadd.f32 %v885_v62, %v884_v59  ;;  %v887_v1 = vpop.f32.mrb[2].mxu1 }
  0xfa   :  { %v485_v2 = vadd.f32 %v846_v60, %v751_v57  ;;  %v849_v3 = vadd.f32 %v848_v63, %v847_v61  ;;  %v888_v4 = vpop.f32.mrb[3].mxu1 }
  0xfb   :  { %v889_v5 = vadd.f32 %v888_v4, %v887_v1 }
  0xfc   :  { %v488_v6 = vadd.f32 %v849_v3, %v751_v57  ;;  %v550_v7 = vadd.f32 %v886_v0, %v485_v2 }
  0xfe   :  { %v850_v8 = vpop.f32.mrb[4].mxu0  ;;  %v1209_v9 = vadd.f32 %v889_v5, %v488_v6 }
  0xff   :  { %v851_v10 = vpop.f32.mrb[5].mxu0  ;;  %v890_v11 = vpop.f32.mrb[4].mxu1 }
 0x100   :  { %v852_v12 = vadd.f32 %v851_v10, %v850_v8  ;;  %v853_v13 = vpop.f32.mrb[6].mxu0  ;;  %v891_v14 = vpop.f32.mrb[5].mxu1 }
 0x101   :  { %v854_v15 = vpop.f32.mrb[7].mxu0  ;;  %v892_v16 = vadd.f32 %v891_v14, %v890_v11  ;;  %v893_v17 = vpop.f32.mrb[6].mxu1 }
 0x102   :  { %v493_v18 = vadd.f32 %v852_v12, %v751_v57  ;;  %v855_v19 = vadd.f32 %v854_v15, %v853_v13  ;;  %v894_v20 = vpop.f32.mrb[7].mxu1 }
 0x103   :  { %v895_v21 = vadd.f32 %v894_v20, %v893_v17 }
 0x104   :  { %v496_v22 = vadd.f32 %v855_v19, %v751_v57  ;;  %v558_v23 = vadd.f32 %v892_v16, %v493_v18 }
 0x106   :  { %v856_v24 = vpop.f32.mrb[8].mxu0  ;;  %v561_v25 = vadd.f32 %v895_v21, %v496_v22 }
 0x107   :  { %v857_v26 = vpop.f32.mrb[9].mxu0  ;;  %v896_v27 = vpop.f32.mrb[8].mxu1 }
 0x108   :  { %v858_v28 = vadd.f32 %v857_v26, %v856_v24  ;;  %v859_v29 = vpop.f32.mrb[10].mxu0  ;;  %v897_v30 = vpop.f32.mrb[9].mxu1 }
 0x109   :  { %v860_v31 = vpop.f32.mrb[11].mxu0  ;;  %v898_v32 = vadd.f32 %v897_v30, %v896_v27  ;;  %v899_v33 = vpop.f32.mrb[10].mxu1 }
 0x10a   :  { %v501_v34 = vadd.f32 %v858_v28, %v751_v57  ;;  %v861_v35 = vadd.f32 %v860_v31, %v859_v29  ;;  %v900_v36 = vpop.f32.mrb[11].mxu1 }
 0x10b   :  { %v901_v37 = vadd.f32 %v900_v36, %v899_v33 }
 0x10c   :  { %v504_v38 = vadd.f32 %v861_v35, %v751_v57  ;;  %v566_v39 = vadd.f32 %v898_v32, %v501_v34 }
 0x10e   :  { %v862_v40 = vpop.f32.mrb[12].mxu0  ;;  %v569_v41 = vadd.f32 %v901_v37, %v504_v38 }
 0x10f   :  { %v863_v42 = vpop.f32.mrb[13].mxu0  ;;  %v902_v43 = vpop.f32.mrb[12].mxu1 }
 0x110   :  { %v864_v44 = vadd.f32 %v863_v42, %v862_v40  ;;  %v865_v45 = vpop.f32.mrb[14].mxu0  ;;  %v903_v46 = vpop.f32.mrb[13].mxu1 }
 0x111   :  { %v866_v47 = vpop.f32.mrb[15].mxu0  ;;  %v904_v48 = vadd.f32 %v903_v46, %v902_v43  ;;  %v905_v49 = vpop.f32.mrb[14].mxu1 }
 0x112   :  { %v509_v50 = vadd.f32 %v864_v44, %v751_v57  ;;  %v867_v51 = vadd.f32 %v866_v47, %v865_v45  ;;  %v906_v52 = vpop.f32.mrb[15].mxu1 }
 0x113   :  { %v907_v53 = vadd.f32 %v906_v52, %v905_v49 }
 0x114   :  { %v512_v54 = vadd.f32 %v867_v51, %v751_v57  ;;  %v574_v55 = vadd.f32 %v904_v48, %v509_v50 }
 0x116   :  { %v926_v56 = vpop.f32.mrb[16].mxu0  ;;  %v577_v58 = vadd.f32 %v907_v53, %v512_v54 }
 0x117   :  { %v623_v59 = vadd.f32 %v926_v56, %v558_v23  ;;  %v930_v60 = vpop.f32.mrb[16].mxu1  ;;  %v614_v61 = vpop.f32.mrb[17].mxu0 }
 0x118   :  { %v639_v62 = vadd.f32 %v930_v60, %v574_v55  ;;  %v615_v63 = vadd.f32 %v614_v61, %v550_v7  ;;  %v630_v0 = vpop.f32.mrb[17].mxu1  ;;  %v927_v1 = vpop.f32.mrb[18].mxu0 }
 0x119   :  { %v822_v2 = vpack.c.bf16 %v623_v59, %v623_v59  ;;  %v631_v3 = vadd.f32 %v630_v0, %v566_v39  ;;  %v931_v4 = vpop.f32.mrb[18].mxu1  ;;  %v617_v5 = vpop.f32.mrb[19].mxu0  ;;  %v626_v7 = vadd.f32 %v927_v1, %v561_v25  ;;  %v711_v16 = vmul.f32 %v623_v59, %v623_v59 }
 0x11a   :  { %v826_v6 = vpack.c.bf16 %v639_v62, %v639_v62  ;;  %v820_v8 = vpack.c.bf16 %v615_v63, %v615_v63  ;;  %v633_v10 = vpop.f32.mrb[19].mxu1  ;;  %v642_v11 = vadd.f32 %v931_v4, %v577_v58  ;;  %v618_v12 = vadd.f32 %v617_v5, %v1209_v9 }
 0x11b   :  { %680 = vst.msk [vmem:[%s1269_s3 + $0x8] sm:$0xf] %vm677_vm1, %v822_v2  ;;  %v824_v57 = vpack.c.bf16 %v631_v3, %v631_v3  ;;  %v634_v13 = vadd.f32 %v633_v10, %v569_v41  ;;  %v709_v14 = vmul.f32 %v615_v63, %v615_v63  ;;  %v823_v15 = vpack.c.bf16 %v626_v7, %v626_v7 }
 0x11c   :  { %684 = vst.msk [vmem:[%s1269_s3 + $0x18] sm:$0xf] %vm677_vm1, %v826_v6  ;;  %678 = vst.msk [vmem:[%s1269_s3] sm:$0xf] %vm677_vm1, %v820_v8  ;;  %v827_v17 = vpack.c.bf16 %v642_v11, %v642_v11  ;;  %v821_v18 = vpack.c.bf16 %v618_v12, %v618_v12  ;;  %v686_v19 = vsel %vm437_vm0, %v615_v63, 0.0  ;;  %v687_v20 = vsel %vm437_vm0, %v618_v12, 0.0 }
 0x11d   :  { %682 = vst.msk [vmem:[%s1269_s3 + $0x10] sm:$0xf] %vm677_vm1, %v824_v57  ;;  %681 = vst.msk [vmem:[%s1269_s3 + $0xc] sm:$0xf] %vm677_vm1, %v823_v15  ;;  %v710_v21 = vmul.f32 %v618_v12, %v618_v12  ;;  %v825_v22 = vpack.c.bf16 %v634_v13, %v634_v13  ;;  %v688_v9 = vadd.f32 %v687_v20, %v686_v19  ;;  %v689_v23 = vsel %vm437_vm0, %v623_v59, 0.0 }
 0x11e   :  { %685 = vst.msk [vmem:[%s1269_s3 + $0x1c] sm:$0xf] %vm677_vm1, %v827_v17  ;;  %679 = vst.msk [vmem:[%s1269_s3 + $0x4] sm:$0xf] %vm677_vm1, %v821_v18  ;;  %v717_v24 = vsel %vm437_vm0, %v709_v14, 0.0  ;;  %v712_v25 = vmul.f32 %v626_v7, %v626_v7  ;;  %v720_v29 = vsel %vm437_vm0, %v711_v16, 0.0  ;;  %v713_v30 = vmul.f32 %v631_v3, %v631_v3 }
 0x11f   :  { %v718_v26 = vsel %vm437_vm0, %v710_v21, 0.0  ;;  %683 = vst.msk [vmem:[%s1269_s3 + $0x14] sm:$0xf] %vm677_vm1, %v825_v22  ;;  %v690_v27 = vadd.f32 %v689_v23, %v688_v9  ;;  %v691_v31 = vsel %vm437_vm0, %v626_v7, 0.0  ;;  %v693_v34 = vsel %vm437_vm0, %v631_v3, 0.0 }
 0x120   :  { %v719_v28 = vadd.f32 %v718_v26, %v717_v24  ;;  %v722_v35 = vsel %vm437_vm0, %v712_v25, 0.0  ;;  %v714_v36 = vmul.f32 %v634_v13, %v634_v13  ;;  %v715_v39 = vmul.f32 %v639_v62, %v639_v62 }
 0x121   :  { %v692_v33 = vadd.f32 %v691_v31, %v690_v27  ;;  %v724_v40 = vsel %vm437_vm0, %v713_v30, 0.0  ;;  %v695_v41 = vsel %vm437_vm0, %v634_v13, 0.0  ;;  %v697_v44 = vsel %vm437_vm0, %v639_v62, 0.0 }
 0x122   :  { %v721_v32 = vadd.f32 %v720_v29, %v719_v28  ;;  %v716_v45 = vmul.f32 %v642_v11, %v642_v11  ;;  %v726_v46 = vsel %vm437_vm0, %v714_v36, 0.0  ;;  %v728_v49 = vsel %vm437_vm0, %v715_v39, 0.0 }
 0x123   :  { %v694_v37 = vadd.f32 %v693_v34, %v692_v33  ;;  %v699_v50 = vsel %vm437_vm0, %v642_v11, 0.0 }
 0x124   :  { %v723_v38 = vadd.f32 %v722_v35, %v721_v32  ;;  %v730_v53 = vsel %vm437_vm0, %v716_v45, 0.0 }
 0x125   :  { %v696_v42 = vadd.f32 %v695_v41, %v694_v37 }
 0x126   :  { %v725_v43 = vadd.f32 %v724_v40, %v723_v38 }
 0x127   :  { %v698_v47 = vadd.f32 %v697_v44, %v696_v42 }
 0x128   :  { %v727_v48 = vadd.f32 %v726_v46, %v725_v43 }
 0x129   :  { %v700_v51 = vadd.f32 %v699_v50, %v698_v47 }
 0x12a   :  { %v729_v52 = vadd.f32 %v728_v49, %v727_v48 }
 0x12b   :  { %v701_v54 = vrot.slane %v700_v51, 4 }
 0x12c   :  { %v731_v55 = vadd.f32 %v730_v53, %v729_v52 }
 0x12d   :  { %v702_v56 = vadd.f32 %v701_v54, %v700_v51 }
 0x12e   :  { %v732_v58 = vrot.slane %v731_v55, 4 }
 0x12f   :  { %v703_v59 = vrot.slane %v702_v56, 2 }
 0x130   :  { %v733_v60 = vadd.f32 %v732_v58, %v731_v55 }
 0x131   :  { %v704_v61 = vadd.f32 %v703_v59, %v702_v56 }
 0x132   :  { %v734_v62 = vrot.slane %v733_v60, 2 }
 0x133   :  { %v705_v63 = vrot.slane %v704_v61, 1 }
 0x134   :  { %v735_v0 = vadd.f32 %v734_v62, %v733_v60 }
 0x135   :  { %v706_v1 = vadd.f32 %v705_v63, %v704_v61 }
 0x136   :  { %v736_v2 = vrot.slane %v735_v0, 1 }
 0x137   :  { %708 = vst.msk [vmem:[%s1270_s4] sm:$0x1] %vm707_vm2, %v706_v1 }
 0x138   :  { %v737_v3 = vadd.f32 %v736_v2, %v735_v0 }
 0x13a   :  { %738 = vst.msk [vmem:[%s1271_s5] sm:$0x1] %vm707_vm2, %v737_v3 }

</bundles_post_ra>
